<compile_context>
chip_gen: v5e
topology: v5e:2x2
jax: 0.10.0
libtpu: 0.0.40
codegen_flags: <defaults>
</compile_context>

<pallas_src>
import jax
import jax.numpy as jnp
from jax.experimental import pallas as pl
from jax.experimental.pallas import tpu as pltpu

EPS = 1e-5        # nn.InstanceNorm2d default eps
B_BLK = 8         # samples per grid step
C_OUT = 16
K = 27            # 3*3*3 im2col patch size
S_PRE = 1024      # 32*32 conv outputs per sample (pool-permuted lane order)
S_POOL = 256      # 16*16 pooled positions per sample
N_CLS = 10
OUT_PAD = 128     # logits padded to a full lane tile (unmasked stores)


def fused_cnn_kernel(patches_ref, w_ref, b_ref, fcw_ref, fcb_ref, out_ref):
    """One grid step = B_BLK samples: conv + InstanceNorm + ReLU + maxpool + FC."""
    w = w_ref[...]           # (16, 27)  bf16
    bias = b_ref[...]        # (16, 1)   f32

    pooled = []
    for b in range(B_BLK):
        p = patches_ref[b]   # (27, 1024) bf16, lane = q*256 + ho*16 + wo
        # Conv2d as one MXU matmul per sample: (16,27)@(27,1024) -> (16,1024) f32.
        conv = jnp.dot(w, p, preferred_element_type=jnp.float32) + bias
        # InstanceNorm2d: per-(sample, channel) mean/var over all 1024 positions (f32).
        mean = jnp.mean(conv, axis=1, keepdims=True)                     # (16, 1)
        var = jnp.mean(jnp.square(conv - mean), axis=1, keepdims=True)   # biased var
        xn = (conv - mean) * jax.lax.rsqrt(var + EPS)
        xn = jnp.maximum(xn, 0.0)                                        # ReLU
        # MaxPool2d(2): lanes are pre-grouped as 4 pooling-window offsets of 256 each.
        pooled.append(jnp.maximum(
            jnp.maximum(xn[:, 0:256], xn[:, 256:512]),
            jnp.maximum(xn[:, 512:768], xn[:, 768:1024])))               # (16, 256)

    # Fused Linear(4096, 10): logits[b, o] = sum_c pooled[b][c, :] @ fcw[c, :, o].
    acc = jnp.zeros((B_BLK, OUT_PAD), jnp.float32)
    for c in range(C_OUT):
        pc = jnp.concatenate([pooled[b][c:c + 1, :] for b in range(B_BLK)], axis=0)
        acc = acc + jnp.dot(pc, fcw_ref[c], preferred_element_type=jnp.float32)
    out_ref[...] = acc + fcb_ref[...]


@jax.jit
def cnn_with_instance_norm(x, conv_w, conv_b, fc_w, fc_b):
    """x: (N, 3, 32, 32) NCHW; conv_w: (16,3,3,3); conv_b: (16,);
    fc_w: (10, 4096) PyTorch layout; fc_b: (10,). Returns (N, 10)."""
    N = x.shape[0]
    H = W = 32
    Ho = Wo = 16

    # ---- glue: im2col with a pooling-friendly lane permutation (layout only) ----
    # patches[n, j, lane]:  j = cin*9 + kh*3 + kw,  lane = (dh*2+dw)*256 + ho*16 + wo
    xp = jnp.pad(x, ((0, 0), (0, 0), (1, 1), (1, 1)))
    slabs = [xp[:, :, kh:kh + H, kw:kw + W] for kh in range(3) for kw in range(3)]
    pf = jnp.stack(slabs, axis=2)                 # (N, 3, 9, 32, 32)
    pf = pf.reshape(N, K, H, W)
    pf = pf.reshape(N, K, Ho, 2, Wo, 2)           # (n, j, ho, dh, wo, dw)
    pf = jnp.transpose(pf, (0, 1, 3, 5, 2, 4))    # (n, j, dh, dw, ho, wo)
    patches = pf.reshape(N, K, S_PRE).astype(jnp.bfloat16)

    n_pad = pl.cdiv(N, B_BLK) * B_BLK
    if n_pad != N:
        patches = jnp.pad(patches, ((0, n_pad - N), (0, 0), (0, 0)))

    w_mat = conv_w.reshape(C_OUT, K).astype(jnp.bfloat16)        # (16, 27)
    b_mat = conv_b.reshape(C_OUT, 1).astype(jnp.float32)         # (16, 1)

    # FC weight in (c, s, o) layout: matches PyTorch NCHW flatten index c*256 + s,
    # padded to 128 output lanes so stores / MXU result width are dense.
    fcw3 = jnp.transpose(fc_w.reshape(N_CLS, C_OUT, S_POOL), (1, 2, 0))   # (16,256,10)
    fcw_pad = jnp.zeros((C_OUT, S_POOL, OUT_PAD), jnp.float32).at[:, :, :N_CLS].set(fcw3)
    fcb_pad = jnp.zeros((1, OUT_PAD), jnp.float32).at[0, :N_CLS].set(fc_b)

    out = pl.pallas_call(
        fused_cnn_kernel,
        out_shape=jax.ShapeDtypeStruct((n_pad, OUT_PAD), jnp.float32),
        grid=(n_pad // B_BLK,),
        in_specs=[
            pl.BlockSpec((B_BLK, K, S_PRE), lambda i: (i, 0, 0)),
            pl.BlockSpec((C_OUT, K), lambda i: (0, 0)),
            pl.BlockSpec((C_OUT, 1), lambda i: (0, 0)),
            pl.BlockSpec((C_OUT, S_POOL, OUT_PAD), lambda i: (0, 0, 0)),
            pl.BlockSpec((1, OUT_PAD), lambda i: (0, 0)),
        ],
        out_specs=pl.BlockSpec((B_BLK, OUT_PAD), lambda i: (i, 0)),
        compiler_params=pltpu.CompilerParams(dimension_semantics=("parallel",)),
    )(patches, w_mat, b_mat, fcw_pad, fcb_pad)
    return out[:N, :N_CLS]


def reference_forward(x, conv_w, conv_b, fc_w, fc_b):
    """Pure-JAX reference matching the PyTorch module."""
    N = x.shape[0]
    y = jax.lax.conv_general_dilated(
        x, conv_w, window_strides=(1, 1), padding=((1, 1), (1, 1)),
        dimension_numbers=("NCHW", "OIHW", "NCHW"))
    y = y + conv_b[None, :, None, None]
    mean = y.mean(axis=(2, 3), keepdims=True)
    var = y.var(axis=(2, 3), keepdims=True)
    y = (y - mean) / jnp.sqrt(var + EPS)
    y = jnp.maximum(y, 0.0)
    y = y.reshape(N, 16, 16, 2, 16, 2).max(axis=(3, 5))
    y = y.reshape(N, -1)
    return y @ fc_w.T + fc_b


if __name__ == "__main__":
    key = jax.random.PRNGKey(0)
    kx, kcw, kcb, kfw, kfb = jax.random.split(key, 5)

    # fc input size is 16*16*16 = 4096 -> input spatial must be 32x32
    x = jax.random.normal(kx, (2, 3, 32, 32), dtype=jnp.float32)
    conv_w = 0.1 * jax.random.normal(kcw, (16, 3, 3, 3), dtype=jnp.float32)
    conv_b = 0.1 * jax.random.normal(kcb, (16,), dtype=jnp.float32)
    fc_w = 0.02 * jax.random.normal(kfw, (10, 16 * 16 * 16), dtype=jnp.float32)
    fc_b = 0.02 * jax.random.normal(kfb, (10,), dtype=jnp.float32)

    out = cnn_with_instance_norm(x, conv_w, conv_b, fc_w, fc_b)
    out = jax.block_until_ready(out)

    ref = reference_forward(x, conv_w, conv_b, fc_w, fc_b)
    assert out.shape == (2, 10)
    assert jnp.allclose(out, ref, rtol=2e-2, atol=2e-2), (out, ref)

    print("KERNEL_OK")
</pallas_src>

<mosaic_0001>
module attributes {stable_mosaic.version = 11 : i64} {
  func.func @fused_cnn_kernel(%arg0: i32, %arg1: memref<8x27x1024xbf16, #tpu.memory_space<vmem>>, %arg2: memref<16x27xbf16, #tpu.memory_space<vmem>>, %arg3: memref<16x1xf32, #tpu.memory_space<vmem>>, %arg4: memref<16x256x128xf32, #tpu.memory_space<vmem>>, %arg5: memref<1x128xf32, #tpu.memory_space<vmem>>, %arg6: memref<8x128xf32, #tpu.memory_space<vmem>>) attributes {dimension_semantics = [#tpu.dimension_semantics<parallel>], iteration_bounds = array<i64: 1>, scalar_prefetch = 0 : i64, scratch_operands = 0 : i64, tpu.core_type = #tpu.core_type<tc>, window_params = [{transform_indices = @transform_0, window_bounds = array<i64: 8, 27, 1024>}, {pipeline_mode = #tpu.pipeline_mode<synchronous>, transform_indices = @transform_1, window_bounds = array<i64: 16, 27>}, {pipeline_mode = #tpu.pipeline_mode<synchronous>, transform_indices = @transform_2, window_bounds = array<i64: 16, 1>}, {pipeline_mode = #tpu.pipeline_mode<synchronous>, transform_indices = @transform_3, window_bounds = array<i64: 16, 256, 128>}, {pipeline_mode = #tpu.pipeline_mode<synchronous>, transform_indices = @transform_4, window_bounds = array<i64: 1, 128>}, {transform_indices = @transform_5, window_bounds = array<i64: 8, 128>}]} {
    %c0 = arith.constant 0 : index
    %c0_0 = arith.constant 0 : index
    %0 = vector.load %arg2[%c0, %c0_0] : memref<16x27xbf16, #tpu.memory_space<vmem>>, vector<16x27xbf16>
    %c0_1 = arith.constant 0 : index
    %c0_2 = arith.constant 0 : index
    %1 = vector.load %arg3[%c0_1, %c0_2] : memref<16x1xf32, #tpu.memory_space<vmem>>, vector<16x1xf32>
    %c0_3 = arith.constant 0 : index
    %c0_4 = arith.constant 0 : index
    %c0_5 = arith.constant 0 : index
    %2 = vector.load %arg1[%c0_3, %c0_4, %c0_5] : memref<8x27x1024xbf16, #tpu.memory_space<vmem>>, vector<1x27x1024xbf16>
    %3 = vector.shape_cast %2 : vector<1x27x1024xbf16> to vector<27x1024xbf16>
    %cst = arith.constant dense<0.000000e+00> : vector<16x1024xf32>
    %4 = tpu.matmul %0, %3, %cst {dimension_numbers = #tpu.dot_dimension_numbers<[1], [0], [0], [1], [0, 0, 1, 1], [], []>} : vector<16x27xbf16>, vector<27x1024xbf16>, vector<16x1024xf32> -> vector<16x1024xf32>
    %5 = vector.broadcast %1 : vector<16x1xf32> to vector<16x1024xf32>
    %6 = arith.addf %4, %5 : vector<16x1024xf32>
    %cst_6 = arith.constant dense<0.000000e+00> : vector<16xf32>
    %7 = vector.multi_reduction <add>, %6, %cst_6 [1] : vector<16x1024xf32> to vector<16xf32>
    %8 = vector.shape_cast %7 : vector<16xf32> to vector<16x1xf32>
    %cst_7 = arith.constant 1.024000e+03 : f32
    %9 = vector.broadcast %cst_7 : f32 to vector<16x1xf32>
    %10 = arith.divf %8, %9 : vector<16x1xf32>
    %11 = vector.broadcast %10 : vector<16x1xf32> to vector<16x1024xf32>
    %12 = arith.subf %6, %11 : vector<16x1024xf32>
    %13 = arith.mulf %12, %12 : vector<16x1024xf32>
    %cst_8 = arith.constant dense<0.000000e+00> : vector<16xf32>
    %14 = vector.multi_reduction <add>, %13, %cst_8 [1] : vector<16x1024xf32> to vector<16xf32>
    %15 = vector.shape_cast %14 : vector<16xf32> to vector<16x1xf32>
    %cst_9 = arith.constant 1.024000e+03 : f32
    %16 = vector.broadcast %cst_9 : f32 to vector<16x1xf32>
    %17 = arith.divf %15, %16 : vector<16x1xf32>
    %18 = vector.broadcast %10 : vector<16x1xf32> to vector<16x1024xf32>
    %19 = arith.subf %6, %18 : vector<16x1024xf32>
    %cst_10 = arith.constant 9.99999974E-6 : f32
    %20 = vector.broadcast %cst_10 : f32 to vector<16x1xf32>
    %21 = arith.addf %17, %20 : vector<16x1xf32>
    %22 = math.rsqrt %21 : vector<16x1xf32>
    %23 = vector.broadcast %22 : vector<16x1xf32> to vector<16x1024xf32>
    %24 = arith.mulf %19, %23 : vector<16x1024xf32>
    %cst_11 = arith.constant 0.000000e+00 : f32
    %25 = vector.broadcast %cst_11 : f32 to vector<16x1024xf32>
    %26 = arith.maximumf %24, %25 : vector<16x1024xf32>
    %27 = vector.extract_strided_slice %26 {offsets = [0, 0], sizes = [16, 256], strides = [1, 1]} : vector<16x1024xf32> to vector<16x256xf32>
    %28 = vector.extract_strided_slice %26 {offsets = [0, 256], sizes = [16, 256], strides = [1, 1]} : vector<16x1024xf32> to vector<16x256xf32>
    %29 = arith.maximumf %27, %28 : vector<16x256xf32>
    %30 = vector.extract_strided_slice %26 {offsets = [0, 512], sizes = [16, 256], strides = [1, 1]} : vector<16x1024xf32> to vector<16x256xf32>
    %31 = vector.extract_strided_slice %26 {offsets = [0, 768], sizes = [16, 256], strides = [1, 1]} : vector<16x1024xf32> to vector<16x256xf32>
    %32 = arith.maximumf %30, %31 : vector<16x256xf32>
    %33 = arith.maximumf %29, %32 : vector<16x256xf32>
    %c1 = arith.constant 1 : index
    %c0_12 = arith.constant 0 : index
    %c0_13 = arith.constant 0 : index
    %34 = vector.load %arg1[%c1, %c0_12, %c0_13] : memref<8x27x1024xbf16, #tpu.memory_space<vmem>>, vector<1x27x1024xbf16>
    %35 = vector.shape_cast %34 : vector<1x27x1024xbf16> to vector<27x1024xbf16>
    %cst_14 = arith.constant dense<0.000000e+00> : vector<16x1024xf32>
    %36 = tpu.matmul %0, %35, %cst_14 {dimension_numbers = #tpu.dot_dimension_numbers<[1], [0], [0], [1], [0, 0, 1, 1], [], []>} : vector<16x27xbf16>, vector<27x1024xbf16>, vector<16x1024xf32> -> vector<16x1024xf32>
    %37 = vector.broadcast %1 : vector<16x1xf32> to vector<16x1024xf32>
    %38 = arith.addf %36, %37 : vector<16x1024xf32>
    %cst_15 = arith.constant dense<0.000000e+00> : vector<16xf32>
    %39 = vector.multi_reduction <add>, %38, %cst_15 [1] : vector<16x1024xf32> to vector<16xf32>
    %40 = vector.shape_cast %39 : vector<16xf32> to vector<16x1xf32>
    %cst_16 = arith.constant 1.024000e+03 : f32
    %41 = vector.broadcast %cst_16 : f32 to vector<16x1xf32>
    %42 = arith.divf %40, %41 : vector<16x1xf32>
    %43 = vector.broadcast %42 : vector<16x1xf32> to vector<16x1024xf32>
    %44 = arith.subf %38, %43 : vector<16x1024xf32>
    %45 = arith.mulf %44, %44 : vector<16x1024xf32>
    %cst_17 = arith.constant dense<0.000000e+00> : vector<16xf32>
    %46 = vector.multi_reduction <add>, %45, %cst_17 [1] : vector<16x1024xf32> to vector<16xf32>
    %47 = vector.shape_cast %46 : vector<16xf32> to vector<16x1xf32>
    %cst_18 = arith.constant 1.024000e+03 : f32
    %48 = vector.broadcast %cst_18 : f32 to vector<16x1xf32>
    %49 = arith.divf %47, %48 : vector<16x1xf32>
    %50 = vector.broadcast %42 : vector<16x1xf32> to vector<16x1024xf32>
    %51 = arith.subf %38, %50 : vector<16x1024xf32>
    %cst_19 = arith.constant 9.99999974E-6 : f32
    %52 = vector.broadcast %cst_19 : f32 to vector<16x1xf32>
    %53 = arith.addf %49, %52 : vector<16x1xf32>
    %54 = math.rsqrt %53 : vector<16x1xf32>
    %55 = vector.broadcast %54 : vector<16x1xf32> to vector<16x1024xf32>
    %56 = arith.mulf %51, %55 : vector<16x1024xf32>
    %cst_20 = arith.constant 0.000000e+00 : f32
    %57 = vector.broadcast %cst_20 : f32 to vector<16x1024xf32>
    %58 = arith.maximumf %56, %57 : vector<16x1024xf32>
    %59 = vector.extract_strided_slice %58 {offsets = [0, 0], sizes = [16, 256], strides = [1, 1]} : vector<16x1024xf32> to vector<16x256xf32>
    %60 = vector.extract_strided_slice %58 {offsets = [0, 256], sizes = [16, 256], strides = [1, 1]} : vector<16x1024xf32> to vector<16x256xf32>
    %61 = arith.maximumf %59, %60 : vector<16x256xf32>
    %62 = vector.extract_strided_slice %58 {offsets = [0, 512], sizes = [16, 256], strides = [1, 1]} : vector<16x1024xf32> to vector<16x256xf32>
    %63 = vector.extract_strided_slice %58 {offsets = [0, 768], sizes = [16, 256], strides = [1, 1]} : vector<16x1024xf32> to vector<16x256xf32>
    %64 = arith.maximumf %62, %63 : vector<16x256xf32>
    %65 = arith.maximumf %61, %64 : vector<16x256xf32>
    %c2 = arith.constant 2 : index
    %c0_21 = arith.constant 0 : index
    %c0_22 = arith.constant 0 : index
    %66 = vector.load %arg1[%c2, %c0_21, %c0_22] : memref<8x27x1024xbf16, #tpu.memory_space<vmem>>, vector<1x27x1024xbf16>
    %67 = vector.shape_cast %66 : vector<1x27x1024xbf16> to vector<27x1024xbf16>
    %cst_23 = arith.constant dense<0.000000e+00> : vector<16x1024xf32>
    %68 = tpu.matmul %0, %67, %cst_23 {dimension_numbers = #tpu.dot_dimension_numbers<[1], [0], [0], [1], [0, 0, 1, 1], [], []>} : vector<16x27xbf16>, vector<27x1024xbf16>, vector<16x1024xf32> -> vector<16x1024xf32>
    %69 = vector.broadcast %1 : vector<16x1xf32> to vector<16x1024xf32>
    %70 = arith.addf %68, %69 : vector<16x1024xf32>
    %cst_24 = arith.constant dense<0.000000e+00> : vector<16xf32>
    %71 = vector.multi_reduction <add>, %70, %cst_24 [1] : vector<16x1024xf32> to vector<16xf32>
    %72 = vector.shape_cast %71 : vector<16xf32> to vector<16x1xf32>
    %cst_25 = arith.constant 1.024000e+03 : f32
    %73 = vector.broadcast %cst_25 : f32 to vector<16x1xf32>
    %74 = arith.divf %72, %73 : vector<16x1xf32>
    %75 = vector.broadcast %74 : vector<16x1xf32> to vector<16x1024xf32>
    %76 = arith.subf %70, %75 : vector<16x1024xf32>
    %77 = arith.mulf %76, %76 : vector<16x1024xf32>
    %cst_26 = arith.constant dense<0.000000e+00> : vector<16xf32>
    %78 = vector.multi_reduction <add>, %77, %cst_26 [1] : vector<16x1024xf32> to vector<16xf32>
    %79 = vector.shape_cast %78 : vector<16xf32> to vector<16x1xf32>
    %cst_27 = arith.constant 1.024000e+03 : f32
    %80 = vector.broadcast %cst_27 : f32 to vector<16x1xf32>
    %81 = arith.divf %79, %80 : vector<16x1xf32>
    %82 = vector.broadcast %74 : vector<16x1xf32> to vector<16x1024xf32>
    %83 = arith.subf %70, %82 : vector<16x1024xf32>
    %cst_28 = arith.constant 9.99999974E-6 : f32
    %84 = vector.broadcast %cst_28 : f32 to vector<16x1xf32>
    %85 = arith.addf %81, %84 : vector<16x1xf32>
    %86 = math.rsqrt %85 : vector<16x1xf32>
    %87 = vector.broadcast %86 : vector<16x1xf32> to vector<16x1024xf32>
    %88 = arith.mulf %83, %87 : vector<16x1024xf32>
    %cst_29 = arith.constant 0.000000e+00 : f32
    %89 = vector.broadcast %cst_29 : f32 to vector<16x1024xf32>
    %90 = arith.maximumf %88, %89 : vector<16x1024xf32>
    %91 = vector.extract_strided_slice %90 {offsets = [0, 0], sizes = [16, 256], strides = [1, 1]} : vector<16x1024xf32> to vector<16x256xf32>
    %92 = vector.extract_strided_slice %90 {offsets = [0, 256], sizes = [16, 256], strides = [1, 1]} : vector<16x1024xf32> to vector<16x256xf32>
    %93 = arith.maximumf %91, %92 : vector<16x256xf32>
    %94 = vector.extract_strided_slice %90 {offsets = [0, 512], sizes = [16, 256], strides = [1, 1]} : vector<16x1024xf32> to vector<16x256xf32>
    %95 = vector.extract_strided_slice %90 {offsets = [0, 768], sizes = [16, 256], strides = [1, 1]} : vector<16x1024xf32> to vector<16x256xf32>
    %96 = arith.maximumf %94, %95 : vector<16x256xf32>
    %97 = arith.maximumf %93, %96 : vector<16x256xf32>
    %c3 = arith.constant 3 : index
    %c0_30 = arith.constant 0 : index
    %c0_31 = arith.constant 0 : index
    %98 = vector.load %arg1[%c3, %c0_30, %c0_31] : memref<8x27x1024xbf16, #tpu.memory_space<vmem>>, vector<1x27x1024xbf16>
    %99 = vector.shape_cast %98 : vector<1x27x1024xbf16> to vector<27x1024xbf16>
    %cst_32 = arith.constant dense<0.000000e+00> : vector<16x1024xf32>
    %100 = tpu.matmul %0, %99, %cst_32 {dimension_numbers = #tpu.dot_dimension_numbers<[1], [0], [0], [1], [0, 0, 1, 1], [], []>} : vector<16x27xbf16>, vector<27x1024xbf16>, vector<16x1024xf32> -> vector<16x1024xf32>
    %101 = vector.broadcast %1 : vector<16x1xf32> to vector<16x1024xf32>
    %102 = arith.addf %100, %101 : vector<16x1024xf32>
    %cst_33 = arith.constant dense<0.000000e+00> : vector<16xf32>
    %103 = vector.multi_reduction <add>, %102, %cst_33 [1] : vector<16x1024xf32> to vector<16xf32>
    %104 = vector.shape_cast %103 : vector<16xf32> to vector<16x1xf32>
    %cst_34 = arith.constant 1.024000e+03 : f32
    %105 = vector.broadcast %cst_34 : f32 to vector<16x1xf32>
    %106 = arith.divf %104, %105 : vector<16x1xf32>
    %107 = vector.broadcast %106 : vector<16x1xf32> to vector<16x1024xf32>
    %108 = arith.subf %102, %107 : vector<16x1024xf32>
    %109 = arith.mulf %108, %108 : vector<16x1024xf32>
    %cst_35 = arith.constant dense<0.000000e+00> : vector<16xf32>
    %110 = vector.multi_reduction <add>, %109, %cst_35 [1] : vector<16x1024xf32> to vector<16xf32>
    %111 = vector.shape_cast %110 : vector<16xf32> to vector<16x1xf32>
    %cst_36 = arith.constant 1.024000e+03 : f32
    %112 = vector.broadcast %cst_36 : f32 to vector<16x1xf32>
    %113 = arith.divf %111, %112 : vector<16x1xf32>
    %114 = vector.broadcast %106 : vector<16x1xf32> to vector<16x1024xf32>
    %115 = arith.subf %102, %114 : vector<16x1024xf32>
    %cst_37 = arith.constant 9.99999974E-6 : f32
    %116 = vector.broadcast %cst_37 : f32 to vector<16x1xf32>
    %117 = arith.addf %113, %116 : vector<16x1xf32>
    %118 = math.rsqrt %117 : vector<16x1xf32>
    %119 = vector.broadcast %118 : vector<16x1xf32> to vector<16x1024xf32>
    %120 = arith.mulf %115, %119 : vector<16x1024xf32>
    %cst_38 = arith.constant 0.000000e+00 : f32
    %121 = vector.broadcast %cst_38 : f32 to vector<16x1024xf32>
    %122 = arith.maximumf %120, %121 : vector<16x1024xf32>
    %123 = vector.extract_strided_slice %122 {offsets = [0, 0], sizes = [16, 256], strides = [1, 1]} : vector<16x1024xf32> to vector<16x256xf32>
    %124 = vector.extract_strided_slice %122 {offsets = [0, 256], sizes = [16, 256], strides = [1, 1]} : vector<16x1024xf32> to vector<16x256xf32>
    %125 = arith.maximumf %123, %124 : vector<16x256xf32>
    %126 = vector.extract_strided_slice %122 {offsets = [0, 512], sizes = [16, 256], strides = [1, 1]} : vector<16x1024xf32> to vector<16x256xf32>
    %127 = vector.extract_strided_slice %122 {offsets = [0, 768], sizes = [16, 256], strides = [1, 1]} : vector<16x1024xf32> to vector<16x256xf32>
    %128 = arith.maximumf %126, %127 : vector<16x256xf32>
    %129 = arith.maximumf %125, %128 : vector<16x256xf32>
    %c4 = arith.constant 4 : index
    %c0_39 = arith.constant 0 : index
    %c0_40 = arith.constant 0 : index
    %130 = vector.load %arg1[%c4, %c0_39, %c0_40] : memref<8x27x1024xbf16, #tpu.memory_space<vmem>>, vector<1x27x1024xbf16>
    %131 = vector.shape_cast %130 : vector<1x27x1024xbf16> to vector<27x1024xbf16>
    %cst_41 = arith.constant dense<0.000000e+00> : vector<16x1024xf32>
    %132 = tpu.matmul %0, %131, %cst_41 {dimension_numbers = #tpu.dot_dimension_numbers<[1], [0], [0], [1], [0, 0, 1, 1], [], []>} : vector<16x27xbf16>, vector<27x1024xbf16>, vector<16x1024xf32> -> vector<16x1024xf32>
    %133 = vector.broadcast %1 : vector<16x1xf32> to vector<16x1024xf32>
    %134 = arith.addf %132, %133 : vector<16x1024xf32>
    %cst_42 = arith.constant dense<0.000000e+00> : vector<16xf32>
    %135 = vector.multi_reduction <add>, %134, %cst_42 [1] : vector<16x1024xf32> to vector<16xf32>
    %136 = vector.shape_cast %135 : vector<16xf32> to vector<16x1xf32>
    %cst_43 = arith.constant 1.024000e+03 : f32
    %137 = vector.broadcast %cst_43 : f32 to vector<16x1xf32>
    %138 = arith.divf %136, %137 : vector<16x1xf32>
    %139 = vector.broadcast %138 : vector<16x1xf32> to vector<16x1024xf32>
    %140 = arith.subf %134, %139 : vector<16x1024xf32>
    %141 = arith.mulf %140, %140 : vector<16x1024xf32>
    %cst_44 = arith.constant dense<0.000000e+00> : vector<16xf32>
    %142 = vector.multi_reduction <add>, %141, %cst_44 [1] : vector<16x1024xf32> to vector<16xf32>
    %143 = vector.shape_cast %142 : vector<16xf32> to vector<16x1xf32>
    %cst_45 = arith.constant 1.024000e+03 : f32
    %144 = vector.broadcast %cst_45 : f32 to vector<16x1xf32>
    %145 = arith.divf %143, %144 : vector<16x1xf32>
    %146 = vector.broadcast %138 : vector<16x1xf32> to vector<16x1024xf32>
    %147 = arith.subf %134, %146 : vector<16x1024xf32>
    %cst_46 = arith.constant 9.99999974E-6 : f32
    %148 = vector.broadcast %cst_46 : f32 to vector<16x1xf32>
    %149 = arith.addf %145, %148 : vector<16x1xf32>
    %150 = math.rsqrt %149 : vector<16x1xf32>
    %151 = vector.broadcast %150 : vector<16x1xf32> to vector<16x1024xf32>
    %152 = arith.mulf %147, %151 : vector<16x1024xf32>
    %cst_47 = arith.constant 0.000000e+00 : f32
    %153 = vector.broadcast %cst_47 : f32 to vector<16x1024xf32>
    %154 = arith.maximumf %152, %153 : vector<16x1024xf32>
    %155 = vector.extract_strided_slice %154 {offsets = [0, 0], sizes = [16, 256], strides = [1, 1]} : vector<16x1024xf32> to vector<16x256xf32>
    %156 = vector.extract_strided_slice %154 {offsets = [0, 256], sizes = [16, 256], strides = [1, 1]} : vector<16x1024xf32> to vector<16x256xf32>
    %157 = arith.maximumf %155, %156 : vector<16x256xf32>
    %158 = vector.extract_strided_slice %154 {offsets = [0, 512], sizes = [16, 256], strides = [1, 1]} : vector<16x1024xf32> to vector<16x256xf32>
    %159 = vector.extract_strided_slice %154 {offsets = [0, 768], sizes = [16, 256], strides = [1, 1]} : vector<16x1024xf32> to vector<16x256xf32>
    %160 = arith.maximumf %158, %159 : vector<16x256xf32>
    %161 = arith.maximumf %157, %160 : vector<16x256xf32>
    %c5 = arith.constant 5 : index
    %c0_48 = arith.constant 0 : index
    %c0_49 = arith.constant 0 : index
    %162 = vector.load %arg1[%c5, %c0_48, %c0_49] : memref<8x27x1024xbf16, #tpu.memory_space<vmem>>, vector<1x27x1024xbf16>
    %163 = vector.shape_cast %162 : vector<1x27x1024xbf16> to vector<27x1024xbf16>
    %cst_50 = arith.constant dense<0.000000e+00> : vector<16x1024xf32>
    %164 = tpu.matmul %0, %163, %cst_50 {dimension_numbers = #tpu.dot_dimension_numbers<[1], [0], [0], [1], [0, 0, 1, 1], [], []>} : vector<16x27xbf16>, vector<27x1024xbf16>, vector<16x1024xf32> -> vector<16x1024xf32>
    %165 = vector.broadcast %1 : vector<16x1xf32> to vector<16x1024xf32>
    %166 = arith.addf %164, %165 : vector<16x1024xf32>
    %cst_51 = arith.constant dense<0.000000e+00> : vector<16xf32>
    %167 = vector.multi_reduction <add>, %166, %cst_51 [1] : vector<16x1024xf32> to vector<16xf32>
    %168 = vector.shape_cast %167 : vector<16xf32> to vector<16x1xf32>
    %cst_52 = arith.constant 1.024000e+03 : f32
    %169 = vector.broadcast %cst_52 : f32 to vector<16x1xf32>
    %170 = arith.divf %168, %169 : vector<16x1xf32>
    %171 = vector.broadcast %170 : vector<16x1xf32> to vector<16x1024xf32>
    %172 = arith.subf %166, %171 : vector<16x1024xf32>
    %173 = arith.mulf %172, %172 : vector<16x1024xf32>
    %cst_53 = arith.constant dense<0.000000e+00> : vector<16xf32>
    %174 = vector.multi_reduction <add>, %173, %cst_53 [1] : vector<16x1024xf32> to vector<16xf32>
    %175 = vector.shape_cast %174 : vector<16xf32> to vector<16x1xf32>
    %cst_54 = arith.constant 1.024000e+03 : f32
    %176 = vector.broadcast %cst_54 : f32 to vector<16x1xf32>
    %177 = arith.divf %175, %176 : vector<16x1xf32>
    %178 = vector.broadcast %170 : vector<16x1xf32> to vector<16x1024xf32>
    %179 = arith.subf %166, %178 : vector<16x1024xf32>
    %cst_55 = arith.constant 9.99999974E-6 : f32
    %180 = vector.broadcast %cst_55 : f32 to vector<16x1xf32>
    %181 = arith.addf %177, %180 : vector<16x1xf32>
    %182 = math.rsqrt %181 : vector<16x1xf32>
    %183 = vector.broadcast %182 : vector<16x1xf32> to vector<16x1024xf32>
    %184 = arith.mulf %179, %183 : vector<16x1024xf32>
    %cst_56 = arith.constant 0.000000e+00 : f32
    %185 = vector.broadcast %cst_56 : f32 to vector<16x1024xf32>
    %186 = arith.maximumf %184, %185 : vector<16x1024xf32>
    %187 = vector.extract_strided_slice %186 {offsets = [0, 0], sizes = [16, 256], strides = [1, 1]} : vector<16x1024xf32> to vector<16x256xf32>
    %188 = vector.extract_strided_slice %186 {offsets = [0, 256], sizes = [16, 256], strides = [1, 1]} : vector<16x1024xf32> to vector<16x256xf32>
    %189 = arith.maximumf %187, %188 : vector<16x256xf32>
    %190 = vector.extract_strided_slice %186 {offsets = [0, 512], sizes = [16, 256], strides = [1, 1]} : vector<16x1024xf32> to vector<16x256xf32>
    %191 = vector.extract_strided_slice %186 {offsets = [0, 768], sizes = [16, 256], strides = [1, 1]} : vector<16x1024xf32> to vector<16x256xf32>
    %192 = arith.maximumf %190, %191 : vector<16x256xf32>
    %193 = arith.maximumf %189, %192 : vector<16x256xf32>
    %c6 = arith.constant 6 : index
    %c0_57 = arith.constant 0 : index
    %c0_58 = arith.constant 0 : index
    %194 = vector.load %arg1[%c6, %c0_57, %c0_58] : memref<8x27x1024xbf16, #tpu.memory_space<vmem>>, vector<1x27x1024xbf16>
    %195 = vector.shape_cast %194 : vector<1x27x1024xbf16> to vector<27x1024xbf16>
    %cst_59 = arith.constant dense<0.000000e+00> : vector<16x1024xf32>
    %196 = tpu.matmul %0, %195, %cst_59 {dimension_numbers = #tpu.dot_dimension_numbers<[1], [0], [0], [1], [0, 0, 1, 1], [], []>} : vector<16x27xbf16>, vector<27x1024xbf16>, vector<16x1024xf32> -> vector<16x1024xf32>
    %197 = vector.broadcast %1 : vector<16x1xf32> to vector<16x1024xf32>
    %198 = arith.addf %196, %197 : vector<16x1024xf32>
    %cst_60 = arith.constant dense<0.000000e+00> : vector<16xf32>
    %199 = vector.multi_reduction <add>, %198, %cst_60 [1] : vector<16x1024xf32> to vector<16xf32>
    %200 = vector.shape_cast %199 : vector<16xf32> to vector<16x1xf32>
    %cst_61 = arith.constant 1.024000e+03 : f32
    %201 = vector.broadcast %cst_61 : f32 to vector<16x1xf32>
    %202 = arith.divf %200, %201 : vector<16x1xf32>
    %203 = vector.broadcast %202 : vector<16x1xf32> to vector<16x1024xf32>
    %204 = arith.subf %198, %203 : vector<16x1024xf32>
    %205 = arith.mulf %204, %204 : vector<16x1024xf32>
    %cst_62 = arith.constant dense<0.000000e+00> : vector<16xf32>
    %206 = vector.multi_reduction <add>, %205, %cst_62 [1] : vector<16x1024xf32> to vector<16xf32>
    %207 = vector.shape_cast %206 : vector<16xf32> to vector<16x1xf32>
    %cst_63 = arith.constant 1.024000e+03 : f32
    %208 = vector.broadcast %cst_63 : f32 to vector<16x1xf32>
    %209 = arith.divf %207, %208 : vector<16x1xf32>
    %210 = vector.broadcast %202 : vector<16x1xf32> to vector<16x1024xf32>
    %211 = arith.subf %198, %210 : vector<16x1024xf32>
    %cst_64 = arith.constant 9.99999974E-6 : f32
    %212 = vector.broadcast %cst_64 : f32 to vector<16x1xf32>
    %213 = arith.addf %209, %212 : vector<16x1xf32>
    %214 = math.rsqrt %213 : vector<16x1xf32>
    %215 = vector.broadcast %214 : vector<16x1xf32> to vector<16x1024xf32>
    %216 = arith.mulf %211, %215 : vector<16x1024xf32>
    %cst_65 = arith.constant 0.000000e+00 : f32
    %217 = vector.broadcast %cst_65 : f32 to vector<16x1024xf32>
    %218 = arith.maximumf %216, %217 : vector<16x1024xf32>
    %219 = vector.extract_strided_slice %218 {offsets = [0, 0], sizes = [16, 256], strides = [1, 1]} : vector<16x1024xf32> to vector<16x256xf32>
    %220 = vector.extract_strided_slice %218 {offsets = [0, 256], sizes = [16, 256], strides = [1, 1]} : vector<16x1024xf32> to vector<16x256xf32>
    %221 = arith.maximumf %219, %220 : vector<16x256xf32>
    %222 = vector.extract_strided_slice %218 {offsets = [0, 512], sizes = [16, 256], strides = [1, 1]} : vector<16x1024xf32> to vector<16x256xf32>
    %223 = vector.extract_strided_slice %218 {offsets = [0, 768], sizes = [16, 256], strides = [1, 1]} : vector<16x1024xf32> to vector<16x256xf32>
    %224 = arith.maximumf %222, %223 : vector<16x256xf32>
    %225 = arith.maximumf %221, %224 : vector<16x256xf32>
    %c7 = arith.constant 7 : index
    %c0_66 = arith.constant 0 : index
    %c0_67 = arith.constant 0 : index
    %226 = vector.load %arg1[%c7, %c0_66, %c0_67] : memref<8x27x1024xbf16, #tpu.memory_space<vmem>>, vector<1x27x1024xbf16>
    %227 = vector.shape_cast %226 : vector<1x27x1024xbf16> to vector<27x1024xbf16>
    %cst_68 = arith.constant dense<0.000000e+00> : vector<16x1024xf32>
    %228 = tpu.matmul %0, %227, %cst_68 {dimension_numbers = #tpu.dot_dimension_numbers<[1], [0], [0], [1], [0, 0, 1, 1], [], []>} : vector<16x27xbf16>, vector<27x1024xbf16>, vector<16x1024xf32> -> vector<16x1024xf32>
    %229 = vector.broadcast %1 : vector<16x1xf32> to vector<16x1024xf32>
    %230 = arith.addf %228, %229 : vector<16x1024xf32>
    %cst_69 = arith.constant dense<0.000000e+00> : vector<16xf32>
    %231 = vector.multi_reduction <add>, %230, %cst_69 [1] : vector<16x1024xf32> to vector<16xf32>
    %232 = vector.shape_cast %231 : vector<16xf32> to vector<16x1xf32>
    %cst_70 = arith.constant 1.024000e+03 : f32
    %233 = vector.broadcast %cst_70 : f32 to vector<16x1xf32>
    %234 = arith.divf %232, %233 : vector<16x1xf32>
    %235 = vector.broadcast %234 : vector<16x1xf32> to vector<16x1024xf32>
    %236 = arith.subf %230, %235 : vector<16x1024xf32>
    %237 = arith.mulf %236, %236 : vector<16x1024xf32>
    %cst_71 = arith.constant dense<0.000000e+00> : vector<16xf32>
    %238 = vector.multi_reduction <add>, %237, %cst_71 [1] : vector<16x1024xf32> to vector<16xf32>
    %239 = vector.shape_cast %238 : vector<16xf32> to vector<16x1xf32>
    %cst_72 = arith.constant 1.024000e+03 : f32
    %240 = vector.broadcast %cst_72 : f32 to vector<16x1xf32>
    %241 = arith.divf %239, %240 : vector<16x1xf32>
    %242 = vector.broadcast %234 : vector<16x1xf32> to vector<16x1024xf32>
    %243 = arith.subf %230, %242 : vector<16x1024xf32>
    %cst_73 = arith.constant 9.99999974E-6 : f32
    %244 = vector.broadcast %cst_73 : f32 to vector<16x1xf32>
    %245 = arith.addf %241, %244 : vector<16x1xf32>
    %246 = math.rsqrt %245 : vector<16x1xf32>
    %247 = vector.broadcast %246 : vector<16x1xf32> to vector<16x1024xf32>
    %248 = arith.mulf %243, %247 : vector<16x1024xf32>
    %cst_74 = arith.constant 0.000000e+00 : f32
    %249 = vector.broadcast %cst_74 : f32 to vector<16x1024xf32>
    %250 = arith.maximumf %248, %249 : vector<16x1024xf32>
    %251 = vector.extract_strided_slice %250 {offsets = [0, 0], sizes = [16, 256], strides = [1, 1]} : vector<16x1024xf32> to vector<16x256xf32>
    %252 = vector.extract_strided_slice %250 {offsets = [0, 256], sizes = [16, 256], strides = [1, 1]} : vector<16x1024xf32> to vector<16x256xf32>
    %253 = arith.maximumf %251, %252 : vector<16x256xf32>
    %254 = vector.extract_strided_slice %250 {offsets = [0, 512], sizes = [16, 256], strides = [1, 1]} : vector<16x1024xf32> to vector<16x256xf32>
    %255 = vector.extract_strided_slice %250 {offsets = [0, 768], sizes = [16, 256], strides = [1, 1]} : vector<16x1024xf32> to vector<16x256xf32>
    %256 = arith.maximumf %254, %255 : vector<16x256xf32>
    %257 = arith.maximumf %253, %256 : vector<16x256xf32>
    %cst_75 = arith.constant 0.000000e+00 : f32
    %258 = vector.broadcast %cst_75 : f32 to vector<8x128xf32>
    %259 = vector.extract_strided_slice %33 {offsets = [0, 0], sizes = [1, 256], strides = [1, 1]} : vector<16x256xf32> to vector<1x256xf32>
    %260 = vector.extract_strided_slice %65 {offsets = [0, 0], sizes = [1, 256], strides = [1, 1]} : vector<16x256xf32> to vector<1x256xf32>
    %261 = vector.extract_strided_slice %97 {offsets = [0, 0], sizes = [1, 256], strides = [1, 1]} : vector<16x256xf32> to vector<1x256xf32>
    %262 = vector.extract_strided_slice %129 {offsets = [0, 0], sizes = [1, 256], strides = [1, 1]} : vector<16x256xf32> to vector<1x256xf32>
    %263 = vector.extract_strided_slice %161 {offsets = [0, 0], sizes = [1, 256], strides = [1, 1]} : vector<16x256xf32> to vector<1x256xf32>
    %264 = vector.extract_strided_slice %193 {offsets = [0, 0], sizes = [1, 256], strides = [1, 1]} : vector<16x256xf32> to vector<1x256xf32>
    %265 = vector.extract_strided_slice %225 {offsets = [0, 0], sizes = [1, 256], strides = [1, 1]} : vector<16x256xf32> to vector<1x256xf32>
    %266 = vector.extract_strided_slice %257 {offsets = [0, 0], sizes = [1, 256], strides = [1, 1]} : vector<16x256xf32> to vector<1x256xf32>
    %267 = tpu.concatenate %259, %260, %261, %262, %263, %264, %265, %266 in 0 : vector<1x256xf32>, vector<1x256xf32>, vector<1x256xf32>, vector<1x256xf32>, vector<1x256xf32>, vector<1x256xf32>, vector<1x256xf32>, vector<1x256xf32> -> vector<8x256xf32>
    %c0_76 = arith.constant 0 : index
    %c0_77 = arith.constant 0 : index
    %c0_78 = arith.constant 0 : index
    %268 = vector.load %arg4[%c0_76, %c0_77, %c0_78] : memref<16x256x128xf32, #tpu.memory_space<vmem>>, vector<1x256x128xf32>
    %269 = vector.shape_cast %268 : vector<1x256x128xf32> to vector<256x128xf32>
    %cst_79 = arith.constant dense<0.000000e+00> : vector<8x128xf32>
    %270 = tpu.matmul %267, %269, %cst_79 {dimension_numbers = #tpu.dot_dimension_numbers<[1], [0], [0], [1], [0, 0, 1, 1], [], []>} : vector<8x256xf32>, vector<256x128xf32>, vector<8x128xf32> -> vector<8x128xf32>
    %271 = arith.addf %258, %270 : vector<8x128xf32>
    %272 = vector.extract_strided_slice %33 {offsets = [1, 0], sizes = [1, 256], strides = [1, 1]} : vector<16x256xf32> to vector<1x256xf32>
    %273 = vector.extract_strided_slice %65 {offsets = [1, 0], sizes = [1, 256], strides = [1, 1]} : vector<16x256xf32> to vector<1x256xf32>
    %274 = vector.extract_strided_slice %97 {offsets = [1, 0], sizes = [1, 256], strides = [1, 1]} : vector<16x256xf32> to vector<1x256xf32>
    %275 = vector.extract_strided_slice %129 {offsets = [1, 0], sizes = [1, 256], strides = [1, 1]} : vector<16x256xf32> to vector<1x256xf32>
    %276 = vector.extract_strided_slice %161 {offsets = [1, 0], sizes = [1, 256], strides = [1, 1]} : vector<16x256xf32> to vector<1x256xf32>
    %277 = vector.extract_strided_slice %193 {offsets = [1, 0], sizes = [1, 256], strides = [1, 1]} : vector<16x256xf32> to vector<1x256xf32>
    %278 = vector.extract_strided_slice %225 {offsets = [1, 0], sizes = [1, 256], strides = [1, 1]} : vector<16x256xf32> to vector<1x256xf32>
    %279 = vector.extract_strided_slice %257 {offsets = [1, 0], sizes = [1, 256], strides = [1, 1]} : vector<16x256xf32> to vector<1x256xf32>
    %280 = tpu.concatenate %272, %273, %274, %275, %276, %277, %278, %279 in 0 : vector<1x256xf32>, vector<1x256xf32>, vector<1x256xf32>, vector<1x256xf32>, vector<1x256xf32>, vector<1x256xf32>, vector<1x256xf32>, vector<1x256xf32> -> vector<8x256xf32>
    %c1_80 = arith.constant 1 : index
    %c0_81 = arith.constant 0 : index
    %c0_82 = arith.constant 0 : index
    %281 = vector.load %arg4[%c1_80, %c0_81, %c0_82] : memref<16x256x128xf32, #tpu.memory_space<vmem>>, vector<1x256x128xf32>
    %282 = vector.shape_cast %281 : vector<1x256x128xf32> to vector<256x128xf32>
    %cst_83 = arith.constant dense<0.000000e+00> : vector<8x128xf32>
    %283 = tpu.matmul %280, %282, %cst_83 {dimension_numbers = #tpu.dot_dimension_numbers<[1], [0], [0], [1], [0, 0, 1, 1], [], []>} : vector<8x256xf32>, vector<256x128xf32>, vector<8x128xf32> -> vector<8x128xf32>
    %284 = arith.addf %271, %283 : vector<8x128xf32>
    %285 = vector.extract_strided_slice %33 {offsets = [2, 0], sizes = [1, 256], strides = [1, 1]} : vector<16x256xf32> to vector<1x256xf32>
    %286 = vector.extract_strided_slice %65 {offsets = [2, 0], sizes = [1, 256], strides = [1, 1]} : vector<16x256xf32> to vector<1x256xf32>
    %287 = vector.extract_strided_slice %97 {offsets = [2, 0], sizes = [1, 256], strides = [1, 1]} : vector<16x256xf32> to vector<1x256xf32>
    %288 = vector.extract_strided_slice %129 {offsets = [2, 0], sizes = [1, 256], strides = [1, 1]} : vector<16x256xf32> to vector<1x256xf32>
    %289 = vector.extract_strided_slice %161 {offsets = [2, 0], sizes = [1, 256], strides = [1, 1]} : vector<16x256xf32> to vector<1x256xf32>
    %290 = vector.extract_strided_slice %193 {offsets = [2, 0], sizes = [1, 256], strides = [1, 1]} : vector<16x256xf32> to vector<1x256xf32>
    %291 = vector.extract_strided_slice %225 {offsets = [2, 0], sizes = [1, 256], strides = [1, 1]} : vector<16x256xf32> to vector<1x256xf32>
    %292 = vector.extract_strided_slice %257 {offsets = [2, 0], sizes = [1, 256], strides = [1, 1]} : vector<16x256xf32> to vector<1x256xf32>
    %293 = tpu.concatenate %285, %286, %287, %288, %289, %290, %291, %292 in 0 : vector<1x256xf32>, vector<1x256xf32>, vector<1x256xf32>, vector<1x256xf32>, vector<1x256xf32>, vector<1x256xf32>, vector<1x256xf32>, vector<1x256xf32> -> vector<8x256xf32>
    %c2_84 = arith.constant 2 : index
    %c0_85 = arith.constant 0 : index
    %c0_86 = arith.constant 0 : index
    %294 = vector.load %arg4[%c2_84, %c0_85, %c0_86] : memref<16x256x128xf32, #tpu.memory_space<vmem>>, vector<1x256x128xf32>
    %295 = vector.shape_cast %294 : vector<1x256x128xf32> to vector<256x128xf32>
    %cst_87 = arith.constant dense<0.000000e+00> : vector<8x128xf32>
    %296 = tpu.matmul %293, %295, %cst_87 {dimension_numbers = #tpu.dot_dimension_numbers<[1], [0], [0], [1], [0, 0, 1, 1], [], []>} : vector<8x256xf32>, vector<256x128xf32>, vector<8x128xf32> -> vector<8x128xf32>
    %297 = arith.addf %284, %296 : vector<8x128xf32>
    %298 = vector.extract_strided_slice %33 {offsets = [3, 0], sizes = [1, 256], strides = [1, 1]} : vector<16x256xf32> to vector<1x256xf32>
    %299 = vector.extract_strided_slice %65 {offsets = [3, 0], sizes = [1, 256], strides = [1, 1]} : vector<16x256xf32> to vector<1x256xf32>
    %300 = vector.extract_strided_slice %97 {offsets = [3, 0], sizes = [1, 256], strides = [1, 1]} : vector<16x256xf32> to vector<1x256xf32>
    %301 = vector.extract_strided_slice %129 {offsets = [3, 0], sizes = [1, 256], strides = [1, 1]} : vector<16x256xf32> to vector<1x256xf32>
    %302 = vector.extract_strided_slice %161 {offsets = [3, 0], sizes = [1, 256], strides = [1, 1]} : vector<16x256xf32> to vector<1x256xf32>
    %303 = vector.extract_strided_slice %193 {offsets = [3, 0], sizes = [1, 256], strides = [1, 1]} : vector<16x256xf32> to vector<1x256xf32>
    %304 = vector.extract_strided_slice %225 {offsets = [3, 0], sizes = [1, 256], strides = [1, 1]} : vector<16x256xf32> to vector<1x256xf32>
    %305 = vector.extract_strided_slice %257 {offsets = [3, 0], sizes = [1, 256], strides = [1, 1]} : vector<16x256xf32> to vector<1x256xf32>
    %306 = tpu.concatenate %298, %299, %300, %301, %302, %303, %304, %305 in 0 : vector<1x256xf32>, vector<1x256xf32>, vector<1x256xf32>, vector<1x256xf32>, vector<1x256xf32>, vector<1x256xf32>, vector<1x256xf32>, vector<1x256xf32> -> vector<8x256xf32>
    %c3_88 = arith.constant 3 : index
    %c0_89 = arith.constant 0 : index
    %c0_90 = arith.constant 0 : index
    %307 = vector.load %arg4[%c3_88, %c0_89, %c0_90] : memref<16x256x128xf32, #tpu.memory_space<vmem>>, vector<1x256x128xf32>
    %308 = vector.shape_cast %307 : vector<1x256x128xf32> to vector<256x128xf32>
    %cst_91 = arith.constant dense<0.000000e+00> : vector<8x128xf32>
    %309 = tpu.matmul %306, %308, %cst_91 {dimension_numbers = #tpu.dot_dimension_numbers<[1], [0], [0], [1], [0, 0, 1, 1], [], []>} : vector<8x256xf32>, vector<256x128xf32>, vector<8x128xf32> -> vector<8x128xf32>
    %310 = arith.addf %297, %309 : vector<8x128xf32>
    %311 = vector.extract_strided_slice %33 {offsets = [4, 0], sizes = [1, 256], strides = [1, 1]} : vector<16x256xf32> to vector<1x256xf32>
    %312 = vector.extract_strided_slice %65 {offsets = [4, 0], sizes = [1, 256], strides = [1, 1]} : vector<16x256xf32> to vector<1x256xf32>
    %313 = vector.extract_strided_slice %97 {offsets = [4, 0], sizes = [1, 256], strides = [1, 1]} : vector<16x256xf32> to vector<1x256xf32>
    %314 = vector.extract_strided_slice %129 {offsets = [4, 0], sizes = [1, 256], strides = [1, 1]} : vector<16x256xf32> to vector<1x256xf32>
    %315 = vector.extract_strided_slice %161 {offsets = [4, 0], sizes = [1, 256], strides = [1, 1]} : vector<16x256xf32> to vector<1x256xf32>
    %316 = vector.extract_strided_slice %193 {offsets = [4, 0], sizes = [1, 256], strides = [1, 1]} : vector<16x256xf32> to vector<1x256xf32>
    %317 = vector.extract_strided_slice %225 {offsets = [4, 0], sizes = [1, 256], strides = [1, 1]} : vector<16x256xf32> to vector<1x256xf32>
    %318 = vector.extract_strided_slice %257 {offsets = [4, 0], sizes = [1, 256], strides = [1, 1]} : vector<16x256xf32> to vector<1x256xf32>
    %319 = tpu.concatenate %311, %312, %313, %314, %315, %316, %317, %318 in 0 : vector<1x256xf32>, vector<1x256xf32>, vector<1x256xf32>, vector<1x256xf32>, vector<1x256xf32>, vector<1x256xf32>, vector<1x256xf32>, vector<1x256xf32> -> vector<8x256xf32>
    %c4_92 = arith.constant 4 : index
    %c0_93 = arith.constant 0 : index
    %c0_94 = arith.constant 0 : index
    %320 = vector.load %arg4[%c4_92, %c0_93, %c0_94] : memref<16x256x128xf32, #tpu.memory_space<vmem>>, vector<1x256x128xf32>
    %321 = vector.shape_cast %320 : vector<1x256x128xf32> to vector<256x128xf32>
    %cst_95 = arith.constant dense<0.000000e+00> : vector<8x128xf32>
    %322 = tpu.matmul %319, %321, %cst_95 {dimension_numbers = #tpu.dot_dimension_numbers<[1], [0], [0], [1], [0, 0, 1, 1], [], []>} : vector<8x256xf32>, vector<256x128xf32>, vector<8x128xf32> -> vector<8x128xf32>
    %323 = arith.addf %310, %322 : vector<8x128xf32>
    %324 = vector.extract_strided_slice %33 {offsets = [5, 0], sizes = [1, 256], strides = [1, 1]} : vector<16x256xf32> to vector<1x256xf32>
    %325 = vector.extract_strided_slice %65 {offsets = [5, 0], sizes = [1, 256], strides = [1, 1]} : vector<16x256xf32> to vector<1x256xf32>
    %326 = vector.extract_strided_slice %97 {offsets = [5, 0], sizes = [1, 256], strides = [1, 1]} : vector<16x256xf32> to vector<1x256xf32>
    %327 = vector.extract_strided_slice %129 {offsets = [5, 0], sizes = [1, 256], strides = [1, 1]} : vector<16x256xf32> to vector<1x256xf32>
    %328 = vector.extract_strided_slice %161 {offsets = [5, 0], sizes = [1, 256], strides = [1, 1]} : vector<16x256xf32> to vector<1x256xf32>
    %329 = vector.extract_strided_slice %193 {offsets = [5, 0], sizes = [1, 256], strides = [1, 1]} : vector<16x256xf32> to vector<1x256xf32>
    %330 = vector.extract_strided_slice %225 {offsets = [5, 0], sizes = [1, 256], strides = [1, 1]} : vector<16x256xf32> to vector<1x256xf32>
    %331 = vector.extract_strided_slice %257 {offsets = [5, 0], sizes = [1, 256], strides = [1, 1]} : vector<16x256xf32> to vector<1x256xf32>
    %332 = tpu.concatenate %324, %325, %326, %327, %328, %329, %330, %331 in 0 : vector<1x256xf32>, vector<1x256xf32>, vector<1x256xf32>, vector<1x256xf32>, vector<1x256xf32>, vector<1x256xf32>, vector<1x256xf32>, vector<1x256xf32> -> vector<8x256xf32>
    %c5_96 = arith.constant 5 : index
    %c0_97 = arith.constant 0 : index
    %c0_98 = arith.constant 0 : index
    %333 = vector.load %arg4[%c5_96, %c0_97, %c0_98] : memref<16x256x128xf32, #tpu.memory_space<vmem>>, vector<1x256x128xf32>
    %334 = vector.shape_cast %333 : vector<1x256x128xf32> to vector<256x128xf32>
    %cst_99 = arith.constant dense<0.000000e+00> : vector<8x128xf32>
    %335 = tpu.matmul %332, %334, %cst_99 {dimension_numbers = #tpu.dot_dimension_numbers<[1], [0], [0], [1], [0, 0, 1, 1], [], []>} : vector<8x256xf32>, vector<256x128xf32>, vector<8x128xf32> -> vector<8x128xf32>
    %336 = arith.addf %323, %335 : vector<8x128xf32>
    %337 = vector.extract_strided_slice %33 {offsets = [6, 0], sizes = [1, 256], strides = [1, 1]} : vector<16x256xf32> to vector<1x256xf32>
    %338 = vector.extract_strided_slice %65 {offsets = [6, 0], sizes = [1, 256], strides = [1, 1]} : vector<16x256xf32> to vector<1x256xf32>
    %339 = vector.extract_strided_slice %97 {offsets = [6, 0], sizes = [1, 256], strides = [1, 1]} : vector<16x256xf32> to vector<1x256xf32>
    %340 = vector.extract_strided_slice %129 {offsets = [6, 0], sizes = [1, 256], strides = [1, 1]} : vector<16x256xf32> to vector<1x256xf32>
    %341 = vector.extract_strided_slice %161 {offsets = [6, 0], sizes = [1, 256], strides = [1, 1]} : vector<16x256xf32> to vector<1x256xf32>
    %342 = vector.extract_strided_slice %193 {offsets = [6, 0], sizes = [1, 256], strides = [1, 1]} : vector<16x256xf32> to vector<1x256xf32>
    %343 = vector.extract_strided_slice %225 {offsets = [6, 0], sizes = [1, 256], strides = [1, 1]} : vector<16x256xf32> to vector<1x256xf32>
    %344 = vector.extract_strided_slice %257 {offsets = [6, 0], sizes = [1, 256], strides = [1, 1]} : vector<16x256xf32> to vector<1x256xf32>
    %345 = tpu.concatenate %337, %338, %339, %340, %341, %342, %343, %344 in 0 : vector<1x256xf32>, vector<1x256xf32>, vector<1x256xf32>, vector<1x256xf32>, vector<1x256xf32>, vector<1x256xf32>, vector<1x256xf32>, vector<1x256xf32> -> vector<8x256xf32>
    %c6_100 = arith.constant 6 : index
    %c0_101 = arith.constant 0 : index
    %c0_102 = arith.constant 0 : index
    %346 = vector.load %arg4[%c6_100, %c0_101, %c0_102] : memref<16x256x128xf32, #tpu.memory_space<vmem>>, vector<1x256x128xf32>
    %347 = vector.shape_cast %346 : vector<1x256x128xf32> to vector<256x128xf32>
    %cst_103 = arith.constant dense<0.000000e+00> : vector<8x128xf32>
    %348 = tpu.matmul %345, %347, %cst_103 {dimension_numbers = #tpu.dot_dimension_numbers<[1], [0], [0], [1], [0, 0, 1, 1], [], []>} : vector<8x256xf32>, vector<256x128xf32>, vector<8x128xf32> -> vector<8x128xf32>
    %349 = arith.addf %336, %348 : vector<8x128xf32>
    %350 = vector.extract_strided_slice %33 {offsets = [7, 0], sizes = [1, 256], strides = [1, 1]} : vector<16x256xf32> to vector<1x256xf32>
    %351 = vector.extract_strided_slice %65 {offsets = [7, 0], sizes = [1, 256], strides = [1, 1]} : vector<16x256xf32> to vector<1x256xf32>
    %352 = vector.extract_strided_slice %97 {offsets = [7, 0], sizes = [1, 256], strides = [1, 1]} : vector<16x256xf32> to vector<1x256xf32>
    %353 = vector.extract_strided_slice %129 {offsets = [7, 0], sizes = [1, 256], strides = [1, 1]} : vector<16x256xf32> to vector<1x256xf32>
    %354 = vector.extract_strided_slice %161 {offsets = [7, 0], sizes = [1, 256], strides = [1, 1]} : vector<16x256xf32> to vector<1x256xf32>
    %355 = vector.extract_strided_slice %193 {offsets = [7, 0], sizes = [1, 256], strides = [1, 1]} : vector<16x256xf32> to vector<1x256xf32>
    %356 = vector.extract_strided_slice %225 {offsets = [7, 0], sizes = [1, 256], strides = [1, 1]} : vector<16x256xf32> to vector<1x256xf32>
    %357 = vector.extract_strided_slice %257 {offsets = [7, 0], sizes = [1, 256], strides = [1, 1]} : vector<16x256xf32> to vector<1x256xf32>
    %358 = tpu.concatenate %350, %351, %352, %353, %354, %355, %356, %357 in 0 : vector<1x256xf32>, vector<1x256xf32>, vector<1x256xf32>, vector<1x256xf32>, vector<1x256xf32>, vector<1x256xf32>, vector<1x256xf32>, vector<1x256xf32> -> vector<8x256xf32>
    %c7_104 = arith.constant 7 : index
    %c0_105 = arith.constant 0 : index
    %c0_106 = arith.constant 0 : index
    %359 = vector.load %arg4[%c7_104, %c0_105, %c0_106] : memref<16x256x128xf32, #tpu.memory_space<vmem>>, vector<1x256x128xf32>
    %360 = vector.shape_cast %359 : vector<1x256x128xf32> to vector<256x128xf32>
    %cst_107 = arith.constant dense<0.000000e+00> : vector<8x128xf32>
    %361 = tpu.matmul %358, %360, %cst_107 {dimension_numbers = #tpu.dot_dimension_numbers<[1], [0], [0], [1], [0, 0, 1, 1], [], []>} : vector<8x256xf32>, vector<256x128xf32>, vector<8x128xf32> -> vector<8x128xf32>
    %362 = arith.addf %349, %361 : vector<8x128xf32>
    %363 = vector.extract_strided_slice %33 {offsets = [8, 0], sizes = [1, 256], strides = [1, 1]} : vector<16x256xf32> to vector<1x256xf32>
    %364 = vector.extract_strided_slice %65 {offsets = [8, 0], sizes = [1, 256], strides = [1, 1]} : vector<16x256xf32> to vector<1x256xf32>
    %365 = vector.extract_strided_slice %97 {offsets = [8, 0], sizes = [1, 256], strides = [1, 1]} : vector<16x256xf32> to vector<1x256xf32>
    %366 = vector.extract_strided_slice %129 {offsets = [8, 0], sizes = [1, 256], strides = [1, 1]} : vector<16x256xf32> to vector<1x256xf32>
    %367 = vector.extract_strided_slice %161 {offsets = [8, 0], sizes = [1, 256], strides = [1, 1]} : vector<16x256xf32> to vector<1x256xf32>
    %368 = vector.extract_strided_slice %193 {offsets = [8, 0], sizes = [1, 256], strides = [1, 1]} : vector<16x256xf32> to vector<1x256xf32>
    %369 = vector.extract_strided_slice %225 {offsets = [8, 0], sizes = [1, 256], strides = [1, 1]} : vector<16x256xf32> to vector<1x256xf32>
    %370 = vector.extract_strided_slice %257 {offsets = [8, 0], sizes = [1, 256], strides = [1, 1]} : vector<16x256xf32> to vector<1x256xf32>
    %371 = tpu.concatenate %363, %364, %365, %366, %367, %368, %369, %370 in 0 : vector<1x256xf32>, vector<1x256xf32>, vector<1x256xf32>, vector<1x256xf32>, vector<1x256xf32>, vector<1x256xf32>, vector<1x256xf32>, vector<1x256xf32> -> vector<8x256xf32>
    %c8 = arith.constant 8 : index
    %c0_108 = arith.constant 0 : index
    %c0_109 = arith.constant 0 : index
    %372 = vector.load %arg4[%c8, %c0_108, %c0_109] : memref<16x256x128xf32, #tpu.memory_space<vmem>>, vector<1x256x128xf32>
    %373 = vector.shape_cast %372 : vector<1x256x128xf32> to vector<256x128xf32>
    %cst_110 = arith.constant dense<0.000000e+00> : vector<8x128xf32>
    %374 = tpu.matmul %371, %373, %cst_110 {dimension_numbers = #tpu.dot_dimension_numbers<[1], [0], [0], [1], [0, 0, 1, 1], [], []>} : vector<8x256xf32>, vector<256x128xf32>, vector<8x128xf32> -> vector<8x128xf32>
    %375 = arith.addf %362, %374 : vector<8x128xf32>
    %376 = vector.extract_strided_slice %33 {offsets = [9, 0], sizes = [1, 256], strides = [1, 1]} : vector<16x256xf32> to vector<1x256xf32>
    %377 = vector.extract_strided_slice %65 {offsets = [9, 0], sizes = [1, 256], strides = [1, 1]} : vector<16x256xf32> to vector<1x256xf32>
    %378 = vector.extract_strided_slice %97 {offsets = [9, 0], sizes = [1, 256], strides = [1, 1]} : vector<16x256xf32> to vector<1x256xf32>
    %379 = vector.extract_strided_slice %129 {offsets = [9, 0], sizes = [1, 256], strides = [1, 1]} : vector<16x256xf32> to vector<1x256xf32>
    %380 = vector.extract_strided_slice %161 {offsets = [9, 0], sizes = [1, 256], strides = [1, 1]} : vector<16x256xf32> to vector<1x256xf32>
    %381 = vector.extract_strided_slice %193 {offsets = [9, 0], sizes = [1, 256], strides = [1, 1]} : vector<16x256xf32> to vector<1x256xf32>
    %382 = vector.extract_strided_slice %225 {offsets = [9, 0], sizes = [1, 256], strides = [1, 1]} : vector<16x256xf32> to vector<1x256xf32>
    %383 = vector.extract_strided_slice %257 {offsets = [9, 0], sizes = [1, 256], strides = [1, 1]} : vector<16x256xf32> to vector<1x256xf32>
    %384 = tpu.concatenate %376, %377, %378, %379, %380, %381, %382, %383 in 0 : vector<1x256xf32>, vector<1x256xf32>, vector<1x256xf32>, vector<1x256xf32>, vector<1x256xf32>, vector<1x256xf32>, vector<1x256xf32>, vector<1x256xf32> -> vector<8x256xf32>
    %c9 = arith.constant 9 : index
    %c0_111 = arith.constant 0 : index
    %c0_112 = arith.constant 0 : index
    %385 = vector.load %arg4[%c9, %c0_111, %c0_112] : memref<16x256x128xf32, #tpu.memory_space<vmem>>, vector<1x256x128xf32>
    %386 = vector.shape_cast %385 : vector<1x256x128xf32> to vector<256x128xf32>
    %cst_113 = arith.constant dense<0.000000e+00> : vector<8x128xf32>
    %387 = tpu.matmul %384, %386, %cst_113 {dimension_numbers = #tpu.dot_dimension_numbers<[1], [0], [0], [1], [0, 0, 1, 1], [], []>} : vector<8x256xf32>, vector<256x128xf32>, vector<8x128xf32> -> vector<8x128xf32>
    %388 = arith.addf %375, %387 : vector<8x128xf32>
    %389 = vector.extract_strided_slice %33 {offsets = [10, 0], sizes = [1, 256], strides = [1, 1]} : vector<16x256xf32> to vector<1x256xf32>
    %390 = vector.extract_strided_slice %65 {offsets = [10, 0], sizes = [1, 256], strides = [1, 1]} : vector<16x256xf32> to vector<1x256xf32>
    %391 = vector.extract_strided_slice %97 {offsets = [10, 0], sizes = [1, 256], strides = [1, 1]} : vector<16x256xf32> to vector<1x256xf32>
    %392 = vector.extract_strided_slice %129 {offsets = [10, 0], sizes = [1, 256], strides = [1, 1]} : vector<16x256xf32> to vector<1x256xf32>
    %393 = vector.extract_strided_slice %161 {offsets = [10, 0], sizes = [1, 256], strides = [1, 1]} : vector<16x256xf32> to vector<1x256xf32>
    %394 = vector.extract_strided_slice %193 {offsets = [10, 0], sizes = [1, 256], strides = [1, 1]} : vector<16x256xf32> to vector<1x256xf32>
    %395 = vector.extract_strided_slice %225 {offsets = [10, 0], sizes = [1, 256], strides = [1, 1]} : vector<16x256xf32> to vector<1x256xf32>
    %396 = vector.extract_strided_slice %257 {offsets = [10, 0], sizes = [1, 256], strides = [1, 1]} : vector<16x256xf32> to vector<1x256xf32>
    %397 = tpu.concatenate %389, %390, %391, %392, %393, %394, %395, %396 in 0 : vector<1x256xf32>, vector<1x256xf32>, vector<1x256xf32>, vector<1x256xf32>, vector<1x256xf32>, vector<1x256xf32>, vector<1x256xf32>, vector<1x256xf32> -> vector<8x256xf32>
    %c10 = arith.constant 10 : index
    %c0_114 = arith.constant 0 : index
    %c0_115 = arith.constant 0 : index
    %398 = vector.load %arg4[%c10, %c0_114, %c0_115] : memref<16x256x128xf32, #tpu.memory_space<vmem>>, vector<1x256x128xf32>
    %399 = vector.shape_cast %398 : vector<1x256x128xf32> to vector<256x128xf32>
    %cst_116 = arith.constant dense<0.000000e+00> : vector<8x128xf32>
    %400 = tpu.matmul %397, %399, %cst_116 {dimension_numbers = #tpu.dot_dimension_numbers<[1], [0], [0], [1], [0, 0, 1, 1], [], []>} : vector<8x256xf32>, vector<256x128xf32>, vector<8x128xf32> -> vector<8x128xf32>
    %401 = arith.addf %388, %400 : vector<8x128xf32>
    %402 = vector.extract_strided_slice %33 {offsets = [11, 0], sizes = [1, 256], strides = [1, 1]} : vector<16x256xf32> to vector<1x256xf32>
    %403 = vector.extract_strided_slice %65 {offsets = [11, 0], sizes = [1, 256], strides = [1, 1]} : vector<16x256xf32> to vector<1x256xf32>
    %404 = vector.extract_strided_slice %97 {offsets = [11, 0], sizes = [1, 256], strides = [1, 1]} : vector<16x256xf32> to vector<1x256xf32>
    %405 = vector.extract_strided_slice %129 {offsets = [11, 0], sizes = [1, 256], strides = [1, 1]} : vector<16x256xf32> to vector<1x256xf32>
    %406 = vector.extract_strided_slice %161 {offsets = [11, 0], sizes = [1, 256], strides = [1, 1]} : vector<16x256xf32> to vector<1x256xf32>
    %407 = vector.extract_strided_slice %193 {offsets = [11, 0], sizes = [1, 256], strides = [1, 1]} : vector<16x256xf32> to vector<1x256xf32>
    %408 = vector.extract_strided_slice %225 {offsets = [11, 0], sizes = [1, 256], strides = [1, 1]} : vector<16x256xf32> to vector<1x256xf32>
    %409 = vector.extract_strided_slice %257 {offsets = [11, 0], sizes = [1, 256], strides = [1, 1]} : vector<16x256xf32> to vector<1x256xf32>
    %410 = tpu.concatenate %402, %403, %404, %405, %406, %407, %408, %409 in 0 : vector<1x256xf32>, vector<1x256xf32>, vector<1x256xf32>, vector<1x256xf32>, vector<1x256xf32>, vector<1x256xf32>, vector<1x256xf32>, vector<1x256xf32> -> vector<8x256xf32>
    %c11 = arith.constant 11 : index
    %c0_117 = arith.constant 0 : index
    %c0_118 = arith.constant 0 : index
    %411 = vector.load %arg4[%c11, %c0_117, %c0_118] : memref<16x256x128xf32, #tpu.memory_space<vmem>>, vector<1x256x128xf32>
    %412 = vector.shape_cast %411 : vector<1x256x128xf32> to vector<256x128xf32>
    %cst_119 = arith.constant dense<0.000000e+00> : vector<8x128xf32>
    %413 = tpu.matmul %410, %412, %cst_119 {dimension_numbers = #tpu.dot_dimension_numbers<[1], [0], [0], [1], [0, 0, 1, 1], [], []>} : vector<8x256xf32>, vector<256x128xf32>, vector<8x128xf32> -> vector<8x128xf32>
    %414 = arith.addf %401, %413 : vector<8x128xf32>
    %415 = vector.extract_strided_slice %33 {offsets = [12, 0], sizes = [1, 256], strides = [1, 1]} : vector<16x256xf32> to vector<1x256xf32>
    %416 = vector.extract_strided_slice %65 {offsets = [12, 0], sizes = [1, 256], strides = [1, 1]} : vector<16x256xf32> to vector<1x256xf32>
    %417 = vector.extract_strided_slice %97 {offsets = [12, 0], sizes = [1, 256], strides = [1, 1]} : vector<16x256xf32> to vector<1x256xf32>
    %418 = vector.extract_strided_slice %129 {offsets = [12, 0], sizes = [1, 256], strides = [1, 1]} : vector<16x256xf32> to vector<1x256xf32>
    %419 = vector.extract_strided_slice %161 {offsets = [12, 0], sizes = [1, 256], strides = [1, 1]} : vector<16x256xf32> to vector<1x256xf32>
    %420 = vector.extract_strided_slice %193 {offsets = [12, 0], sizes = [1, 256], strides = [1, 1]} : vector<16x256xf32> to vector<1x256xf32>
    %421 = vector.extract_strided_slice %225 {offsets = [12, 0], sizes = [1, 256], strides = [1, 1]} : vector<16x256xf32> to vector<1x256xf32>
    %422 = vector.extract_strided_slice %257 {offsets = [12, 0], sizes = [1, 256], strides = [1, 1]} : vector<16x256xf32> to vector<1x256xf32>
    %423 = tpu.concatenate %415, %416, %417, %418, %419, %420, %421, %422 in 0 : vector<1x256xf32>, vector<1x256xf32>, vector<1x256xf32>, vector<1x256xf32>, vector<1x256xf32>, vector<1x256xf32>, vector<1x256xf32>, vector<1x256xf32> -> vector<8x256xf32>
    %c12 = arith.constant 12 : index
    %c0_120 = arith.constant 0 : index
    %c0_121 = arith.constant 0 : index
    %424 = vector.load %arg4[%c12, %c0_120, %c0_121] : memref<16x256x128xf32, #tpu.memory_space<vmem>>, vector<1x256x128xf32>
    %425 = vector.shape_cast %424 : vector<1x256x128xf32> to vector<256x128xf32>
    %cst_122 = arith.constant dense<0.000000e+00> : vector<8x128xf32>
    %426 = tpu.matmul %423, %425, %cst_122 {dimension_numbers = #tpu.dot_dimension_numbers<[1], [0], [0], [1], [0, 0, 1, 1], [], []>} : vector<8x256xf32>, vector<256x128xf32>, vector<8x128xf32> -> vector<8x128xf32>
    %427 = arith.addf %414, %426 : vector<8x128xf32>
    %428 = vector.extract_strided_slice %33 {offsets = [13, 0], sizes = [1, 256], strides = [1, 1]} : vector<16x256xf32> to vector<1x256xf32>
    %429 = vector.extract_strided_slice %65 {offsets = [13, 0], sizes = [1, 256], strides = [1, 1]} : vector<16x256xf32> to vector<1x256xf32>
    %430 = vector.extract_strided_slice %97 {offsets = [13, 0], sizes = [1, 256], strides = [1, 1]} : vector<16x256xf32> to vector<1x256xf32>
    %431 = vector.extract_strided_slice %129 {offsets = [13, 0], sizes = [1, 256], strides = [1, 1]} : vector<16x256xf32> to vector<1x256xf32>
    %432 = vector.extract_strided_slice %161 {offsets = [13, 0], sizes = [1, 256], strides = [1, 1]} : vector<16x256xf32> to vector<1x256xf32>
    %433 = vector.extract_strided_slice %193 {offsets = [13, 0], sizes = [1, 256], strides = [1, 1]} : vector<16x256xf32> to vector<1x256xf32>
    %434 = vector.extract_strided_slice %225 {offsets = [13, 0], sizes = [1, 256], strides = [1, 1]} : vector<16x256xf32> to vector<1x256xf32>
    %435 = vector.extract_strided_slice %257 {offsets = [13, 0], sizes = [1, 256], strides = [1, 1]} : vector<16x256xf32> to vector<1x256xf32>
    %436 = tpu.concatenate %428, %429, %430, %431, %432, %433, %434, %435 in 0 : vector<1x256xf32>, vector<1x256xf32>, vector<1x256xf32>, vector<1x256xf32>, vector<1x256xf32>, vector<1x256xf32>, vector<1x256xf32>, vector<1x256xf32> -> vector<8x256xf32>
    %c13 = arith.constant 13 : index
    %c0_123 = arith.constant 0 : index
    %c0_124 = arith.constant 0 : index
    %437 = vector.load %arg4[%c13, %c0_123, %c0_124] : memref<16x256x128xf32, #tpu.memory_space<vmem>>, vector<1x256x128xf32>
    %438 = vector.shape_cast %437 : vector<1x256x128xf32> to vector<256x128xf32>
    %cst_125 = arith.constant dense<0.000000e+00> : vector<8x128xf32>
    %439 = tpu.matmul %436, %438, %cst_125 {dimension_numbers = #tpu.dot_dimension_numbers<[1], [0], [0], [1], [0, 0, 1, 1], [], []>} : vector<8x256xf32>, vector<256x128xf32>, vector<8x128xf32> -> vector<8x128xf32>
    %440 = arith.addf %427, %439 : vector<8x128xf32>
    %441 = vector.extract_strided_slice %33 {offsets = [14, 0], sizes = [1, 256], strides = [1, 1]} : vector<16x256xf32> to vector<1x256xf32>
    %442 = vector.extract_strided_slice %65 {offsets = [14, 0], sizes = [1, 256], strides = [1, 1]} : vector<16x256xf32> to vector<1x256xf32>
    %443 = vector.extract_strided_slice %97 {offsets = [14, 0], sizes = [1, 256], strides = [1, 1]} : vector<16x256xf32> to vector<1x256xf32>
    %444 = vector.extract_strided_slice %129 {offsets = [14, 0], sizes = [1, 256], strides = [1, 1]} : vector<16x256xf32> to vector<1x256xf32>
    %445 = vector.extract_strided_slice %161 {offsets = [14, 0], sizes = [1, 256], strides = [1, 1]} : vector<16x256xf32> to vector<1x256xf32>
    %446 = vector.extract_strided_slice %193 {offsets = [14, 0], sizes = [1, 256], strides = [1, 1]} : vector<16x256xf32> to vector<1x256xf32>
    %447 = vector.extract_strided_slice %225 {offsets = [14, 0], sizes = [1, 256], strides = [1, 1]} : vector<16x256xf32> to vector<1x256xf32>
    %448 = vector.extract_strided_slice %257 {offsets = [14, 0], sizes = [1, 256], strides = [1, 1]} : vector<16x256xf32> to vector<1x256xf32>
    %449 = tpu.concatenate %441, %442, %443, %444, %445, %446, %447, %448 in 0 : vector<1x256xf32>, vector<1x256xf32>, vector<1x256xf32>, vector<1x256xf32>, vector<1x256xf32>, vector<1x256xf32>, vector<1x256xf32>, vector<1x256xf32> -> vector<8x256xf32>
    %c14 = arith.constant 14 : index
    %c0_126 = arith.constant 0 : index
    %c0_127 = arith.constant 0 : index
    %450 = vector.load %arg4[%c14, %c0_126, %c0_127] : memref<16x256x128xf32, #tpu.memory_space<vmem>>, vector<1x256x128xf32>
    %451 = vector.shape_cast %450 : vector<1x256x128xf32> to vector<256x128xf32>
    %cst_128 = arith.constant dense<0.000000e+00> : vector<8x128xf32>
    %452 = tpu.matmul %449, %451, %cst_128 {dimension_numbers = #tpu.dot_dimension_numbers<[1], [0], [0], [1], [0, 0, 1, 1], [], []>} : vector<8x256xf32>, vector<256x128xf32>, vector<8x128xf32> -> vector<8x128xf32>
    %453 = arith.addf %440, %452 : vector<8x128xf32>
    %454 = vector.extract_strided_slice %33 {offsets = [15, 0], sizes = [1, 256], strides = [1, 1]} : vector<16x256xf32> to vector<1x256xf32>
    %455 = vector.extract_strided_slice %65 {offsets = [15, 0], sizes = [1, 256], strides = [1, 1]} : vector<16x256xf32> to vector<1x256xf32>
    %456 = vector.extract_strided_slice %97 {offsets = [15, 0], sizes = [1, 256], strides = [1, 1]} : vector<16x256xf32> to vector<1x256xf32>
    %457 = vector.extract_strided_slice %129 {offsets = [15, 0], sizes = [1, 256], strides = [1, 1]} : vector<16x256xf32> to vector<1x256xf32>
    %458 = vector.extract_strided_slice %161 {offsets = [15, 0], sizes = [1, 256], strides = [1, 1]} : vector<16x256xf32> to vector<1x256xf32>
    %459 = vector.extract_strided_slice %193 {offsets = [15, 0], sizes = [1, 256], strides = [1, 1]} : vector<16x256xf32> to vector<1x256xf32>
    %460 = vector.extract_strided_slice %225 {offsets = [15, 0], sizes = [1, 256], strides = [1, 1]} : vector<16x256xf32> to vector<1x256xf32>
    %461 = vector.extract_strided_slice %257 {offsets = [15, 0], sizes = [1, 256], strides = [1, 1]} : vector<16x256xf32> to vector<1x256xf32>
    %462 = tpu.concatenate %454, %455, %456, %457, %458, %459, %460, %461 in 0 : vector<1x256xf32>, vector<1x256xf32>, vector<1x256xf32>, vector<1x256xf32>, vector<1x256xf32>, vector<1x256xf32>, vector<1x256xf32>, vector<1x256xf32> -> vector<8x256xf32>
    %c15 = arith.constant 15 : index
    %c0_129 = arith.constant 0 : index
    %c0_130 = arith.constant 0 : index
    %463 = vector.load %arg4[%c15, %c0_129, %c0_130] : memref<16x256x128xf32, #tpu.memory_space<vmem>>, vector<1x256x128xf32>
    %464 = vector.shape_cast %463 : vector<1x256x128xf32> to vector<256x128xf32>
    %cst_131 = arith.constant dense<0.000000e+00> : vector<8x128xf32>
    %465 = tpu.matmul %462, %464, %cst_131 {dimension_numbers = #tpu.dot_dimension_numbers<[1], [0], [0], [1], [0, 0, 1, 1], [], []>} : vector<8x256xf32>, vector<256x128xf32>, vector<8x128xf32> -> vector<8x128xf32>
    %466 = arith.addf %453, %465 : vector<8x128xf32>
    %c0_132 = arith.constant 0 : index
    %c0_133 = arith.constant 0 : index
    %467 = vector.load %arg5[%c0_132, %c0_133] : memref<1x128xf32, #tpu.memory_space<vmem>>, vector<1x128xf32>
    %468 = vector.broadcast %467 : vector<1x128xf32> to vector<8x128xf32>
    %469 = arith.addf %466, %468 : vector<8x128xf32>
    %c0_134 = arith.constant 0 : index
    %c0_135 = arith.constant 0 : index
    %470 = vector.load %arg6[%c0_134, %c0_135] : memref<8x128xf32, #tpu.memory_space<vmem>>, vector<8x128xf32>
    tpu.vector_store %arg6[%c0_134, %c0_135], %469 {strides = array<i32>} : memref<8x128xf32, #tpu.memory_space<vmem>>, vector<8x128xf32>,
    return
  }
  func.func @transform_0(%arg0: i32) -> (i32, i32, i32) {
    %c0_i32 = arith.constant 0 : i32
    %c0_i32_0 = arith.constant 0 : i32
    %c0_i32_1 = arith.constant 0 : i32
    return %arg0, %c0_i32, %c0_i32_0 : i32, i32, i32
  }
  func.func @transform_1(%arg0: i32) -> (i32, i32) {
    %c0_i32 = arith.constant 0 : i32
    %c0_i32_0 = arith.constant 0 : i32
    %c0_i32_1 = arith.constant 0 : i32
    return %c0_i32, %c0_i32_0 : i32, i32
  }
  func.func @transform_2(%arg0: i32) -> (i32, i32) {
    %c0_i32 = arith.constant 0 : i32
    %c0_i32_0 = arith.constant 0 : i32
    %c0_i32_1 = arith.constant 0 : i32
    return %c0_i32, %c0_i32_0 : i32, i32
  }
  func.func @transform_3(%arg0: i32) -> (i32, i32, i32) {
    %c0_i32 = arith.constant 0 : i32
    %c0_i32_0 = arith.constant 0 : i32
    %c0_i32_1 = arith.constant 0 : i32
    %c0_i32_2 = arith.constant 0 : i32
    return %c0_i32, %c0_i32_0, %c0_i32_1 : i32, i32, i32
  }
  func.func @transform_4(%arg0: i32) -> (i32, i32) {
    %c0_i32 = arith.constant 0 : i32
    %c0_i32_0 = arith.constant 0 : i32
    %c0_i32_1 = arith.constant 0 : i32
    return %c0_i32, %c0_i32_0 : i32, i32
  }
  func.func @transform_5(%arg0: i32) -> (i32, i32) {
    %c0_i32 = arith.constant 0 : i32
    %c0_i32_0 = arith.constant 0 : i32
    return %arg0, %c0_i32 : i32, i32
  }
}

</mosaic_0001>

<bundles_post_ra>
// kernel: cnn_with_instance_norm.1
= control target key start
LH: loop header
LB: loop body
LE: loop exit
PB: predicated region body
PF: predicated region fallthrough
CT: control target
= control target key end

     0   :  { %vm132_vm0 = vcmask 1044480   ;;  %vm133_vm1 = vcmask 1045504   ;;  %v6200_v2 = vmov 65535   ;;  %v6201_v12 = vmov 0   ;;  %s11450_s0 = inlined_call_operand.vmem [shape: bf16[8,27,1024], index: 0, kind: input, shape index: {}]   ;;  %s11451_s1 = inlined_call_operand.vmem [shape: bf16[16,27], index: 1, kind: input, shape index: {}]   ;;  %s11452_s2 = inlined_call_operand.vmem [shape: f32[16,1], index: 2, kind: input, shape index: {}]   ;;  %s11453_s3 = inlined_call_operand.vmem [shape: f32[16,256,128], index: 3, kind: input, shape index: {}]   ;;  %s11454_s4 = inlined_call_operand.vmem [shape: f32[1,128], index: 4, kind: input, shape index: {}]   ;;  %s11455_s5 = inlined_call_operand.vmem [shape: f32[8,128], index: 5, kind: output, shape index: {}]  }
   0x1   :  { %v4896_v0 = vld [vmem:[%s11450_s0 + $0x40] sm:$0xf]  ;;  %v134_v3 = vsel %vm132_vm0, 4294967295, %v6200_v2  ;;  %v6039_v6 = vld [vmem:[%s11450_s0 + $0x44] sm:$0xf]  ;;  %6162 = vset.pattern.permute.xlu0 %v6201_v12  ;;  %6163 = vset.pattern.permute.xlu2 %v6201_v12  ;;  %vm128_vm2 = vcmask 220160  }
   0x2   :  { %v6043_v1 = vld [vmem:[%s11450_s0 + $0x5c] sm:$0x30]  ;;  %v6241_v5 = vsel %vm133_vm1, %v134_v3, 0  ;;  %v4898_v7 = vld [vmem:[%s11450_s0 + $0x60] sm:$0x30] }
   0x3   :  { %v4897_v4 = vor.u32 %v6043_v1, %v4896_v0  ;;  %v4901_v8 = vor.u32 %v6039_v6, %v4898_v7  ;;  %v4904_v9 = vld [vmem:[%s11450_s0 + $0x48] sm:$0xf]  ;;  %v6040_v11 = vld [vmem:[%s11450_s0 + $0x4c] sm:$0xf]  ;;  %v4864_v16 = vld [vmem:[%s11450_s0] sm:$0xf] }
   0x4   :  { %v6044_v10 = vld [vmem:[%s11450_s0 + $0x64] sm:$0x30]  ;;  %v4906_v15 = vld [vmem:[%s11450_s0 + $0x68] sm:$0x30]  ;;  %v6035_v17 = vld [vmem:[%s11450_s0 + $0x1c] sm:$0xf0] }
   0x5   :  { %v137_v13 = vand.u32 %v4897_v4, %v6241_v5  ;;  %v4905_v14 = vor.u32 %v6044_v10, %v4904_v9  ;;  %v140_v18 = vand.u32 %v4901_v8, %v6241_v5  ;;  %v4909_v19 = vor.u32 %v6040_v11, %v4906_v15  ;;  %v6031_v20 = vld [vmem:[%s11450_s0 + $0x4] sm:$0xf]  ;;  %v4872_v22 = vld [vmem:[%s11450_s0 + $0x8] sm:$0xf]  ;;  %v6032_v26 = vld [vmem:[%s11450_s0 + $0xc] sm:$0xf] }
   0x6   :  { %v4866_v21 = vld [vmem:[%s11450_s0 + $0x20] sm:$0xf0]  ;;  %v4865_v24 = vor.u32 %v6035_v17, %v4864_v16  ;;  %v6036_v25 = vld [vmem:[%s11450_s0 + $0x24] sm:$0xf0]  ;;  %v4874_v27 = vld [vmem:[%s11450_s0 + $0x28] sm:$0xf0] }
   0x7   :  { %166 = vmatpush.bf16.msra.mxu0 %v137_v13  ;;  %v143_v23 = vand.u32 %v4905_v14, %v6241_v5  ;;  %180 = vmatpush.bf16.msra.mxu1 %v140_v18  ;;  %v146_v28 = vand.u32 %v4909_v19, %v6241_v5  ;;  %v4869_v29 = vor.u32 %v6031_v20, %v4866_v21  ;;  %v6292_v30 = vld [vmem:[%s11451_s1] sm:$0xff]  ;;  %v4912_v31 = vld [vmem:[%s11450_s0 + $0x50] sm:$0xf]  ;;  %v6041_v33 = vld [vmem:[%s11450_s0 + $0x54] sm:$0xf] }
   0x8   :  { %v6045_v32 = vld [vmem:[%s11450_s0 + $0x6c] sm:$0x30]  ;;  %v4873_v34 = vor.u32 %v6036_v25, %v4872_v22  ;;  %v4914_v36 = vld [vmem:[%s11450_s0 + $0x70] sm:$0x30]  ;;  %v4920_v37 = vld [vmem:[%s11450_s0 + $0x58] sm:$0xf]  ;;  %v4877_v39 = vor.u32 %v6032_v26, %v4874_v27 }
   0x9   :  { %194 = vmatpush.bf16.msra.mxu2 %v143_v23  ;;  %v4913_v35 = vor.u32 %v6045_v32, %v4912_v31  ;;  %v6046_v38 = vld [vmem:[%s11450_s0 + $0x74] sm:$0x30]  ;;  %208 = vmatpush.bf16.msra.mxu3 %v146_v28  ;;  %v4917_v40 = vor.u32 %v6041_v33, %v4914_v36  ;;  %v6042_v42 = vld [vmem:[%s11450_s0 + $0x5c] sm:$0xf]  ;;  %v23_v44 = vld [vmem:[%s11452_s2] sm:$0xff] }
   0xa   :  { %v4921_v41 = vor.u32 %v6046_v38, %v4920_v37  ;;  %v4922_v43 = vld [vmem:[%s11450_s0 + $0x78] sm:$0x30]  ;;  %43 = vperm.xlu0 %6162, %v23_v44   ;;  %v4880_v47 = vld [vmem:[%s11450_s0 + $0x10] sm:$0xf]  ;;  %v6033_v49 = vld [vmem:[%s11450_s0 + $0x14] sm:$0xf] }
   0xb   :  { %167 = vmatpush.bf16.msra.mxu0 %v4865_v24  ;;  %v149_v45 = vand.u32 %v4913_v35, %v6241_v5  ;;  %v4925_v46 = vor.u32 %v6042_v42, %v4922_v43  ;;  %v6037_v48 = vld [vmem:[%s11450_s0 + $0x2c] sm:$0xf0]  ;;  %181 = vmatpush.bf16.msra.mxu1 %v4869_v29  ;;  %v152_v50 = vand.u32 %v4917_v40, %v6241_v5  ;;  %v4882_v52 = vld [vmem:[%s11450_s0 + $0x30] sm:$0xf0]  ;;  %v4888_v53 = vld [vmem:[%s11450_s0 + $0x18] sm:$0xf] }
   0xc   :  { %v155_v51 = vand.u32 %v4921_v41, %v6241_v5  ;;  %v6038_v54 = vld [vmem:[%s11450_s0 + $0x34] sm:$0xf0]  ;;  %v4881_v55 = vor.u32 %v6037_v48, %v4880_v47  ;;  %v6034_v56 = vld [vmem:[%s11450_s0 + $0x1c] sm:$0xf]  ;;  %v4984_v58 = vld [vmem:[%s11450_s0 + $0xc0] sm:$0xf]  ;;  %v4885_v6 = vor.u32 %v6033_v49, %v4882_v52 }
   0xd   :  { %195 = vmatpush.bf16.msra.mxu2 %v4873_v34  ;;  %v4890_v57 = vld [vmem:[%s11450_s0 + $0x38] sm:$0xf0]  ;;  %209 = vmatpush.bf16.msra.mxu3 %v4877_v39  ;;  %v158_v59 = vand.u32 %v4925_v46, %v6241_v5  ;;  %v6059_v60 = vld [vmem:[%s11450_s0 + $0xdc] sm:$0x30]  ;;  %v6055_v61 = vld [vmem:[%s11450_s0 + $0xc4] sm:$0xf]  ;;  %v4889_v63 = vor.u32 %v6038_v54, %v4888_v53 }
   0xe   :  { %4926 = vmatmul.msk.bf16.vlgmr.msra.gmra.mxu0 %vm128_vm2, %v6292_v30  ;;  %v4986_v62 = vld [vmem:[%s11450_s0 + $0xe0] sm:$0x30]  ;;  %4927 = vmatmul.msk.bf16.vlgmr.msra.gmra.mxu1 %vm128_vm2, %v6292_v30  ;;  %v4985_v0 = vor.u32 %v6059_v60, %v4984_v58  ;;  %v4992_v2 = vld [vmem:[%s11450_s0 + $0xc8] sm:$0xf]  ;;  %v6056_v4 = vld [vmem:[%s11450_s0 + $0xcc] sm:$0xf]  ;;  %v4893_v15 = vor.u32 %v6034_v56, %v4890_v57 }
   0xf   :  { %222 = vmatpush.bf16.msrb.mxu0 %v149_v45  ;;  %v4989_v1 = vor.u32 %v6055_v61, %v4986_v62  ;;  %v6060_v3 = vld [vmem:[%s11450_s0 + $0xe4] sm:$0x30]  ;;  %236 = vmatpush.bf16.msrb.mxu1 %v152_v50  ;;  %v4994_v8 = vld [vmem:[%s11450_s0 + $0xe8] sm:$0x30]  ;;  %v4952_v9 = vld [vmem:[%s11450_s0 + $0x80] sm:$0xf] }
  0x10   :  { %4928 = vmatmul.msk.bf16.vlgmr.msra.gmra.mxu2 %vm128_vm2, %v6292_v30  ;;  %v4993_v7 = vor.u32 %v6060_v3, %v4992_v2  ;;  %v6051_v10 = vld [vmem:[%s11450_s0 + $0x9c] sm:$0xf0]  ;;  %4929 = vmatmul.msk.bf16.vlgmr.msra.gmra.mxu3 %vm128_vm2, %v6292_v30  ;;  %v507_v11 = vand.u32 %v4985_v0, %v6241_v5  ;;  %v4997_v13 = vor.u32 %v6056_v4, %v4994_v8  ;;  %v4960_v14 = vld [vmem:[%s11450_s0 + $0x88] sm:$0xf]  ;;  %v6047_v17 = vld [vmem:[%s11450_s0 + $0x84] sm:$0xf] }
  0x11   :  { %250 = vmatpush.bf16.msrb.mxu2 %v155_v51  ;;  %v510_v12 = vand.u32 %v4989_v1, %v6241_v5  ;;  %264 = vmatpush.bf16.msrb.mxu3 %v158_v59  ;;  %v4954_v18 = vld [vmem:[%s11450_s0 + $0xa0] sm:$0xf0]  ;;  %v6052_v19 = vld [vmem:[%s11450_s0 + $0xa4] sm:$0xf0]  ;;  %v4953_v21 = vor.u32 %v6051_v10, %v4952_v9  ;;  %v6048_v22 = vld [vmem:[%s11450_s0 + $0x8c] sm:$0xf] }
  0x12   :  { %v513_v16 = vand.u32 %v4993_v7, %v6241_v5  ;;  %v516_v20 = vand.u32 %v4997_v13, %v6241_v5  ;;  %v4961_v23 = vor.u32 %v6052_v19, %v4960_v14  ;;  %v4962_v24 = vld [vmem:[%s11450_s0 + $0xa8] sm:$0xf0]  ;;  %v5000_v25 = vld [vmem:[%s11450_s0 + $0xd0] sm:$0xf]  ;;  %v4957_v27 = vor.u32 %v6047_v17, %v4954_v18  ;;  %v6057_v28 = vld [vmem:[%s11450_s0 + $0xd4] sm:$0xf] }
  0x13   :  { %223 = vmatpush.bf16.msrb.mxu0 %v4881_v55  ;;  %237 = vmatpush.bf16.msrb.mxu1 %v4885_v6  ;;  %v6061_v26 = vld [vmem:[%s11450_s0 + $0xec] sm:$0x30]  ;;  %v5002_v29 = vld [vmem:[%s11450_s0 + $0xf0] sm:$0x30]  ;;  %v5008_v31 = vld [vmem:[%s11450_s0 + $0xd8] sm:$0xf]  ;;  %v4965_v33 = vor.u32 %v6048_v22, %v4962_v24 }
  0x14   :  { %v6062_v32 = vld [vmem:[%s11450_s0 + $0xf4] sm:$0x30]  ;;  %v5001_v34 = vor.u32 %v6061_v26, %v5000_v25  ;;  %v6058_v35 = vld [vmem:[%s11450_s0 + $0xdc] sm:$0xf]  ;;  %v5005_v37 = vor.u32 %v6057_v28, %v5002_v29  ;;  %v4968_v42 = vld [vmem:[%s11450_s0 + $0x90] sm:$0xf] }
  0x15   :  { %251 = vmatpush.bf16.msrb.mxu2 %v4889_v63  ;;  %265 = vmatpush.bf16.msrb.mxu3 %v4893_v15  ;;  %v5010_v36 = vld [vmem:[%s11450_s0 + $0xf8] sm:$0x30]  ;;  %v5009_v38 = vor.u32 %v6062_v32, %v5008_v31  ;;  %v6053_v43 = vld [vmem:[%s11450_s0 + $0xac] sm:$0xf0]  ;;  %v6049_v45 = vld [vmem:[%s11450_s0 + $0x94] sm:$0xf] }
  0x16   :  { %v5013_v39 = vor.u32 %v6058_v35, %v5010_v36  ;;  %v519_v40 = vand.u32 %v5001_v34, %v6241_v5  ;;  %v522_v41 = vand.u32 %v5005_v37, %v6241_v5  ;;  %v4970_v46 = vld [vmem:[%s11450_s0 + $0xb0] sm:$0xf0]  ;;  %v4976_v48 = vld [vmem:[%s11450_s0 + $0x98] sm:$0xf]  ;;  %v4969_v50 = vor.u32 %v6053_v43, %v4968_v42  ;;  %v6050_v51 = vld [vmem:[%s11450_s0 + $0x9c] sm:$0xf] }
  0x17   :  { %536 = vmatpush.bf16.msra.mxu0 %v507_v11  ;;  %550 = vmatpush.bf16.msra.mxu1 %v510_v12  ;;  %v525_v44 = vand.u32 %v5009_v38, %v6241_v5  ;;  %v6054_v49 = vld [vmem:[%s11450_s0 + $0xb4] sm:$0xf0]  ;;  %v4978_v52 = vld [vmem:[%s11450_s0 + $0xb8] sm:$0xf0]  ;;  %v4973_v53 = vor.u32 %v6049_v45, %v4970_v46  ;;  %v5072_v56 = vld [vmem:[%s11450_s0 + $0x140] sm:$0xf] }
  0x18   :  { %v528_v47 = vand.u32 %v5013_v39, %v6241_v5  ;;  %v4977_v54 = vor.u32 %v6054_v49, %v4976_v48  ;;  %v4981_v55 = vor.u32 %v6050_v51, %v4978_v52  ;;  %v6075_v57 = vld [vmem:[%s11450_s0 + $0x15c] sm:$0x30]  ;;  %v6071_v58 = vld [vmem:[%s11450_s0 + $0x144] sm:$0xf]  ;;  %v5080_v60 = vld [vmem:[%s11450_s0 + $0x148] sm:$0xf] }
  0x19   :  { %564 = vmatpush.bf16.msra.mxu2 %v513_v16  ;;  %578 = vmatpush.bf16.msra.mxu3 %v516_v20  ;;  %v5074_v59 = vld [vmem:[%s11450_s0 + $0x160] sm:$0x30]  ;;  %v6076_v61 = vld [vmem:[%s11450_s0 + $0x164] sm:$0x30]  ;;  %v5073_v62 = vor.u32 %v6075_v57, %v5072_v56  ;;  %v6072_v63 = vld [vmem:[%s11450_s0 + $0x14c] sm:$0xf] }
  0x1a   :  { %v5082_v0 = vld [vmem:[%s11450_s0 + $0x168] sm:$0x30]  ;;  %v5077_v1 = vor.u32 %v6071_v58, %v5074_v59  ;;  %v5081_v2 = vor.u32 %v6076_v61, %v5080_v60  ;;  %v5040_v7 = vld [vmem:[%s11450_s0 + $0x100] sm:$0xf]  ;;  %v6063_v10 = vld [vmem:[%s11450_s0 + $0x104] sm:$0xf] }
  0x1b   :  { %537 = vmatpush.bf16.msra.mxu0 %v4953_v21  ;;  %551 = vmatpush.bf16.msra.mxu1 %v4957_v27  ;;  %v5085_v3 = vor.u32 %v6072_v63, %v5082_v0  ;;  %v870_v4 = vand.u32 %v5073_v62, %v6241_v5  ;;  %v6067_v8 = vld [vmem:[%s11450_s0 + $0x11c] sm:$0xf0]  ;;  %v5042_v11 = vld [vmem:[%s11450_s0 + $0x120] sm:$0xf0]  ;;  %v5048_v13 = vld [vmem:[%s11450_s0 + $0x108] sm:$0xf] }
  0x1c   :  { %v873_v6 = vand.u32 %v5077_v1, %v6241_v5  ;;  %v876_v9 = vand.u32 %v5081_v2, %v6241_v5  ;;  %v6068_v14 = vld [vmem:[%s11450_s0 + $0x124] sm:$0xf0]  ;;  %v5041_v15 = vor.u32 %v6067_v8, %v5040_v7  ;;  %v6064_v16 = vld [vmem:[%s11450_s0 + $0x10c] sm:$0xf]  ;;  %v5045_v18 = vor.u32 %v6063_v10, %v5042_v11  ;;  %v5088_v21 = vld [vmem:[%s11450_s0 + $0x150] sm:$0xf] }
  0x1d   :  { %565 = vmatpush.bf16.msra.mxu2 %v4961_v23  ;;  %579 = vmatpush.bf16.msra.mxu3 %v4965_v33  ;;  %v879_v12 = vand.u32 %v5085_v3, %v6241_v5  ;;  %v5050_v17 = vld [vmem:[%s11450_s0 + $0x128] sm:$0xf0]  ;;  %v5049_v19 = vor.u32 %v6068_v14, %v5048_v13  ;;  %v6077_v22 = vld [vmem:[%s11450_s0 + $0x16c] sm:$0x30]  ;;  %v6073_v23 = vld [vmem:[%s11450_s0 + $0x154] sm:$0xf] }
  0x1e   :  { %4930 = vmatmul.msk.bf16.vlgmr.msrb.gmra.mxu0 %vm128_vm2, %v6292_v30  ;;  %4931 = vmatmul.msk.bf16.vlgmr.msrb.gmra.mxu1 %vm128_vm2, %v6292_v30  ;;  %v5053_v20 = vor.u32 %v6064_v16, %v5050_v17  ;;  %v5090_v24 = vld [vmem:[%s11450_s0 + $0x170] sm:$0x30]  ;;  %v5096_v25 = vld [vmem:[%s11450_s0 + $0x158] sm:$0xf]  ;;  %v5089_v27 = vor.u32 %v6077_v22, %v5088_v21  ;;  %v6074_v28 = vld [vmem:[%s11450_s0 + $0x15c] sm:$0xf] }
  0x1f   :  { %592 = vmatpush.bf16.msrb.mxu0 %v519_v40  ;;  %606 = vmatpush.bf16.msrb.mxu1 %v522_v41  ;;  %v6078_v26 = vld [vmem:[%s11450_s0 + $0x174] sm:$0x30]  ;;  %v5098_v29 = vld [vmem:[%s11450_s0 + $0x178] sm:$0x30]  ;;  %v5093_v31 = vor.u32 %v6073_v23, %v5090_v24  ;;  %v5056_v36 = vld [vmem:[%s11450_s0 + $0x110] sm:$0xf] }
  0x20   :  { %4932 = vmatmul.msk.bf16.vlgmr.msrb.gmra.mxu2 %vm128_vm2, %v6292_v30  ;;  %4933 = vmatmul.msk.bf16.vlgmr.msrb.gmra.mxu3 %vm128_vm2, %v6292_v30  ;;  %v5097_v32 = vor.u32 %v6078_v26, %v5096_v25  ;;  %v5101_v33 = vor.u32 %v6074_v28, %v5098_v29  ;;  %v882_v34 = vand.u32 %v5089_v27, %v6241_v5  ;;  %v6069_v37 = vld [vmem:[%s11450_s0 + $0x12c] sm:$0xf0]  ;;  %v6065_v39 = vld [vmem:[%s11450_s0 + $0x114] sm:$0xf]  ;;  %v5064_v42 = vld [vmem:[%s11450_s0 + $0x118] sm:$0xf] }
  0x21   :  { %620 = vmatpush.bf16.msrb.mxu2 %v525_v44  ;;  %634 = vmatpush.bf16.msrb.mxu3 %v528_v47  ;;  %v885_v35 = vand.u32 %v5093_v31, %v6241_v5  ;;  %v5058_v40 = vld [vmem:[%s11450_s0 + $0x130] sm:$0xf0]  ;;  %v6070_v43 = vld [vmem:[%s11450_s0 + $0x134] sm:$0xf0]  ;;  %v5057_v44 = vor.u32 %v6069_v37, %v5056_v36  ;;  %v6066_v45 = vld [vmem:[%s11450_s0 + $0x11c] sm:$0xf] }
  0x22   :  { %v888_v38 = vand.u32 %v5097_v32, %v6241_v5  ;;  %v891_v41 = vand.u32 %v5101_v33, %v6241_v5  ;;  %v5066_v46 = vld [vmem:[%s11450_s0 + $0x138] sm:$0xf0]  ;;  %v5061_v47 = vor.u32 %v6065_v39, %v5058_v40  ;;  %v5065_v48 = vor.u32 %v6070_v43, %v5064_v42  ;;  %v6091_v51 = vld [vmem:[%s11450_s0 + $0x1dc] sm:$0x30]  ;;  %v6087_v52 = vld [vmem:[%s11450_s0 + $0x1c4] sm:$0xf] }
  0x23   :  { %593 = vmatpush.bf16.msrb.mxu0 %v4969_v50  ;;  %607 = vmatpush.bf16.msrb.mxu1 %v4973_v53  ;;  %v5069_v49 = vor.u32 %v6066_v45, %v5066_v46  ;;  %v5160_v50 = vld [vmem:[%s11450_s0 + $0x1c0] sm:$0xf]  ;;  %v5162_v53 = vld [vmem:[%s11450_s0 + $0x1e0] sm:$0x30]  ;;  %v6088_v57 = vld [vmem:[%s11450_s0 + $0x1cc] sm:$0xf] }
  0x24   :  { %v5161_v56 = vor.u32 %v6091_v51, %v5160_v50  ;;  %v5170_v58 = vld [vmem:[%s11450_s0 + $0x1e8] sm:$0x30]  ;;  %v5165_v59 = vor.u32 %v6087_v52, %v5162_v53  ;;  %v5128_v0 = vld [vmem:[%s11450_s0 + $0x180] sm:$0xf]  ;;  %v6079_v3 = vld [vmem:[%s11450_s0 + $0x184] sm:$0xf] }
  0x25   :  { %621 = vmatpush.bf16.msrb.mxu2 %v4977_v54  ;;  %635 = vmatpush.bf16.msrb.mxu3 %v4981_v55  ;;  %v5168_v54 = vld [vmem:[%s11450_s0 + $0x1c8] sm:$0xf]  ;;  %v5173_v61 = vor.u32 %v6088_v57, %v5170_v58  ;;  %v6083_v1 = vld [vmem:[%s11450_s0 + $0x19c] sm:$0xf0]  ;;  %v6080_v10 = vld [vmem:[%s11450_s0 + $0x18c] sm:$0xf] }
  0x26   :  { %v6092_v55 = vld [vmem:[%s11450_s0 + $0x1e4] sm:$0x30]  ;;  %v1233_v62 = vand.u32 %v5161_v56, %v6241_v5  ;;  %v1236_v63 = vand.u32 %v5165_v59, %v6241_v5  ;;  %v5138_v11 = vld [vmem:[%s11450_s0 + $0x1a8] sm:$0xf0]  ;;  %v6093_v16 = vld [vmem:[%s11450_s0 + $0x1ec] sm:$0x30] }
  0x27   :  { %v5169_v60 = vor.u32 %v6092_v55, %v5168_v54  ;;  %v5136_v7 = vld [vmem:[%s11450_s0 + $0x188] sm:$0xf]  ;;  %v5141_v14 = vor.u32 %v6080_v10, %v5138_v11  ;;  %v6089_v17 = vld [vmem:[%s11450_s0 + $0x1d4] sm:$0xf]  ;;  %v6090_v22 = vld [vmem:[%s11450_s0 + $0x1dc] sm:$0xf] }
  0x28   :  { %v6084_v8 = vld [vmem:[%s11450_s0 + $0x1a4] sm:$0xf0]  ;;  %v5186_v23 = vld [vmem:[%s11450_s0 + $0x1f8] sm:$0x30]  ;;  %v5144_v29 = vld [vmem:[%s11450_s0 + $0x190] sm:$0xf] }
  0x29   :  { %v1239_v2 = vand.u32 %v5169_v60, %v6241_v5  ;;  %v5137_v13 = vor.u32 %v6084_v8, %v5136_v7  ;;  %v5189_v26 = vor.u32 %v6090_v22, %v5186_v23  ;;  %v6085_v31 = vld [vmem:[%s11450_s0 + $0x1ac] sm:$0xf0]  ;;  %v6081_v33 = vld [vmem:[%s11450_s0 + $0x194] sm:$0xf]  ;;  %v5152_v36 = vld [vmem:[%s11450_s0 + $0x198] sm:$0xf] }
  0x2a   :  { %v6086_v37 = vld [vmem:[%s11450_s0 + $0x1b4] sm:$0xf0]  ;;  %v6082_v39 = vld [vmem:[%s11450_s0 + $0x19c] sm:$0xf]  ;;  %v6107_v45 = vld [vmem:[%s11450_s0 + $0x25c] sm:$0x30] }
  0x2b   :  { %v5154_v40 = vld [vmem:[%s11450_s0 + $0x1b8] sm:$0xf0]  ;;  %v5153_v42 = vor.u32 %v6086_v37, %v5152_v36  ;;  %v6103_v46 = vld [vmem:[%s11450_s0 + $0x244] sm:$0xf]  ;;  %v6104_v51 = vld [vmem:[%s11450_s0 + $0x24c] sm:$0xf] }
  0x2c   :  { %v5157_v43 = vor.u32 %v6082_v39, %v5154_v40  ;;  %v5258_v52 = vld [vmem:[%s11450_s0 + $0x268] sm:$0x30]  ;;  %v5216_v58 = vld [vmem:[%s11450_s0 + $0x200] sm:$0xf]  ;;  %v6109_v10 = vld [vmem:[%s11450_s0 + $0x26c] sm:$0x30] }
  0x2d   :  { %v5261_v55 = vor.u32 %v6104_v51, %v5258_v52  ;;  %v6099_v59 = vld [vmem:[%s11450_s0 + $0x21c] sm:$0xf0]  ;;  %v6105_v11 = vld [vmem:[%s11450_s0 + $0x254] sm:$0xf]  ;;  %v5232_v23 = vld [vmem:[%s11450_s0 + $0x210] sm:$0xf] }
  0x2e   :  { %5014 = vmatmul.msk.bf16.vlgmr.msra.gmra.mxu0 %vm128_vm2, %v6292_v30  ;;  %5015 = vmatmul.msk.bf16.vlgmr.msra.gmra.mxu1 %vm128_vm2, %v6292_v30  ;;  %v6123_v39 = vld [vmem:[%s11450_s0 + $0x2dc] sm:$0x30]  ;;  %v6119_v40 = vld [vmem:[%s11450_s0 + $0x2c4] sm:$0xf] }
  0x2f   :  { %899 = vmatpush.bf16.msra.mxu0 %v870_v4  ;;  %913 = vmatpush.bf16.msra.mxu1 %v873_v6  ;;  %v5130_v4 = vld [vmem:[%s11450_s0 + $0x1a0] sm:$0xf0]  ;;  %v1242_v6 = vand.u32 %v5173_v61, %v6241_v5 }
  0x30   :  { %5016 = vmatmul.msk.bf16.vlgmr.msra.gmra.mxu2 %vm128_vm2, %v6292_v30  ;;  %5017 = vmatmul.msk.bf16.vlgmr.msra.gmra.mxu3 %vm128_vm2, %v6292_v30  ;;  %v6095_v61 = vld [vmem:[%s11450_s0 + $0x204] sm:$0xf] }
  0x31   :  { %927 = vmatpush.bf16.msra.mxu2 %v876_v9  ;;  %941 = vmatpush.bf16.msra.mxu3 %v879_v12  ;;  %v5129_v9 = vor.u32 %v6083_v1, %v5128_v0  ;;  %v5133_v12 = vor.u32 %v6079_v3, %v5130_v4  ;;  %v5224_v0 = vld [vmem:[%s11450_s0 + $0x208] sm:$0xf]  ;;  %v6096_v3 = vld [vmem:[%s11450_s0 + $0x20c] sm:$0xf] }
  0x32   :  { %v6100_v1 = vld [vmem:[%s11450_s0 + $0x224] sm:$0xf0]  ;;  %v5226_v4 = vld [vmem:[%s11450_s0 + $0x228] sm:$0xf0] }
  0x33   :  { %900 = vmatpush.bf16.msra.mxu0 %v5041_v15  ;;  %914 = vmatpush.bf16.msra.mxu1 %v5045_v18  ;;  %v5176_v15 = vld [vmem:[%s11450_s0 + $0x1d0] sm:$0xf]  ;;  %v5178_v18 = vld [vmem:[%s11450_s0 + $0x1f0] sm:$0x30]  ;;  %v5225_v7 = vor.u32 %v6100_v1, %v5224_v0  ;;  %v5229_v8 = vor.u32 %v6096_v3, %v5226_v4  ;;  %v5314_v0 = vld [vmem:[%s11450_s0 + $0x2a8] sm:$0xf0] }
  0x34   :  { %v5177_v21 = vor.u32 %v6093_v16, %v5176_v15  ;;  %v5181_v24 = vor.u32 %v6089_v17, %v5178_v18  ;;  %v6106_v16 = vld [vmem:[%s11450_s0 + $0x25c] sm:$0xf] }
  0x35   :  { %928 = vmatpush.bf16.msra.mxu2 %v5049_v19  ;;  %942 = vmatpush.bf16.msra.mxu3 %v5053_v20  ;;  %v5184_v19 = vld [vmem:[%s11450_s0 + $0x1d8] sm:$0xf]  ;;  %v5274_v17 = vld [vmem:[%s11450_s0 + $0x278] sm:$0x30] }
  0x36   :  { %v6094_v20 = vld [vmem:[%s11450_s0 + $0x1f4] sm:$0x30]  ;;  %v1245_v27 = vand.u32 %v5177_v21, %v6241_v5  ;;  %v1248_v28 = vand.u32 %v5181_v24, %v6241_v5  ;;  %v6101_v24 = vld [vmem:[%s11450_s0 + $0x22c] sm:$0xf0] }
  0x37   :  { %v5185_v25 = vor.u32 %v6094_v20, %v5184_v19  ;;  %v5277_v20 = vor.u32 %v6106_v16, %v5274_v17  ;;  %v5354_v16 = vld [vmem:[%s11450_s0 + $0x2f0] sm:$0x30]  ;;  %v5360_v17 = vld [vmem:[%s11450_s0 + $0x2d8] sm:$0xf] }
  0x39   :  { %v1251_v32 = vand.u32 %v5185_v25, %v6241_v5 }
  0x3e   :  { %5018 = vmatmul.msk.bf16.vlgmr.msrb.gmra.mxu0 %vm128_vm2, %v6292_v30  ;;  %5019 = vmatmul.msk.bf16.vlgmr.msrb.gmra.mxu1 %vm128_vm2, %v6292_v30 }
  0x3f   :  { %955 = vmatpush.bf16.msrb.mxu0 %v882_v34  ;;  %969 = vmatpush.bf16.msrb.mxu1 %v885_v35  ;;  %v5146_v34 = vld [vmem:[%s11450_s0 + $0x1b0] sm:$0xf0]  ;;  %v1254_v35 = vand.u32 %v5189_v26, %v6241_v5 }
  0x40   :  { %5020 = vmatmul.msk.bf16.vlgmr.msrb.gmra.mxu2 %vm128_vm2, %v6292_v30  ;;  %5021 = vmatmul.msk.bf16.vlgmr.msrb.gmra.mxu3 %vm128_vm2, %v6292_v30  ;;  %v6097_v26 = vld [vmem:[%s11450_s0 + $0x214] sm:$0xf] }
  0x41   :  { %983 = vmatpush.bf16.msrb.mxu2 %v888_v38  ;;  %997 = vmatpush.bf16.msrb.mxu3 %v891_v41  ;;  %v5145_v38 = vor.u32 %v6085_v31, %v5144_v29  ;;  %v5149_v41 = vor.u32 %v6081_v33, %v5146_v34  ;;  %v5240_v29 = vld [vmem:[%s11450_s0 + $0x218] sm:$0xf]  ;;  %v6098_v33 = vld [vmem:[%s11450_s0 + $0x21c] sm:$0xf] }
  0x42   :  { %v6102_v31 = vld [vmem:[%s11450_s0 + $0x234] sm:$0xf0]  ;;  %v5242_v34 = vld [vmem:[%s11450_s0 + $0x238] sm:$0xf0] }
  0x43   :  { %956 = vmatpush.bf16.msrb.mxu0 %v5057_v44  ;;  %970 = vmatpush.bf16.msrb.mxu1 %v5061_v47  ;;  %v5248_v44 = vld [vmem:[%s11450_s0 + $0x240] sm:$0xf]  ;;  %v5250_v47 = vld [vmem:[%s11450_s0 + $0x260] sm:$0x30]  ;;  %v5241_v36 = vor.u32 %v6102_v31, %v5240_v29  ;;  %v5245_v37 = vor.u32 %v6098_v33, %v5242_v34 }
  0x44   :  { %v5249_v50 = vor.u32 %v6107_v45, %v5248_v44  ;;  %v5253_v53 = vor.u32 %v6103_v46, %v5250_v47  ;;  %v6120_v45 = vld [vmem:[%s11450_s0 + $0x2cc] sm:$0xf] }
  0x45   :  { %984 = vmatpush.bf16.msrb.mxu2 %v5065_v48  ;;  %998 = vmatpush.bf16.msrb.mxu3 %v5069_v49  ;;  %v5256_v48 = vld [vmem:[%s11450_s0 + $0x248] sm:$0xf]  ;;  %v5346_v46 = vld [vmem:[%s11450_s0 + $0x2e8] sm:$0x30] }
  0x46   :  { %v6108_v49 = vld [vmem:[%s11450_s0 + $0x264] sm:$0x30]  ;;  %v1596_v56 = vand.u32 %v5249_v50, %v6241_v5  ;;  %v1599_v57 = vand.u32 %v5253_v53, %v6241_v5 }
  0x47   :  { %v5257_v54 = vor.u32 %v6108_v49, %v5256_v48  ;;  %v5349_v49 = vor.u32 %v6120_v45, %v5346_v46  ;;  %v6114_v46 = vld [vmem:[%s11450_s0 + $0x29c] sm:$0xf] }
  0x49   :  { %v1602_v60 = vand.u32 %v5257_v54, %v6241_v5  ;;  %v5304_v54 = vld [vmem:[%s11450_s0 + $0x280] sm:$0xf] }
  0x4e   :  { %5102 = vmatmul.msk.bf16.vlgmr.msra.gmra.mxu0 %vm128_vm2, %v6292_v30  ;;  %5103 = vmatmul.msk.bf16.vlgmr.msra.gmra.mxu1 %vm128_vm2, %v6292_v30 }
  0x4f   :  { %1262 = vmatpush.bf16.msra.mxu0 %v1233_v62  ;;  %1276 = vmatpush.bf16.msra.mxu1 %v1236_v63  ;;  %v5218_v62 = vld [vmem:[%s11450_s0 + $0x220] sm:$0xf0]  ;;  %v1605_v63 = vand.u32 %v5261_v55, %v6241_v5  ;;  %v6115_v55 = vld [vmem:[%s11450_s0 + $0x29c] sm:$0xf0] }
  0x50   :  { %5104 = vmatmul.msk.bf16.vlgmr.msra.gmra.mxu2 %vm128_vm2, %v6292_v30  ;;  %5105 = vmatmul.msk.bf16.vlgmr.msra.gmra.mxu3 %vm128_vm2, %v6292_v30 }
  0x51   :  { %1290 = vmatpush.bf16.msra.mxu2 %v1239_v2  ;;  %1304 = vmatpush.bf16.msra.mxu3 %v1242_v6  ;;  %v5217_v2 = vor.u32 %v6099_v59, %v5216_v58  ;;  %v5221_v6 = vor.u32 %v6095_v61, %v5218_v62  ;;  %v5306_v58 = vld [vmem:[%s11450_s0 + $0x2a0] sm:$0xf0]  ;;  %v1968_v59 = vand.u32 %v5349_v49, %v6241_v5  ;;  %v6116_v61 = vld [vmem:[%s11450_s0 + $0x2a4] sm:$0xf0] }
  0x52   :  { %v5305_v62 = vor.u32 %v6115_v55, %v5304_v54 }
  0x53   :  { %1263 = vmatpush.bf16.msra.mxu0 %v5129_v9  ;;  %1277 = vmatpush.bf16.msra.mxu1 %v5133_v12  ;;  %v5264_v9 = vld [vmem:[%s11450_s0 + $0x250] sm:$0xf]  ;;  %v5266_v12 = vld [vmem:[%s11450_s0 + $0x270] sm:$0x30] }
  0x54   :  { %v5265_v15 = vor.u32 %v6109_v10, %v5264_v9  ;;  %v5269_v18 = vor.u32 %v6105_v11, %v5266_v12  ;;  %v5352_v12 = vld [vmem:[%s11450_s0 + $0x2d0] sm:$0xf] }
  0x55   :  { %1291 = vmatpush.bf16.msra.mxu2 %v5137_v13  ;;  %1305 = vmatpush.bf16.msra.mxu3 %v5141_v14  ;;  %v5272_v13 = vld [vmem:[%s11450_s0 + $0x258] sm:$0xf] }
  0x56   :  { %v6110_v14 = vld [vmem:[%s11450_s0 + $0x274] sm:$0x30]  ;;  %v1608_v21 = vand.u32 %v5265_v15, %v6241_v5  ;;  %v1611_v22 = vand.u32 %v5269_v18, %v6241_v5 }
  0x57   :  { %v5273_v19 = vor.u32 %v6110_v14, %v5272_v13  ;;  %v6125_v13 = vld [vmem:[%s11450_s0 + $0x2ec] sm:$0x30]  ;;  %v6121_v14 = vld [vmem:[%s11450_s0 + $0x2d4] sm:$0xf]  ;;  %v6126_v18 = vld [vmem:[%s11450_s0 + $0x2f4] sm:$0x30] }
  0x59   :  { %v1614_v25 = vand.u32 %v5273_v19, %v6241_v5  ;;  %v5353_v19 = vor.u32 %v6125_v13, %v5352_v12 }
  0x5b   :  { %v1971_v31 = vand.u32 %v5353_v19, %v6241_v5 }
  0x5e   :  { %5106 = vmatmul.msk.bf16.vlgmr.msrb.gmra.mxu0 %vm128_vm2, %v6292_v30  ;;  %5107 = vmatmul.msk.bf16.vlgmr.msrb.gmra.mxu1 %vm128_vm2, %v6292_v30 }
  0x5f   :  { %1318 = vmatpush.bf16.msrb.mxu0 %v1245_v27  ;;  %1332 = vmatpush.bf16.msrb.mxu1 %v1248_v28  ;;  %v5234_v27 = vld [vmem:[%s11450_s0 + $0x230] sm:$0xf0]  ;;  %v1617_v28 = vand.u32 %v5277_v20, %v6241_v5  ;;  %v6122_v20 = vld [vmem:[%s11450_s0 + $0x2dc] sm:$0xf] }
  0x60   :  { %5108 = vmatmul.msk.bf16.vlgmr.msrb.gmra.mxu2 %vm128_vm2, %v6292_v30  ;;  %5109 = vmatmul.msk.bf16.vlgmr.msrb.gmra.mxu3 %vm128_vm2, %v6292_v30 }
  0x61   :  { %1346 = vmatpush.bf16.msrb.mxu2 %v1251_v32  ;;  %1360 = vmatpush.bf16.msrb.mxu3 %v1254_v35  ;;  %v5233_v32 = vor.u32 %v6101_v24, %v5232_v23  ;;  %v5237_v35 = vor.u32 %v6097_v26, %v5234_v27  ;;  %v5357_v23 = vor.u32 %v6121_v14, %v5354_v16 }
  0x62   :  { %v5361_v24 = vor.u32 %v6126_v18, %v5360_v17 }
  0x63   :  { %1319 = vmatpush.bf16.msrb.mxu0 %v5145_v38  ;;  %1333 = vmatpush.bf16.msrb.mxu1 %v5149_v41  ;;  %v5336_v38 = vld [vmem:[%s11450_s0 + $0x2c0] sm:$0xf]  ;;  %v5338_v41 = vld [vmem:[%s11450_s0 + $0x2e0] sm:$0x30] }
  0x64   :  { %v5337_v44 = vor.u32 %v6123_v39, %v5336_v38  ;;  %v5341_v47 = vor.u32 %v6119_v40, %v5338_v41  ;;  %v1977_v38 = vand.u32 %v5361_v24, %v6241_v5  ;;  %v6113_v39 = vld [vmem:[%s11450_s0 + $0x294] sm:$0xf]  ;;  %v6131_v24 = vld [vmem:[%s11450_s0 + $0x31c] sm:$0xf0] }
  0x65   :  { %1347 = vmatpush.bf16.msrb.mxu2 %v5153_v42  ;;  %1361 = vmatpush.bf16.msrb.mxu3 %v5157_v43  ;;  %v5344_v42 = vld [vmem:[%s11450_s0 + $0x2c8] sm:$0xf]  ;;  %v5322_v40 = vld [vmem:[%s11450_s0 + $0x2b0] sm:$0xf0] }
  0x66   :  { %v6124_v43 = vld [vmem:[%s11450_s0 + $0x2e4] sm:$0x30]  ;;  %v1959_v51 = vand.u32 %v5337_v44, %v6241_v5  ;;  %v1962_v53 = vand.u32 %v5341_v47, %v6241_v5  ;;  %v6118_v44 = vld [vmem:[%s11450_s0 + $0x2b4] sm:$0xf0]  ;;  %v5330_v47 = vld [vmem:[%s11450_s0 + $0x2b8] sm:$0xf0] }
  0x67   :  { %v5345_v48 = vor.u32 %v6124_v43, %v5344_v42  ;;  %v5328_v43 = vld [vmem:[%s11450_s0 + $0x298] sm:$0xf] }
  0x6e   :  { %5190 = vmatmul.msk.bf16.vlgmr.msra.gmra.mxu0 %vm128_vm2, %v6292_v30  ;;  %5191 = vmatmul.msk.bf16.vlgmr.msra.gmra.mxu1 %vm128_vm2, %v6292_v30 }
  0x6f   :  { %1625 = vmatpush.bf16.msra.mxu0 %v1596_v56  ;;  %1639 = vmatpush.bf16.msra.mxu1 %v1599_v57  ;;  %v1965_v56 = vand.u32 %v5345_v48, %v6241_v5  ;;  %v6111_v57 = vld [vmem:[%s11450_s0 + $0x284] sm:$0xf] }
  0x70   :  { %5192 = vmatmul.msk.bf16.vlgmr.msra.gmra.mxu2 %vm128_vm2, %v6292_v30  ;;  %5193 = vmatmul.msk.bf16.vlgmr.msra.gmra.mxu3 %vm128_vm2, %v6292_v30  ;;  %v5309_v1 = vor.u32 %v6111_v57, %v5306_v58 }
  0x71   :  { %1653 = vmatpush.bf16.msra.mxu2 %v1602_v60  ;;  %1667 = vmatpush.bf16.msra.mxu3 %v1605_v63  ;;  %v5312_v60 = vld [vmem:[%s11450_s0 + $0x288] sm:$0xf]  ;;  %v6112_v63 = vld [vmem:[%s11450_s0 + $0x28c] sm:$0xf] }
  0x72   :  { %v5313_v3 = vor.u32 %v6116_v61, %v5312_v60  ;;  %v5317_v4 = vor.u32 %v6112_v63, %v5314_v0  ;;  %v5424_v60 = vld [vmem:[%s11450_s0 + $0x340] sm:$0xf]  ;;  %v5426_v0 = vld [vmem:[%s11450_s0 + $0x360] sm:$0x30] }
  0x73   :  { %1626 = vmatpush.bf16.msra.mxu0 %v5217_v2  ;;  %1640 = vmatpush.bf16.msra.mxu1 %v5221_v6  ;;  %v6139_v61 = vld [vmem:[%s11450_s0 + $0x35c] sm:$0x30] }
  0x75   :  { %1654 = vmatpush.bf16.msra.mxu2 %v5225_v7  ;;  %1668 = vmatpush.bf16.msra.mxu3 %v5229_v8 }
  0x7c   :  { %v6887_v2 = vpop.permute.xlu0 %43 }
  0x7e   :  { %5194 = vmatmul.msk.bf16.vlgmr.msrb.gmra.mxu0 %vm128_vm2, %v6292_v30  ;;  %5195 = vmatmul.msk.bf16.vlgmr.msrb.gmra.mxu1 %vm128_vm2, %v6292_v30 }
  0x7f   :  { %1681 = vmatpush.bf16.msrb.mxu0 %v1608_v21  ;;  %1695 = vmatpush.bf16.msrb.mxu1 %v1611_v22  ;;  %v5362_v21 = vld [vmem:[%s11450_s0 + $0x2f8] sm:$0x30] }
  0x80   :  { %5196 = vmatmul.msk.bf16.vlgmr.msrb.gmra.mxu2 %vm128_vm2, %v6292_v30  ;;  %5197 = vmatmul.msk.bf16.vlgmr.msrb.gmra.mxu3 %vm128_vm2, %v6292_v30  ;;  %v5365_v27 = vor.u32 %v6122_v20, %v5362_v21 }
  0x81   :  { %1709 = vmatpush.bf16.msrb.mxu2 %v1614_v25  ;;  %1723 = vmatpush.bf16.msrb.mxu3 %v1617_v28 }
  0x82   :  { %v1980_v42 = vand.u32 %v5365_v27, %v6241_v5  ;;  %v6127_v27 = vld [vmem:[%s11450_s0 + $0x304] sm:$0xf] }
  0x83   :  { %1682 = vmatpush.bf16.msrb.mxu0 %v5233_v32  ;;  %1696 = vmatpush.bf16.msrb.mxu1 %v5237_v35  ;;  %v1974_v35 = vand.u32 %v5357_v23, %v6241_v5  ;;  %v5392_v23 = vld [vmem:[%s11450_s0 + $0x300] sm:$0xf] }
  0x85   :  { %1710 = vmatpush.bf16.msrb.mxu2 %v5241_v36  ;;  %1724 = vmatpush.bf16.msrb.mxu3 %v5245_v37  ;;  %v5320_v36 = vld [vmem:[%s11450_s0 + $0x290] sm:$0xf] }
  0x86   :  { %v6117_v37 = vld [vmem:[%s11450_s0 + $0x2ac] sm:$0xf0] }
  0x87   :  { %v5321_v45 = vor.u32 %v6117_v37, %v5320_v36  ;;  %v5393_v36 = vor.u32 %v6131_v24, %v5392_v23  ;;  %v6128_v37 = vld [vmem:[%s11450_s0 + $0x30c] sm:$0xf]  ;;  %v6129_v24 = vld [vmem:[%s11450_s0 + $0x314] sm:$0xf] }
  0x8b   :  { %v169_v50 = vpop.f32.mrf.mxu0  ;;  %v183_v52 = vpop.f32.mrf.mxu1 }
  0x8c   :  { %v6894_v8 = vadd.f32 %v169_v50, %v6887_v2  ;;  %v6897_v9 = vadd.f32 %v183_v52, %v6887_v2  ;;  %v5325_v50 = vor.u32 %v6113_v39, %v5322_v40  ;;  %v5333_v52 = vor.u32 %v6114_v46, %v5330_v47  ;;  %v7060_v40 = vld [vmem:[%s11451_s1] sm:$0xff] }
  0x8e   :  { %5278 = vmatmul.msk.bf16.vlgmr.msra.gmra.mxu0 %vm128_vm2, %v6292_v30  ;;  %5279 = vmatmul.msk.bf16.vlgmr.msra.gmra.mxu1 %vm128_vm2, %v6292_v30  ;;  %v272_v22 = vadd.f32 %v6897_v9, %v6894_v8 }
  0x8f   :  { %1988 = vmatpush.bf16.msra.mxu0 %v1959_v51  ;;  %2002 = vmatpush.bf16.msra.mxu1 %v1962_v53  ;;  %v5329_v51 = vor.u32 %v6118_v44, %v5328_v43 }
  0x90   :  { %5280 = vmatmul.msk.bf16.vlgmr.msra.gmra.mxu2 %vm128_vm2, %v6292_v30  ;;  %5281 = vmatmul.msk.bf16.vlgmr.msra.gmra.mxu3 %vm128_vm2, %v6292_v30 }
  0x91   :  { %2016 = vmatpush.bf16.msra.mxu2 %v1965_v56  ;;  %2030 = vmatpush.bf16.msra.mxu3 %v1968_v59 }
  0x93   :  { %v197_v6 = vpop.f32.mrf.mxu2  ;;  %v6891_v7 = vpop.f32.mrf.mxu0  ;;  %1989 = vmatpush.bf16.msra.mxu0 %v5305_v62  ;;  %2003 = vmatpush.bf16.msra.mxu1 %v5309_v1  ;;  %v6135_v62 = vld [vmem:[%s11450_s0 + $0x344] sm:$0xf]  ;;  %v5432_v1 = vld [vmem:[%s11450_s0 + $0x348] sm:$0xf] }
  0x94   :  { %11617 = vst [vmem:[#allocation2_spill] sm:$0xff] %v6891_v7  ;;  %v211_v10 = vpop.f32.mrf.mxu3  ;;  %v6899_v11 = vpop.f32.mrf.mxu1  ;;  %v6911_v15 = vadd.f32 %v197_v6, %v6887_v2  ;;  %v6136_v6 = vld [vmem:[%s11450_s0 + $0x34c] sm:$0xf]  ;;  %v5429_v13 = vor.u32 %v6135_v62, %v5426_v0  ;;  %v5450_v62 = vld [vmem:[%s11450_s0 + $0x378] sm:$0x30] }
  0x95   :  { %11618 = vst [vmem:[#allocation3_spill] sm:$0xff] %v6899_v11  ;;  %2017 = vmatpush.bf16.msra.mxu2 %v5313_v3  ;;  %2031 = vmatpush.bf16.msra.mxu3 %v5317_v4  ;;  %v6932_v26 = vadd.f32 %v211_v10, %v6887_v2  ;;  %v6140_v3 = vld [vmem:[%s11450_s0 + $0x364] sm:$0x30]  ;;  %v5425_v4 = vor.u32 %v6139_v61, %v5424_v60  ;;  %v5434_v10 = vld [vmem:[%s11450_s0 + $0x368] sm:$0x30]  ;;  %v6202_v11 = vmov 1024.0  }
  0x96   :  { %v273_v25 = vadd.f32 %v272_v22, %v6911_v15  ;;  %v5433_v14 = vor.u32 %v6140_v3, %v5432_v1  ;;  %v5437_v16 = vor.u32 %v6136_v6, %v5434_v10  ;;  %v2325_v22 = vand.u32 %v5429_v13, %v6241_v5  ;;  %v6138_v61 = vld [vmem:[%s11450_s0 + $0x35c] sm:$0xf] }
  0x97   :  { %v2322_v19 = vand.u32 %v5425_v4, %v6241_v5  ;;  %v5453_v6 = vor.u32 %v6138_v61, %v5450_v62  ;;  %v6155_v61 = vld [vmem:[%s11450_s0 + $0x3dc] sm:$0x30]  ;;  %v6151_v62 = vld [vmem:[%s11450_s0 + $0x3c4] sm:$0xf]  ;;  %6165 = vrcp.f32 %v6202_v11 }
  0x98   :  { %v274_v41 = vadd.f32 %v273_v25, %v6932_v26  ;;  %v2328_v25 = vand.u32 %v5433_v14, %v6241_v5 }
  0x9b   :  { %v6934_v28 = vpop.f32.mrf.mxu2  ;;  %v225_v29 = vpop.f32.mrf.mxu0 }
  0x9c   :  { %11619 = vst [vmem:[#allocation4_spill] sm:$0xff] %v6934_v28  ;;  %v6937_v32 = vpop.f32.mrf.mxu3  ;;  %v6940_v33 = vadd.f32 %v225_v29, %v6887_v2  ;;  %v239_v34 = vpop.f32.mrf.mxu1  ;;  %v5394_v29 = vld [vmem:[%s11450_s0 + $0x320] sm:$0xf0] }
  0x9d   :  { %11620 = vst [vmem:[#allocation5_spill] sm:$0xff] %v6937_v32  ;;  %v6976_v49 = vadd.f32 %v239_v34, %v6887_v2  ;;  %v5400_v34 = vld [vmem:[%s11450_s0 + $0x308] sm:$0xf]  ;;  %v5397_v39 = vor.u32 %v6127_v27, %v5394_v29  ;;  %v2343_v29 = vand.u32 %v5453_v6, %v6241_v5 }
  0x9e   :  { %5282 = vmatmul.msk.bf16.vlgmr.msrb.gmra.mxu0 %vm128_vm2, %v6292_v30  ;;  %5283 = vmatmul.msk.bf16.vlgmr.msrb.gmra.mxu1 %vm128_vm2, %v6292_v30  ;;  %v275_v48 = vadd.f32 %v274_v41, %v6940_v33 }
  0x9f   :  { %2044 = vmatpush.bf16.msrb.mxu0 %v1971_v31  ;;  %2058 = vmatpush.bf16.msrb.mxu1 %v1974_v35  ;;  %v2331_v31 = vand.u32 %v5437_v16, %v6241_v5  ;;  %v6132_v35 = vld [vmem:[%s11450_s0 + $0x324] sm:$0xf0] }
  0xa0   :  { %5284 = vmatmul.msk.bf16.vlgmr.msrb.gmra.mxu2 %vm128_vm2, %v6292_v30  ;;  %5285 = vmatmul.msk.bf16.vlgmr.msrb.gmra.mxu3 %vm128_vm2, %v6292_v30  ;;  %v276_v55 = vadd.f32 %v275_v48, %v6976_v49  ;;  %v5401_v41 = vor.u32 %v6132_v35, %v5400_v34  ;;  %v5440_v48 = vld [vmem:[%s11450_s0 + $0x350] sm:$0xf]  ;;  %v6134_v34 = vld [vmem:[%s11450_s0 + $0x334] sm:$0xf0] }
  0xa1   :  { %2072 = vmatpush.bf16.msrb.mxu2 %v1977_v38  ;;  %2086 = vmatpush.bf16.msrb.mxu3 %v1980_v42  ;;  %v5402_v38 = vld [vmem:[%s11450_s0 + $0x328] sm:$0xf0] }
  0xa2   :  { %v5405_v42 = vor.u32 %v6128_v37, %v5402_v38  ;;  %v5418_v37 = vld [vmem:[%s11450_s0 + $0x338] sm:$0xf0] }
  0xa3   :  { %v253_v53 = vpop.f32.mrf.mxu2  ;;  %v6982_v54 = vpop.f32.mrf.mxu0  ;;  %2045 = vmatpush.bf16.msrb.mxu0 %v5321_v45  ;;  %2059 = vmatpush.bf16.msrb.mxu1 %v5325_v50  ;;  %v6141_v50 = vld [vmem:[%s11450_s0 + $0x36c] sm:$0x30] }
  0xa4   :  { %11621 = vst [vmem:[#allocation6_spill] sm:$0xff] %v6982_v54  ;;  %v6986_v56 = vadd.f32 %v253_v53, %v6887_v2  ;;  %v267_v57 = vpop.f32.mrf.mxu3  ;;  %v6988_v58 = vpop.f32.mrf.mxu1  ;;  %v5442_v53 = vld [vmem:[%s11450_s0 + $0x370] sm:$0x30]  ;;  %v5441_v60 = vor.u32 %v6141_v50, %v5440_v48 }
  0xa5   :  { %11622 = vst [vmem:[#allocation7_spill] sm:$0xff] %v6988_v58  ;;  %v6991_v59 = vadd.f32 %v267_v57, %v6887_v2  ;;  %2073 = vmatpush.bf16.msrb.mxu2 %v5329_v51  ;;  %2087 = vmatpush.bf16.msrb.mxu3 %v5333_v52  ;;  %v6137_v51 = vld [vmem:[%s11450_s0 + $0x354] sm:$0xf]  ;;  %v6142_v57 = vld [vmem:[%s11450_s0 + $0x374] sm:$0x30] }
  0xa6   :  { %v277_v63 = vadd.f32 %v276_v55, %v6986_v56  ;;  %v5448_v55 = vld [vmem:[%s11450_s0 + $0x358] sm:$0xf]  ;;  %v5445_v0 = vor.u32 %v6137_v51, %v5442_v53  ;;  %v2334_v13 = vand.u32 %v5441_v60, %v6241_v5  ;;  %v5512_v60 = vld [vmem:[%s11450_s0 + $0x3c0] sm:$0xf] }
  0xa7   :  { %v5449_v1 = vor.u32 %v6142_v57, %v5448_v55  ;;  %v5513_v6 = vor.u32 %v6155_v61, %v5512_v60 }
  0xa8   :  { %v278_v12 = vadd.f32 %v277_v63, %v6991_v59 }
  0xa9   :  { %v2340_v23 = vand.u32 %v5449_v1, %v6241_v5  ;;  %v5520_v1 = vld [vmem:[%s11450_s0 + $0x3c8] sm:$0xf] }
  0xaa   :  { %279 = vadd.xlane.f32.xlu1 %v278_v12 }
  0xab   :  { %v7019_v17 = vpop.f32.mrf.mxu2  ;;  %v539_v18 = vpop.f32.mrf.mxu0 }
  0xac   :  { %11623 = vst [vmem:[#allocation8_spill] sm:$0xff] %v7019_v17  ;;  %v7022_v20 = vpop.f32.mrf.mxu3  ;;  %v553_v21 = vpop.f32.mrf.mxu1 }
  0xad   :  { %11624 = vst [vmem:[#allocation9_spill] sm:$0xff] %v7022_v20  ;;  %v7070_v45 = vadd.f32 %v553_v21, %v6887_v2  ;;  %v5408_v21 = vld [vmem:[%s11450_s0 + $0x310] sm:$0xf] }
  0xae   :  { %5366 = vmatmul.msk.bf16.vlgmr.msra.gmra.mxu0 %vm128_vm2, %v6292_v30  ;;  %5367 = vmatmul.msk.bf16.vlgmr.msra.gmra.mxu1 %vm128_vm2, %v6292_v30 }
  0xaf   :  { %2351 = vmatpush.bf16.msra.mxu0 %v2322_v19  ;;  %2365 = vmatpush.bf16.msra.mxu1 %v2325_v22  ;;  %v2337_v19 = vand.u32 %v5445_v0, %v6241_v5  ;;  %v6133_v22 = vld [vmem:[%s11450_s0 + $0x32c] sm:$0xf0]  ;;  %v5514_v0 = vld [vmem:[%s11450_s0 + $0x3e0] sm:$0x30] }
  0xb0   :  { %5368 = vmatmul.msk.bf16.vlgmr.msra.gmra.mxu2 %vm128_vm2, %v6292_v30  ;;  %5369 = vmatmul.msk.bf16.vlgmr.msra.gmra.mxu3 %vm128_vm2, %v7060_v40  ;;  %v7067_v30 = vadd.f32 %v539_v18, %v6887_v2  ;;  %v5409_v35 = vor.u32 %v6133_v22, %v5408_v21 }
  0xb1   :  { %2379 = vmatpush.bf16.msra.mxu2 %v2328_v25  ;;  %2393 = vmatpush.bf16.msra.mxu3 %v2331_v31  ;;  %v5410_v25 = vld [vmem:[%s11450_s0 + $0x330] sm:$0xf0]  ;;  %v5416_v31 = vld [vmem:[%s11450_s0 + $0x318] sm:$0xf] }
  0xb2   :  { %v642_v63 = vadd.f32 %v7070_v45, %v7067_v30 }
  0xb3   :  { %v567_v43 = vpop.f32.mrf.mxu2  ;;  %v7064_v44 = vpop.f32.mrf.mxu0  ;;  %2352 = vmatpush.bf16.msra.mxu0 %v5393_v36  ;;  %2366 = vmatpush.bf16.msra.mxu1 %v5397_v39  ;;  %v6130_v36 = vld [vmem:[%s11450_s0 + $0x31c] sm:$0xf] }
  0xb4   :  { %11625 = vst [vmem:[#allocation10_spill] sm:$0xff] %v7064_v44  ;;  %v581_v46 = vpop.f32.mrf.mxu3  ;;  %v7072_v47 = vpop.f32.mrf.mxu1  ;;  %v7084_v52 = vadd.f32 %v567_v43, %v6887_v2  ;;  %v5421_v43 = vor.u32 %v6130_v36, %v5418_v37  ;;  %v6143_v37 = vld [vmem:[%s11450_s0 + $0x384] sm:$0xf] }
  0xb5   :  { %11626 = vst [vmem:[#allocation11_spill] sm:$0xff] %v7072_v47  ;;  %2380 = vmatpush.bf16.msra.mxu2 %v5401_v41  ;;  %2394 = vmatpush.bf16.msra.mxu3 %v5405_v42  ;;  %v7105_v4 = vadd.f32 %v581_v46, %v6887_v2  ;;  %v5413_v41 = vor.u32 %v6129_v24, %v5410_v25 }
  0xb6   :  { %v643_v3 = vadd.f32 %v642_v63, %v7084_v52  ;;  %v5417_v42 = vor.u32 %v6134_v34, %v5416_v31  ;;  %v2685_v25 = vand.u32 %v5513_v6, %v6241_v5  ;;  %v5480_v34 = vld [vmem:[%s11450_s0 + $0x380] sm:$0xf] }
  0xb8   :  { %v644_v27 = vadd.f32 %v643_v3, %v7105_v4  ;;  %v6156_v3 = vld [vmem:[%s11450_s0 + $0x3e4] sm:$0x30] }
  0xb9   :  { %v5521_v21 = vor.u32 %v6156_v3, %v5520_v1 }
  0xbb   :  { %v7107_v10 = vpop.f32.mrf.mxu2  ;;  %v595_v12 = vpop.f32.mrf.mxu0  ;;  %v2691_v36 = vand.u32 %v5521_v21, %v6241_v5 }
  0xbc   :  { %11627 = vst [vmem:[#allocation12_spill] sm:$0xff] %v7107_v10  ;;  %v7110_v14 = vpop.f32.mrf.mxu3  ;;  %v7113_v16 = vadd.f32 %v595_v12, %v6887_v2  ;;  %v609_v18 = vpop.f32.mrf.mxu1  ;;  %v6152_v12 = vld [vmem:[%s11450_s0 + $0x3cc] sm:$0xf] }
  0xbd   :  { %11628 = vst [vmem:[#allocation13_spill] sm:$0xff] %v7110_v14  ;;  %v7149_v39 = vadd.f32 %v609_v18, %v6887_v2 }
  0xbe   :  { %5370 = vmatmul.msk.bf16.vlgmr.msrb.gmra.mxu0 %vm128_vm2, %v7060_v40  ;;  %5371 = vmatmul.msk.bf16.vlgmr.msrb.gmra.mxu1 %vm128_vm2, %v7060_v40  ;;  %v645_v38 = vadd.f32 %v644_v27, %v7113_v16 }
  0xbf   :  { %2407 = vmatpush.bf16.msrb.mxu0 %v2334_v13  ;;  %2421 = vmatpush.bf16.msrb.mxu1 %v2337_v19  ;;  %v5522_v13 = vld [vmem:[%s11450_s0 + $0x3e8] sm:$0x30]  ;;  %v5517_v19 = vor.u32 %v6151_v62, %v5514_v0 }
  0xc0   :  { %5372 = vmatmul.msk.bf16.vlgmr.msrb.gmra.mxu2 %vm128_vm2, %v7060_v40  ;;  %5373 = vmatmul.msk.bf16.vlgmr.msrb.gmra.mxu3 %vm128_vm2, %v7060_v40  ;;  %v646_v50 = vadd.f32 %v645_v38, %v7149_v39  ;;  %v5525_v22 = vor.u32 %v6152_v12, %v5522_v13  ;;  %v5482_v38 = vld [vmem:[%s11450_s0 + $0x3a0] sm:$0xf0]  ;;  %v5528_v13 = vld [vmem:[%s11450_s0 + $0x3d0] sm:$0xf] }
  0xc1   :  { %2435 = vmatpush.bf16.msrb.mxu2 %v2340_v23  ;;  %2449 = vmatpush.bf16.msrb.mxu3 %v2343_v29  ;;  %v2688_v31 = vand.u32 %v5517_v19, %v6241_v5  ;;  %v5485_v60 = vor.u32 %v6143_v37, %v5482_v38  ;;  %v6153_v19 = vld [vmem:[%s11450_s0 + $0x3d4] sm:$0xf] }
  0xc3   :  { %v623_v46 = vpop.f32.mrf.mxu2  ;;  %v7155_v48 = vpop.f32.mrf.mxu0  ;;  %2408 = vmatpush.bf16.msrb.mxu0 %v5409_v35  ;;  %2422 = vmatpush.bf16.msrb.mxu1 %v5413_v41  ;;  %v6147_v35 = vld [vmem:[%s11450_s0 + $0x39c] sm:$0xf0]  ;;  %v2694_v41 = vand.u32 %v5525_v22, %v6241_v5  ;;  %v5530_v22 = vld [vmem:[%s11450_s0 + $0x3f0] sm:$0x30] }
  0xc4   :  { %11629 = vst [vmem:[#allocation14_spill] sm:$0xff] %v7155_v48  ;;  %v7159_v51 = vadd.f32 %v623_v46, %v6887_v2  ;;  %v637_v53 = vpop.f32.mrf.mxu3  ;;  %v7161_v55 = vpop.f32.mrf.mxu1  ;;  %v5481_v46 = vor.u32 %v6147_v35, %v5480_v34  ;;  %v5538_v34 = vld [vmem:[%s11450_s0 + $0x3f8] sm:$0x30] }
  0xc5   :  { %11630 = vst [vmem:[#allocation15_spill] sm:$0xff] %v7161_v55  ;;  %v7164_v57 = vadd.f32 %v637_v53, %v6887_v2  ;;  %2436 = vmatpush.bf16.msrb.mxu2 %v5417_v42  ;;  %2450 = vmatpush.bf16.msrb.mxu3 %v5421_v43  ;;  %v5488_v42 = vld [vmem:[%s11450_s0 + $0x388] sm:$0xf]  ;;  %v5490_v53 = vld [vmem:[%s11450_s0 + $0x3a8] sm:$0xf0] }
  0xc6   :  { %v647_v63 = vadd.f32 %v646_v50, %v7159_v51  ;;  %v6148_v43 = vld [vmem:[%s11450_s0 + $0x3a4] sm:$0xf0]  ;;  %v6144_v50 = vld [vmem:[%s11450_s0 + $0x38c] sm:$0xf] }
  0xc7   :  { %v5489_v61 = vor.u32 %v6148_v43, %v5488_v42  ;;  %v5493_v62 = vor.u32 %v6144_v50, %v5490_v53 }
  0xc8   :  { %v648_v18 = vadd.f32 %v647_v63, %v7164_v57 }
  0xca   :  { %649 = vadd.xlane.f32.xlu0 %v648_v18  ;;  %v6157_v18 = vld [vmem:[%s11450_s0 + $0x3ec] sm:$0x30] }
  0xcb   :  { %v7192_v23 = vpop.f32.mrf.mxu2  ;;  %v902_v24 = vpop.f32.mrf.mxu0 }
  0xcc   :  { %11631 = vst [vmem:[#allocation16_spill] sm:$0xff] %v7192_v23  ;;  %v7195_v27 = vpop.f32.mrf.mxu3  ;;  %v916_v29 = vpop.f32.mrf.mxu1  ;;  %v7235_v1 = vadd.f32 %v902_v24, %v6887_v2  ;;  %v5536_v24 = vld [vmem:[%s11450_s0 + $0x3d8] sm:$0xf] }
  0xcd   :  { %11632 = vst [vmem:[#allocation17_spill] sm:$0xff] %v7195_v27  ;;  %v7238_v3 = vadd.f32 %v916_v29, %v6887_v2  ;;  %v5529_v29 = vor.u32 %v6157_v18, %v5528_v13  ;;  %v6145_v18 = vld [vmem:[%s11450_s0 + $0x394] sm:$0xf] }
  0xce   :  { %5454 = vmatmul.msk.bf16.vlgmr.msra.gmra.mxu0 %vm128_vm2, %v7060_v40  ;;  %5455 = vmatmul.msk.bf16.vlgmr.msra.gmra.mxu1 %vm128_vm2, %v7060_v40 }
  0xcf   :  { %2714 = vmatpush.bf16.msra.mxu0 %v2685_v25  ;;  %2728 = vmatpush.bf16.msra.mxu1 %v2688_v31  ;;  %v6158_v25 = vld [vmem:[%s11450_s0 + $0x3f4] sm:$0x30]  ;;  %v6154_v31 = vld [vmem:[%s11450_s0 + $0x3dc] sm:$0xf]  ;;  %v1005_v35 = vadd.f32 %v7238_v3, %v7235_v1  ;;  %v2697_v50 = vand.u32 %v5529_v29, %v6241_v5 }
  0xd0   :  { %5456 = vmatmul.msk.bf16.vlgmr.msra.gmra.mxu2 %vm128_vm2, %v7060_v40  ;;  %5457 = vmatmul.msk.bf16.vlgmr.msra.gmra.mxu3 %vm128_vm2, %v7060_v40  ;;  %v5537_v37 = vor.u32 %v6158_v25, %v5536_v24  ;;  %v5541_v42 = vor.u32 %v6154_v31, %v5538_v34  ;;  %v5504_v25 = vld [vmem:[%s11450_s0 + $0x398] sm:$0xf]  ;;  %v6146_v34 = vld [vmem:[%s11450_s0 + $0x39c] sm:$0xf] }
  0xd1   :  { %2742 = vmatpush.bf16.msra.mxu2 %v2691_v36  ;;  %2756 = vmatpush.bf16.msra.mxu3 %v2694_v41  ;;  %v5533_v36 = vor.u32 %v6153_v19, %v5530_v22  ;;  %v5498_v19 = vld [vmem:[%s11450_s0 + $0x3b0] sm:$0xf0]  ;;  %v6150_v29 = vld [vmem:[%s11450_s0 + $0x3b4] sm:$0xf0] }
  0xd2   :  { %v2703_v13 = vand.u32 %v5537_v37, %v6241_v5  ;;  %v2706_v24 = vand.u32 %v5541_v42, %v6241_v5  ;;  %v5501_v37 = vor.u32 %v6145_v18, %v5498_v19 }
  0xd3   :  { %v930_v63 = vpop.f32.mrf.mxu2  ;;  %v7232_v0 = vpop.f32.mrf.mxu0  ;;  %2715 = vmatpush.bf16.msra.mxu0 %v5481_v46  ;;  %2729 = vmatpush.bf16.msra.mxu1 %v5485_v60 }
  0xd4   :  { %11633 = vst [vmem:[#allocation18_spill] sm:$0xff] %v7232_v0  ;;  %v944_v6 = vpop.f32.mrf.mxu3  ;;  %v7240_v12 = vpop.f32.mrf.mxu1  ;;  %v7252_v21 = vadd.f32 %v930_v63, %v6887_v2  ;;  %v5496_v63 = vld [vmem:[%s11450_s0 + $0x390] sm:$0xf] }
  0xd5   :  { %11634 = vst [vmem:[#allocation19_spill] sm:$0xff] %v7240_v12  ;;  %2743 = vmatpush.bf16.msra.mxu2 %v5489_v61  ;;  %2757 = vmatpush.bf16.msra.mxu3 %v5493_v62  ;;  %v7273_v41 = vadd.f32 %v944_v6, %v6887_v2  ;;  %v2700_v62 = vand.u32 %v5533_v36, %v6241_v5  ;;  %v6149_v6 = vld [vmem:[%s11450_s0 + $0x3ac] sm:$0xf0]  ;;  %v5506_v5 = vld [vmem:[%s11450_s0 + $0x3b8] sm:$0xf0] }
  0xd6   :  { %v1006_v38 = vadd.f32 %v1005_v35, %v7252_v21  ;;  %v5497_v31 = vor.u32 %v6149_v6, %v5496_v63  ;;  %v5509_v42 = vor.u32 %v6146_v34, %v5506_v5 }
  0xd8   :  { %v1007_v22 = vadd.f32 %v1006_v38, %v7273_v41  ;;  %v5505_v38 = vor.u32 %v6150_v29, %v5504_v25 }
  0xdb   :  { %v7275_v43 = vpop.f32.mrf.mxu2  ;;  %v958_v46 = vpop.f32.mrf.mxu0 }
  0xdc   :  { %11635 = vst [vmem:[#allocation20_spill] sm:$0xff] %v7275_v43  ;;  %v7278_v53 = vpop.f32.mrf.mxu3  ;;  %v7281_v60 = vadd.f32 %v958_v46, %v6887_v2  ;;  %v972_v61 = vpop.f32.mrf.mxu1 }
  0xdd   :  { %11636 = vst [vmem:[#allocation21_spill] sm:$0xff] %v7278_v53  ;;  %v7317_v36 = vadd.f32 %v972_v61, %v6887_v2 }
  0xde   :  { %5458 = vmatmul.msk.bf16.vlgmr.msrb.gmra.mxu0 %vm128_vm2, %v7060_v40  ;;  %5459 = vmatmul.msk.bf16.vlgmr.msrb.gmra.mxu1 %vm128_vm2, %v7060_v40  ;;  %v1008_v35 = vadd.f32 %v1007_v22, %v7281_v60 }
  0xdf   :  { %2770 = vmatpush.bf16.msrb.mxu0 %v2697_v50  ;;  %2784 = vmatpush.bf16.msrb.mxu1 %v2700_v62 }
  0xe0   :  { %5460 = vmatmul.msk.bf16.vlgmr.msrb.gmra.mxu2 %vm128_vm2, %v7060_v40  ;;  %5461 = vmatmul.msk.bf16.vlgmr.msrb.gmra.mxu3 %vm128_vm2, %v7060_v40  ;;  %v1009_v63 = vadd.f32 %v1008_v35, %v7317_v36 }
  0xe1   :  { %2798 = vmatpush.bf16.msrb.mxu2 %v2703_v13  ;;  %2812 = vmatpush.bf16.msrb.mxu3 %v2706_v24 }
  0xe3   :  { %v986_v46 = vpop.f32.mrf.mxu2  ;;  %v7323_v50 = vpop.f32.mrf.mxu0  ;;  %2771 = vmatpush.bf16.msrb.mxu0 %v5497_v31  ;;  %2785 = vmatpush.bf16.msrb.mxu1 %v5501_v37 }
  0xe4   :  { %11637 = vst [vmem:[#allocation22_spill] sm:$0xff] %v7323_v50  ;;  %v7327_v61 = vadd.f32 %v986_v46, %v6887_v2  ;;  %v1000_v6 = vpop.f32.mrf.mxu3  ;;  %v7329_v22 = vpop.f32.mrf.mxu1 }
  0xe5   :  { %11638 = vst [vmem:[#allocation23_spill] sm:$0xff] %v7329_v22  ;;  %v7332_v62 = vadd.f32 %v1000_v6, %v6887_v2  ;;  %2799 = vmatpush.bf16.msrb.mxu2 %v5505_v38  ;;  %2813 = vmatpush.bf16.msrb.mxu3 %v5509_v42 }
  0xe6   :  { %v1010_v13 = vadd.f32 %v1009_v63, %v7327_v61 }
  0xe8   :  { %v1011_v18 = vadd.f32 %v1010_v13, %v7332_v62 }
  0xea   :  { %1012 = vadd.xlane.f32.xlu1 %v1011_v18 }
  0xeb   :  { %v7336_v19 = vpop.f32.mrf.mxu2  ;;  %v1265_v24 = vpop.f32.mrf.mxu0 }
  0xec   :  { %11639 = vst [vmem:[#allocation24_spill] sm:$0xff] %v7336_v19  ;;  %v7338_v25 = vpop.f32.mrf.mxu3  ;;  %v1279_v29 = vpop.f32.mrf.mxu1  ;;  %v7351_v5 = vadd.f32 %v1265_v24, %v6887_v2 }
  0xed   :  { %11640 = vst [vmem:[#allocation25_spill] sm:$0xff] %v7338_v25  ;;  %v7354_v35 = vadd.f32 %v1279_v29, %v6887_v2 }
  0xee   :  { %5542 = vmatmul.msk.bf16.vlgmr.msra.gmra.mxu0 %vm128_vm2, %v7060_v40  ;;  %5543 = vmatmul.msk.bf16.vlgmr.msra.gmra.mxu1 %vm128_vm2, %v7060_v40 }
  0xef   :  { %v1368_v46 = vadd.f32 %v7354_v35, %v7351_v5 }
  0xf0   :  { %5544 = vmatmul.msk.bf16.vlgmr.msra.gmra.mxu2 %vm128_vm2, %v7060_v40  ;;  %5545 = vmatmul.msk.bf16.vlgmr.msra.gmra.mxu3 %vm128_vm2, %v7060_v40 }
  0xf3   :  { %v1293_v31 = vpop.f32.mrf.mxu2  ;;  %v7348_v34 = vpop.f32.mrf.mxu0 }
  0xf4   :  { %11641 = vst [vmem:[#allocation26_spill] sm:$0xff] %v7348_v34  ;;  %v1307_v37 = vpop.f32.mrf.mxu3  ;;  %v7356_v38 = vpop.f32.mrf.mxu1  ;;  %v7359_v42 = vadd.f32 %v1293_v31, %v6887_v2 }
  0xf5   :  { %11642 = vst [vmem:[#allocation27_spill] sm:$0xff] %v7356_v38  ;;  %v7365_v6 = vadd.f32 %v1307_v37, %v6887_v2 }
  0xf6   :  { %v1369_v63 = vadd.f32 %v1368_v46, %v7359_v42 }
  0xf8   :  { %v1370_v31 = vadd.f32 %v1369_v63, %v7365_v6 }
  0xfb   :  { %v7367_v13 = vpop.f32.mrf.mxu2  ;;  %v1321_v18 = vpop.f32.mrf.mxu0 }
  0xfc   :  { %11643 = vst [vmem:[#allocation28_spill] sm:$0xff] %v7367_v13  ;;  %v7369_v24 = vpop.f32.mrf.mxu3  ;;  %v7372_v29 = vadd.f32 %v1321_v18, %v6887_v2  ;;  %v1335_v27 = vpop.f32.mrf.mxu1 }
  0xfd   :  { %11644 = vst [vmem:[#allocation29_spill] sm:$0xff] %v7369_v24  ;;  %v7381_v46 = vadd.f32 %v1335_v27, %v6887_v2 }
  0xfe   :  { %5546 = vmatmul.msk.bf16.vlgmr.msrb.gmra.mxu0 %vm128_vm2, %v7060_v40  ;;  %5547 = vmatmul.msk.bf16.vlgmr.msrb.gmra.mxu1 %vm128_vm2, %v7060_v40  ;;  %v1371_v37 = vadd.f32 %v1370_v31, %v7372_v29 }
 0x100   :  { %5548 = vmatmul.msk.bf16.vlgmr.msrb.gmra.mxu2 %vm128_vm2, %v7060_v40  ;;  %5549 = vmatmul.msk.bf16.vlgmr.msrb.gmra.mxu3 %vm128_vm2, %v7060_v40  ;;  %v1372_v63 = vadd.f32 %v1371_v37, %v7381_v46  ;;  %vm3000_vm2 = vcmask 1040384  }
 0x103   :  { %v1349_v18 = vpop.f32.mrf.mxu2  ;;  %v7387_v23 = vpop.f32.mrf.mxu0 }
 0x104   :  { %11645 = vst [vmem:[#allocation30_spill] sm:$0xff] %v7387_v23  ;;  %v7391_v55 = vadd.f32 %v1349_v18, %v6887_v2  ;;  %v1363_v25 = vpop.f32.mrf.mxu3  ;;  %v7393_v19 = vpop.f32.mrf.mxu1 }
 0x105   :  { %11646 = vst [vmem:[#allocation31_spill] sm:$0xff] %v7393_v19  ;;  %v7396_v27 = vadd.f32 %v1363_v25, %v6887_v2 }
 0x106   :  { %v1373_v31 = vadd.f32 %v1372_v63, %v7391_v55 }
 0x108   :  { %v1374_v48 = vadd.f32 %v1373_v31, %v7396_v27 }
 0x10a   :  { %1375 = vadd.xlane.f32.xlu2 %v1374_v48 }
 0x10b   :  { %v7400_v40 = vpop.f32.mrf.mxu2  ;;  %v1628_v22 = vpop.f32.mrf.mxu0 }
 0x10c   :  { %11647 = vst [vmem:[#allocation32_spill] sm:$0xff] %v7400_v40  ;;  %v7402_v14 = vpop.f32.mrf.mxu3  ;;  %v1642_v37 = vpop.f32.mrf.mxu1  ;;  %v7407_v10 = vadd.f32 %v1628_v22, %v6887_v2 }
 0x10d   :  { %11648 = vst [vmem:[#allocation33_spill] sm:$0xff] %v7402_v14  ;;  %v7410_v25 = vadd.f32 %v1642_v37, %v6887_v2 }
 0x10f   :  { %v1731_v31 = vadd.f32 %v7410_v25, %v7407_v10 }
 0x113   :  { %v1656_v50 = vpop.f32.mrf.mxu2  ;;  %v7404_v18 = vpop.f32.mrf.mxu0 }
 0x114   :  { %11649 = vst [vmem:[#allocation34_spill] sm:$0xff] %v7404_v18  ;;  %v1670_v53 = vpop.f32.mrf.mxu3  ;;  %v7412_v63 = vpop.f32.mrf.mxu1  ;;  %v7415_v48 = vadd.f32 %v1656_v50, %v6887_v2 }
 0x115   :  { %11650 = vst [vmem:[#allocation35_spill] sm:$0xff] %v7412_v63  ;;  %v7421_v47 = vadd.f32 %v1670_v53, %v6887_v2 }
 0x116   :  { %v1732_v20 = vadd.f32 %v1731_v31, %v7415_v48 }
 0x118   :  { %v1733_v50 = vadd.f32 %v1732_v20, %v7421_v47 }
 0x11b   :  { %v7423_v44 = vpop.f32.mrf.mxu2  ;;  %v1684_v22 = vpop.f32.mrf.mxu0 }
 0x11c   :  { %11651 = vst [vmem:[#allocation36_spill] sm:$0xff] %v7423_v44  ;;  %v7425_v43 = vpop.f32.mrf.mxu3  ;;  %v7428_v37 = vadd.f32 %v1684_v22, %v6887_v2  ;;  %v1698_v17 = vpop.f32.mrf.mxu1 }
 0x11d   :  { %11652 = vst [vmem:[#allocation37_spill] sm:$0xff] %v7425_v43  ;;  %v7433_v12 = vadd.f32 %v1698_v17, %v6887_v2 }
 0x11e   :  { %v1734_v58 = vadd.f32 %v1733_v50, %v7428_v37 }
 0x120   :  { %v1735_v53 = vadd.f32 %v1734_v58, %v7433_v12 }
 0x123   :  { %v1712_v31 = vpop.f32.mrf.mxu2  ;;  %v7435_v0 = vpop.f32.mrf.mxu0 }
 0x124   :  { %11653 = vst [vmem:[#allocation38_spill] sm:$0xff] %v7435_v0  ;;  %v7439_v54 = vadd.f32 %v1712_v31, %v6887_v2  ;;  %v1726_v43 = vpop.f32.mrf.mxu3  ;;  %v7441_v44 = vpop.f32.mrf.mxu1 }
 0x125   :  { %11654 = vst [vmem:[#allocation39_spill] sm:$0xff] %v7441_v44  ;;  %v7444_v22 = vadd.f32 %v1726_v43, %v6887_v2 }
 0x126   :  { %v1736_v20 = vadd.f32 %v1735_v53, %v7439_v54 }
 0x128   :  { %v1737_v50 = vadd.f32 %v1736_v20, %v7444_v22 }
 0x12a   :  { %1738 = vadd.xlane.f32.xlu2 %v1737_v50 }
 0x12b   :  { %v7448_v17 = vpop.f32.mrf.mxu2  ;;  %v1991_v32 = vpop.f32.mrf.mxu0 }
 0x12c   :  { %11655 = vst [vmem:[#allocation40_spill] sm:$0xff] %v7448_v17  ;;  %v7450_v0 = vpop.f32.mrf.mxu3  ;;  %v2005_v58 = vpop.f32.mrf.mxu1  ;;  %v7455_v40 = vadd.f32 %v1991_v32, %v6887_v2 }
 0x12d   :  { %11656 = vst [vmem:[#allocation41_spill] sm:$0xff] %v7450_v0  ;;  %v7458_v43 = vadd.f32 %v2005_v58, %v6887_v2 }
 0x12f   :  { %v2094_v50 = vadd.f32 %v7458_v43, %v7455_v40 }
 0x133   :  { %v2019_v14 = vpop.f32.mrf.mxu2  ;;  %v7452_v31 = vpop.f32.mrf.mxu0 }
 0x134   :  { %11657 = vst [vmem:[#allocation42_spill] sm:$0xff] %v7452_v31  ;;  %v2033_v44 = vpop.f32.mrf.mxu3  ;;  %v7460_v53 = vpop.f32.mrf.mxu1  ;;  %v7463_v20 = vadd.f32 %v2019_v14, %v6887_v2 }
 0x135   :  { %11658 = vst [vmem:[#allocation43_spill] sm:$0xff] %v7460_v53  ;;  %v7469_v17 = vadd.f32 %v2033_v44, %v6887_v2 }
 0x136   :  { %v2095_v0 = vadd.f32 %v2094_v50, %v7463_v20 }
 0x138   :  { %v2096_v14 = vadd.f32 %v2095_v0, %v7469_v17 }
 0x13b   :  { %v7471_v31 = vpop.f32.mrf.mxu2  ;;  %v2047_v32 = vpop.f32.mrf.mxu0 }
 0x13c   :  { %11659 = vst [vmem:[#allocation44_spill] sm:$0xff] %v7471_v31  ;;  %v7473_v19 = vpop.f32.mrf.mxu3  ;;  %v7476_v58 = vadd.f32 %v2047_v32, %v6887_v2  ;;  %v2061_v53 = vpop.f32.mrf.mxu1 }
 0x13d   :  { %11660 = vst [vmem:[#allocation45_spill] sm:$0xff] %v7473_v19  ;;  %v7481_v63 = vadd.f32 %v2061_v53, %v6887_v2 }
 0x13e   :  { %v2097_v23 = vadd.f32 %v2096_v14, %v7476_v58 }
 0x140   :  { %v2098_v44 = vadd.f32 %v2097_v23, %v7481_v63 }
 0x143   :  { %v2075_v50 = vpop.f32.mrf.mxu2  ;;  %v7483_v18 = vpop.f32.mrf.mxu0 }
 0x144   :  { %11661 = vst [vmem:[#allocation46_spill] sm:$0xff] %v7483_v18  ;;  %v7487_v31 = vadd.f32 %v2075_v50, %v6887_v2  ;;  %v2089_v19 = vpop.f32.mrf.mxu3  ;;  %v7489_v28 = vpop.f32.mrf.mxu1 }
 0x145   :  { %11663 = vst [vmem:[#allocation48_spill] sm:$0xff] %v7489_v28  ;;  %v7492_v32 = vadd.f32 %v2089_v19, %v6887_v2 }
 0x146   :  { %11662 = vst [vmem:[#allocation47_spill] sm:$0xff] %v7487_v31  ;;  %v2099_v0 = vadd.f32 %v2098_v44, %v7487_v31 }
 0x147   :  { %11664 = vst [vmem:[#allocation49_spill] sm:$0xff] %v7492_v32 }
 0x148   :  { %v2100_v14 = vadd.f32 %v2099_v0, %v7492_v32 }
 0x14a   :  { %2101 = vadd.xlane.f32.xlu1 %v2100_v14 }
 0x14b   :  { %v7496_v53 = vpop.f32.mrf.mxu2  ;;  %v2354_v24 = vpop.f32.mrf.mxu0 }
 0x14c   :  { %11665 = vst [vmem:[#allocation50_spill] sm:$0xff] %v7496_v53  ;;  %v7498_v18 = vpop.f32.mrf.mxu3  ;;  %v2368_v23 = vpop.f32.mrf.mxu1  ;;  %v7503_v28 = vadd.f32 %v2354_v24, %v6887_v2 }
 0x14d   :  { %11666 = vst [vmem:[#allocation51_spill] sm:$0xff] %v7498_v18  ;;  %v7506_v19 = vadd.f32 %v2368_v23, %v6887_v2  ;;  %v6166_v53 = vpop.eup %6165 }
 0x14e   :  { %11668 = vst [vmem:[#allocation53_spill] sm:$0xff] %v7503_v28  ;;  %v291_v11 = vmul.f32 1024.0, %v6166_v53  ;;  %vm295_vm3 = vweird.f32 %v6166_v53 }
 0x14f   :  { %11669 = vst [vmem:[#allocation54_spill] sm:$0xff] %v7506_v19  ;;  %v2457_v18 = vadd.f32 %v7506_v19, %v7503_v28 }
 0x150   :  { %v292_v31 = vsub.f32 1.0, %v291_v11 }
 0x152   :  { %v293_v28 = vmul.f32 %v6166_v53, %v292_v31  ;;  %v650_v31 = vpop.xlane.xlu0 %649 }
 0x153   :  { %v2382_v50 = vpop.f32.mrf.mxu2  ;;  %v7500_v7 = vpop.f32.mrf.mxu0 }
 0x154   :  { %11667 = vst [vmem:[#allocation52_spill] sm:$0xff] %v7500_v7  ;;  %v2396_v44 = vpop.f32.mrf.mxu3  ;;  %v7508_v0 = vpop.f32.mrf.mxu1  ;;  %v7511_v14 = vadd.f32 %v2382_v50, %v6887_v2  ;;  %v294_v11 = vadd.f32 %v6166_v53, %v293_v28 }
 0x155   :  { %11670 = vst [vmem:[#allocation55_spill] sm:$0xff] %v7508_v0  ;;  %v7519_v34 = vadd.f32 %v2396_v44, %v6887_v2 }
 0x156   :  { %11671 = vst [vmem:[#allocation56_spill] sm:$0xff] %v7511_v14  ;;  %v2458_v13 = vadd.f32 %v2457_v18, %v7511_v14 }
 0x157   :  { %11673 = vst [vmem:[#allocation58_spill] sm:$0xff] %v7519_v34 }
 0x158   :  { %v2459_v0 = vadd.f32 %v2458_v13, %v7519_v34  ;;  %v7544_v34 = vsel %vm295_vm3, %v6166_v53, %v294_v11  ;;  %vm3003_vm3 = vcmask 1041408  }
 0x15b   :  { %v7516_v38 = vpop.f32.mrf.mxu2  ;;  %v2410_v24 = vpop.f32.mrf.mxu0 }
 0x15c   :  { %11672 = vst [vmem:[#allocation57_spill] sm:$0xff] %v7516_v38  ;;  %v7521_v23 = vpop.f32.mrf.mxu3  ;;  %v7524_v32 = vadd.f32 %v2410_v24, %v6887_v2  ;;  %v2424_v50 = vpop.f32.mrf.mxu1 }
 0x15d   :  { %11674 = vst [vmem:[#allocation59_spill] sm:$0xff] %v7521_v23  ;;  %v7529_v18 = vadd.f32 %v2424_v50, %v6887_v2 }
 0x15e   :  { %11675 = vst [vmem:[#allocation60_spill] sm:$0xff] %v7524_v32  ;;  %v2460_v19 = vadd.f32 %v2459_v0, %v7524_v32  ;;  %v280_v32 = vpop.xlane.xlu1 %279 }
 0x15f   :  { %11676 = vst [vmem:[#allocation61_spill] sm:$0xff] %v7529_v18 }
 0x160   :  { %v2461_v44 = vadd.f32 %v2460_v19, %v7529_v18  ;;  %v7547_v19 = vmul.f32 %v650_v31, %v7544_v34 }
 0x163   :  { %v2438_v14 = vpop.f32.mrf.mxu2  ;;  %v7531_v38 = vpop.f32.mrf.mxu0 }
 0x164   :  { %v7535_v23 = vadd.f32 %v2438_v14, %v6887_v2  ;;  %v2452_v24 = vpop.f32.mrf.mxu3  ;;  %v7537_v7 = vpop.f32.mrf.mxu1 }
 0x165   :  { %v7541_v0 = vadd.f32 %v2452_v24, %v6887_v2  ;;  %v7555_v24 = vsub.f32 %v7067_v30, %v7547_v19 }
 0x166   :  { %11677 = vst [vmem:[#allocation62_spill] sm:$0xff] %v7535_v23  ;;  %v2462_v13 = vadd.f32 %v2461_v44, %v7535_v23  ;;  %v1013_v53 = vpop.xlane.xlu1 %1012 }
 0x167   :  { %11678 = vst [vmem:[#allocation63_spill] sm:$0xff] %v7541_v0  ;;  %v678_v31 = vmul.f32 %v7555_v24, %v7555_v24  ;;  %v7568_v23 = vmul.f32 %v1013_v53, %v7544_v34 }
 0x168   :  { %v2463_v50 = vadd.f32 %v2462_v13, %v7541_v0  ;;  %11681 = vst [vmem:[#allocation66_spill] sm:$0xff] %v7555_v24  ;;  %v7559_v13 = vsub.f32 %v7070_v45, %v7547_v19 }
 0x16a   :  { %2464 = vadd.xlane.f32.xlu2 %v2463_v50  ;;  %11682 = vst [vmem:[#allocation67_spill] sm:$0xff] %v7559_v13  ;;  %v679_v0 = vmul.f32 %v7559_v13, %v7559_v13 }
 0x16b   :  { %v7549_v14 = vpop.f32.mrf.mxu2  ;;  %v2717_v18 = vpop.f32.mrf.mxu0 }
 0x16c   :  { %11679 = vst [vmem:[#allocation64_spill] sm:$0xff] %v7549_v14  ;;  %v7551_v28 = vpop.f32.mrf.mxu3  ;;  %v2731_v44 = vpop.f32.mrf.mxu1  ;;  %v7571_v30 = vadd.f32 %v2717_v18, %v6887_v2  ;;  %v694_v13 = vadd.f32 %v679_v0, %v678_v31  ;;  %v7589_v18 = vsub.f32 %v7235_v1, %v7568_v23  ;;  %v7603_v0 = vmul.f32 %v7544_v34, %v280_v32 }
 0x16d   :  { %11680 = vst [vmem:[#allocation65_spill] sm:$0xff] %v7551_v28  ;;  %v7574_v28 = vadd.f32 %v2731_v44, %v6887_v2  ;;  %v7593_v44 = vsub.f32 %v7238_v3, %v7568_v23 }
 0x16e   :  { %11684 = vst [vmem:[#allocation69_spill] sm:$0xff] %v7571_v30 }
 0x16f   :  { %11685 = vst [vmem:[#allocation70_spill] sm:$0xff] %v7574_v28  ;;  %v2820_v53 = vadd.f32 %v7574_v28, %v7571_v30 }
 0x170   :  { %11688 = vst [vmem:[#allocation73_spill] sm:$0xff] %v7589_v18 }
 0x171   :  { %11689 = vst [vmem:[#allocation74_spill] sm:$0xff] %v7593_v44 }
 0x173   :  { %v2745_v11 = vpop.f32.mrf.mxu2  ;;  %v7561_v50 = vpop.f32.mrf.mxu0 }
 0x174   :  { %11683 = vst [vmem:[#allocation68_spill] sm:$0xff] %v7561_v50  ;;  %v2759_v45 = vpop.f32.mrf.mxu3  ;;  %v7576_v14 = vpop.f32.mrf.mxu1  ;;  %v7580_v50 = vsub.f32 %v7084_v52, %v7547_v19  ;;  %v7583_v24 = vadd.f32 %v2745_v11, %v6887_v2  ;;  %v7600_v11 = vsub.f32 %v7105_v4, %v7547_v19  ;;  %v1042_v4 = vmul.f32 %v7593_v44, %v7593_v44 }
 0x175   :  { %11686 = vst [vmem:[#allocation71_spill] sm:$0xff] %v7576_v14  ;;  %v7608_v30 = vadd.f32 %v2759_v45, %v6887_v2  ;;  %v7635_v44 = vsub.f32 %v6894_v8, %v7603_v0 }
 0x176   :  { %11687 = vst [vmem:[#allocation72_spill] sm:$0xff] %v7580_v50  ;;  %v680_v14 = vmul.f32 %v7580_v50, %v7580_v50  ;;  %v2821_v52 = vadd.f32 %v2820_v53, %v7583_v24  ;;  %v1041_v53 = vmul.f32 %v7589_v18, %v7589_v18 }
 0x177   :  { %11690 = vst [vmem:[#allocation75_spill] sm:$0xff] %v7600_v11 }
 0x178   :  { %v695_v28 = vadd.f32 %v694_v13, %v680_v14  ;;  %11692 = vst [vmem:[#allocation77_spill] sm:$0xff] %v7608_v30  ;;  %v2822_v32 = vadd.f32 %v2821_v52, %v7608_v30  ;;  %v681_v14 = vmul.f32 %v7600_v11, %v7600_v11  ;;  %v7628_v13 = vsub.f32 %v7252_v21, %v7568_v23 }
 0x179   :  { %11696 = vst [vmem:[#allocation81_spill] sm:$0xff] %v7635_v44  ;;  %v1057_v11 = vadd.f32 %v1042_v4, %v1041_v53  ;;  %v7644_v21 = vsub.f32 %v7149_v39, %v7547_v19  ;;  %v315_v39 = vmul.f32 %v7635_v44, %v7635_v44 }
 0x17a   :  { %11695 = vst [vmem:[#allocation80_spill] sm:$0xff] %v7628_v13  ;;  %v696_v18 = vadd.f32 %v695_v28, %v681_v14  ;;  %v1043_v28 = vmul.f32 %v7628_v13, %v7628_v13  ;;  %v7670_v13 = vsub.f32 %v7159_v51, %v7547_v19 }
 0x17b   :  { %v7605_v31 = vpop.f32.mrf.mxu2  ;;  %v2773_v1 = vpop.f32.mrf.mxu0  ;;  %v683_v44 = vmul.f32 %v7644_v21, %v7644_v21 }
 0x17c   :  { %11691 = vst [vmem:[#allocation76_spill] sm:$0xff] %v7605_v31  ;;  %v7610_v3 = vpop.f32.mrf.mxu3  ;;  %v7613_v50 = vadd.f32 %v2773_v1, %v6887_v2  ;;  %v7622_v31 = vsub.f32 %v7113_v16, %v7547_v19  ;;  %v2787_v45 = vpop.f32.mrf.mxu1  ;;  %v24_v1 = vld [vmem:[%s11452_s2 + $0x8] sm:$0xff]  ;;  %v7639_v16 = vsub.f32 %v6897_v9, %v7603_v0  ;;  %v7653_v9 = vsub.f32 %v7273_v41, %v7568_v23 }
 0x17d   :  { %11693 = vst [vmem:[#allocation78_spill] sm:$0xff] %v7610_v3  ;;  %v7647_v3 = vadd.f32 %v2787_v45, %v6887_v2  ;;  %v1376_v30 = vpop.xlane.xlu2 %1375 }
 0x17e   :  { %11694 = vst [vmem:[#allocation79_spill] sm:$0xff] %v7622_v31  ;;  %v2823_v52 = vadd.f32 %v2822_v32, %v7613_v50  ;;  %v682_v8 = vmul.f32 %v7622_v31, %v7622_v31  ;;  %v316_v4 = vmul.f32 %v7639_v16, %v7639_v16  ;;  %v1058_v31 = vadd.f32 %v1057_v11, %v1043_v28 }
 0x17f   :  { %11697 = vst [vmem:[#allocation82_spill] sm:$0xff] %v7639_v16  ;;  %v7666_v41 = vmul.f32 %v1376_v30, %v7544_v34  ;;  %v7676_v16 = vsub.f32 %v6911_v15, %v7603_v0  ;;  %v7684_v30 = vsub.f32 %v7281_v60, %v7568_v23  ;;  %v1044_v51 = vmul.f32 %v7653_v9, %v7653_v9 }
 0x180   :  { %v2824_v32 = vadd.f32 %v2823_v52, %v7647_v3  ;;  %v331_v28 = vadd.f32 %v316_v4, %v315_v39  ;;  %v7691_v15 = vsub.f32 %v6932_v26, %v7603_v0  ;;  %v684_v26 = vmul.f32 %v7670_v13, %v7670_v13 }
 0x181   :  { %v7701_v60 = vsub.f32 %v7354_v35, %v7666_v41  ;;  %v7717_v35 = vsub.f32 %v6940_v33, %v7603_v0 }
 0x182   :  { %48 = vperm.xlu2 %6163, %v24_v1   ;;  %v697_v1 = vadd.f32 %v696_v18, %v682_v8  ;;  %v1059_v8 = vadd.f32 %v1058_v31, %v1044_v51  ;;  %v7711_v31 = vsub.f32 %v7317_v36, %v7568_v23  ;;  %v318_v33 = vmul.f32 %v7691_v15, %v7691_v15 }
 0x183   :  { %v2801_v53 = vpop.f32.mrf.mxu2  ;;  %v7735_v51 = vsub.f32 %v7359_v42, %v7666_v41  ;;  %v319_v42 = vmul.f32 %v7717_v35, %v7717_v35 }
 0x184   :  { %v7663_v14 = vadd.f32 %v2801_v53, %v6887_v2  ;;  %v2815_v45 = vpop.f32.mrf.mxu3  ;;  %v698_v11 = vadd.f32 %v697_v1, %v683_v44  ;;  %v7705_v44 = vsub.f32 %v7164_v57, %v7547_v19  ;;  %v1405_v19 = vmul.f32 %v7701_v60, %v7701_v60 }
 0x185   :  { %v7680_v53 = vadd.f32 %v2815_v45, %v6887_v2  ;;  %v317_v2 = vmul.f32 %v7676_v16, %v7676_v16  ;;  %v7727_v1 = vsub.f32 %v7327_v61, %v7568_v23 }
 0x186   :  { %v2825_v52 = vadd.f32 %v2824_v32, %v7663_v14  ;;  %v7697_v32 = vsub.f32 %v7351_v5, %v7666_v41  ;;  %v1045_v5 = vmul.f32 %v7684_v30, %v7684_v30  ;;  %v699_v39 = vadd.f32 %v698_v11, %v684_v26 }
 0x187   :  { %v332_v45 = vadd.f32 %v331_v28, %v317_v2  ;;  %v685_v36 = vmul.f32 %v7705_v44, %v7705_v44  ;;  %v7739_v2 = vsub.f32 %v7332_v62, %v7568_v23  ;;  %v1047_v61 = vmul.f32 %v7727_v1, %v7727_v1 }
 0x188   :  { %v2826_v18 = vadd.f32 %v2825_v52, %v7680_v53  ;;  %v1060_v4 = vadd.f32 %v1059_v8, %v1045_v5  ;;  %v1404_v57 = vmul.f32 %v7697_v32, %v7697_v32  ;;  %v1046_v52 = vmul.f32 %v7711_v31, %v7711_v31 }
 0x189   :  { %v333_v8 = vadd.f32 %v332_v45, %v318_v33  ;;  %v7745_v26 = vsub.f32 %v6976_v49, %v7603_v0  ;;  %v7751_v5 = vsub.f32 %v7365_v6, %v7666_v41  ;;  %v1048_v45 = vmul.f32 %v7739_v2, %v7739_v2 }
 0x18a   :  { %2827 = vadd.xlane.f32.xlu1 %v2826_v18  ;;  %v700_v18 = vadd.f32 %v699_v39, %v685_v36  ;;  %v1061_v11 = vadd.f32 %v1060_v4, %v1046_v52  ;;  %v1420_v28 = vadd.f32 %v1405_v19, %v1404_v57  ;;  %v1406_v39 = vmul.f32 %v7735_v51, %v7735_v51 }
 0x18b   :  { %v334_v62 = vadd.f32 %v333_v8, %v319_v42  ;;  %v7759_v49 = vsub.f32 %v6986_v56, %v7603_v0  ;;  %v320_v57 = vmul.f32 %v7745_v26, %v7745_v26  ;;  %v7765_v6 = vsub.f32 %v7372_v29, %v7666_v41 }
 0x18c   :  { %v1062_v4 = vadd.f32 %v1061_v11, %v1047_v61  ;;  %v1421_v23 = vadd.f32 %v1420_v28, %v1406_v39  ;;  %v1407_v19 = vmul.f32 %v7751_v5, %v7751_v5  ;;  %v7777_v11 = vsub.f32 %v7381_v46, %v7666_v41 }
 0x18d   :  { %v335_v52 = vadd.f32 %v334_v62, %v320_v57  ;;  %v321_v56 = vmul.f32 %v7759_v49, %v7759_v49  ;;  %v1408_v29 = vmul.f32 %v7765_v6, %v7765_v6  ;;  %v7785_v42 = vsub.f32 %v7391_v55, %v7666_v41 }
 0x18e   :  { %v1063_v36 = vadd.f32 %v1062_v4, %v1048_v45  ;;  %v1422_v33 = vadd.f32 %v1421_v23, %v1407_v19  ;;  %v7791_v46 = vsub.f32 %v7396_v27, %v7666_v41 }
 0x18f   :  { %v336_v8 = vadd.f32 %v335_v52, %v321_v56  ;;  %v1410_v4 = vmul.f32 %v7785_v42, %v7785_v42 }
 0x190   :  { %v1423_v28 = vadd.f32 %v1422_v33, %v1408_v29  ;;  %v1411_v23 = vmul.f32 %v7791_v46, %v7791_v46 }
 0x192   :  { %701 = vadd.xlane.f32.xlu1 %v700_v18  ;;  %v7771_v18 = vsub.f32 %v6991_v59, %v7603_v0  ;;  %v1409_v59 = vmul.f32 %v7777_v11, %v7777_v11 }
 0x194   :  { %v322_v61 = vmul.f32 %v7771_v18, %v7771_v18  ;;  %v1424_v39 = vadd.f32 %v1423_v28, %v1409_v59 }
 0x196   :  { %v337_v0 = vadd.f32 %v336_v8, %v322_v61  ;;  %v1425_v62 = vadd.f32 %v1424_v39, %v1410_v4 }
 0x198   :  { %v1426_v45 = vadd.f32 %v1425_v62, %v1411_v23 }
 0x19a   :  { %1064 = vadd.xlane.f32.xlu1 %v1063_v36 }
 0x19d   :  { %v1739_v55 = vpop.xlane.xlu2 %1738 }
 0x19e   :  { %v1749_v57 = vmul.f32 %v1739_v55, %v7544_v34 }
 0x1a0   :  { %v7799_v19 = vsub.f32 %v7407_v10, %v1749_v57  ;;  %v7802_v36 = vsub.f32 %v7410_v25, %v1749_v57  ;;  %v7809_v52 = vsub.f32 %v7415_v48, %v1749_v57  ;;  %v7812_v56 = vsub.f32 %v7421_v47, %v1749_v57 }
 0x1a1   :  { %v7817_v25 = vsub.f32 %v7428_v37, %v1749_v57  ;;  %v7823_v48 = vsub.f32 %v7433_v12, %v1749_v57  ;;  %v7834_v4 = vsub.f32 %v7439_v54, %v1749_v57 }
 0x1a2   :  { %338 = vadd.xlane.f32.xlu1 %v337_v0  ;;  %11698 = vst [vmem:[#allocation83_spill] sm:$0xff] %v7799_v19  ;;  %v1767_v27 = vmul.f32 %v7799_v19, %v7799_v19  ;;  %v1768_v41 = vmul.f32 %v7802_v36, %v7802_v36  ;;  %v1769_v10 = vmul.f32 %v7809_v52, %v7809_v52 }
 0x1a3   :  { %11699 = vst [vmem:[#allocation84_spill] sm:$0xff] %v7802_v36  ;;  %v1770_v28 = vmul.f32 %v7812_v56, %v7812_v56  ;;  %v1771_v47 = vmul.f32 %v7817_v25, %v7817_v25  ;;  %v1772_v62 = vmul.f32 %v7823_v48, %v7823_v48  ;;  %v1773_v54 = vmul.f32 %v7834_v4, %v7834_v4  ;;  %v11745_v36 = vld [vmem:[#allocation30_spill] sm:$0xff] }
 0x1a4   :  { %11700 = vst [vmem:[#allocation85_spill] sm:$0xff] %v7809_v52  ;;  %v1783_v33 = vadd.f32 %v1768_v41, %v1767_v27 }
 0x1a5   :  { %11701 = vst [vmem:[#allocation86_spill] sm:$0xff] %v7812_v56  ;;  %v11741_v56 = vld [vmem:[#allocation34_spill] sm:$0xff] }
 0x1a6   :  { %v1784_v8 = vadd.f32 %v1783_v33, %v1769_v10  ;;  %11702 = vst [vmem:[#allocation87_spill] sm:$0xff] %v7817_v25  ;;  %v11740_v25 = vld [vmem:[#allocation4_spill] sm:$0xff] }
 0x1a7   :  { %11703 = vst [vmem:[#allocation88_spill] sm:$0xff] %v7823_v48 }
 0x1a8   :  { %v1785_v59 = vadd.f32 %v1784_v8, %v1770_v28  ;;  %11706 = vst [vmem:[#allocation91_spill] sm:$0xff] %v7834_v4 }
 0x1aa   :  { %v1786_v37 = vadd.f32 %v1785_v59, %v1771_v47 }
 0x1ab   :  { %1427 = vadd.xlane.f32.xlu2 %v1426_v45 }
 0x1ac   :  { %v1787_v55 = vadd.f32 %v1786_v37, %v1772_v62  ;;  %v11715_v62 = vld [vmem:[#allocation47_spill] sm:$0xff] }
 0x1ae   :  { %v1788_v41 = vadd.f32 %v1787_v55, %v1773_v54  ;;  %v11718_v54 = vld [vmem:[#allocation57_spill] sm:$0xff] }
 0x1bd   :  { %v2102_v29 = vpop.xlane.xlu1 %2101 }
 0x1be   :  { %v2112_v61 = vmul.f32 %v2102_v29, %v7544_v34 }
 0x1c0   :  { %v7828_v0 = vsub.f32 %v7455_v40, %v2112_v61  ;;  %v7831_v39 = vsub.f32 %v7458_v43, %v2112_v61  ;;  %v7843_v40 = vsub.f32 %v7463_v20, %v2112_v61  ;;  %v7846_v43 = vsub.f32 %v7444_v22, %v1749_v57 }
 0x1c1   :  { %v7851_v33 = vsub.f32 %v7469_v17, %v2112_v61  ;;  %v7854_v10 = vsub.f32 %v7476_v58, %v2112_v61  ;;  %v7866_v8 = vsub.f32 %v7481_v63, %v2112_v61  ;;  %v11712_v17 = vld [vmem:[#allocation52_spill] sm:$0xff]  ;;  %v11713_v58 = vld [vmem:[#allocation55_spill] sm:$0xff] }
 0x1c2   :  { %11704 = vst [vmem:[#allocation89_spill] sm:$0xff] %v7828_v0  ;;  %v2130_v12 = vmul.f32 %v7828_v0, %v7828_v0  ;;  %v2131_v45 = vmul.f32 %v7831_v39, %v7831_v39  ;;  %v2132_v29 = vmul.f32 %v7843_v40, %v7843_v40  ;;  %v1774_v20 = vmul.f32 %v7846_v43, %v7846_v43 }
 0x1c3   :  { %11705 = vst [vmem:[#allocation90_spill] sm:$0xff] %v7831_v39  ;;  %v2133_v63 = vmul.f32 %v7851_v33, %v7851_v33  ;;  %v7888_v55 = vmul.f32 %v7854_v10, %v7854_v10  ;;  %v11728_v39 = vld [vmem:[#allocation2_spill] sm:$0xff] }
 0x1c4   :  { %11707 = vst [vmem:[#allocation92_spill] sm:$0xff] %v7843_v40  ;;  %v2146_v27 = vadd.f32 %v2131_v45, %v2130_v12  ;;  %v7876_v37 = vadd.f32 %v1788_v41, %v1774_v20  ;;  %v7879_v12 = vsub.f32 %v11715_v62, %v2112_v61  ;;  %v11726_v40 = vld [vmem:[#allocation28_spill] sm:$0xff] }
 0x1c5   :  { %11708 = vst [vmem:[#allocation93_spill] sm:$0xff] %v7846_v43  ;;  %v11736_v43 = vld [vmem:[#allocation65_spill] sm:$0xff] }
 0x1c6   :  { %11709 = vst [vmem:[#allocation94_spill] sm:$0xff] %v7851_v33  ;;  %v2147_v28 = vadd.f32 %v2146_v27, %v2132_v29  ;;  %v11720_v29 = vld [vmem:[#allocation26_spill] sm:$0xff] }
 0x1c7   :  { %11710 = vst [vmem:[#allocation95_spill] sm:$0xff] %v7854_v10  ;;  %v11724_v10 = vld [vmem:[#allocation53_spill] sm:$0xff] }
 0x1c8   :  { %11711 = vst [vmem:[#allocation96_spill] sm:$0xff] %v7866_v8 }
 0x1c9   :  { %11716 = vst [vmem:[#allocation55_spill] sm:$0xff] %v7879_v12 }
 0x1dd   :  { %v2465_v23 = vpop.xlane.xlu2 %2464 }
 0x1de   :  { %v7861_v22 = vmul.f32 %v2465_v23, %v7544_v34  ;;  %v11717_v23 = vld [vmem:[#allocation49_spill] sm:$0xff] }
 0x1df   :  { %v7882_v45 = vsub.f32 %v11717_v23, %v2112_v61  ;;  %v11721_v61 = vld [vmem:[#allocation27_spill] sm:$0xff]  ;;  %v7910_v23 = vmul.f32 %v7866_v8, %v7866_v8 }
 0x1e0   :  { %v7916_v33 = vsub.f32 %v11724_v10, %v7861_v22 }
 0x1e2   :  { %11725 = vst [vmem:[#allocation57_spill] sm:$0xff] %v7916_v33 }
 0x1e5   :  { %v7863_v57 = vpop.permute.xlu2 %48 }
 0x1e6   :  { %v7870_v59 = vadd.f32 %v11712_v17, %v7863_v57  ;;  %v7874_v47 = vadd.f32 %v11713_v58, %v7863_v57  ;;  %v7892_v27 = vadd.f32 %v11718_v54, %v7863_v57  ;;  %v7898_v20 = vadd.f32 %v11720_v29, %v7863_v57  ;;  %v11722_v58 = vld [vmem:[#allocation59_spill] sm:$0xff] }
 0x1e7   :  { %v7902_v17 = vadd.f32 %v11721_v61, %v7863_v57  ;;  %v7906_v62 = vadd.f32 %v11722_v58, %v7863_v57  ;;  %v7912_v54 = vadd.f32 %v2147_v28, %v2133_v63  ;;  %v7921_v61 = vadd.f32 %v11726_v40, %v7863_v57  ;;  %v11732_v63 = vld [vmem:[#allocation64_spill] sm:$0xff]  ;;  %v11734_v40 = vld [vmem:[#allocation3_spill] sm:$0xff] }
 0x1e8   :  { %11714 = vst [vmem:[#allocation52_spill] sm:$0xff] %v7874_v47  ;;  %v2466_v41 = vadd.f32 %v7874_v47, %v7870_v59  ;;  %v7927_v0 = vadd.f32 %v11728_v39, %v7863_v57  ;;  %v7931_v28 = vadd.f32 %v7531_v38, %v7863_v57  ;;  %v7935_v10 = vadd.f32 %v7537_v7, %v7863_v57  ;;  %v11738_v38 = vld [vmem:[#allocation29_spill] sm:$0xff]  ;;  %v11759_v47 = vld [vmem:[#allocation18_spill] sm:$0xff] }
 0x1e9   :  { %11719 = vst [vmem:[#allocation47_spill] sm:$0xff] %v7892_v27  ;;  %v1377_v58 = vadd.f32 %v7902_v17, %v7898_v20  ;;  %v7943_v8 = vadd.f32 %v11734_v40, %v7863_v57  ;;  %v7947_v39 = vadd.f32 %v11736_v43, %v7863_v57  ;;  %v7952_v48 = vadd.f32 %v11738_v38, %v7863_v57  ;;  %v11743_v43 = vld [vmem:[#allocation35_spill] sm:$0xff] }
 0x1ea   :  { %11723 = vst [vmem:[#allocation49_spill] sm:$0xff] %v7906_v62  ;;  %v2467_v29 = vadd.f32 %v2466_v41, %v7892_v27  ;;  %v7939_v41 = vadd.f32 %v11732_v63, %v7863_v57  ;;  %v7957_v63 = vadd.f32 %v11740_v25, %v7863_v57  ;;  %v7963_v52 = vadd.f32 %v11741_v56, %v7863_v57  ;;  %v11747_v25 = vld [vmem:[#allocation31_spill] sm:$0xff] }
 0x1eb   :  { %11727 = vst [vmem:[#allocation26_spill] sm:$0xff] %v7921_v61  ;;  %v1378_v7 = vadd.f32 %v1377_v58, %v7921_v61  ;;  %v281_v40 = vadd.f32 %v7943_v8, %v7927_v0  ;;  %v7972_v58 = vadd.f32 %v11745_v36, %v7863_v57  ;;  %v7976_v19 = vadd.f32 %v11747_v25, %v7863_v57  ;;  %v11751_v61 = vld [vmem:[#allocation33_spill] sm:$0xff] }
 0x1ec   :  { %11729 = vst [vmem:[#allocation27_spill] sm:$0xff] %v7927_v0  ;;  %v2468_v4 = vadd.f32 %v2467_v29, %v7906_v62  ;;  %v7967_v29 = vadd.f32 %v11743_v43, %v7863_v57  ;;  %v11749_v0 = vld [vmem:[#allocation32_spill] sm:$0xff]  ;;  %v7985_v43 = vadd.f32 %v11751_v61, %v7863_v57  ;;  %v11757_v61 = vld [vmem:[#allocation6_spill] sm:$0xff] }
 0x1ed   :  { %11730 = vst [vmem:[#allocation59_spill] sm:$0xff] %v7931_v28  ;;  %v7981_v56 = vadd.f32 %v11749_v0, %v7863_v57  ;;  %v282_v36 = vadd.f32 %v281_v40, %v7957_v63  ;;  %v8002_v27 = vadd.f32 %v11757_v61, %v7863_v57  ;;  %v8007_v40 = vadd.f32 %v11759_v47, %v7863_v57  ;;  %v11766_v47 = vld [vmem:[#allocation8_spill] sm:$0xff] }
 0x1ee   :  { %11731 = vst [vmem:[#allocation53_spill] sm:$0xff] %v7935_v10  ;;  %v2469_v38 = vadd.f32 %v2468_v4, %v7931_v28  ;;  %v11753_v4 = vld [vmem:[#allocation5_spill] sm:$0xff]  ;;  %v1740_v0 = vadd.f32 %v7967_v29, %v7963_v52 }
 0x1ef   :  { %11733 = vst [vmem:[#allocation28_spill] sm:$0xff] %v7939_v41  ;;  %v7989_v28 = vadd.f32 %v11753_v4, %v7863_v57 }
 0x1f0   :  { %11735 = vst [vmem:[#allocation2_spill] sm:$0xff] %v7943_v8  ;;  %v1379_v8 = vadd.f32 %v1378_v7, %v7952_v48  ;;  %v2470_v62 = vadd.f32 %v2469_v38, %v7935_v10  ;;  %v11755_v7 = vld [vmem:[#allocation36_spill] sm:$0xff]  ;;  %v11761_v38 = vld [vmem:[#allocation19_spill] sm:$0xff] }
 0x1f1   :  { %11737 = vst [vmem:[#allocation64_spill] sm:$0xff] %v7947_v39  ;;  %v283_v4 = vadd.f32 %v282_v36, %v7989_v28  ;;  %v11765_v36 = vld [vmem:[#allocation7_spill] sm:$0xff] }
 0x1f2   :  { %11739 = vst [vmem:[#allocation3_spill] sm:$0xff] %v7952_v48  ;;  %v1380_v25 = vadd.f32 %v1379_v8, %v7972_v58  ;;  %v7996_v48 = vadd.f32 %v11755_v7, %v7863_v57  ;;  %v8011_v8 = vadd.f32 %v11761_v38, %v7863_v57  ;;  %v2471_v7 = vadd.f32 %v2470_v62, %v7939_v41  ;;  %v11768_v62 = vld [vmem:[#allocation38_spill] sm:$0xff] }
 0x1f3   :  { %11742 = vst [vmem:[#allocation65_spill] sm:$0xff] %v7963_v52  ;;  %v284_v38 = vadd.f32 %v283_v4, %v8002_v27  ;;  %v8031_v41 = vadd.f32 %v11768_v62, %v7863_v57  ;;  %v11772_v4 = vld [vmem:[#allocation10_spill] sm:$0xff]  ;;  %v11774_v62 = vld [vmem:[#allocation11_spill] sm:$0xff] }
 0x1f4   :  { %11744 = vst [vmem:[#allocation29_spill] sm:$0xff] %v7967_v29  ;;  %v1381_v10 = vadd.f32 %v1380_v25, %v7976_v19  ;;  %v11763_v29 = vld [vmem:[#allocation37_spill] sm:$0xff]  ;;  %v1741_v61 = vadd.f32 %v1740_v0, %v7996_v48  ;;  %v2472_v25 = vadd.f32 %v2471_v7, %v7947_v39  ;;  %v8049_v7 = vadd.f32 %v11774_v62, %v7863_v57 }
 0x1f5   :  { %11746 = vst [vmem:[#allocation4_spill] sm:$0xff] %v7972_v58  ;;  %v8017_v52 = vadd.f32 %v11763_v29, %v7863_v57  ;;  %v8022_v58 = vadd.f32 %v11765_v36, %v7863_v57 }
 0x1f6   :  { %11748 = vst [vmem:[#allocation34_spill] sm:$0xff] %v7976_v19  ;;  %v1382_v29 = vadd.f32 %v1381_v10, %v7981_v56  ;;  %2473 = vadd.xlane.f32.xlu2 %v2472_v25  ;;  %v11782_v25 = vld [vmem:[#allocation21_spill] sm:$0xff] }
 0x1f7   :  { %11750 = vst [vmem:[#allocation35_spill] sm:$0xff] %v7981_v56  ;;  %v1742_v0 = vadd.f32 %v1741_v61, %v8017_v52  ;;  %v285_v19 = vadd.f32 %v284_v38, %v8022_v58  ;;  %v11776_v61 = vld [vmem:[#allocation39_spill] sm:$0xff] }
 0x1f8   :  { %11752 = vst [vmem:[#allocation30_spill] sm:$0xff] %v7985_v43  ;;  %v1383_v10 = vadd.f32 %v1382_v29, %v7985_v43 }
 0x1f9   :  { %11754 = vst [vmem:[#allocation31_spill] sm:$0xff] %v7989_v28  ;;  %v8026_v28 = vadd.f32 %v11766_v47, %v7863_v57  ;;  %v1014_v47 = vadd.f32 %v8011_v8, %v8007_v40  ;;  %v1743_v38 = vadd.f32 %v1742_v0, %v8031_v41 }
 0x1fa   :  { %11756 = vst [vmem:[#allocation32_spill] sm:$0xff] %v7996_v48  ;;  %v11770_v48 = vld [vmem:[#allocation20_spill] sm:$0xff]  ;;  %1384 = vadd.xlane.f32.xlu0 %v1383_v10  ;;  %v2493_v10 = vmul.f32 %v7916_v33, %v7916_v33 }
 0x1fb   :  { %11758 = vst [vmem:[#allocation33_spill] sm:$0xff] %v8002_v27  ;;  %v8038_v36 = vadd.f32 %v11770_v48, %v7863_v57  ;;  %v8045_v27 = vadd.f32 %v11772_v4, %v7863_v57  ;;  %v8054_v48 = vadd.f32 %v11776_v61, %v7863_v57  ;;  %v11780_v4 = vld [vmem:[#allocation9_spill] sm:$0xff]  ;;  %v286_v62 = vadd.f32 %v285_v19, %v8026_v28  ;;  %v11784_v61 = vld [vmem:[#allocation40_spill] sm:$0xff] }
 0x1fc   :  { %11760 = vst [vmem:[#allocation5_spill] sm:$0xff] %v8007_v40  ;;  %v8068_v40 = vadd.f32 %v11782_v25, %v7863_v57  ;;  %v8073_v0 = vadd.f32 %v11784_v61, %v7863_v57  ;;  %v11788_v25 = vld [vmem:[#allocation22_spill] sm:$0xff]  ;;  %v11790_v61 = vld [vmem:[#allocation13_spill] sm:$0xff]  ;;  %v11796_v33 = vld [vmem:[#allocation56_spill] sm:$0xff] }
 0x1fd   :  { %11762 = vst [vmem:[#allocation36_spill] sm:$0xff] %v8011_v8  ;;  %v8063_v8 = vadd.f32 %v11780_v4, %v7863_v57  ;;  %v1015_v29 = vadd.f32 %v1014_v47, %v8038_v36  ;;  %v651_v19 = vadd.f32 %v8049_v7, %v8045_v27  ;;  %v8085_v56 = vadd.f32 %v11788_v25, %v7863_v57  ;;  %v11792_v25 = vld [vmem:[#allocation41_spill] sm:$0xff] }
 0x1fe   :  { %11764 = vst [vmem:[#allocation6_spill] sm:$0xff] %v8017_v52  ;;  %v11778_v52 = vld [vmem:[#allocation54_spill] sm:$0xff] }
 0x1ff   :  { %11767 = vst [vmem:[#allocation18_spill] sm:$0xff] %v8026_v28  ;;  %v8059_v39 = vsub.f32 %v11778_v52, %v7861_v22  ;;  %v1744_v52 = vadd.f32 %v1743_v38, %v8054_v48  ;;  %v287_v4 = vadd.f32 %v286_v62, %v8063_v8  ;;  %v1016_v47 = vadd.f32 %v1015_v29, %v8068_v40  ;;  %v11794_v29 = vld [vmem:[#allocation23_spill] sm:$0xff] }
 0x200   :  { %11769 = vst [vmem:[#allocation19_spill] sm:$0xff] %v8031_v41  ;;  %v11786_v41 = vld [vmem:[#allocation12_spill] sm:$0xff] }
 0x201   :  { %11771 = vst [vmem:[#allocation37_spill] sm:$0xff] %v8038_v36  ;;  %v8078_v43 = vadd.f32 %v11786_v41, %v7863_v57  ;;  %v1745_v38 = vadd.f32 %v1744_v52, %v8073_v0  ;;  %v8093_v41 = vadd.f32 %v11790_v61, %v7863_v57  ;;  %v2494_v62 = vmul.f32 %v8059_v39, %v8059_v39 }
 0x202   :  { %11773 = vst [vmem:[#allocation7_spill] sm:$0xff] %v8045_v27  ;;  %288 = vadd.xlane.f32.xlu1 %v287_v4  ;;  %v8104_v27 = vadd.f32 %v11794_v29, %v7863_v57  ;;  %v1017_v52 = vadd.f32 %v1016_v47, %v8085_v56  ;;  %v8109_v61 = vsub.f32 %v11796_v33, %v7861_v22  ;;  %v11804_v47 = vld [vmem:[#allocation24_spill] sm:$0xff] }
 0x203   :  { %11775 = vst [vmem:[#allocation8_spill] sm:$0xff] %v8049_v7  ;;  %v8100_v7 = vadd.f32 %v11792_v25, %v7863_v57  ;;  %v2509_v36 = vadd.f32 %v2494_v62, %v2493_v10 }
 0x204   :  { %11777 = vst [vmem:[#allocation38_spill] sm:$0xff] %v8054_v48  ;;  %v652_v48 = vadd.f32 %v651_v19, %v8078_v43  ;;  %v11798_v19 = vld [vmem:[#allocation14_spill] sm:$0xff]  ;;  %v1018_v33 = vadd.f32 %v1017_v52, %v8104_v27  ;;  %v11807_v52 = vld [vmem:[#allocation15_spill] sm:$0xff] }
 0x205   :  { %11779 = vst [vmem:[#allocation20_spill] sm:$0xff] %v8059_v39  ;;  %v11800_v39 = vld [vmem:[#allocation42_spill] sm:$0xff] }
 0x206   :  { %11781 = vst [vmem:[#allocation10_spill] sm:$0xff] %v8063_v8  ;;  %v653_v4 = vadd.f32 %v652_v48, %v8093_v41  ;;  %v8118_v25 = vadd.f32 %v11800_v39, %v7863_v57  ;;  %v2149_v48 = vadd.f32 %v7912_v54, %v7888_v55  ;;  %v11805_v8 = vld [vmem:[#allocation25_spill] sm:$0xff] }
 0x207   :  { %11783 = vst [vmem:[#allocation11_spill] sm:$0xff] %v8068_v40  ;;  %v2828_v40 = vpop.xlane.xlu1 %2827  ;;  %v8138_v28 = vadd.f32 %v11805_v8, %v7863_v57  ;;  %v11811_v54 = vld [vmem:[#allocation69_spill] sm:$0xff]  ;;  %v2495_v8 = vmul.f32 %v8109_v61, %v8109_v61 }
 0x208   :  { %11785 = vst [vmem:[#allocation39_spill] sm:$0xff] %v8073_v0  ;;  %v11802_v0 = vld [vmem:[#allocation43_spill] sm:$0xff]  ;;  %v2838_v39 = vmul.f32 %v2828_v40, %v7544_v34 }
 0x209   :  { %11787 = vst [vmem:[#allocation54_spill] sm:$0xff] %v8078_v43  ;;  %v8113_v43 = vadd.f32 %v11798_v19, %v7863_v57  ;;  %v8122_v29 = vadd.f32 %v11802_v0, %v7863_v57  ;;  %v2136_v19 = vmul.f32 %v7879_v12, %v7879_v12  ;;  %v11809_v12 = vld [vmem:[#allocation58_spill] sm:$0xff] }
 0x20a   :  { %11789 = vst [vmem:[#allocation9_spill] sm:$0xff] %v8085_v56  ;;  %v8126_v56 = vadd.f32 %v11804_v47, %v7863_v57  ;;  %v8147_v55 = vsub.f32 %v11809_v12, %v7861_v22  ;;  %v8150_v40 = vsub.f32 %v11811_v54, %v2838_v39  ;;  %v2150_v12 = vadd.f32 %v2149_v48, %v7910_v23  ;;  %v11816_v54 = vld [vmem:[#allocation60_spill] sm:$0xff]  ;;  %v11821_v23 = vld [vmem:[#allocation77_spill] sm:$0xff] }
 0x20b   :  { %11791 = vst [vmem:[#allocation21_spill] sm:$0xff] %v8093_v41  ;;  %v1746_v41 = vadd.f32 %v1745_v38, %v8100_v7  ;;  %v654_v0 = vadd.f32 %v653_v4, %v8113_v43  ;;  %v11813_v38 = vld [vmem:[#allocation70_spill] sm:$0xff]  ;;  %v2103_v62 = vadd.f32 %v8122_v29, %v8118_v25 }
 0x20c   :  { %11793 = vst [vmem:[#allocation40_spill] sm:$0xff] %v8100_v7  ;;  %v1019_v47 = vadd.f32 %v1018_v33, %v8126_v56  ;;  %v8153_v10 = vsub.f32 %v11813_v38, %v2838_v39  ;;  %v8169_v38 = vsub.f32 %v11816_v54, %v7861_v22 }
 0x20d   :  { %11795 = vst [vmem:[#allocation12_spill] sm:$0xff] %v8104_v27  ;;  %v8143_v27 = vadd.f32 %v11807_v52, %v7863_v57  ;;  %1747 = vadd.xlane.f32.xlu0 %v1746_v41  ;;  %v8163_v41 = vsub.f32 %v7583_v24, %v2838_v39  ;;  %v2856_v52 = vmul.f32 %v8150_v40, %v8150_v40 }
 0x20e   :  { %11797 = vst [vmem:[#allocation22_spill] sm:$0xff] %v8109_v61  ;;  %v1020_v4 = vadd.f32 %v1019_v47, %v8138_v28  ;;  %v2510_v61 = vadd.f32 %v2509_v36, %v2495_v8  ;;  %v8180_v24 = vsub.f32 %v11821_v23, %v2838_v39  ;;  %v2857_v48 = vmul.f32 %v8153_v10, %v8153_v10  ;;  %v11824_v8 = vld [vmem:[#allocation68_spill] sm:$0xff] }
 0x20f   :  { %11799 = vst [vmem:[#allocation13_spill] sm:$0xff] %v8113_v43  ;;  %v655_v33 = vadd.f32 %v654_v0, %v8143_v27  ;;  %v11818_v43 = vld [vmem:[#allocation44_spill] sm:$0xff]  ;;  %v2496_v36 = vmul.f32 %v8147_v55, %v8147_v55 }
 0x210   :  { %11801 = vst [vmem:[#allocation41_spill] sm:$0xff] %v8118_v25  ;;  %1021 = vadd.xlane.f32.xlu1 %v1020_v4  ;;  %v11820_v0 = vld [vmem:[#allocation16_spill] sm:$0xff]  ;;  %v11822_v25 = vld [vmem:[#allocation61_spill] sm:$0xff]  ;;  %v8193_v4 = vadd.f32 %v11824_v8, %v7863_v57 }
 0x211   :  { %11803 = vst [vmem:[#allocation23_spill] sm:$0xff] %v8122_v29  ;;  %v8173_v29 = vadd.f32 %v11818_v43, %v7863_v57  ;;  %v8177_v47 = vadd.f32 %v11820_v0, %v7863_v57  ;;  %v8186_v54 = vsub.f32 %v11822_v25, %v7861_v22  ;;  %v11826_v0 = vld [vmem:[#allocation71_spill] sm:$0xff]  ;;  %v2858_v25 = vmul.f32 %v8163_v41, %v8163_v41 }
 0x212   :  { %11806 = vst [vmem:[#allocation56_spill] sm:$0xff] %v8138_v28  ;;  %v8197_v23 = vadd.f32 %v11826_v0, %v7863_v57  ;;  %v2497_v0 = vmul.f32 %v8169_v38, %v8169_v38  ;;  %v2511_v7 = vadd.f32 %v2510_v61, %v2496_v36  ;;  %v8213_v28 = vsub.f32 %v7647_v3, %v2838_v39  ;;  %v11833_v61 = vld [vmem:[#allocation76_spill] sm:$0xff] }
 0x213   :  { %11808 = vst [vmem:[#allocation14_spill] sm:$0xff] %v8143_v27  ;;  %v2104_v43 = vadd.f32 %v2103_v62, %v8173_v29  ;;  %v8201_v27 = vsub.f32 %v7613_v50, %v2838_v39  ;;  %v2859_v50 = vmul.f32 %v8180_v24, %v8180_v24 }
 0x214   :  { %11810 = vst [vmem:[#allocation42_spill] sm:$0xff] %v8147_v55  ;;  %v2872_v55 = vadd.f32 %v2857_v48, %v2856_v52  ;;  %v8229_v48 = vadd.f32 %v11833_v61, %v7863_v57  ;;  %v2829_v3 = vadd.f32 %v8197_v23, %v8193_v4  ;;  %v8240_v61 = vsub.f32 %v7680_v53, %v2838_v39  ;;  %v11839_v53 = vld [vmem:[#allocation78_spill] sm:$0xff] }
 0x215   :  { %11812 = vst [vmem:[#allocation43_spill] sm:$0xff] %v8150_v40  ;;  %v702_v40 = vpop.xlane.xlu1 %701  ;;  %1790 = vadd.xlane.f32.xlu0 %v7876_v37  ;;  %v2151_v37 = vadd.f32 %v2150_v12, %v2136_v19  ;;  %v11837_v19 = vld [vmem:[#allocation62_spill] sm:$0xff]  ;;  %v2498_v12 = vmul.f32 %v8186_v54, %v8186_v54 }
 0x216   :  { %11814 = vst [vmem:[#allocation24_spill] sm:$0xff] %v8153_v10  ;;  %v656_v10 = vadd.f32 %v655_v33, %v8177_v47  ;;  %v712_v62 = vmul.f32 %v702_v40, %v7544_v34  ;;  %v2873_v33 = vadd.f32 %v2872_v55, %v2858_v25 }
 0x217   :  { %11815 = vst [vmem:[#allocation25_spill] sm:$0xff] %v8163_v41  ;;  %v11830_v41 = vld [vmem:[#allocation45_spill] sm:$0xff] }
 0x218   :  { %11817 = vst [vmem:[#allocation15_spill] sm:$0xff] %v8169_v38  ;;  %v8219_v52 = vadd.f32 %v11830_v41, %v7863_v57  ;;  %v8221_v40 = vadd.f32 1e-05, %v712_v62  ;;  %v2860_v41 = vmul.f32 %v8201_v27, %v8201_v27  ;;  %v2874_v36 = vadd.f32 %v2873_v33, %v2859_v50 }
 0x219   :  { %11819 = vst [vmem:[#allocation58_spill] sm:$0xff] %v8173_v29  ;;  %v11828_v29 = vld [vmem:[#allocation17_spill] sm:$0xff]  ;;  %v2830_v62 = vadd.f32 %v2829_v3, %v8229_v48 }
 0x21a   :  { %11823 = vst [vmem:[#allocation69_spill] sm:$0xff] %v8186_v54  ;;  %v8208_v8 = vadd.f32 %v11828_v29, %v7863_v57  ;;  %v8225_v29 = vsub.f32 %v7663_v14, %v2838_v39  ;;  %v2105_v25 = vadd.f32 %v2104_v43, %v8219_v52  ;;  %6167 = vrsqrt.f32 %v8221_v40 }
 0x21b   :  { %11825 = vst [vmem:[#allocation70_spill] sm:$0xff] %v8193_v4  ;;  %v2512_v14 = vadd.f32 %v2511_v7, %v2497_v0  ;;  %v11835_v4 = vld [vmem:[#allocation46_spill] sm:$0xff]  ;;  %v2137_v43 = vmul.f32 %v7882_v45, %v7882_v45  ;;  %v8252_v7 = vsub.f32 %v11837_v19, %v7861_v22  ;;  %v8258_v39 = vadd.f32 %v11839_v53, %v7863_v57  ;;  %v2775_v19 = vpop.f32.mrf.mxu0  ;;  %v11841_v53 = vld [vmem:[#allocation48_spill] sm:$0xff] }
 0x21c   :  { %11827 = vst [vmem:[#allocation60_spill] sm:$0xff] %v8197_v23  ;;  %v657_v55 = vadd.f32 %v656_v10, %v8208_v8  ;;  %v2861_v23 = vmul.f32 %v8213_v28, %v8213_v28  ;;  %v2875_v10 = vadd.f32 %v2874_v36, %v2860_v41  ;;  %v2862_v50 = vmul.f32 %v8225_v29, %v8225_v29 }
 0x21d   :  { %11829 = vst [vmem:[#allocation44_spill] sm:$0xff] %v8208_v8  ;;  %v8246_v8 = vadd.f32 %v11835_v4, %v7863_v57  ;;  %v1065_v0 = vpop.xlane.xlu1 %1064  ;;  %v2513_v41 = vadd.f32 %v2512_v14, %v2498_v12  ;;  %v2831_v36 = vadd.f32 %v2830_v62, %v8258_v39  ;;  %v8269_v54 = vadd.f32 %v11841_v53, %v7863_v57 }
 0x21e   :  { %11831 = vst [vmem:[#allocation16_spill] sm:$0xff] %v8219_v52  ;;  %658 = vadd.xlane.f32.xlu1 %v657_v55  ;;  %v2876_v4 = vadd.f32 %v2875_v10, %v2861_v23  ;;  %v1075_v3 = vmul.f32 %v1065_v0, %v7544_v34  ;;  %v2152_v55 = vadd.f32 %v2151_v37, %v2137_v43  ;;  %v11843_v23 = vld [vmem:[#allocation63_spill] sm:$0xff]  ;;  %v2789_v0 = vpop.f32.mrf.mxu1  ;;  %vm722_vm5 = vweird.f32 %v8221_v40 }
 0x21f   :  { %11832 = vst [vmem:[#allocation77_spill] sm:$0xff] %v8225_v29  ;;  %v2106_v33 = vadd.f32 %v2105_v25, %v8246_v8  ;;  %v8275_v25 = vsub.f32 %v11843_v23, %v7861_v22  ;;  %v2499_v37 = vmul.f32 %v8252_v7, %v8252_v7  ;;  %v8280_v14 = vadd.f32 %v2775_v19, %v7863_v57  ;;  %v11846_v22 = vld [vmem:[#allocation50_spill] sm:$0xff]  ;;  %v2803_v19 = vpop.f32.mrf.mxu2  ;;  %v11849_v23 = vld [vmem:[#allocation51_spill] sm:$0xff] }
 0x220   :  { %11834 = vst [vmem:[#allocation61_spill] sm:$0xff] %v8229_v48  ;;  %v2863_v48 = vmul.f32 %v8240_v61, %v8240_v61  ;;  %v2877_v52 = vadd.f32 %v2876_v4, %v2862_v50  ;;  %v6168_v38 = vpop.eup %6167  ;;  %v8271_v29 = vadd.f32 1e-05, %v1075_v3  ;;  %2153 = vadd.xlane.f32.xlu0 %v2152_v55  ;;  %v8288_v4 = vadd.f32 %v11846_v22, %v7863_v57 }
 0x221   :  { %11836 = vst [vmem:[#allocation68_spill] sm:$0xff] %v8246_v8  ;;  %v2107_v10 = vadd.f32 %v2106_v33, %v8269_v54  ;;  %v2514_v43 = vadd.f32 %v2513_v41, %v2499_v37  ;;  %v2832_v12 = vadd.f32 %v2831_v36, %v8280_v14  ;;  %v717_v50 = vmul.f32 %v6168_v38, %v8221_v40  ;;  %v11856_v40 = vld [vmem:[#allocation75_spill] sm:$0xff]  ;;  %v11860_v8 = vld [vmem:[#allocation80_spill] sm:$0xff] }
 0x222   :  { %11838 = vst [vmem:[#allocation71_spill] sm:$0xff] %v8252_v7  ;;  %v2878_v62 = vadd.f32 %v2877_v52, %v2863_v48  ;;  %6169 = vrsqrt.f32 %v8271_v29  ;;  %v2500_v3 = vmul.f32 %v8275_v25, %v8275_v25  ;;  %v8293_v52 = vadd.f32 %v2789_v0, %v7863_v57 }
 0x223   :  { %11840 = vst [vmem:[#allocation17_spill] sm:$0xff] %v8258_v39  ;;  %v2108_v33 = vadd.f32 %v2107_v10, %v8288_v4  ;;  %v718_v53 = vmul.f32 %v6168_v38, %v717_v50  ;;  %v8300_v37 = vadd.f32 %v11849_v23, %v7863_v57  ;;  %v8303_v0 = vadd.f32 %v2803_v19, %v7863_v57  ;;  %v1428_v23 = vpop.xlane.xlu2 %1427 }
 0x224   :  { %11842 = vst [vmem:[#allocation45_spill] sm:$0xff] %v8269_v54  ;;  %v2515_v41 = vadd.f32 %v2514_v43, %v2500_v3  ;;  %v2833_v36 = vadd.f32 %v2832_v12, %v8293_v52  ;;  %v2817_v12 = vpop.f32.mrf.mxu3  ;;  %vm723_vm4 = vweird.f32 %v6168_v38  ;;  %vm1085_vm8 = vweird.f32 %v8271_v29  ;;  %v11859_v54 = vld [vmem:[#allocation74_spill] sm:$0xff] }
 0x225   :  { %11844 = vst [vmem:[#allocation76_spill] sm:$0xff] %v8275_v25  ;;  %v339_v48 = vpop.xlane.xlu1 %338  ;;  %v2109_v10 = vadd.f32 %v2108_v33, %v8300_v37  ;;  %v719_v3 = vmul.f32 0.5, %v718_v53  ;;  %v8309_v50 = vadd.f32 %v2817_v12, %v7863_v57  ;;  %vm724_vm6 = vmor %vm722_vm5, %vm723_vm4  ;;  %vm3006_vm4 = vcmask 1042432  }
 0x226   :  { %11845 = vst [vmem:[#allocation46_spill] sm:$0xff] %v8280_v14  ;;  %2879 = vadd.xlane.f32.xlu1 %v2878_v62  ;;  %v349_v55 = vmul.f32 %v339_v48, %v7544_v34  ;;  %v2834_v43 = vadd.f32 %v2833_v36, %v8303_v0 }
 0x227   :  { %11847 = vst [vmem:[#allocation62_spill] sm:$0xff] %v8288_v4  ;;  %v11858_v4 = vld [vmem:[#allocation73_spill] sm:$0xff] }
 0x228   :  { %11848 = vst [vmem:[#allocation78_spill] sm:$0xff] %v8293_v52  ;;  %v6170_v62 = vpop.eup %6169  ;;  %v351_v22 = vadd.f32 1e-05, %v349_v55  ;;  %2516 = vadd.xlane.f32.xlu0 %v2515_v41  ;;  %v2835_v55 = vadd.f32 %v2834_v43, %v8309_v50  ;;  %v720_v41 = vsub.f32 1.5, %v719_v3  ;;  %v1438_v52 = vmul.f32 %v1428_v23, %v7544_v34  ;;  %v11853_v3 = vld [vmem:[#allocation66_spill] sm:$0xff] }
 0x229   :  { %11850 = vst [vmem:[#allocation48_spill] sm:$0xff] %v8300_v37  ;;  %v1080_v14 = vmul.f32 %v6170_v62, %v8271_v29  ;;  %vm1086_vm7 = vweird.f32 %v6170_v62 }
 0x22a   :  { %11851 = vst [vmem:[#allocation63_spill] sm:$0xff] %v8303_v0  ;;  %6171 = vrsqrt.f32 %v351_v22  ;;  %v8313_v37 = vadd.f32 1e-05, %v1438_v52  ;;  %v721_v36 = vmul.f32 %v6168_v38, %v720_v41  ;;  %v11854_v52 = vld [vmem:[#allocation67_spill] sm:$0xff]  ;;  %vm1087_vm9 = vmor %vm1085_vm8, %vm1086_vm7  ;;  %vm359_vm11 = vweird.f32 %v351_v22 }
 0x22b   :  { %11852 = vst [vmem:[#allocation50_spill] sm:$0xff] %v8309_v50  ;;  %v1081_v48 = vmul.f32 %v6170_v62, %v1080_v14 }
 0x22c   :  { %6173 = vrsqrt.f32 %v8313_v37  ;;  %v725_v14 = vsel %vm724_vm6, %v6168_v38, %v721_v36  ;;  %v11857_v36 = vld [vmem:[#allocation79_spill] sm:$0xff]  ;;  %vm1448_vm13 = vweird.f32 %v8313_v37 }
 0x22d   :  { %v1082_v39 = vmul.f32 0.5, %v1081_v48  ;;  %v8320_v48 = vmul.f32 %v725_v14, %v11853_v3  ;;  %v8323_v23 = vmul.f32 %v725_v14, %v11854_v52  ;;  %v742_v3 = vmul.f32 %v725_v14, %v7670_v13 }
 0x22e   :  { %2110 = vadd.xlane.f32.xlu1 %v2109_v10  ;;  %v743_v52 = vmul.f32 %v725_v14, %v7705_v44 }
 0x22f   :  { %v1083_v57 = vsub.f32 1.5, %v1082_v39  ;;  %v8330_v39 = vmul.f32 %v725_v14, %v11856_v40  ;;  %v752_v40 = vmax.f32 %v8320_v48, 0.0 }
 0x230   :  { %v6172_v19 = vpop.eup %6171  ;;  %2836 = vadd.xlane.f32.xlu0 %v2835_v55  ;;  %v11855_v55 = vld [vmem:[#allocation72_spill] sm:$0xff] }
 0x231   :  { %v354_v33 = vmul.f32 %v6172_v19, %v351_v22  ;;  %v1084_v43 = vmul.f32 %v6170_v62, %v1083_v57  ;;  %v8327_v41 = vmul.f32 %v725_v14, %v11855_v55  ;;  %v741_v57 = vmul.f32 %v725_v14, %v7644_v21 }
 0x232   :  { %v8317_v12 = vpop.eup %6173  ;;  %vm360_vm10 = vweird.f32 %v6172_v19 }
 0x233   :  { %v355_v53 = vmul.f32 %v6172_v19, %v354_v33  ;;  %v1443_v33 = vmul.f32 %v8317_v12, %v8313_v37  ;;  %v1088_v29 = vsel %vm1087_vm9, %v6170_v62, %v1084_v43  ;;  %v754_v0 = vmax.f32 %v8327_v41, 0.0  ;;  %vm361_vm12 = vmor %vm359_vm11, %vm360_vm10 }
 0x234   :  { %v1099_v13 = vmul.f32 %v1088_v29, %v11858_v4  ;;  %v758_v62 = vmax.f32 %v742_v3, 0.0  ;;  %v759_v43 = vmax.f32 %v743_v52, 0.0  ;;  %v1101_v48 = vmul.f32 %v1088_v29, %v11860_v8 }
 0x235   :  { %v356_v10 = vmul.f32 0.5, %v355_v53  ;;  %v740_v53 = vmul.f32 %v725_v14, %v11857_v36  ;;  %v1444_v55 = vmul.f32 %v8317_v12, %v1443_v33  ;;  %v755_v36 = vmax.f32 %v8330_v39, 0.0 }
 0x236   :  { %v757_v14 = vmax.f32 %v741_v57, 0.0  ;;  %v1100_v33 = vmul.f32 %v1088_v29, %v11859_v54  ;;  %v1103_v22 = vmul.f32 %v1088_v29, %v7684_v30  ;;  %v1104_v41 = vmul.f32 %v1088_v29, %v7711_v31  ;;  %v11861_v57 = vld [vmem:[#allocation81_spill] sm:$0xff]  ;;  %v11862_v54 = vld [vmem:[#allocation82_spill] sm:$0xff] }
 0x237   :  { %v357_v38 = vsub.f32 1.5, %v356_v10  ;;  %v753_v10 = vmax.f32 %v8323_v23, 0.0  ;;  %v756_v21 = vmax.f32 %v740_v53, 0.0  ;;  %v1445_v44 = vmul.f32 0.5, %v1444_v55 }
 0x238   :  { %v1102_v23 = vmul.f32 %v1088_v29, %v7653_v9  ;;  %v1105_v4 = vmul.f32 %v1088_v29, %v7727_v1  ;;  %v1106_v39 = vmul.f32 %v1088_v29, %v7739_v2  ;;  %v1115_v53 = vmax.f32 %v1099_v13, 0.0 }
 0x239   :  { %v358_v50 = vmul.f32 %v6172_v19, %v357_v38  ;;  %vm1449_vm14 = vweird.f32 %v8317_v12  ;;  %v1116_v29 = vmax.f32 %v1100_v33, 0.0  ;;  %v1117_v55 = vmax.f32 %v1101_v48, 0.0 }
 0x23a   :  { %v1118_v13 = vmax.f32 %v1102_v23, 0.0  ;;  %v1122_v25 = vmax.f32 %v1106_v39, 0.0  ;;  %vm1450_vm15 = vmor %vm1448_vm13, %vm1449_vm14  ;;  %v768_v23 = vmax.f32 %v752_v40, %v754_v0 }
 0x23b   :  { %v362_v38 = vsel %vm361_vm12, %v6172_v19, %v358_v50  ;;  %v1446_v50 = vsub.f32 1.5, %v1445_v44  ;;  %v1119_v44 = vmax.f32 %v1103_v22, 0.0  ;;  %v769_v22 = vmax.f32 %v753_v10, %v755_v36 }
 0x23c   :  { %v373_v3 = vmul.f32 %v362_v38, %v11861_v57  ;;  %v374_v8 = vmul.f32 %v362_v38, %v11862_v54  ;;  %v375_v9 = vmul.f32 %v362_v38, %v7676_v16  ;;  %v376_v19 = vmul.f32 %v362_v38, %v7691_v15 }
 0x23d   :  { %v377_v30 = vmul.f32 %v362_v38, %v7717_v35  ;;  %v378_v31 = vmul.f32 %v362_v38, %v7745_v26  ;;  %v379_v1 = vmul.f32 %v362_v38, %v7759_v49  ;;  %v380_v2 = vmul.f32 %v362_v38, %v7771_v18 }
 0x23e   :  { %v1447_v52 = vmul.f32 %v8317_v12, %v1446_v50  ;;  %v1120_v57 = vmax.f32 %v1104_v41, 0.0  ;;  %v1121_v54 = vmax.f32 %v1105_v4, 0.0  ;;  %v389_v16 = vmax.f32 %v373_v3, 0.0 }
 0x23f   :  { %v390_v15 = vmax.f32 %v374_v8, 0.0  ;;  %v391_v35 = vmax.f32 %v375_v9, 0.0  ;;  %v392_v26 = vmax.f32 %v376_v19, 0.0  ;;  %v393_v18 = vmax.f32 %v377_v30, 0.0 }
 0x240   :  { %v1451_v49 = vsel %vm1450_vm15, %v8317_v12, %v1447_v52  ;;  %v394_v38 = vmax.f32 %v378_v31, 0.0  ;;  %v395_v33 = vmax.f32 %v379_v1, 0.0  ;;  %v396_v48 = vmax.f32 %v380_v2, 0.0 }
 0x241   :  { %v772_v41 = vmax.f32 %v756_v21, %v758_v62  ;;  %v773_v4 = vmax.f32 %v757_v14, %v759_v43  ;;  %v1131_v39 = vmax.f32 %v1115_v53, %v1117_v55  ;;  %v1132_v3 = vmax.f32 %v1116_v29, %v1118_v13 }
 0x242   :  { %v1462_v50 = vmul.f32 %v1451_v49, %v7697_v32  ;;  %v1464_v37 = vmul.f32 %v1451_v49, %v7735_v51  ;;  %v1135_v7 = vmax.f32 %v1119_v44, %v1121_v54  ;;  %v1136_v8 = vmax.f32 %v1120_v57, %v1122_v25 }
 0x243   :  { %v1463_v9 = vmul.f32 %v1451_v49, %v7701_v60  ;;  %v1465_v12 = vmul.f32 %v1451_v49, %v7751_v5  ;;  %v405_v19 = vmax.f32 %v389_v16, %v391_v35  ;;  %v406_v30 = vmax.f32 %v390_v15, %v392_v26 }
 0x244   :  { %v409_v31 = vmax.f32 %v393_v18, %v395_v33  ;;  %v410_v1 = vmax.f32 %v394_v38, %v396_v48  ;;  %v8371_v0 = vmax.f32 %v768_v23, %v772_v41  ;;  %v8373_v40 = vmax.f32 %v769_v22, %v773_v4 }
 0x245   :  { %v1466_v10 = vmul.f32 %v1451_v49, %v7765_v6  ;;  %v8377_v32 = vmul.f32 %v1451_v49, %v7777_v11  ;;  %v1468_v51 = vmul.f32 %v1451_v49, %v7785_v42  ;;  %v8381_v25 = vmul.f32 %v1451_v49, %v7791_v46 }
 0x246   :  { %v1478_v60 = vmax.f32 %v1462_v50, 0.0  ;;  %v1480_v5 = vmax.f32 %v1464_v37, 0.0  ;;  %v1479_v36 = vmax.f32 %v1463_v9, 0.0  ;;  %v1481_v21 = vmax.f32 %v1465_v12, 0.0 }
 0x247   :  { %v8383_v14 = vmax.f32 %v1131_v39, %v1135_v7  ;;  %v8385_v62 = vmax.f32 %v1132_v3, %v1136_v8  ;;  %v8387_v43 = vmax.f32 %v405_v19, %v409_v31  ;;  %v8389_v53 = vmax.f32 %v406_v30, %v410_v1 }
 0x248   :  { %v1482_v6 = vmax.f32 %v1466_v10, 0.0  ;;  %v2960_v11 = vrot.slane %v8371_v0, 7  ;;  %v2961_v42 = vrot.slane %v8373_v40, 7  ;;  %v3212_v46 = vrot.slane %v8371_v0, 1 }
 0x249   :  { %v1483_v2 = vmax.f32 %v8377_v32, 0.0  ;;  %v1484_v52 = vmax.f32 %v1468_v51, 0.0  ;;  %v1485_v29 = vmax.f32 %v8381_v25, 0.0  ;;  %v8396_v7 = vmax.f32 %v1478_v60, %v1480_v5 }
 0x24a   :  { %v8398_v55 = vmax.f32 %v1479_v36, %v1481_v21  ;;  %v3213_v13 = vrot.slane %v8373_v40, 1  ;;  %v3328_v44 = vrot.slane %v8371_v0, 2  ;;  %v3329_v57 = vrot.slane %v8373_v40, 2 }
 0x24b   :  { %v3057_v54 = vrot.slane %v8383_v14, 7  ;;  %v3058_v16 = vrot.slane %v8385_v62, 7  ;;  %v3444_v15 = vrot.slane %v8371_v0, 3  ;;  %v3445_v35 = vrot.slane %v8373_v40, 3 }
 0x24c   :  { %v2966_v26 = vrot.slane %v8383_v14, 6  ;;  %v2967_v49 = vrot.slane %v8385_v62, 6  ;;  %v3332_v18 = vrot.slane %v8383_v14, 1  ;;  %v3053_v38 = vrot.slane %v8387_v43, 1 }
 0x24d   :  { %v3054_v33 = vrot.slane %v8389_v53, 1  ;;  %v3001_v48 = vsel %vm3000_vm2, %v8387_v43, %v2960_v11  ;;  %v3002_v22 = vsel %vm3000_vm2, %v8389_v53, %v2961_v42  ;;  %v3208_v41 = vrot.slane %v8387_v43, 2 }
 0x24e   :  { %v8415_v23 = vsel %vm3003_vm3, %v3001_v48, %v2966_v26  ;;  %v3209_v4 = vrot.slane %v8389_v53, 2  ;;  %v3081_v39 = vsel %vm3000_vm2, %v3053_v38, %v8371_v0  ;;  %v8426_v50 = vsel %vm3003_vm3, %v3002_v22, %v2967_v49  ;;  %v5564_v26 = vld [vmem:[%s11453_s3 + $0x170] sm:$0xff] }
 0x24f   :  { %v3082_v3 = vsel %vm3000_vm2, %v3054_v33, %v8373_v40  ;;  %v3324_v37 = vrot.slane %v8387_v43, 3  ;;  %v8430_v8 = vsel %vm3003_vm3, %v3081_v39, %v3057_v54  ;;  %v3236_v12 = vsel %vm3000_vm2, %v3208_v41, %v3212_v46  ;;  %v5565_v46 = vld [vmem:[%s11453_s3 + $0x178] sm:$0xff]  ;;  %v5580_v49 = vld [vmem:[%s11453_s3 + $0x1f0] sm:$0xff] }
 0x250   :  { %v8433_v9 = vsel %vm3003_vm3, %v3082_v3, %v3058_v16  ;;  %v3237_v19 = vsel %vm3000_vm2, %v3209_v4, %v3213_v13  ;;  %v8439_v30 = vsel %vm3003_vm3, %v3236_v12, %v8383_v14  ;;  %v3325_v10 = vrot.slane %v8389_v53, 3  ;;  %v5581_v13 = vld [vmem:[%s11453_s3 + $0x1f8] sm:$0xff]  ;;  %3128 = vmatpush.msra.mxu0 %v5565_v46  ;;  %v5562_v46 = vld [vmem:[%s11453_s3 + $0x160] sm:$0xff] }
 0x251   :  { %v8443_v31 = vsel %vm3003_vm3, %v3237_v19, %v8385_v62  ;;  %v3352_v1 = vsel %vm3000_vm2, %v3324_v37, %v3328_v44  ;;  %v3333_v51 = vrot.slane %v8385_v62, 1  ;;  %v3440_v25 = vrot.slane %v8387_v43, 4  ;;  %v3034_v44 = vld [vmem:[%s11453_s3 + $0x78] sm:$0xff]  ;;  %3148 = vmatpush.msra.mxu1 %v5581_v13  ;;  %v5578_v13 = vld [vmem:[%s11453_s3 + $0x1e0] sm:$0xff] }
 0x252   :  { %v8448_v32 = vsel %vm3003_vm3, %v3352_v1, %v3332_v18  ;;  %v3441_v60 = vrot.slane %v8389_v53, 4  ;;  %v3353_v5 = vsel %vm3000_vm2, %v3325_v10, %v3329_v57  ;;  %v3448_v36 = vrot.slane %v8383_v14, 2  ;;  %3168 = vmatpush.msra.mxu2 %v3034_v44  ;;  %3129 = vmatpush.msra.mxu0 %v5564_v26 }
 0x253   :  { %v3449_v21 = vrot.slane %v8385_v62, 2  ;;  %v3556_v11 = vrot.slane %v8387_v43, 5  ;;  %v1498_v42 = vmax.f32 %v1482_v6, %v1484_v52  ;;  %v8467_v57 = vsel %vm3003_vm3, %v3353_v5, %v3333_v51  ;;  %v3050_v52 = vld [vmem:[%s11453_s3 + $0xf8] sm:$0xff]  ;;  %3149 = vmatpush.msra.mxu1 %v5580_v49  ;;  %v3032_v5 = vld [vmem:[%s11453_s3 + $0x68] sm:$0xff] }
 0x254   :  { %v3468_v54 = vsel %vm3000_vm2, %v3440_v25, %v3444_v15  ;;  %v3469_v16 = vsel %vm3000_vm2, %v3441_v60, %v3445_v35  ;;  %v1499_v6 = vmax.f32 %v1483_v2, %v1485_v29  ;;  %v3560_v2 = vrot.slane %v8371_v0, 4  ;;  %3188 = vmatpush.msra.mxu3 %v3050_v52  ;;  %v3033_v29 = vld [vmem:[%s11453_s3 + $0x70] sm:$0xff]  ;;  %v5563_v25 = vld [vmem:[%s11453_s3 + $0x168] sm:$0xff]  ;;  %v5561_v52 = vld [vmem:[%s11453_s3 + $0x158] sm:$0xff] }
 0x255   :  { %v8481_v18 = vsel %vm3003_vm3, %v3468_v54, %v3448_v36  ;;  %v8484_v15 = vsel %vm3003_vm3, %v3469_v16, %v3449_v21  ;;  %v3049_v35 = vld [vmem:[%s11453_s3 + $0xf0] sm:$0xff]  ;;  %v3557_v38 = vrot.slane %v8389_v53, 5  ;;  %3169 = vmatpush.msra.mxu2 %v3033_v29  ;;  %v3564_v48 = vrot.slane %v8383_v14, 3  ;;  %v5579_v60 = vld [vmem:[%s11453_s3 + $0x1e8] sm:$0xff]  ;;  %3130 = vmatpush.msra.mxu0 %v5563_v25  ;;  %v3031_v16 = vld [vmem:[%s11453_s3 + $0x60] sm:$0xff] }
 0x256   :  { %11863 = vst [vmem:[#allocation51_spill] sm:$0xff] %v8481_v18  ;;  %v3584_v33 = vsel %vm3000_vm2, %v3556_v11, %v3560_v2  ;;  %3189 = vmatpush.msra.mxu3 %v3049_v35  ;;  %v3561_v22 = vrot.slane %v8373_v40, 4  ;;  %v8498_v41 = vmax.f32 %v8396_v7, %v1498_v42  ;;  %v8501_v4 = vmax.f32 %v8398_v55, %v1499_v6  ;;  %v3048_v42 = vld [vmem:[%s11453_s3 + $0xe8] sm:$0xff]  ;;  %v3047_v6 = vld [vmem:[%s11453_s3 + $0xe0] sm:$0xff]  ;;  %v5577_v49 = vld [vmem:[%s11453_s3 + $0x1d8] sm:$0xff] }
 0x257   :  { %11864 = vst [vmem:[#allocation66_spill] sm:$0xff] %v8484_v15  ;;  %v3565_v39 = vrot.slane %v8385_v62, 3  ;;  %v3676_v3 = vrot.slane %v8371_v0, 5  ;;  %v8506_v37 = vsel %vm3003_vm3, %v3584_v33, %v3564_v48  ;;  %v3672_v19 = vrot.slane %v8387_v43, 6  ;;  %3150 = vmatpush.msra.mxu1 %v5579_v60  ;;  %3170 = vmatpush.msra.mxu2 %v3032_v5  ;;  %v3030_v2 = vld [vmem:[%s11453_s3 + $0x58] sm:$0xff]  ;;  %v5560_v33 = vld [vmem:[%s11453_s3 + $0x150] sm:$0xff] }
 0x258   :  { %11865 = vst [vmem:[#allocation67_spill] sm:$0xff] %v8506_v37  ;;  %v3585_v12 = vsel %vm3000_vm2, %v3557_v38, %v3561_v22  ;;  %v3677_v1 = vrot.slane %v8373_v40, 5  ;;  %v3680_v7 = vrot.slane %v8383_v14, 4  ;;  %v3673_v55 = vrot.slane %v8389_v53, 6  ;;  %3190 = vmatpush.msra.mxu3 %v3048_v42  ;;  %3131 = vmatpush.msra.mxu0 %v5562_v46  ;;  %v3046_v29 = vld [vmem:[%s11453_s3 + $0xd8] sm:$0xff]  ;;  %v5576_v48 = vld [vmem:[%s11453_s3 + $0x1d0] sm:$0xff] }
 0x259   :  { %v8512_v10 = vsel %vm3003_vm3, %v3585_v12, %v3565_v39  ;;  %v3788_v51 = vrot.slane %v8387_v43, 7  ;;  %v3700_v36 = vsel %vm3000_vm2, %v3672_v19, %v3676_v3  ;;  %v3681_v21 = vrot.slane %v8385_v62, 4  ;;  %3151 = vmatpush.msra.mxu1 %v5578_v13  ;;  %3171 = vmatpush.msra.mxu2 %v3031_v16  ;;  %v3029_v3 = vld [vmem:[%s11453_s3 + $0x50] sm:$0xff] }
 0x25a   :  { %11866 = vst [vmem:[#allocation72_spill] sm:$0xff] %v8512_v10  ;;  %v3792_v11 = vrot.slane %v8371_v0, 6  ;;  %v3789_v43 = vrot.slane %v8389_v53, 7  ;;  %v3702_v44 = vsel %vm3003_vm3, %v3700_v36, %v3680_v7  ;;  %v3701_v0 = vsel %vm3000_vm2, %v3673_v55, %v3677_v1  ;;  %3191 = vmatpush.msra.mxu3 %v3047_v6  ;;  %3132 = vmatpush.msra.mxu0 %v5561_v52  ;;  %v3045_v12 = vld [vmem:[%s11453_s3 + $0xd0] sm:$0xff] }
 0x25b   :  { %v3796_v53 = vrot.slane %v8383_v14, 5  ;;  %v3793_v54 = vrot.slane %v8373_v40, 6  ;;  %v3703_v26 = vsel %vm3003_vm3, %v3701_v0, %v3681_v21  ;;  %v3797_v40 = vrot.slane %v8385_v62, 5  ;;  %3152 = vmatpush.msra.mxu1 %v5577_v49  ;;  %3172 = vmatpush.msra.mxu2 %v3030_v2  ;;  %v11878_v2 = vld [vmem:[#allocation3_spill] sm:$0xff] }
 0x25c   :  { %v3816_v14 = vsel %vm3000_vm2, %v3788_v51, %v3792_v11  ;;  %v3684_v35 = vrot.slane %v8498_v41, 3  ;;  %v3685_v22 = vrot.slane %v8501_v4, 3  ;;  %3192 = vmatpush.msra.mxu3 %v3046_v29  ;;  %v3800_v1 = vrot.slane %v8498_v41, 4  ;;  %3133 = vmatpush.msra.mxu0 %v5560_v33  ;;  %v11882_v33 = vld [vmem:[#allocation2_spill] sm:$0xff] }
 0x25d   :  { %v3818_v38 = vsel %vm3003_vm3, %v3816_v14, %v3796_v53  ;;  %v3817_v62 = vsel %vm3000_vm2, %v3789_v43, %v3793_v54  ;;  %3153 = vmatpush.msra.mxu1 %v5576_v48  ;;  %3173 = vmatpush.msra.mxu2 %v3029_v3  ;;  %v3801_v55 = vrot.slane %v8501_v4, 4  ;;  %v3061_v5 = vrot.slane %v8498_v41, 6 }
 0x25e   :  { %v3819_v39 = vsel %vm3003_vm3, %v3817_v62, %v3797_v40  ;;  %v8582_v19 = vsel %vm3006_vm4, %v3702_v44, %v3684_v35  ;;  %v8586_v7 = vsel %vm3006_vm4, %v3703_v26, %v3685_v22  ;;  %3193 = vmatpush.msra.mxu3 %v3045_v12  ;;  %v8590_v51 = vsel %vm3006_vm4, %v3818_v38, %v3800_v1  ;;  %v11880_v38 = vld [vmem:[#allocation27_spill] sm:$0xff]  ;;  %v11887_v12 = vld [vmem:[#allocation33_spill] sm:$0xff] }
 0x25f   :  { %v8593_v25 = vsel %vm3006_vm4, %v3819_v39, %v3801_v55  ;;  %v3062_v36 = vrot.slane %v8501_v4, 6  ;;  %v2972_v21 = vrot.slane %v8498_v41, 5  ;;  %v2973_v11 = vrot.slane %v8501_v4, 5  ;;  %v11885_v39 = vld [vmem:[#allocation31_spill] sm:$0xff] }
 0x260   :  { %v3216_v42 = vrot.slane %v8498_v41, 7  ;;  %v8607_v44 = vsel %vm3006_vm4, %v8448_v32, %v8498_v41  ;;  %v8611_v0 = vsel %vm3006_vm4, %v8430_v8, %v3061_v5 }
 0x261   :  { %v8615_v53 = vsel %vm3006_vm4, %v8433_v9, %v3062_v36  ;;  %v8619_v54 = vsel %vm3006_vm4, %v8415_v23, %v2972_v21  ;;  %v8623_v16 = vsel %vm3006_vm4, %v8426_v50, %v2973_v11  ;;  %v11870_v50 = vld [vmem:[#allocation52_spill] sm:$0xff]  ;;  %v11892_v36 = vld [vmem:[#allocation10_spill] sm:$0xff] }
 0x262   :  { %v8637_v9 = vsel %vm3006_vm4, %v8439_v30, %v3216_v42 }
 0x269   :  { %v2474_v60 = vpop.xlane.xlu2 %2473 }
 0x26a   :  { %v8600_v43 = vmul.f32 %v2474_v60, %v7544_v34  ;;  %v11890_v60 = vld [vmem:[#allocation18_spill] sm:$0xff] }
 0x26c   :  { %v8633_v8 = vsub.f32 %v7870_v59, %v8600_v43  ;;  %v8642_v26 = vsub.f32 %v11870_v50, %v8600_v43  ;;  %v11876_v59 = vld [vmem:[#allocation26_spill] sm:$0xff] }
 0x26d   :  { %v1385_v46 = vpop.xlane.xlu0 %1384  ;;  %v11896_v50 = vld [vmem:[#allocation34_spill] sm:$0xff] }
 0x26e   :  { %v1387_v13 = vmul.f32 %v1385_v46, %v7544_v34  ;;  %11869 = vst [vmem:[#allocation73_spill] sm:$0xff] %v8633_v8  ;;  %v11894_v46 = vld [vmem:[#allocation4_spill] sm:$0xff] }
 0x26f   :  { %11871 = vst [vmem:[#allocation74_spill] sm:$0xff] %v8642_v26 }
 0x270   :  { %v8626_v32 = vsub.f32 %v7898_v20, %v1387_v13  ;;  %v8629_v52 = vsub.f32 %v7902_v17, %v1387_v13  ;;  %v11872_v20 = vld [vmem:[#allocation47_spill] sm:$0xff]  ;;  %v11874_v17 = vld [vmem:[#allocation49_spill] sm:$0xff]  ;;  %v8653_v49 = vsub.f32 %v11876_v59, %v1387_v13  ;;  %v8656_v30 = vsub.f32 %v11878_v2, %v1387_v13 }
 0x271   :  { %v8646_v14 = vsub.f32 %v11872_v20, %v8600_v43  ;;  %v8650_v40 = vsub.f32 %v11874_v17, %v8600_v43  ;;  %v8694_v20 = vsub.f32 %v11896_v50, %v1387_v13  ;;  %v11898_v17 = vld [vmem:[#allocation35_spill] sm:$0xff] }
 0x272   :  { %11867 = vst [vmem:[#allocation75_spill] sm:$0xff] %v8626_v32  ;;  %v1412_v29 = vmul.f32 %v8626_v32, %v8626_v32  ;;  %v1413_v35 = vmul.f32 %v8629_v52, %v8629_v52  ;;  %v8699_v59 = vsub.f32 %v11898_v17, %v1387_v13 }
 0x273   :  { %11868 = vst [vmem:[#allocation79_spill] sm:$0xff] %v8629_v52 }
 0x274   :  { %11873 = vst [vmem:[#allocation80_spill] sm:$0xff] %v8646_v14  ;;  %v1418_v52 = vmul.f32 %v8699_v59, %v8699_v59 }
 0x275   :  { %v289_v6 = vpop.xlane.xlu1 %288  ;;  %11875 = vst [vmem:[#allocation81_spill] sm:$0xff] %v8650_v40 }
 0x276   :  { %v298_v23 = vmul.f32 %v7544_v34, %v289_v6  ;;  %11877 = vst [vmem:[#allocation82_spill] sm:$0xff] %v8653_v49  ;;  %v8691_v6 = vsub.f32 %v11894_v46, %v1387_v13 }
 0x277   :  { %11879 = vst [vmem:[#allocation52_spill] sm:$0xff] %v8656_v30 }
 0x278   :  { %v8663_v62 = vsub.f32 %v11880_v38, %v298_v23  ;;  %v8666_v48 = vsub.f32 %v11882_v33, %v298_v23  ;;  %v8669_v22 = vsub.f32 %v7957_v63, %v298_v23  ;;  %v8672_v3 = vsub.f32 %v11885_v39, %v298_v23  ;;  %11895 = vst [vmem:[#allocation18_spill] sm:$0xff] %v8691_v6 }
 0x279   :  { %v8675_v1 = vsub.f32 %v11887_v12, %v298_v23  ;;  %v8678_v55 = vsub.f32 %v8022_v58, %v298_v23  ;;  %v8681_v5 = vsub.f32 %v11890_v60, %v298_v23  ;;  %v8684_v21 = vsub.f32 %v11892_v36, %v298_v23  ;;  %11897 = vst [vmem:[#allocation10_spill] sm:$0xff] %v8694_v20  ;;  %v11900_v23 = vld [vmem:[#allocation30_spill] sm:$0xff] }
 0x27a   :  { %11881 = vst [vmem:[#allocation47_spill] sm:$0xff] %v8663_v62  ;;  %v323_v63 = vmul.f32 %v8663_v62, %v8663_v62  ;;  %v324_v42 = vmul.f32 %v8666_v48, %v8666_v48  ;;  %v325_v58 = vmul.f32 %v8669_v22, %v8669_v22  ;;  %v8702_v2 = vsub.f32 %v11900_v23, %v1387_v13  ;;  %v11920_v62 = vld [vmem:[#allocation12_spill] sm:$0xff] }
 0x27b   :  { %11883 = vst [vmem:[#allocation49_spill] sm:$0xff] %v8666_v48  ;;  %v1414_v38 = vmul.f32 %v8653_v49, %v8653_v49  ;;  %v326_v39 = vmul.f32 %v8672_v3, %v8672_v3  ;;  %v327_v12 = vmul.f32 %v8675_v1, %v8675_v1  ;;  %v328_v46 = vmul.f32 %v8678_v55, %v8678_v55 }
 0x27c   :  { %11884 = vst [vmem:[#allocation26_spill] sm:$0xff] %v8669_v22  ;;  %v340_v60 = vadd.f32 %v324_v42, %v323_v63  ;;  %v329_v13 = vmul.f32 %v8681_v5, %v8681_v5  ;;  %v8719_v50 = vmul.f32 %v8684_v21, %v8684_v21  ;;  %v1415_v49 = vmul.f32 %v8656_v30, %v8656_v30  ;;  %v3044_v30 = vld [vmem:[%s11453_s3 + $0xc8] sm:$0xff]  ;;  %v3026_v22 = vld [vmem:[%s11453_s3 + $0x38] sm:$0xff] }
 0x27d   :  { %11886 = vst [vmem:[#allocation3_spill] sm:$0xff] %v8672_v3  ;;  %v1416_v63 = vmul.f32 %v8691_v6, %v8691_v6  ;;  %v1417_v42 = vmul.f32 %v8694_v20, %v8694_v20  ;;  %v8732_v32 = vmul.f32 %v8702_v2, %v8702_v2  ;;  %3194 = vmatpush.msra.mxu3 %v3044_v30  ;;  %v5573_v3 = vld [vmem:[%s11453_s3 + $0x1b8] sm:$0xff] }
 0x27e   :  { %11888 = vst [vmem:[#allocation27_spill] sm:$0xff] %v8675_v1  ;;  %v341_v23 = vadd.f32 %v340_v60, %v325_v58  ;;  %v5575_v58 = vld [vmem:[%s11453_s3 + $0x1c8] sm:$0xff] }
 0x27f   :  { %11889 = vst [vmem:[#allocation2_spill] sm:$0xff] %v8678_v55  ;;  %v3028_v60 = vld [vmem:[%s11453_s3 + $0x48] sm:$0xff]  ;;  %3154 = vmatpush.msra.mxu1 %v5575_v58  ;;  %v3027_v58 = vld [vmem:[%s11453_s3 + $0x40] sm:$0xff] }
 0x280   :  { %11891 = vst [vmem:[#allocation31_spill] sm:$0xff] %v8681_v5  ;;  %v1748_v11 = vpop.xlane.xlu0 %1747  ;;  %3174 = vmatpush.msra.mxu2 %v3028_v60  ;;  %v3043_v55 = vld [vmem:[%s11453_s3 + $0xc0] sm:$0xff] }
 0x281   :  { %11893 = vst [vmem:[#allocation33_spill] sm:$0xff] %v8684_v21  ;;  %v8707_v33 = vmul.f32 %v1748_v11, %v7544_v34  ;;  %v1429_v11 = vadd.f32 %v1413_v35, %v1412_v29  ;;  %v5559_v35 = vld [vmem:[%s11453_s3 + $0x148] sm:$0xff]  ;;  %3195 = vmatpush.msra.mxu3 %v3043_v55  ;;  %v3025_v55 = vld [vmem:[%s11453_s3 + $0x30] sm:$0xff] }
 0x282   :  { %11899 = vst [vmem:[#allocation4_spill] sm:$0xff] %v8699_v59  ;;  %v11902_v59 = vld [vmem:[#allocation59_spill] sm:$0xff]  ;;  %3134 = vmatpush.msra.mxu0 %v5559_v35  ;;  %3175 = vmatpush.msra.mxu2 %v3027_v58 }
 0x283   :  { %11901 = vst [vmem:[#allocation34_spill] sm:$0xff] %v8702_v2  ;;  %v1022_v36 = vpop.xlane.xlu1 %1021  ;;  %v1430_v29 = vadd.f32 %v1429_v11, %v1414_v38  ;;  %v8745_v20 = vsub.f32 %v11902_v59, %v8600_v43  ;;  %v11904_v2 = vld [vmem:[#allocation53_spill] sm:$0xff]  ;;  %v11906_v11 = vld [vmem:[#allocation28_spill] sm:$0xff]  ;;  %v5574_v59 = vld [vmem:[%s11453_s3 + $0x1c0] sm:$0xff] }
 0x284   :  { %v1024_v17 = vmul.f32 %v1022_v36, %v7544_v34  ;;  %v342_v36 = vadd.f32 %v341_v23, %v326_v39  ;;  %v8749_v38 = vsub.f32 %v11904_v2, %v8600_v43  ;;  %v8753_v6 = vsub.f32 %v11906_v11, %v8600_v43  ;;  %v5558_v39 = vld [vmem:[%s11453_s3 + $0x140] sm:$0xff]  ;;  %v11908_v23 = vld [vmem:[#allocation5_spill] sm:$0xff]  ;;  %v11910_v11 = vld [vmem:[#allocation36_spill] sm:$0xff]  ;;  %3155 = vmatpush.msra.mxu1 %v5574_v59 }
 0x285   :  { %11903 = vst [vmem:[#allocation35_spill] sm:$0xff] %v8745_v20  ;;  %v1431_v2 = vadd.f32 %v1430_v29, %v1415_v49  ;;  %v5557_v49 = vld [vmem:[%s11453_s3 + $0x138] sm:$0xff]  ;;  %3135 = vmatpush.msra.mxu0 %v5558_v39  ;;  %v5556_v59 = vld [vmem:[%s11453_s3 + $0x130] sm:$0xff]  ;;  %3176 = vmatpush.msra.mxu2 %v3026_v22 }
 0x286   :  { %11905 = vst [vmem:[#allocation30_spill] sm:$0xff] %v8749_v38  ;;  %v8765_v21 = vsub.f32 %v11908_v23, %v1024_v17  ;;  %v8768_v5 = vsub.f32 %v11910_v11, %v1024_v17  ;;  %v343_v29 = vadd.f32 %v342_v36, %v327_v12  ;;  %v11912_v23 = vld [vmem:[#allocation37_spill] sm:$0xff]  ;;  %v11914_v11 = vld [vmem:[#allocation64_spill] sm:$0xff]  ;;  %v8809_v10 = vsub.f32 %v11920_v62, %v1024_v17 }
 0x287   :  { %11907 = vst [vmem:[#allocation59_spill] sm:$0xff] %v8753_v6  ;;  %v8780_v1 = vsub.f32 %v11912_v23, %v1024_v17  ;;  %v8784_v60 = vsub.f32 %v11914_v11, %v8600_v43  ;;  %v3042_v12 = vld [vmem:[%s11453_s3 + $0xb8] sm:$0xff]  ;;  %v1432_v36 = vadd.f32 %v1431_v2, %v1416_v63  ;;  %v11916_v23 = vld [vmem:[#allocation11_spill] sm:$0xff]  ;;  %3136 = vmatpush.msra.mxu0 %v5557_v49  ;;  %v11923_v49 = vld [vmem:[#allocation56_spill] sm:$0xff] }
 0x288   :  { %11909 = vst [vmem:[#allocation53_spill] sm:$0xff] %v8765_v21  ;;  %v1791_v35 = vpop.xlane.xlu0 %1790  ;;  %v8797_v43 = vsub.f32 %v11916_v23, %v1024_v17  ;;  %v344_v39 = vadd.f32 %v343_v29, %v328_v46  ;;  %v11918_v11 = vld [vmem:[#allocation9_spill] sm:$0xff]  ;;  %3156 = vmatpush.msra.mxu1 %v5573_v3  ;;  %v3041_v46 = vld [vmem:[%s11453_s3 + $0xb0] sm:$0xff]  ;;  %v1049_v29 = vmul.f32 %v8765_v21, %v8765_v21 }
 0x289   :  { %11911 = vst [vmem:[#allocation28_spill] sm:$0xff] %v8768_v5  ;;  %v1801_v30 = vmul.f32 %v1791_v35, %v7544_v34  ;;  %v5572_v35 = vld [vmem:[%s11453_s3 + $0x1b0] sm:$0xff]  ;;  %v8806_v48 = vsub.f32 %v11918_v11, %v1024_v17  ;;  %v1433_v58 = vadd.f32 %v1432_v36, %v1417_v42  ;;  %v1050_v62 = vmul.f32 %v8768_v5, %v8768_v5 }
 0x28a   :  { %11913 = vst [vmem:[#allocation5_spill] sm:$0xff] %v8780_v1  ;;  %3196 = vmatpush.msra.mxu3 %v3042_v12  ;;  %v8824_v3 = vsub.f32 %v8126_v56, %v1024_v17  ;;  %v8827_v23 = vsub.f32 %v11923_v49, %v1024_v17  ;;  %3137 = vmatpush.msra.mxu0 %v5556_v59  ;;  %v5571_v17 = vld [vmem:[%s11453_s3 + $0x1a8] sm:$0xff]  ;;  %v3023_v49 = vld [vmem:[%s11453_s3 + $0x20] sm:$0xff] }
 0x28b   :  { %11915 = vst [vmem:[#allocation36_spill] sm:$0xff] %v8784_v60  ;;  %v8811_v63 = vadd.f32 1e-05, %v1801_v30  ;;  %v345_v30 = vadd.f32 %v344_v39, %v329_v13  ;;  %3157 = vmatpush.msra.mxu1 %v5572_v35  ;;  %v1434_v42 = vadd.f32 %v1433_v58, %v1418_v52  ;;  %v1051_v36 = vmul.f32 %v8780_v1, %v8780_v1  ;;  %v5555_v52 = vld [vmem:[%s11453_s3 + $0x128] sm:$0xff] }
 0x28c   :  { %11917 = vst [vmem:[#allocation37_spill] sm:$0xff] %v8797_v43  ;;  %v2501_v11 = vmul.f32 %v8633_v8, %v8633_v8  ;;  %3177 = vmatpush.msra.mxu2 %v3025_v55  ;;  %3197 = vmatpush.msra.mxu3 %v3041_v46  ;;  %v1052_v13 = vmul.f32 %v8797_v43, %v8797_v43  ;;  %v3024_v12 = vld [vmem:[%s11453_s3 + $0x28] sm:$0xff] }
 0x28d   :  { %11919 = vst [vmem:[#allocation64_spill] sm:$0xff] %v8806_v48  ;;  %6175 = vrsqrt.f32 %v8811_v63  ;;  %v346_v56 = vadd.f32 %v345_v30, %v8719_v50  ;;  %v1053_v50 = vmul.f32 %v8806_v48, %v8806_v48  ;;  %v1054_v39 = vmul.f32 %v8809_v10, %v8809_v10  ;;  %3138 = vmatpush.msra.mxu0 %v5555_v52  ;;  %v3040_v55 = vld [vmem:[%s11453_s3 + $0xa8] sm:$0xff]  ;;  %v3039_v52 = vld [vmem:[%s11453_s3 + $0xa0] sm:$0xff] }
 0x28e   :  { %11921 = vst [vmem:[#allocation11_spill] sm:$0xff] %v8809_v10  ;;  %v1066_v59 = vadd.f32 %v1050_v62, %v1049_v29  ;;  %v2502_v35 = vmul.f32 %v8642_v26, %v8642_v26  ;;  %v1435_v46 = vadd.f32 %v1434_v42, %v8732_v32  ;;  %v8861_v58 = vmul.f32 %v8824_v3, %v8824_v3  ;;  %v5554_v62 = vld [vmem:[%s11453_s3 + $0x120] sm:$0xff] }
 0x28f   :  { %11922 = vst [vmem:[#allocation9_spill] sm:$0xff] %v8824_v3  ;;  %347 = vadd.xlane.f32.xlu1 %v346_v56  ;;  %v8865_v30 = vmul.f32 %v8827_v23, %v8827_v23  ;;  %3158 = vmatpush.msra.mxu1 %v5571_v17  ;;  %v5570_v32 = vld [vmem:[%s11453_s3 + $0x1a0] sm:$0xff]  ;;  %v2503_v56 = vmul.f32 %v8646_v14, %v8646_v14  ;;  %vm1811_vm6 = vweird.f32 %v8811_v63  ;;  %v11948_v3 = vld [vmem:[#allocation93_spill] sm:$0xff] }
 0x290   :  { %11924 = vst [vmem:[#allocation12_spill] sm:$0xff] %v8827_v23  ;;  %3178 = vmatpush.msra.mxu2 %v3024_v12  ;;  %v1067_v42 = vadd.f32 %v1066_v59, %v1051_v36  ;;  %3198 = vmatpush.msra.mxu3 %v3040_v55  ;;  %v2504_v17 = vmul.f32 %v8650_v40, %v8650_v40  ;;  %v5553_v59 = vld [vmem:[%s11453_s3 + $0x118] sm:$0xff] }
 0x291   :  { %v659_v2 = vpop.xlane.xlu1 %658  ;;  %3139 = vmatpush.msra.mxu0 %v5554_v62  ;;  %v2505_v12 = vmul.f32 %v8745_v20, %v8745_v20  ;;  %3159 = vmatpush.msra.mxu1 %v5570_v32  ;;  %v5569_v55 = vld [vmem:[%s11453_s3 + $0x198] sm:$0xff] }
 0x292   :  { %v8835_v22 = vmul.f32 %v659_v2, %v7544_v34  ;;  %3179 = vmatpush.msra.mxu2 %v3023_v49  ;;  %v3022_v62 = vld [vmem:[%s11453_s3 + $0x18] sm:$0xff]  ;;  %3199 = vmatpush.msra.mxu3 %v3039_v52  ;;  %v5568_v52 = vld [vmem:[%s11453_s3 + $0x190] sm:$0xff] }
 0x293   :  { %v2154_v2 = vpop.xlane.xlu0 %2153  ;;  %v8886_v26 = vpop.eup %6175  ;;  %3140 = vmatpush.msra.mxu0 %v5553_v59  ;;  %v3038_v20 = vld [vmem:[%s11453_s3 + $0x98] sm:$0xff]  ;;  %3160 = vmatpush.msra.mxu1 %v5569_v55 }
 0x294   :  { %v2164_v29 = vmul.f32 %v2154_v2, %v7544_v34  ;;  %v2518_v2 = vadd.f32 %v2502_v35, %v2501_v11  ;;  %v1068_v11 = vadd.f32 %v1067_v42, %v1052_v13  ;;  %v2506_v35 = vmul.f32 %v8749_v38, %v8749_v38  ;;  %3180 = vmatpush.msra.mxu2 %v3022_v62  ;;  %v5552_v42 = vld [vmem:[%s11453_s3 + $0x110] sm:$0xff]  ;;  %v11925_v59 = vld [vmem:[#allocation65_spill] sm:$0xff]  ;;  %v11933_v38 = vld [vmem:[#allocation19_spill] sm:$0xff] }
 0x295   :  { %v1806_v32 = vmul.f32 %v8886_v26, %v8811_v63  ;;  %3200 = vmatpush.msra.mxu3 %v3038_v20  ;;  %3141 = vmatpush.msra.mxu0 %v5552_v42  ;;  %v3037_v62 = vld [vmem:[%s11453_s3 + $0x90] sm:$0xff]  ;;  %v5551_v20 = vld [vmem:[%s11453_s3 + $0x108] sm:$0xff]  ;;  %v8961_v14 = vsub.f32 %v11933_v38, %v8707_v33  ;;  %vm1812_vm5 = vweird.f32 %v8886_v26  ;;  %v5566_v38 = vld [vmem:[%s11453_s3 + $0x180] sm:$0xff] }
 0x296   :  { %v8888_v8 = vadd.f32 1e-05, %v2164_v29  ;;  %v8903_v29 = vmul.f32 %v8753_v6, %v8753_v6  ;;  %v2519_v40 = vadd.f32 %v2518_v2, %v2503_v56  ;;  %v1069_v13 = vadd.f32 %v1068_v11, %v1053_v50  ;;  %v3021_v50 = vld [vmem:[%s11453_s3 + $0x10] sm:$0xff]  ;;  %3161 = vmatpush.msra.mxu1 %v5568_v52  ;;  %v3036_v52 = vld [vmem:[%s11453_s3 + $0x88] sm:$0xff]  ;;  %vm1813_vm7 = vmor %vm1811_vm6, %vm1812_vm5 }
 0x297   :  { %v8924_v56 = vsub.f32 %v11925_v59, %v8707_v33  ;;  %v1807_v2 = vmul.f32 %v8886_v26, %v1806_v32  ;;  %3181 = vmatpush.msra.mxu2 %v3021_v50  ;;  %v5567_v32 = vld [vmem:[%s11453_s3 + $0x188] sm:$0xff]  ;;  %1436 = vadd.xlane.f32.xlu1 %v1435_v46  ;;  %vm3009_vm6 = vcmask 1043456  }
 0x298   :  { %6177 = vrsqrt.f32 %v8888_v8  ;;  %v2520_v11 = vadd.f32 %v2519_v40, %v2504_v17  ;;  %v1070_v59 = vadd.f32 %v1069_v13, %v1054_v39  ;;  %v11929_v40 = vld [vmem:[#allocation32_spill] sm:$0xff]  ;;  %3201 = vmatpush.msra.mxu3 %v3037_v62  ;;  %3142 = vmatpush.msra.mxu0 %v5551_v20  ;;  %v3019_v62 = vld [vmem:[%s11453_s3] sm:$0xff]  ;;  %v5597_v20 = vld [vmem:[%s11453_s3 + $0x278] sm:$0xff]  ;;  %vm2174_vm9 = vweird.f32 %v8888_v8 }
 0x299   :  { %v2880_v36 = vpop.xlane.xlu1 %2879  ;;  %11926 = vst [vmem:[#allocation56_spill] sm:$0xff] %v8924_v56  ;;  %v8950_v17 = vsub.f32 %v11929_v40, %v8707_v33  ;;  %v1808_v13 = vmul.f32 0.5, %v1807_v2  ;;  %v11935_v40 = vld [vmem:[#allocation38_spill] sm:$0xff]  ;;  %3162 = vmatpush.msra.mxu1 %v5567_v32 }
 0x29a   :  { %v2890_v49 = vmul.f32 %v2880_v36, %v7544_v34  ;;  %v8920_v36 = vmul.f32 %v8784_v60, %v8784_v60  ;;  %v11927_v60 = vld [vmem:[#allocation29_spill] sm:$0xff]  ;;  %v2521_v50 = vadd.f32 %v2520_v11, %v2505_v12  ;;  %v8965_v23 = vsub.f32 %v11935_v40, %v8707_v33  ;;  %v5550_v12 = vld [vmem:[%s11453_s3 + $0x100] sm:$0xff]  ;;  %v11937_v11 = vld [vmem:[#allocation39_spill] sm:$0xff]  ;;  %3202 = vmatpush.msra.mxu3 %v3036_v52 }
 0x29b   :  { %v8937_v6 = vsub.f32 %v11927_v60, %v8707_v33  ;;  %11930 = vst [vmem:[#allocation29_spill] sm:$0xff] %v8950_v17  ;;  %v11931_v60 = vld [vmem:[#allocation6_spill] sm:$0xff]  ;;  %v2517_v42 = vpop.xlane.xlu0 %2516  ;;  %v1071_v2 = vadd.f32 %v1070_v59, %v8861_v58  ;;  %v1809_v58 = vsub.f32 1.5, %v1808_v13  ;;  %3143 = vmatpush.msra.mxu0 %v5550_v12  ;;  %3163 = vmatpush.msra.mxu1 %v5566_v38 }
 0x29c   :  { %v8927_v55 = vadd.f32 1e-05, %v2890_v49  ;;  %v3020_v49 = vld [vmem:[%s11453_s3 + $0x8] sm:$0xff]  ;;  %v8954_v39 = vsub.f32 %v11931_v60, %v8707_v33  ;;  %11934 = vst [vmem:[#allocation6_spill] sm:$0xff] %v8961_v14  ;;  %v2527_v46 = vmul.f32 %v2517_v42, %v7544_v34  ;;  %v8981_v60 = vsub.f32 %v11937_v11, %v8707_v33  ;;  %v3035_v59 = vld [vmem:[%s11453_s3 + $0x80] sm:$0xff]  ;;  %v11939_v42 = vld [vmem:[#allocation40_spill] sm:$0xff] }
 0x29d   :  { %11928 = vst [vmem:[#allocation65_spill] sm:$0xff] %v8937_v6  ;;  %3182 = vmatpush.msra.mxu2 %v3020_v49  ;;  %v2522_v32 = vadd.f32 %v2521_v50, %v2506_v35  ;;  %v8992_v40 = vsub.f32 %v11939_v42, %v8707_v33  ;;  %v1072_v13 = vadd.f32 %v1071_v2, %v8865_v30  ;;  %v5613_v49 = vld [vmem:[%s11453_s3 + $0x2f8] sm:$0xff]  ;;  %v11941_v42 = vld [vmem:[#allocation83_spill] sm:$0xff] }
 0x29e   :  { %11932 = vst [vmem:[#allocation32_spill] sm:$0xff] %v8954_v39  ;;  %6179 = vrsqrt.f32 %v8927_v55  ;;  %v8994_v11 = vpop.eup %6177  ;;  %v8997_v10 = vadd.f32 1e-05, %v2527_v46  ;;  %v5629_v35 = vld [vmem:[%s11453_s3 + $0x378] sm:$0xff]  ;;  %v9007_v33 = vmul.f32 %v8924_v56, %v8924_v56  ;;  %v1776_v30 = vmul.f32 %v8937_v6, %v8937_v6  ;;  %3203 = vmatpush.msra.mxu3 %v3035_v59  ;;  %3283 = vmatpush.msrb.mxu0 %v5597_v20  ;;  %v11947_v56 = vld [vmem:[#allocation91_spill] sm:$0xff] }
 0x29f   :  { %11936 = vst [vmem:[#allocation19_spill] sm:$0xff] %v8965_v23  ;;  %v1810_v50 = vmul.f32 %v8886_v26, %v1809_v58  ;;  %v2169_v2 = vmul.f32 %v8994_v11, %v8888_v8  ;;  %3183 = vmatpush.msra.mxu2 %v3019_v62  ;;  %v5645_v46 = vld [vmem:[%s11453_s3 + $0x3f8] sm:$0xff]  ;;  %v9020_v12 = vmul.f32 %v8950_v17, %v8950_v17  ;;  %vm2175_vm8 = vweird.f32 %v8994_v11 }
 0x2a0   :  { %11938 = vst [vmem:[#allocation38_spill] sm:$0xff] %v8981_v60  ;;  %1073 = vadd.xlane.f32.xlu2 %v1072_v13  ;;  %6181 = vrsqrt.f32 %v8997_v10  ;;  %v2523_v38 = vadd.f32 %v2522_v32, %v8903_v29  ;;  %v9031_v62 = vmul.f32 %v8954_v39, %v8954_v39  ;;  %3303 = vmatpush.msrb.mxu1 %v5613_v49  ;;  %v11943_v32 = vld [vmem:[#allocation85_spill] sm:$0xff]  ;;  %v11944_v39 = vld [vmem:[#allocation86_spill] sm:$0xff]  ;;  %vm2900_vm11 = vweird.f32 %v8927_v55  ;;  %vm2176_vm12 = vmor %vm2174_vm9, %vm2175_vm8 }
 0x2a1   :  { %11940 = vst [vmem:[#allocation39_spill] sm:$0xff] %v8992_v40  ;;  %v2111_v52 = vpop.xlane.xlu1 %2110  ;;  %v1814_v58 = vsel %vm1813_vm7, %v8886_v26, %v1810_v50  ;;  %v2170_v59 = vmul.f32 %v8994_v11, %v2169_v2  ;;  %3399 = vmatpush.msrb.mxu2 %v5629_v35  ;;  %v9038_v20 = vmul.f32 %v8961_v14, %v8961_v14  ;;  %v11945_v50 = vld [vmem:[#allocation87_spill] sm:$0xff]  ;;  %v11946_v35 = vld [vmem:[#allocation88_spill] sm:$0xff]  ;;  %vm2537_vm14 = vweird.f32 %v8997_v10 }
 0x2a2   :  { %v9026_v63 = vmul.f32 %v2111_v52, %v7544_v34  ;;  %v1825_v13 = vmul.f32 %v1814_v58, %v11941_v42  ;;  %v11942_v52 = vld [vmem:[#allocation84_spill] sm:$0xff]  ;;  %v1827_v17 = vmul.f32 %v1814_v58, %v11943_v32  ;;  %v1828_v6 = vmul.f32 %v1814_v58, %v11944_v39  ;;  %3419 = vmatpush.msrb.mxu3 %v5645_v46 }
 0x2a3   :  { %v1826_v29 = vmul.f32 %v1814_v58, %v11942_v52  ;;  %v1829_v49 = vmul.f32 %v1814_v58, %v11945_v50  ;;  %v1830_v2 = vmul.f32 %v1814_v58, %v11946_v35  ;;  %v1831_v14 = vmul.f32 %v1814_v58, %v11947_v56 }
 0x2a4   :  { %v9045_v26 = vpop.eup %6179  ;;  %v1832_v48 = vmul.f32 %v1814_v58, %v11948_v3  ;;  %v1841_v42 = vmax.f32 %v1825_v13, 0.0  ;;  %v1843_v52 = vmax.f32 %v1827_v17, 0.0  ;;  %v1844_v5 = vmax.f32 %v1828_v6, 0.0 }
 0x2a5   :  { %v1842_v43 = vmax.f32 %v1826_v29, 0.0  ;;  %v1845_v32 = vmax.f32 %v1829_v49, 0.0  ;;  %v1846_v1 = vmax.f32 %v1830_v2, 0.0  ;;  %v1847_v39 = vmax.f32 %v1831_v14, 0.0  ;;  %v11950_v29 = vld [vmem:[#allocation8_spill] sm:$0xff]  ;;  %v11951_v2 = vld [vmem:[#allocation54_spill] sm:$0xff] }
 0x2a6   :  { %v1848_v21 = vmax.f32 %v1832_v48, 0.0  ;;  %v9051_v37 = vpop.eup %6181  ;;  %v1857_v46 = vmax.f32 %v1841_v42, %v1843_v52  ;;  %v2171_v18 = vmul.f32 0.5, %v2170_v59  ;;  %v2895_v50 = vmul.f32 %v9045_v26, %v8927_v55  ;;  %v11952_v52 = vld [vmem:[#allocation21_spill] sm:$0xff] }
 0x2a7   :  { %v1858_v15 = vmax.f32 %v1842_v43, %v1844_v5  ;;  %v1861_v35 = vmax.f32 %v1845_v32, %v1847_v39  ;;  %v2532_v3 = vmul.f32 %v9051_v37, %v8997_v10  ;;  %v9059_v6 = vmul.f32 %v8965_v23, %v8965_v23  ;;  %v11953_v39 = vld [vmem:[#allocation89_spill] sm:$0xff] }
 0x2a8   :  { %v1862_v56 = vmax.f32 %v1846_v1, %v1848_v21  ;;  %v2172_v17 = vsub.f32 1.5, %v2171_v18  ;;  %v2896_v14 = vmul.f32 %v9045_v26, %v2895_v50  ;;  %vm2901_vm10 = vweird.f32 %v9045_v26  ;;  %v11954_v50 = vld [vmem:[#allocation90_spill] sm:$0xff] }
 0x2a9   :  { %v2524_v48 = vadd.f32 %v2523_v38, %v8920_v36  ;;  %v9064_v5 = vmax.f32 %v1857_v46, %v1861_v35  ;;  %v2533_v1 = vmul.f32 %v9051_v37, %v2532_v3  ;;  %v9072_v21 = vmul.f32 %v8981_v60, %v8981_v60  ;;  %v11949_v38 = vld [vmem:[#allocation7_spill] sm:$0xff]  ;;  %vm2902_vm15 = vmor %vm2900_vm11, %vm2901_vm10 }
 0x2aa   :  { %v9066_v43 = vmax.f32 %v1858_v15, %v1862_v56  ;;  %v2173_v18 = vmul.f32 %v8994_v11, %v2172_v17  ;;  %v2897_v58 = vmul.f32 0.5, %v2896_v14  ;;  %v9077_v59 = vmul.f32 %v8992_v40, %v8992_v40  ;;  %v11955_v56 = vld [vmem:[#allocation92_spill] sm:$0xff]  ;;  %v11956_v17 = vld [vmem:[#allocation94_spill] sm:$0xff] }
 0x2ab   :  { %2525 = vadd.xlane.f32.xlu1 %v2524_v48  ;;  %v1792_v36 = vadd.f32 %v1776_v30, %v9007_v33  ;;  %v2534_v15 = vmul.f32 0.5, %v2533_v1  ;;  %v9086_v13 = vsub.f32 %v11949_v38, %v8835_v22  ;;  %v9090_v49 = vsub.f32 %v11950_v29, %v8835_v22  ;;  %v11957_v48 = vld [vmem:[#allocation95_spill] sm:$0xff] }
 0x2ac   :  { %v9094_v42 = vsub.f32 %v11951_v2, %v8835_v22  ;;  %v2177_v33 = vsel %vm2176_vm12, %v8994_v11, %v2173_v18  ;;  %v2898_v30 = vsub.f32 1.5, %v2897_v58  ;;  %vm2538_vm13 = vweird.f32 %v9051_v37  ;;  %v11958_v11 = vld [vmem:[#allocation96_spill] sm:$0xff]  ;;  %v11959_v58 = vld [vmem:[#allocation55_spill] sm:$0xff] }
 0x2ad   :  { %v1793_v8 = vadd.f32 %v1792_v36, %v9020_v12  ;;  %v9101_v32 = vsub.f32 %v11952_v52, %v8835_v22  ;;  %v2188_v46 = vmul.f32 %v2177_v33, %v11953_v39  ;;  %v2189_v35 = vmul.f32 %v2177_v33, %v11954_v50  ;;  %vm2539_vm5 = vmor %vm2537_vm14, %vm2538_vm13 }
 0x2ae   :  { %v2190_v3 = vmul.f32 %v2177_v33, %v11955_v56  ;;  %v2191_v14 = vmul.f32 %v2177_v33, %v11956_v17  ;;  %v2192_v1 = vmul.f32 %v2177_v33, %v11957_v48  ;;  %v2193_v18 = vmul.f32 %v2177_v33, %v11958_v11  ;;  %v5596_v11 = vld [vmem:[%s11453_s3 + $0x270] sm:$0xff] }
 0x2af   :  { %v2194_v38 = vmul.f32 %v2177_v33, %v11959_v58  ;;  %v2195_v12 = vmul.f32 %v2177_v33, %v7882_v45  ;;  %v2204_v36 = vmax.f32 %v2188_v46, 0.0  ;;  %v2205_v29 = vmax.f32 %v2189_v35, 0.0  ;;  %v5612_v45 = vld [vmem:[%s11453_s3 + $0x2f0] sm:$0xff]  ;;  %3284 = vmatpush.msrb.mxu0 %v5596_v11  ;;  %v11965_v11 = vld [vmem:[#allocation77_spill] sm:$0xff] }
 0x2b0   :  { %v2206_v2 = vmax.f32 %v2190_v3, 0.0  ;;  %v2207_v52 = vmax.f32 %v2191_v14, 0.0  ;;  %v2208_v39 = vmax.f32 %v2192_v1, 0.0  ;;  %v2209_v50 = vmax.f32 %v2193_v18, 0.0  ;;  %v5628_v33 = vld [vmem:[%s11453_s3 + $0x370] sm:$0xff]  ;;  %v11961_v18 = vld [vmem:[#allocation14_spill] sm:$0xff]  ;;  %3304 = vmatpush.msrb.mxu1 %v5612_v45 }
 0x2b1   :  { %v2210_v40 = vmax.f32 %v2194_v38, 0.0  ;;  %v2211_v56 = vmax.f32 %v2195_v12, 0.0  ;;  %v2899_v48 = vmul.f32 %v9045_v26, %v2898_v30  ;;  %v2535_v23 = vsub.f32 1.5, %v2534_v15  ;;  %v11960_v30 = vld [vmem:[#allocation13_spill] sm:$0xff]  ;;  %v5644_v14 = vld [vmem:[%s11453_s3 + $0x3f0] sm:$0xff]  ;;  %v11962_v38 = vld [vmem:[#allocation43_spill] sm:$0xff]  ;;  %3400 = vmatpush.msrb.mxu2 %v5628_v33 }
 0x2b2   :  { %v2220_v60 = vmax.f32 %v2204_v36, %v2206_v2  ;;  %v2221_v17 = vmax.f32 %v2205_v29, %v2207_v52  ;;  %v1794_v15 = vadd.f32 %v1793_v8, %v9031_v62  ;;  %v9129_v3 = vsub.f32 %v11960_v30, %v8835_v22  ;;  %v5595_v62 = vld [vmem:[%s11453_s3 + $0x268] sm:$0xff]  ;;  %v11963_v36 = vld [vmem:[#allocation24_spill] sm:$0xff]  ;;  %v11964_v52 = vld [vmem:[#allocation25_spill] sm:$0xff]  ;;  %3420 = vmatpush.msrb.mxu3 %v5644_v14 }
 0x2b3   :  { %v2224_v46 = vmax.f32 %v2208_v39, %v2210_v40  ;;  %v2225_v35 = vmax.f32 %v2209_v50, %v2211_v56  ;;  %v2903_v1 = vsel %vm2902_vm15, %v9045_v26, %v2899_v48  ;;  %v2536_v40 = vmul.f32 %v9051_v37, %v2535_v23  ;;  %v5611_v8 = vld [vmem:[%s11453_s3 + $0x2e8] sm:$0xff]  ;;  %v5610_v48 = vld [vmem:[%s11453_s3 + $0x2e0] sm:$0xff]  ;;  %3285 = vmatpush.msrb.mxu0 %v5595_v62 }
 0x2b4   :  { %v9138_v58 = vsub.f32 %v11961_v18, %v8835_v22  ;;  %v9142_v55 = vsub.f32 %v8177_v47, %v8835_v22  ;;  %v2914_v12 = vmul.f32 %v2903_v1, %v11962_v38  ;;  %v2915_v29 = vmul.f32 %v2903_v1, %v11963_v36  ;;  %v5627_v47 = vld [vmem:[%s11453_s3 + $0x368] sm:$0xff]  ;;  %3305 = vmatpush.msrb.mxu1 %v5611_v8  ;;  %v5593_v38 = vld [vmem:[%s11453_s3 + $0x258] sm:$0xff] }
 0x2b5   :  { %v9150_v26 = vmax.f32 %v2220_v60, %v2224_v46  ;;  %v9152_v23 = vmax.f32 %v2221_v17, %v2225_v35  ;;  %v5643_v2 = vld [vmem:[%s11453_s3 + $0x3e8] sm:$0xff]  ;;  %v2916_v39 = vmul.f32 %v2903_v1, %v11964_v52  ;;  %v2917_v60 = vmul.f32 %v2903_v1, %v8180_v24  ;;  %v5594_v17 = vld [vmem:[%s11453_s3 + $0x260] sm:$0xff]  ;;  %3401 = vmatpush.msrb.mxu2 %v5627_v47  ;;  %v11966_v36 = vld [vmem:[#allocation57_spill] sm:$0xff] }
 0x2b6   :  { %v2918_v50 = vmul.f32 %v2903_v1, %v8201_v27  ;;  %v2919_v56 = vmul.f32 %v2903_v1, %v8213_v28  ;;  %v2920_v45 = vmul.f32 %v2903_v1, %v11965_v11  ;;  %v2921_v33 = vmul.f32 %v2903_v1, %v8240_v61  ;;  %v5626_v27 = vld [vmem:[%s11453_s3 + $0x360] sm:$0xff]  ;;  %3421 = vmatpush.msrb.mxu3 %v5643_v2  ;;  %v11967_v47 = vld [vmem:[#allocation20_spill] sm:$0xff]  ;;  %v5609_v52 = vld [vmem:[%s11453_s3 + $0x2d8] sm:$0xff] }
 0x2b7   :  { %v2930_v46 = vmax.f32 %v2914_v12, 0.0  ;;  %v2931_v35 = vmax.f32 %v2915_v29, 0.0  ;;  %v2932_v28 = vmax.f32 %v2916_v39, 0.0  ;;  %v2933_v24 = vmax.f32 %v2917_v60, 0.0  ;;  %v5642_v61 = vld [vmem:[%s11453_s3 + $0x3e0] sm:$0xff]  ;;  %3286 = vmatpush.msrb.mxu0 %v5594_v17  ;;  %3306 = vmatpush.msrb.mxu1 %v5610_v48  ;;  %v5592_v17 = vld [vmem:[%s11453_s3 + $0x250] sm:$0xff] }
 0x2b8   :  { %v2934_v30 = vmax.f32 %v2918_v50, 0.0  ;;  %v2935_v14 = vmax.f32 %v2919_v56, 0.0  ;;  %v2936_v1 = vmax.f32 %v2920_v45, 0.0  ;;  %v2937_v18 = vmax.f32 %v2921_v33, 0.0  ;;  %3402 = vmatpush.msrb.mxu2 %v5626_v27  ;;  %v11969_v60 = vld [vmem:[#allocation42_spill] sm:$0xff]  ;;  %3422 = vmatpush.msrb.mxu3 %v5642_v61  ;;  %v5641_v56 = vld [vmem:[%s11453_s3 + $0x3d8] sm:$0xff] }
 0x2b9   :  { %v2540_v62 = vsel %vm2539_vm5, %v9051_v37, %v2536_v40  ;;  %v1795_v8 = vadd.f32 %v1794_v15, %v9038_v20  ;;  %v2946_v10 = vmax.f32 %v2930_v46, %v2932_v28  ;;  %v2947_v12 = vmax.f32 %v2931_v35, %v2933_v24  ;;  %v5625_v37 = vld [vmem:[%s11453_s3 + $0x358] sm:$0xff]  ;;  %v11968_v40 = vld [vmem:[#allocation22_spill] sm:$0xff]  ;;  %v11970_v48 = vld [vmem:[#allocation15_spill] sm:$0xff]  ;;  %3287 = vmatpush.msrb.mxu0 %v5593_v38 }
 0x2ba   :  { %v2551_v29 = vmul.f32 %v2540_v62, %v11966_v36  ;;  %v2552_v2 = vmul.f32 %v2540_v62, %v11967_v47  ;;  %v2950_v20 = vmax.f32 %v2934_v30, %v2936_v1  ;;  %v2951_v15 = vmax.f32 %v2935_v14, %v2937_v18  ;;  %v11971_v45 = vld [vmem:[#allocation69_spill] sm:$0xff]  ;;  %v11972_v46 = vld [vmem:[#allocation71_spill] sm:$0xff]  ;;  %v11973_v27 = vld [vmem:[#allocation76_spill] sm:$0xff]  ;;  %3307 = vmatpush.msrb.mxu1 %v5609_v52 }
 0x2bb   :  { %v2553_v39 = vmul.f32 %v2540_v62, %v11968_v40  ;;  %v2554_v50 = vmul.f32 %v2540_v62, %v11969_v60  ;;  %v2555_v11 = vmul.f32 %v2540_v62, %v11970_v48  ;;  %v2556_v33 = vmul.f32 %v2540_v62, %v11971_v45  ;;  %v5608_v24 = vld [vmem:[%s11453_s3 + $0x2d0] sm:$0xff]  ;;  %3403 = vmatpush.msrb.mxu2 %v5625_v37  ;;  %v5607_v37 = vld [vmem:[%s11453_s3 + $0x2c8] sm:$0xff]  ;;  %v2837_v48 = vpop.xlane.xlu0 %2836  ;;  %v5590_v45 = vld [vmem:[%s11453_s3 + $0x240] sm:$0xff] }
 0x2bc   :  { %v2557_v35 = vmul.f32 %v2540_v62, %v11972_v46  ;;  %v2558_v28 = vmul.f32 %v2540_v62, %v11973_v27  ;;  %v5624_v30 = vld [vmem:[%s11453_s3 + $0x350] sm:$0xff]  ;;  %v9215_v14 = vmax.f32 %v2946_v10, %v2950_v20  ;;  %v9217_v61 = vmax.f32 %v2947_v12, %v2951_v15  ;;  %3423 = vmatpush.msrb.mxu3 %v5641_v56  ;;  %v5591_v10 = vld [vmem:[%s11453_s3 + $0x248] sm:$0xff]  ;;  %v5606_v27 = vld [vmem:[%s11453_s3 + $0x2c0] sm:$0xff] }
 0x2bd   :  { %v2567_v1 = vmax.f32 %v2551_v29, 0.0  ;;  %v2568_v18 = vmax.f32 %v2552_v2, 0.0  ;;  %v5640_v62 = vld [vmem:[%s11453_s3 + $0x3d0] sm:$0xff]  ;;  %v2569_v38 = vmax.f32 %v2553_v39, 0.0  ;;  %v2570_v36 = vmax.f32 %v2554_v50, 0.0  ;;  %3288 = vmatpush.msrb.mxu0 %v5592_v17  ;;  %3308 = vmatpush.msrb.mxu1 %v5608_v24 }
 0x2be   :  { %v2571_v47 = vmax.f32 %v2555_v11, 0.0  ;;  %v2572_v40 = vmax.f32 %v2556_v33, 0.0  ;;  %v2573_v12 = vmax.f32 %v2557_v35, 0.0  ;;  %v2574_v20 = vmax.f32 %v2558_v28, 0.0  ;;  %v11974_v2 = vld [vmem:[#allocation44_spill] sm:$0xff]  ;;  %3404 = vmatpush.msrb.mxu2 %v5624_v30  ;;  %3424 = vmatpush.msrb.mxu3 %v5640_v62  ;;  %v5639_v11 = vld [vmem:[%s11453_s3 + $0x3c8] sm:$0xff] }
 0x2bf   :  { %v1796_v29 = vadd.f32 %v1795_v8, %v9059_v6  ;;  %v9228_v52 = vsub.f32 %v11974_v2, %v8835_v22  ;;  %v2583_v15 = vmax.f32 %v2567_v1, %v2569_v38  ;;  %v2584_v39 = vmax.f32 %v2568_v18, %v2570_v36  ;;  %v5623_v22 = vld [vmem:[%s11453_s3 + $0x348] sm:$0xff]  ;;  %3289 = vmatpush.msrb.mxu0 %v5591_v10  ;;  %v5622_v18 = vld [vmem:[%s11453_s3 + $0x340] sm:$0xff] }
 0x2c0   :  { %v686_v60 = vmul.f32 %v9086_v13, %v9086_v13  ;;  %v687_v50 = vmul.f32 %v9090_v49, %v9090_v49  ;;  %v2587_v6 = vmax.f32 %v2571_v47, %v2573_v12  ;;  %v2588_v8 = vmax.f32 %v2572_v40, %v2574_v20  ;;  %3309 = vmatpush.msrb.mxu1 %v5607_v37  ;;  %v5638_v62 = vld [vmem:[%s11453_s3 + $0x3c0] sm:$0xff]  ;;  %v5605_v47 = vld [vmem:[%s11453_s3 + $0x2b8] sm:$0xff] }
 0x2c1   :  { %v1797_v56 = vadd.f32 %v1796_v29, %v9072_v21  ;;  %v688_v17 = vmul.f32 %v9094_v42, %v9094_v42  ;;  %v689_v33 = vmul.f32 %v9101_v32, %v9101_v32  ;;  %v690_v46 = vmul.f32 %v9129_v3, %v9129_v3  ;;  %3405 = vmatpush.msrb.mxu2 %v5623_v22  ;;  %v11975_v40 = vld [vmem:[#allocation41_spill] sm:$0xff]  ;;  %v11977_v29 = vld [vmem:[#allocation23_spill] sm:$0xff]  ;;  %v11979_v37 = vld [vmem:[#allocation58_spill] sm:$0xff] }
 0x2c2   :  { %v9255_v21 = vmul.f32 %v9138_v58, %v9138_v58  ;;  %v9259_v35 = vmul.f32 %v9142_v55, %v9142_v55  ;;  %v9264_v28 = vmax.f32 %v2583_v15, %v2587_v6  ;;  %v9266_v24 = vmax.f32 %v2584_v39, %v2588_v8  ;;  %3425 = vmatpush.msrb.mxu3 %v5639_v11  ;;  %v5621_v12 = vld [vmem:[%s11453_s3 + $0x338] sm:$0xff]  ;;  %v11981_v39 = vld [vmem:[#allocation16_spill] sm:$0xff] }
 0x2c3   :  { %v1798_v30 = vadd.f32 %v1797_v56, %v9077_v59  ;;  %v9271_v1 = vmul.f32 %v9228_v52, %v9228_v52  ;;  %v703_v38 = vadd.f32 %v687_v50, %v686_v60  ;;  %v9280_v36 = vmul.f32 %v2837_v48, %v7544_v34  ;;  %3290 = vmatpush.msrb.mxu0 %v5590_v45  ;;  %v5589_v59 = vld [vmem:[%s11453_s3 + $0x238] sm:$0xff]  ;;  %v5588_v22 = vld [vmem:[%s11453_s3 + $0x230] sm:$0xff] }
 0x2c4   :  { %v9290_v10 = vsub.f32 %v11975_v40, %v9026_v63  ;;  %3310 = vmatpush.msrb.mxu1 %v5606_v27  ;;  %v5637_v20 = vld [vmem:[%s11453_s3 + $0x3b8] sm:$0xff]  ;;  %v9300_v2 = vsub.f32 %v11977_v29, %v9026_v63  ;;  %v9304_v15 = vsub.f32 %v11979_v37, %v9026_v63  ;;  %v9308_v60 = vsub.f32 %v11981_v39, %v9026_v63  ;;  %v5604_v6 = vld [vmem:[%s11453_s3 + $0x2b0] sm:$0xff]  ;;  %v11987_v27 = vld [vmem:[#allocation62_spill] sm:$0xff] }
 0x2c5   :  { %1799 = vadd.xlane.f32.xlu2 %v1798_v30  ;;  %v704_v50 = vadd.f32 %v703_v38, %v688_v17  ;;  %3406 = vmatpush.msrb.mxu2 %v5622_v18  ;;  %v11983_v8 = vld [vmem:[#allocation68_spill] sm:$0xff]  ;;  %v11985_v48 = vld [vmem:[#allocation45_spill] sm:$0xff]  ;;  %v9332_v30 = vsub.f32 %v11987_v27, %v9026_v63  ;;  %v5587_v40 = vld [vmem:[%s11453_s3 + $0x228] sm:$0xff]  ;;  %vm3016_vm7 = vcmask 1046528  }
 0x2c6   :  { %11976 = vst [vmem:[#allocation40_spill] sm:$0xff] %v9290_v10  ;;  %3426 = vmatpush.msrb.mxu3 %v5638_v62  ;;  %v9318_v56 = vsub.f32 %v11983_v8, %v9026_v63  ;;  %v9322_v11 = vsub.f32 %v11985_v48, %v9026_v63  ;;  %3291 = vmatpush.msrb.mxu0 %v5589_v59  ;;  %v5620_v17 = vld [vmem:[%s11453_s3 + $0x330] sm:$0xff]  ;;  %v5603_v29 = vld [vmem:[%s11453_s3 + $0x2a8] sm:$0xff]  ;;  %v5602_v59 = vld [vmem:[%s11453_s3 + $0x2a0] sm:$0xff] }
 0x2c7   :  { %11978 = vst [vmem:[#allocation83_spill] sm:$0xff] %v9300_v2  ;;  %3311 = vmatpush.msrb.mxu1 %v5605_v47  ;;  %v5636_v45 = vld [vmem:[%s11453_s3 + $0x3b0] sm:$0xff]  ;;  %v2138_v38 = vmul.f32 %v9290_v10, %v9290_v10  ;;  %v705_v47 = vadd.f32 %v704_v50, %v689_v33  ;;  %3407 = vmatpush.msrb.mxu2 %v5621_v12  ;;  %v5619_v33 = vld [vmem:[%s11453_s3 + $0x328] sm:$0xff] }
 0x2c8   :  { %11980 = vst [vmem:[#allocation84_spill] sm:$0xff] %v9304_v15  ;;  %v11989_v18 = vld [vmem:[#allocation48_spill] sm:$0xff]  ;;  %3427 = vmatpush.msrb.mxu3 %v5637_v20  ;;  %v2140_v37 = vmul.f32 %v9304_v15, %v9304_v15  ;;  %3292 = vmatpush.msrb.mxu0 %v5588_v22  ;;  %v5635_v12 = vld [vmem:[%s11453_s3 + $0x3a8] sm:$0xff]  ;;  %v2141_v20 = vmul.f32 %v9308_v60, %v9308_v60  ;;  %v11991_v22 = vld [vmem:[#allocation70_spill] sm:$0xff] }
 0x2c9   :  { %11982 = vst [vmem:[#allocation85_spill] sm:$0xff] %v9308_v60  ;;  %v9336_v62 = vsub.f32 %v11989_v18, %v9026_v63  ;;  %v2139_v63 = vmul.f32 %v9300_v2, %v9300_v2  ;;  %3312 = vmatpush.msrb.mxu1 %v5604_v6  ;;  %v2142_v50 = vmul.f32 %v9318_v56, %v9318_v56  ;;  %v5586_v18 = vld [vmem:[%s11453_s3 + $0x220] sm:$0xff] }
 0x2ca   :  { %11984 = vst [vmem:[#allocation86_spill] sm:$0xff] %v9318_v56  ;;  %v9364_v8 = vmul.f32 %v9322_v11, %v9322_v11  ;;  %v706_v6 = vadd.f32 %v705_v47, %v690_v46  ;;  %3408 = vmatpush.msrb.mxu2 %v5620_v17  ;;  %3428 = vmatpush.msrb.mxu3 %v5636_v45  ;;  %v5618_v45 = vld [vmem:[%s11453_s3 + $0x320] sm:$0xff] }
 0x2cb   :  { %11986 = vst [vmem:[#allocation87_spill] sm:$0xff] %v9322_v11  ;;  %v9369_v48 = vmul.f32 %v9332_v30, %v9332_v30  ;;  %v9373_v27 = vmul.f32 %v9336_v62, %v9336_v62  ;;  %3293 = vmatpush.msrb.mxu0 %v5587_v40  ;;  %3313 = vmatpush.msrb.mxu1 %v5603_v29  ;;  %v5634_v47 = vld [vmem:[%s11453_s3 + $0x3a0] sm:$0xff]  ;;  %v5585_v29 = vld [vmem:[%s11453_s3 + $0x218] sm:$0xff] }
 0x2cc   :  { %11988 = vst [vmem:[#allocation88_spill] sm:$0xff] %v9332_v30  ;;  %v2155_v17 = vadd.f32 %v2139_v63, %v2138_v38  ;;  %v9390_v39 = vsub.f32 %v11991_v22, %v9280_v36  ;;  %v707_v38 = vadd.f32 %v706_v6, %v9255_v21  ;;  %3409 = vmatpush.msrb.mxu2 %v5619_v33  ;;  %v5601_v63 = vld [vmem:[%s11453_s3 + $0x298] sm:$0xff]  ;;  %v3066_v21 = vrot.slane %v9066_v43, 5  ;;  %v12004_v60 = vld [vmem:[#allocation50_spill] sm:$0xff] }
 0x2cd   :  { %11990 = vst [vmem:[#allocation91_spill] sm:$0xff] %v9336_v62  ;;  %v11993_v62 = vld [vmem:[#allocation60_spill] sm:$0xff]  ;;  %3429 = vmatpush.msrb.mxu3 %v5635_v12  ;;  %v11995_v22 = vld [vmem:[#allocation61_spill] sm:$0xff]  ;;  %3294 = vmatpush.msrb.mxu0 %v5586_v18  ;;  %v12003_v18 = vld [vmem:[#allocation63_spill] sm:$0xff]  ;;  %v9435_v15 = vsub.f32 %v12004_v60, %v9280_v36  ;;  %v3078_v60 = vrot.slane %v9217_v61, 2 }
 0x2ce   :  { %11992 = vst [vmem:[#allocation93_spill] sm:$0xff] %v9390_v39  ;;  %v9394_v30 = vsub.f32 %v11993_v62, %v9280_v36  ;;  %v9406_v46 = vsub.f32 %v11995_v22, %v9280_v36  ;;  %v11997_v62 = vld [vmem:[#allocation17_spill] sm:$0xff]  ;;  %v2156_v33 = vadd.f32 %v2155_v17, %v2140_v37  ;;  %3314 = vmatpush.msrb.mxu1 %v5602_v59  ;;  %v11999_v22 = vld [vmem:[#allocation46_spill] sm:$0xff]  ;;  %v3070_v37 = vrot.slane %v9152_v23, 4 }
 0x2cf   :  { %v9410_v11 = vsub.f32 %v11997_v62, %v9280_v36  ;;  %v5617_v12 = vld [vmem:[%s11453_s3 + $0x318] sm:$0xff]  ;;  %v9421_v40 = vsub.f32 %v11999_v22, %v9280_v36  ;;  %v12001_v62 = vld [vmem:[#allocation78_spill] sm:$0xff]  ;;  %v708_v59 = vadd.f32 %v707_v38, %v9259_v35  ;;  %3410 = vmatpush.msrb.mxu2 %v5618_v45  ;;  %3430 = vmatpush.msrb.mxu3 %v5634_v47  ;;  %v5584_v22 = vld [vmem:[%s11453_s3 + $0x210] sm:$0xff] }
 0x2d0   :  { %11994 = vst [vmem:[#allocation7_spill] sm:$0xff] %v9394_v30  ;;  %v5633_v6 = vld [vmem:[%s11453_s3 + $0x398] sm:$0xff]  ;;  %v9425_v56 = vsub.f32 %v12001_v62, %v9280_v36  ;;  %v9431_v17 = vsub.f32 %v12003_v18, %v9280_v36  ;;  %v3074_v62 = vrot.slane %v9266_v24, 3  ;;  %v2157_v2 = vadd.f32 %v2156_v33, %v2141_v20  ;;  %3295 = vmatpush.msrb.mxu0 %v5585_v29  ;;  %v5600_v36 = vld [vmem:[%s11453_s3 + $0x290] sm:$0xff] }
 0x2d1   :  { %11996 = vst [vmem:[#allocation8_spill] sm:$0xff] %v9406_v46  ;;  %3315 = vmatpush.msrb.mxu1 %v5601_v63  ;;  %v2864_v35 = vmul.f32 %v9390_v39, %v9390_v39  ;;  %v2865_v45 = vmul.f32 %v9394_v30, %v9394_v30  ;;  %v709_v47 = vadd.f32 %v708_v59, %v9271_v1  ;;  %v5616_v38 = vld [vmem:[%s11453_s3 + $0x310] sm:$0xff]  ;;  %v2978_v63 = vrot.slane %v9064_v5, 4  ;;  %v5599_v59 = vld [vmem:[%s11453_s3 + $0x288] sm:$0xff] }
 0x2d2   :  { %11998 = vst [vmem:[#allocation54_spill] sm:$0xff] %v9410_v11  ;;  %3411 = vmatpush.msrb.mxu2 %v5617_v12  ;;  %3431 = vmatpush.msrb.mxu3 %v5633_v6  ;;  %v2866_v20 = vmul.f32 %v9406_v46, %v9406_v46  ;;  %v5632_v29 = vld [vmem:[%s11453_s3 + $0x390] sm:$0xff]  ;;  %v2984_v33 = vrot.slane %v9150_v26, 3  ;;  %v2158_v18 = vadd.f32 %v2157_v2, %v2142_v50  ;;  %v5583_v6 = vld [vmem:[%s11453_s3 + $0x208] sm:$0xff]  ;;  %v2990_v46 = vrot.slane %v9264_v28, 2 }
 0x2d3   :  { %12000 = vst [vmem:[#allocation21_spill] sm:$0xff] %v9421_v40  ;;  %v2867_v1 = vmul.f32 %v9410_v11, %v9410_v11  ;;  %v2868_v12 = vmul.f32 %v9421_v40, %v9421_v40  ;;  %3296 = vmatpush.msrb.mxu0 %v5584_v22  ;;  %710 = vadd.xlane.f32.xlu0 %v709_v47  ;;  %v5615_v22 = vld [vmem:[%s11453_s3 + $0x308] sm:$0xff]  ;;  %v12005_v11 = vrot.slane %v9064_v5, 5  ;;  %v2996_v47 = vrot.slane %v9215_v14, 1 }
 0x2d4   :  { %12002 = vst [vmem:[#allocation89_spill] sm:$0xff] %v9425_v56  ;;  %v2869_v2 = vmul.f32 %v9425_v56, %v9425_v56  ;;  %v2881_v50 = vadd.f32 %v2865_v45, %v2864_v35  ;;  %3316 = vmatpush.msrb.mxu1 %v5600_v36  ;;  %v5631_v40 = vld [vmem:[%s11453_s3 + $0x388] sm:$0xff]  ;;  %v2159_v39 = vadd.f32 %v2158_v18, %v9364_v8  ;;  %v5582_v35 = vld [vmem:[%s11453_s3 + $0x200] sm:$0xff]  ;;  %v12006_v36 = vrot.slane %v9150_v26, 4 }
 0x2d5   :  { %v3087_v30 = vsel %vm3009_vm6, %v8611_v0, %v12005_v11  ;;  %3412 = vmatpush.msrb.mxu2 %v5616_v38  ;;  %3432 = vmatpush.msrb.mxu3 %v5632_v29  ;;  %v5598_v45 = vld [vmem:[%s11453_s3 + $0x280] sm:$0xff]  ;;  %v3088_v0 = vsel %vm3009_vm6, %v8615_v53, %v3066_v21  ;;  %v2979_v11 = vrot.slane %v9066_v43, 4  ;;  %v12007_v18 = vrot.slane %v9264_v28, 3 }
 0x2d6   :  { %v3089_v56 = vsel %vm132_vm0, %v3087_v30, %v12006_v36  ;;  %v2882_v8 = vadd.f32 %v2881_v50, %v2866_v20  ;;  %3297 = vmatpush.msrb.mxu0 %v5583_v6  ;;  %3317 = vmatpush.msrb.mxu1 %v5599_v59  ;;  %v5614_v38 = vld [vmem:[%s11453_s3 + $0x300] sm:$0xff]  ;;  %v3090_v36 = vsel %vm132_vm0, %v3088_v0, %v3070_v37  ;;  %v2985_v53 = vrot.slane %v9152_v23, 3 }
 0x2d7   :  { %v5630_v29 = vld [vmem:[%s11453_s3 + $0x380] sm:$0xff]  ;;  %v3091_v30 = vsel %vm133_vm1, %v3089_v56, %v12007_v18  ;;  %v2160_v21 = vadd.f32 %v2159_v39, %v9369_v48  ;;  %3413 = vmatpush.msrb.mxu2 %v5615_v22  ;;  %3433 = vmatpush.msrb.mxu3 %v5631_v40  ;;  %v12008_v20 = vrot.slane %v9215_v14, 2  ;;  %v3092_v59 = vsel %vm133_vm1, %v3090_v36, %v3074_v62  ;;  %v5661_v48 = vld [vmem:[%s11453_s3 + $0x478] sm:$0xff]  ;;  %v5692_v18 = vld [vmem:[%s11453_s3 + $0x570] sm:$0xff] }
 0x2d8   :  { %v2991_v50 = vrot.slane %v9266_v24, 2  ;;  %v2883_v10 = vadd.f32 %v2882_v8, %v2867_v1  ;;  %3298 = vmatpush.msrb.mxu0 %v5582_v35  ;;  %3318 = vmatpush.msrb.mxu1 %v5598_v45  ;;  %v3094_v56 = vsel %vm3016_vm7, %v3092_v59, %v3078_v60  ;;  %v3010_v37 = vsel %vm3009_vm6, %v8619_v54, %v2978_v63  ;;  %v5677_v40 = vld [vmem:[%s11453_s3 + $0x4f8] sm:$0xff] }
 0x2d9   :  { %v3093_v6 = vsel %vm3016_vm7, %v3091_v30, %v12008_v20  ;;  %v2997_v39 = vrot.slane %v9217_v61, 1  ;;  %v2161_v62 = vadd.f32 %v2160_v21, %v9373_v27  ;;  %3414 = vmatpush.msrb.mxu2 %v5614_v38  ;;  %3434 = vmatpush.msrb.mxu3 %v5630_v29  ;;  %v3012_v1 = vsel %vm132_vm0, %v3010_v37, %v2984_v33  ;;  %v5693_v27 = vld [vmem:[%s11453_s3 + $0x578] sm:$0xff]  ;;  %v5676_v29 = vld [vmem:[%s11453_s3 + $0x4f0] sm:$0xff] }
 0x2da   :  { %v3011_v60 = vsel %vm3009_vm6, %v8623_v16, %v2979_v11  ;;  %v3220_v54 = vrot.slane %v9064_v5, 6  ;;  %v2884_v63 = vadd.f32 %v2883_v10, %v2868_v12  ;;  %3144 = vmatmul.f32.vlgmr.msra.gmra.mxu0 %v3093_v6  ;;  %3164 = vmatmul.f32.vlgmr.msra.gmra.mxu1 %v3094_v56  ;;  %v3014_v22 = vsel %vm133_vm1, %v3012_v1, %v2990_v46  ;;  %v5709_v16 = vld [vmem:[%s11453_s3 + $0x5f8] sm:$0xff]  ;;  %v5660_v10 = vld [vmem:[%s11453_s3 + $0x470] sm:$0xff] }
 0x2db   :  { %v3013_v35 = vsel %vm132_vm0, %v3011_v60, %v2985_v53  ;;  %v3224_v45 = vrot.slane %v9150_v26, 5  ;;  %v3017_v33 = vsel %vm3016_vm7, %v3014_v22, %v2996_v47  ;;  %3515 = vmatpush.msra.mxu0 %v5661_v48  ;;  %3535 = vmatpush.msra.mxu1 %v5677_v40  ;;  %v3228_v46 = vrot.slane %v9264_v28, 4  ;;  %v5658_v60 = vld [vmem:[%s11453_s3 + $0x460] sm:$0xff] }
 0x2dc   :  { %v3015_v0 = vsel %vm133_vm1, %v3013_v35, %v2991_v50  ;;  %v12009_v12 = vrot.slane %v8501_v4, 7  ;;  %2162 = vadd.xlane.f32.xlu0 %v2161_v62  ;;  %v2870_v47 = vmul.f32 %v9431_v17, %v9431_v17  ;;  %v2885_v8 = vadd.f32 %v2884_v63, %v2869_v2  ;;  %3184 = vmatmul.f32.vlgmr.msra.gmra.mxu2 %v3017_v33  ;;  %v5659_v2 = vld [vmem:[%s11453_s3 + $0x468] sm:$0xff]  ;;  %v5690_v35 = vld [vmem:[%s11453_s3 + $0x560] sm:$0xff] }
 0x2dd   :  { %v3018_v38 = vsel %vm3016_vm7, %v3015_v0, %v2997_v39  ;;  %v3221_v30 = vrot.slane %v9066_v43, 6  ;;  %3631 = vmatpush.msra.mxu2 %v5693_v27  ;;  %v3242_v36 = vsel %vm3009_vm6, %v8637_v9, %v3220_v54  ;;  %v3225_v53 = vrot.slane %v9152_v23, 5  ;;  %3516 = vmatpush.msra.mxu0 %v5660_v10  ;;  %v5675_v50 = vld [vmem:[%s11453_s3 + $0x4e8] sm:$0xff]  ;;  %v5674_v54 = vld [vmem:[%s11453_s3 + $0x4e0] sm:$0xff] }
 0x2de   :  { %v3241_v11 = vsel %vm3006_vm4, %v8443_v31, %v12009_v12  ;;  %3204 = vmatmul.f32.vlgmr.msra.gmra.mxu3 %v3018_v38  ;;  %v5708_v31 = vld [vmem:[%s11453_s3 + $0x5f0] sm:$0xff]  ;;  %v3229_v21 = vrot.slane %v9266_v24, 4  ;;  %v3357_v20 = vsel %vm3006_vm4, %v8467_v57, %v8501_v4  ;;  %v2871_v6 = vmul.f32 %v9435_v15, %v9435_v15  ;;  %v5691_v9 = vld [vmem:[%s11453_s3 + $0x568] sm:$0xff]  ;;  %3536 = vmatpush.msra.mxu1 %v5676_v29  ;;  %v5706_v27 = vld [vmem:[%s11453_s3 + $0x5e0] sm:$0xff] }
 0x2df   :  { %v2886_v59 = vadd.f32 %v2885_v8, %v2870_v47  ;;  %3651 = vmatpush.msra.mxu3 %v5709_v16  ;;  %v3244_v56 = vsel %vm132_vm0, %v3242_v36, %v3224_v45  ;;  %v3336_v37 = vrot.slane %v9064_v5, 7  ;;  %3632 = vmatpush.msra.mxu2 %v5692_v18  ;;  %v5707_v57 = vld [vmem:[%s11453_s3 + $0x5e8] sm:$0xff]  ;;  %v3243_v48 = vsel %vm3009_vm6, %v3241_v11, %v3221_v30  ;;  %v5657_v8 = vld [vmem:[%s11453_s3 + $0x458] sm:$0xff] }
 0x2e0   :  { %v3246_v39 = vsel %vm133_vm1, %v3244_v56, %v3228_v46  ;;  %v3340_v40 = vrot.slane %v9150_v26, 6  ;;  %v3344_v62 = vrot.slane %v9264_v28, 5  ;;  %3517 = vmatpush.msra.mxu0 %v5659_v2  ;;  %v3245_v63 = vsel %vm132_vm0, %v3243_v48, %v3225_v53  ;;  %3537 = vmatpush.msra.mxu1 %v5675_v50  ;;  %v5689_v53 = vld [vmem:[%s11453_s3 + $0x558] sm:$0xff]  ;;  %v5688_v50 = vld [vmem:[%s11453_s3 + $0x550] sm:$0xff]  ;;  %v5655_v56 = vld [vmem:[%s11453_s3 + $0x448] sm:$0xff] }
 0x2e1   :  { %v2887_v1 = vadd.f32 %v2886_v59, %v2871_v6  ;;  %3652 = vmatpush.msra.mxu3 %v5708_v31  ;;  %v3358_v22 = vsel %vm3009_vm6, %v8607_v44, %v3336_v37  ;;  %3633 = vmatpush.msra.mxu2 %v5691_v9  ;;  %v3247_v45 = vsel %vm133_vm1, %v3245_v63, %v3229_v21  ;;  %v3337_v0 = vrot.slane %v9066_v43, 7  ;;  %v5673_v31 = vld [vmem:[%s11453_s3 + $0x4d8] sm:$0xff]  ;;  %v5656_v6 = vld [vmem:[%s11453_s3 + $0x450] sm:$0xff]  ;;  %v5671_v37 = vld [vmem:[%s11453_s3 + $0x4c8] sm:$0xff] }
 0x2e2   :  { %v3360_v33 = vsel %vm132_vm0, %v3358_v22, %v3340_v40  ;;  %v3341_v16 = vrot.slane %v9152_v23, 6  ;;  %v3232_v44 = vrot.slane %v9215_v14, 3  ;;  %v3233_v10 = vrot.slane %v9217_v61, 3  ;;  %3518 = vmatpush.msra.mxu0 %v5658_v60  ;;  %3538 = vmatpush.msra.mxu1 %v5674_v54  ;;  %v5705_v21 = vld [vmem:[%s11453_s3 + $0x5d8] sm:$0xff]  ;;  %v5672_v59 = vld [vmem:[%s11453_s3 + $0x4d0] sm:$0xff]  ;;  %v5686_v54 = vld [vmem:[%s11453_s3 + $0x540] sm:$0xff] }
 0x2e3   :  { %2888 = vadd.xlane.f32.xlu2 %v2887_v1  ;;  %3653 = vmatpush.msra.mxu3 %v5707_v57  ;;  %v3362_v46 = vsel %vm133_vm1, %v3360_v33, %v3344_v62  ;;  %v3345_v12 = vrot.slane %v9266_v24, 5  ;;  %v3348_v11 = vrot.slane %v9215_v14, 4  ;;  %v3359_v47 = vsel %vm3009_vm6, %v3357_v20, %v3337_v0  ;;  %v5704_v9 = vld [vmem:[%s11453_s3 + $0x5d0] sm:$0xff]  ;;  %v5687_v57 = vld [vmem:[%s11453_s3 + $0x548] sm:$0xff]  ;;  %v5654_v62 = vld [vmem:[%s11453_s3 + $0x440] sm:$0xff] }
 0x2e4   :  { %3634 = vmatpush.msra.mxu2 %v5690_v35  ;;  %v3248_v38 = vsel %vm3016_vm7, %v3246_v39, %v3232_v44  ;;  %v3249_v29 = vsel %vm3016_vm7, %v3247_v45, %v3233_v10  ;;  %v3349_v18 = vrot.slane %v9217_v61, 4  ;;  %v3361_v30 = vsel %vm132_vm0, %v3359_v47, %v3341_v16  ;;  %3519 = vmatpush.msra.mxu0 %v5657_v8  ;;  %v5703_v39 = vld [vmem:[%s11453_s3 + $0x5c8] sm:$0xff]  ;;  %v5670_v1 = vld [vmem:[%s11453_s3 + $0x4c0] sm:$0xff]  ;;  %v5669_v45 = vld [vmem:[%s11453_s3 + $0x4b8] sm:$0xff] }
 0x2e5   :  { %3654 = vmatpush.msra.mxu3 %v5706_v27  ;;  %3299 = vmatmul.f32.vlgmr.msrb.gmra.mxu0 %v3248_v38  ;;  %v3364_v2 = vsel %vm3016_vm7, %v3362_v46, %v3348_v11  ;;  %v3363_v36 = vsel %vm133_vm1, %v3361_v30, %v3345_v12  ;;  %v3688_v48 = vrot.slane %v9064_v5, 2  ;;  %v3692_v40 = vrot.slane %v9150_v26, 1  ;;  %v5702_v63 = vld [vmem:[%s11453_s3 + $0x5c0] sm:$0xff]  ;;  %v5653_v27 = vld [vmem:[%s11453_s3 + $0x438] sm:$0xff]  ;;  %v5668_v47 = vld [vmem:[%s11453_s3 + $0x4b0] sm:$0xff] }
 0x2e6   :  { %3319 = vmatmul.f32.vlgmr.msrb.gmra.mxu1 %v3249_v29  ;;  %3415 = vmatmul.f32.vlgmr.msrb.gmra.mxu2 %v3364_v2  ;;  %v3365_v20 = vsel %vm3016_vm7, %v3363_v36, %v3349_v18  ;;  %v3689_v60 = vrot.slane %v9066_v43, 2  ;;  %v3693_v35 = vrot.slane %v9152_v23, 1  ;;  %v3696_v33 = vrot.slane %v9215_v14, 7  ;;  %v5701_v44 = vld [vmem:[%s11453_s3 + $0x5b8] sm:$0xff]  ;;  %v5684_v30 = vld [vmem:[%s11453_s3 + $0x530] sm:$0xff] }
 0x2e7   :  { %3435 = vmatmul.f32.vlgmr.msrb.gmra.mxu3 %v3365_v20  ;;  %3539 = vmatpush.msra.mxu1 %v5673_v31  ;;  %v3706_v22 = vsel %vm3009_vm6, %v8582_v19, %v3688_v48  ;;  %v5685_v19 = vld [vmem:[%s11453_s3 + $0x538] sm:$0xff]  ;;  %v3697_v46 = vrot.slane %v9217_v61, 7  ;;  %v3804_v11 = vrot.slane %v9064_v5, 3  ;;  %v3808_v29 = vrot.slane %v9150_v26, 2  ;;  %v5700_v31 = vld [vmem:[%s11453_s3 + $0x5b0] sm:$0xff]  ;;  %v5651_v20 = vld [vmem:[%s11453_s3 + $0x428] sm:$0xff] }
 0x2e8   :  { %3635 = vmatpush.msra.mxu2 %v5689_v53  ;;  %3655 = vmatpush.msra.mxu3 %v5705_v21  ;;  %v3708_v0 = vsel %vm132_vm0, %v3706_v22, %v3692_v40  ;;  %v3707_v16 = vsel %vm3009_vm6, %v8586_v7, %v3689_v60  ;;  %v5652_v7 = vld [vmem:[%s11453_s3 + $0x430] sm:$0xff]  ;;  %v3812_v18 = vrot.slane %v9264_v28, 1  ;;  %v3805_v53 = vrot.slane %v9066_v43, 3  ;;  %v5665_v22 = vld [vmem:[%s11453_s3 + $0x498] sm:$0xff] }
 0x2e9   :  { %3520 = vmatpush.msra.mxu0 %v5656_v6  ;;  %3540 = vmatpush.msra.mxu1 %v5672_v59  ;;  %v3710_v10 = vsel %vm133_vm1, %v3708_v0, %v9264_v28  ;;  %v3709_v12 = vsel %vm132_vm0, %v3707_v16, %v3693_v35  ;;  %v3822_v36 = vsel %vm3009_vm6, %v8590_v51, %v3804_v11  ;;  %v3809_v21 = vrot.slane %v9152_v23, 2  ;;  %v5667_v6 = vld [vmem:[%s11453_s3 + $0x4a8] sm:$0xff]  ;;  %v5697_v0 = vld [vmem:[%s11453_s3 + $0x598] sm:$0xff] }
 0x2ea   :  { %3636 = vmatpush.msra.mxu2 %v5688_v50  ;;  %3656 = vmatpush.msra.mxu3 %v5704_v9  ;;  %v9702_v8 = vsel %vm3016_vm7, %v3710_v10, %v3696_v33  ;;  %v3711_v38 = vsel %vm133_vm1, %v3709_v12, %v9266_v24  ;;  %v3824_v59 = vsel %vm132_vm0, %v3822_v36, %v3808_v29  ;;  %v3813_v50 = vrot.slane %v9266_v24, 1  ;;  %v5683_v51 = vld [vmem:[%s11453_s3 + $0x528] sm:$0xff]  ;;  %v5681_v33 = vld [vmem:[%s11453_s3 + $0x518] sm:$0xff] }
 0x2eb   :  { %3521 = vmatpush.msra.mxu0 %v5655_v56  ;;  %3541 = vmatpush.msra.mxu1 %v5671_v37  ;;  %v9715_v2 = vsel %vm3016_vm7, %v3711_v38, %v3697_v46  ;;  %v5699_v9 = vld [vmem:[%s11453_s3 + $0x5a8] sm:$0xff]  ;;  %v3826_v56 = vsel %vm133_vm1, %v3824_v59, %v3812_v18  ;;  %v3823_v37 = vsel %vm3009_vm6, %v8593_v25, %v3805_v53  ;;  %v3452_v48 = vrot.slane %v8498_v41, 1  ;;  %v5682_v25 = vld [vmem:[%s11453_s3 + $0x520] sm:$0xff] }
 0x2ec   :  { %3637 = vmatpush.msra.mxu2 %v5687_v57  ;;  %3657 = vmatpush.msra.mxu3 %v5703_v39  ;;  %v5650_v57 = vld [vmem:[%s11453_s3 + $0x420] sm:$0xff]  ;;  %v9747_v40 = vsel %vm3016_vm7, %v3826_v56, %v9215_v14  ;;  %v3453_v60 = vrot.slane %v8501_v4, 1  ;;  %v3456_v35 = vrot.slane %v9150_v26, 7  ;;  %v3460_v16 = vrot.slane %v9264_v28, 6  ;;  %v12010_v10 = vld [vmem:[#allocation51_spill] sm:$0xff] }
 0x2ed   :  { %3522 = vmatpush.msra.mxu0 %v5654_v62  ;;  %3542 = vmatpush.msra.mxu1 %v5670_v1  ;;  %v5666_v39 = vld [vmem:[%s11453_s3 + $0x4a0] sm:$0xff]  ;;  %v3825_v62 = vsel %vm132_vm0, %v3823_v37, %v3809_v21  ;;  %v3472_v46 = vsel %vm3006_vm4, %v12010_v10, %v3452_v48  ;;  %v3457_v12 = vrot.slane %v9152_v23, 7  ;;  %v3572_v11 = vrot.slane %v9064_v5, 1  ;;  %v5663_v36 = vld [vmem:[%s11453_s3 + $0x488] sm:$0xff]  ;;  %v5740_v10 = vld [vmem:[%s11453_s3 + $0x6f0] sm:$0xff] }
 0x2ee   :  { %3638 = vmatpush.msra.mxu2 %v5686_v54  ;;  %3658 = vmatpush.msra.mxu3 %v5702_v63  ;;  %v5698_v1 = vld [vmem:[%s11453_s3 + $0x5a0] sm:$0xff]  ;;  %v3827_v54 = vsel %vm133_vm1, %v3825_v62, %v3813_v50  ;;  %v5649_v63 = vld [vmem:[%s11453_s3 + $0x418] sm:$0xff]  ;;  %v3474_v38 = vsel %vm3009_vm6, %v3472_v46, %v9064_v5  ;;  %v3461_v29 = vrot.slane %v9266_v24, 6  ;;  %v3576_v21 = vrot.slane %v9264_v28, 7  ;;  %v12012_v5 = vld [vmem:[#allocation67_spill] sm:$0xff] }
 0x2ef   :  { %3523 = vmatpush.msra.mxu0 %v5653_v27  ;;  %3543 = vmatpush.msra.mxu1 %v5669_v45  ;;  %v3568_v27 = vrot.slane %v8498_v41, 2  ;;  %v9768_v45 = vsel %vm3016_vm7, %v3827_v54, %v9217_v61  ;;  %v5648_v41 = vld [vmem:[%s11453_s3 + $0x410] sm:$0xff]  ;;  %v12011_v18 = vld [vmem:[#allocation66_spill] sm:$0xff]  ;;  %v3476_v53 = vsel %vm132_vm0, %v3474_v38, %v3456_v35  ;;  %v5679_v59 = vld [vmem:[%s11453_s3 + $0x508] sm:$0xff]  ;;  %v3464_v54 = vrot.slane %v9215_v14, 5 }
 0x2f0   :  { %3639 = vmatpush.msra.mxu2 %v5685_v19  ;;  %3659 = vmatpush.msra.mxu3 %v5701_v44  ;;  %v3569_v19 = vrot.slane %v8501_v4, 2  ;;  %v5664_v44 = vld [vmem:[%s11453_s3 + $0x490] sm:$0xff]  ;;  %v5695_v50 = vld [vmem:[%s11453_s3 + $0x588] sm:$0xff]  ;;  %v5662_v37 = vld [vmem:[%s11453_s3 + $0x480] sm:$0xff] }
 0x2f1   :  { %3524 = vmatpush.msra.mxu0 %v5652_v7  ;;  %3544 = vmatpush.msra.mxu1 %v5668_v47  ;;  %v3573_v7 = vrot.slane %v9066_v43, 1  ;;  %v5680_v4 = vld [vmem:[%s11453_s3 + $0x510] sm:$0xff]  ;;  %v5694_v62 = vld [vmem:[%s11453_s3 + $0x580] sm:$0xff] }
 0x2f2   :  { %3640 = vmatpush.msra.mxu2 %v5684_v30  ;;  %3660 = vmatpush.msra.mxu3 %v5700_v31  ;;  %v5696_v47 = vld [vmem:[%s11453_s3 + $0x590] sm:$0xff]  ;;  %v3473_v30 = vsel %vm3006_vm4, %v12011_v18, %v3453_v60  ;;  %v5647_v31 = vld [vmem:[%s11453_s3 + $0x408] sm:$0xff]  ;;  %v5722_v38 = vld [vmem:[%s11453_s3 + $0x660] sm:$0xff] }
 0x2f3   :  { %3525 = vmatpush.msra.mxu0 %v5651_v20  ;;  %3545 = vmatpush.msra.mxu1 %v5667_v6  ;;  %v3588_v20 = vsel %vm3006_vm4, %v12012_v5, %v3568_v27  ;;  %v3577_v6 = vrot.slane %v9266_v24, 7  ;;  %v3475_v28 = vsel %vm3009_vm6, %v3473_v30, %v9066_v43  ;;  %v5646_v24 = vld [vmem:[%s11453_s3 + $0x400] sm:$0xff]  ;;  %v3580_v27 = vrot.slane %v9215_v14, 6  ;;  %v5756_v46 = vld [vmem:[%s11453_s3 + $0x770] sm:$0xff] }
 0x2f4   :  { %3641 = vmatpush.msra.mxu2 %v5683_v51  ;;  %3661 = vmatpush.msra.mxu3 %v5699_v9  ;;  %v3478_v51 = vsel %vm133_vm1, %v3476_v53, %v3460_v16  ;;  %v12013_v9 = vld [vmem:[#allocation72_spill] sm:$0xff]  ;;  %v5678_v43 = vld [vmem:[%s11453_s3 + $0x500] sm:$0xff]  ;;  %v5741_v16 = vld [vmem:[%s11453_s3 + $0x6f8] sm:$0xff] }
 0x2f5   :  { %3526 = vmatpush.msra.mxu0 %v5650_v57  ;;  %3546 = vmatpush.msra.mxu1 %v5666_v39  ;;  %v3589_v56 = vsel %vm3006_vm4, %v12013_v9, %v3569_v19  ;;  %v3477_v57 = vsel %vm132_vm0, %v3475_v28, %v3457_v12  ;;  %v3590_v39 = vsel %vm3009_vm6, %v3588_v20, %v3572_v11  ;;  %v5757_v19 = vld [vmem:[%s11453_s3 + $0x778] sm:$0xff]  ;;  %v5772_v12 = vld [vmem:[%s11453_s3 + $0x7f0] sm:$0xff]  ;;  %v5723_v11 = vld [vmem:[%s11453_s3 + $0x668] sm:$0xff] }
 0x2f6   :  { %3642 = vmatpush.msra.mxu2 %v5682_v25  ;;  %3662 = vmatpush.msra.mxu3 %v5698_v1  ;;  %v3591_v48 = vsel %vm3009_vm6, %v3589_v56, %v3573_v7  ;;  %v3479_v25 = vsel %vm133_vm1, %v3477_v57, %v3461_v29  ;;  %v3592_v1 = vsel %vm132_vm0, %v3590_v39, %v9150_v26  ;;  %v5739_v7 = vld [vmem:[%s11453_s3 + $0x6e8] sm:$0xff]  ;;  %v5738_v29 = vld [vmem:[%s11453_s3 + $0x6e0] sm:$0xff]  ;;  %v5753_v53 = vld [vmem:[%s11453_s3 + $0x758] sm:$0xff] }
 0x2f7   :  { %3527 = vmatpush.msra.mxu0 %v5649_v63  ;;  %3547 = vmatpush.msra.mxu1 %v5665_v22  ;;  %v3593_v60 = vsel %vm132_vm0, %v3591_v48, %v9152_v23  ;;  %v3465_v63 = vrot.slane %v9217_v61, 5  ;;  %v3594_v22 = vsel %vm133_vm1, %v3592_v1, %v3576_v21  ;;  %v3480_v26 = vsel %vm3016_vm7, %v3478_v51, %v3464_v54  ;;  %v5754_v18 = vld [vmem:[%s11453_s3 + $0x760] sm:$0xff]  ;;  %v5769_v21 = vld [vmem:[%s11453_s3 + $0x7d8] sm:$0xff]  ;;  %v5720_v5 = vld [vmem:[%s11453_s3 + $0x650] sm:$0xff] }
 0x2f8   :  { %3643 = vmatpush.msra.mxu2 %v5681_v33  ;;  %3663 = vmatpush.msra.mxu3 %v5697_v0  ;;  %v3595_v35 = vsel %vm133_vm1, %v3593_v60, %v3577_v6  ;;  %v3581_v33 = vrot.slane %v9217_v61, 6  ;;  %v5725_v0 = vld [vmem:[%s11453_s3 + $0x678] sm:$0xff]  ;;  %v3596_v14 = vsel %vm3016_vm7, %v3594_v22, %v3580_v27  ;;  %v5770_v30 = vld [vmem:[%s11453_s3 + $0x7e0] sm:$0xff]  ;;  %v5736_v20 = vld [vmem:[%s11453_s3 + $0x6d0] sm:$0xff] }
 0x2f9   :  { %3528 = vmatpush.msra.mxu0 %v5648_v41  ;;  %3548 = vmatpush.msra.mxu1 %v5664_v44  ;;  %v3481_v23 = vsel %vm3016_vm7, %v3479_v25, %v3465_v63  ;;  %v5773_v41 = vld [vmem:[%s11453_s3 + $0x7f8] sm:$0xff]  ;;  %v5724_v44 = vld [vmem:[%s11453_s3 + $0x670] sm:$0xff]  ;;  %v5735_v51 = vld [vmem:[%s11453_s3 + $0x6c8] sm:$0xff] }
 0x2fa   :  { %3644 = vmatpush.msra.mxu2 %v5680_v4  ;;  %3664 = vmatpush.msra.mxu3 %v5696_v47  ;;  %v3597_v61 = vsel %vm3016_vm7, %v3595_v35, %v3581_v33  ;;  %v5755_v4 = vld [vmem:[%s11453_s3 + $0x768] sm:$0xff]  ;;  %v5752_v6 = vld [vmem:[%s11453_s3 + $0x750] sm:$0xff]  ;;  %v5750_v57 = vld [vmem:[%s11453_s3 + $0x740] sm:$0xff] }
 0x2fb   :  { %3529 = vmatpush.msra.mxu0 %v5647_v31  ;;  %3549 = vmatpush.msra.mxu1 %v5663_v36  ;;  %v5771_v47 = vld [vmem:[%s11453_s3 + $0x7e8] sm:$0xff]  ;;  %v5721_v31 = vld [vmem:[%s11453_s3 + $0x658] sm:$0xff]  ;;  %v5766_v39 = vld [vmem:[%s11453_s3 + $0x7c0] sm:$0xff] }
 0x2fc   :  { %3645 = vmatpush.msra.mxu2 %v5679_v59  ;;  %3665 = vmatpush.msra.mxu3 %v5695_v50  ;;  %v5737_v36 = vld [vmem:[%s11453_s3 + $0x6d8] sm:$0xff]  ;;  %v5768_v59 = vld [vmem:[%s11453_s3 + $0x7d0] sm:$0xff]  ;;  %v5719_v50 = vld [vmem:[%s11453_s3 + $0x648] sm:$0xff] }
 0x2fd   :  { %3530 = vmatpush.msra.mxu0 %v5646_v24  ;;  %3550 = vmatpush.msra.mxu1 %v5662_v37  ;;  %v5751_v28 = vld [vmem:[%s11453_s3 + $0x748] sm:$0xff]  ;;  %v5718_v24 = vld [vmem:[%s11453_s3 + $0x640] sm:$0xff]  ;;  %v5717_v48 = vld [vmem:[%s11453_s3 + $0x638] sm:$0xff] }
 0x2fe   :  { %3646 = vmatpush.msra.mxu2 %v5678_v43  ;;  %3666 = vmatpush.msra.mxu3 %v5694_v62  ;;  %v5767_v9 = vld [vmem:[%s11453_s3 + $0x7c8] sm:$0xff]  ;;  %v5734_v37 = vld [vmem:[%s11453_s3 + $0x6c0] sm:$0xff]  ;;  %v5733_v43 = vld [vmem:[%s11453_s3 + $0x6b8] sm:$0xff] }
 0x2ff   :  { %3531 = vmatmul.f32.vlgmr.msra.gmra.mxu0 %v3480_v26  ;;  %3551 = vmatmul.f32.vlgmr.msra.gmra.mxu1 %v3481_v23  ;;  %v5749_v25 = vld [vmem:[%s11453_s3 + $0x738] sm:$0xff]  ;;  %v5716_v60 = vld [vmem:[%s11453_s3 + $0x630] sm:$0xff]  ;;  %v5715_v35 = vld [vmem:[%s11453_s3 + $0x628] sm:$0xff] }
 0x300   :  { %3647 = vmatmul.f32.vlgmr.msra.gmra.mxu2 %v3596_v14  ;;  %3667 = vmatmul.f32.vlgmr.msra.gmra.mxu3 %v3597_v61  ;;  %v5765_v1 = vld [vmem:[%s11453_s3 + $0x7b8] sm:$0xff]  ;;  %v5732_v54 = vld [vmem:[%s11453_s3 + $0x6b0] sm:$0xff]  ;;  %v5731_v27 = vld [vmem:[%s11453_s3 + $0x6a8] sm:$0xff] }
 0x301   :  { %3747 = vmatpush.msrb.mxu0 %v5725_v0  ;;  %3767 = vmatpush.msrb.mxu1 %v5741_v16  ;;  %v5748_v63 = vld [vmem:[%s11453_s3 + $0x730] sm:$0xff]  ;;  %v5747_v26 = vld [vmem:[%s11453_s3 + $0x728] sm:$0xff]  ;;  %v5714_v0 = vld [vmem:[%s11453_s3 + $0x620] sm:$0xff] }
 0x302   :  { %3863 = vmatpush.msrb.mxu2 %v5757_v19  ;;  %3883 = vmatpush.msrb.mxu3 %v5773_v41  ;;  %v348_v56 = vpop.xlane.xlu1 %347  ;;  %v5764_v22 = vld [vmem:[%s11453_s3 + $0x7b0] sm:$0xff]  ;;  %v5763_v23 = vld [vmem:[%s11453_s3 + $0x7a8] sm:$0xff]  ;;  %v5730_v16 = vld [vmem:[%s11453_s3 + $0x6a0] sm:$0xff] }
 0x303   :  { %3748 = vmatpush.msrb.mxu0 %v5724_v44  ;;  %3768 = vmatpush.msrb.mxu1 %v5740_v10  ;;  %v350_v62 = vmul.f32 %v348_v56, %v7544_v34  ;;  %v5746_v14 = vld [vmem:[%s11453_s3 + $0x720] sm:$0xff]  ;;  %v5713_v19 = vld [vmem:[%s11453_s3 + $0x618] sm:$0xff] }
 0x304   :  { %3864 = vmatpush.msrb.mxu2 %v5756_v46  ;;  %3884 = vmatpush.msrb.mxu3 %v5772_v12  ;;  %v5762_v61 = vld [vmem:[%s11453_s3 + $0x7a0] sm:$0xff]  ;;  %v5729_v41 = vld [vmem:[%s11453_s3 + $0x698] sm:$0xff] }
 0x305   :  { %3749 = vmatpush.msrb.mxu0 %v5723_v11  ;;  %3769 = vmatpush.msrb.mxu1 %v5739_v7  ;;  %v9979_v33 = vadd.f32 1e-05, %v350_v62  ;;  %v5745_v10 = vld [vmem:[%s11453_s3 + $0x718] sm:$0xff]  ;;  %v5712_v11 = vld [vmem:[%s11453_s3 + $0x610] sm:$0xff] }
 0x306   :  { %3865 = vmatpush.msrb.mxu2 %v5755_v4  ;;  %3885 = vmatpush.msrb.mxu3 %v5771_v47  ;;  %v5761_v46 = vld [vmem:[%s11453_s3 + $0x798] sm:$0xff]  ;;  %v5728_v7 = vld [vmem:[%s11453_s3 + $0x690] sm:$0xff] }
 0x307   :  { %3750 = vmatpush.msrb.mxu0 %v5722_v38  ;;  %3770 = vmatpush.msrb.mxu1 %v5738_v29  ;;  %6183 = vrsqrt.f32 %v9979_v33  ;;  %v5744_v47 = vld [vmem:[%s11453_s3 + $0x710] sm:$0xff]  ;;  %vm369_vm9 = vweird.f32 %v9979_v33 }
 0x308   :  { %3866 = vmatpush.msrb.mxu2 %v5754_v18  ;;  %3886 = vmatpush.msrb.mxu3 %v5770_v30  ;;  %v5760_v38 = vld [vmem:[%s11453_s3 + $0x790] sm:$0xff]  ;;  %v5711_v18 = vld [vmem:[%s11453_s3 + $0x608] sm:$0xff] }
 0x309   :  { %3751 = vmatpush.msrb.mxu0 %v5721_v31  ;;  %3771 = vmatpush.msrb.mxu1 %v5737_v36  ;;  %v5727_v30 = vld [vmem:[%s11453_s3 + $0x688] sm:$0xff] }
 0x30a   :  { %3867 = vmatpush.msrb.mxu2 %v5753_v53  ;;  %3887 = vmatpush.msrb.mxu3 %v5769_v21  ;;  %v1437_v4 = vpop.xlane.xlu1 %1436  ;;  %v5743_v31 = vld [vmem:[%s11453_s3 + $0x708] sm:$0xff] }
 0x30b   :  { %3752 = vmatpush.msrb.mxu0 %v5720_v5  ;;  %3772 = vmatpush.msrb.mxu1 %v5736_v20  ;;  %v5759_v36 = vld [vmem:[%s11453_s3 + $0x788] sm:$0xff]  ;;  %v1439_v53 = vmul.f32 %v1437_v4, %v7544_v34  ;;  %v5710_v5 = vld [vmem:[%s11453_s3 + $0x600] sm:$0xff] }
 0x30c   :  { %3868 = vmatpush.msrb.mxu2 %v5752_v6  ;;  %3888 = vmatpush.msrb.mxu3 %v5768_v59  ;;  %v5726_v20 = vld [vmem:[%s11453_s3 + $0x680] sm:$0xff] }
 0x30d   :  { %3753 = vmatpush.msrb.mxu0 %v5719_v50  ;;  %3773 = vmatpush.msrb.mxu1 %v5735_v51  ;;  %v6184_v21 = vpop.eup %6183  ;;  %v5742_v6 = vld [vmem:[%s11453_s3 + $0x700] sm:$0xff]  ;;  %v10054_v51 = vadd.f32 1e-05, %v1439_v53 }
 0x30e   :  { %3869 = vmatpush.msrb.mxu2 %v5751_v28  ;;  %3889 = vmatpush.msrb.mxu3 %v5767_v9  ;;  %v5758_v59 = vld [vmem:[%s11453_s3 + $0x780] sm:$0xff]  ;;  %v364_v50 = vmul.f32 %v6184_v21, %v9979_v33  ;;  %v5789_v28 = vld [vmem:[%s11453_s3 + $0x878] sm:$0xff]  ;;  %vm370_vm8 = vweird.f32 %v6184_v21  ;;  %v5787_v33 = vld [vmem:[%s11453_s3 + $0x868] sm:$0xff] }
 0x30f   :  { %3754 = vmatpush.msrb.mxu0 %v5718_v24  ;;  %3774 = vmatpush.msrb.mxu1 %v5734_v37  ;;  %v5805_v9 = vld [vmem:[%s11453_s3 + $0x8f8] sm:$0xff]  ;;  %vm371_vm10 = vmor %vm369_vm9, %vm370_vm8  ;;  %vm1458_vm15 = vweird.f32 %v10054_v51 }
 0x310   :  { %3870 = vmatpush.msrb.mxu2 %v5750_v57  ;;  %3890 = vmatpush.msrb.mxu3 %v5766_v39  ;;  %v5821_v24 = vld [vmem:[%s11453_s3 + $0x978] sm:$0xff]  ;;  %v5788_v57 = vld [vmem:[%s11453_s3 + $0x870] sm:$0xff] }
 0x311   :  { %3755 = vmatpush.msrb.mxu0 %v5717_v48  ;;  %3775 = vmatpush.msrb.mxu1 %v5733_v43  ;;  %v5837_v37 = vld [vmem:[%s11453_s3 + $0x9f8] sm:$0xff]  ;;  %v5820_v39 = vld [vmem:[%s11453_s3 + $0x970] sm:$0xff] }
 0x312   :  { %3871 = vmatpush.msrb.mxu2 %v5749_v25  ;;  %3891 = vmatpush.msrb.mxu3 %v5765_v1 }
 0x313   :  { %3756 = vmatpush.msrb.mxu0 %v5716_v60  ;;  %3776 = vmatpush.msrb.mxu1 %v5732_v54  ;;  %v1074_v44 = vpop.xlane.xlu2 %1073 }
 0x314   :  { %3872 = vmatpush.msrb.mxu2 %v5748_v63  ;;  %3892 = vmatpush.msrb.mxu3 %v5764_v22  ;;  %v1076_v12 = vmul.f32 %v1074_v44, %v7544_v34 }
 0x315   :  { %3757 = vmatpush.msrb.mxu0 %v5715_v35  ;;  %3777 = vmatpush.msrb.mxu1 %v5731_v27 }
 0x316   :  { %3873 = vmatpush.msrb.mxu2 %v5747_v26  ;;  %3893 = vmatpush.msrb.mxu3 %v5763_v23  ;;  %v10025_v29 = vadd.f32 1e-05, %v1076_v12  ;;  %v12014_v23 = vld [vmem:[#allocation47_spill] sm:$0xff] }
 0x317   :  { %3758 = vmatpush.msrb.mxu0 %v5714_v0  ;;  %3778 = vmatpush.msrb.mxu1 %v5730_v16  ;;  %v12015_v16 = vld [vmem:[#allocation49_spill] sm:$0xff] }
 0x318   :  { %3874 = vmatpush.msrb.mxu2 %v5746_v14  ;;  %3894 = vmatpush.msrb.mxu3 %v5762_v61  ;;  %6185 = vrsqrt.f32 %v10025_v29  ;;  %v12016_v61 = vld [vmem:[#allocation26_spill] sm:$0xff]  ;;  %vm1095_vm12 = vweird.f32 %v10025_v29 }
 0x319   :  { %3759 = vmatpush.msrb.mxu0 %v5713_v19  ;;  %3779 = vmatpush.msrb.mxu1 %v5729_v41  ;;  %6187 = vrsqrt.f32 %v10054_v51  ;;  %v12017_v41 = vld [vmem:[#allocation3_spill] sm:$0xff] }
 0x31a   :  { %3875 = vmatpush.msrb.mxu2 %v5745_v10  ;;  %3895 = vmatpush.msrb.mxu3 %v5761_v46  ;;  %v5803_v10 = vld [vmem:[%s11453_s3 + $0x8e8] sm:$0xff] }
 0x31b   :  { %3760 = vmatpush.msrb.mxu0 %v5712_v11  ;;  %3780 = vmatpush.msrb.mxu1 %v5728_v7  ;;  %v12018_v46 = vld [vmem:[#allocation27_spill] sm:$0xff]  ;;  %v12019_v11 = vld [vmem:[#allocation2_spill] sm:$0xff] }
 0x31c   :  { %3876 = vmatpush.msrb.mxu2 %v5744_v47  ;;  %3896 = vmatpush.msrb.mxu3 %v5760_v38  ;;  %v5819_v38 = vld [vmem:[%s11453_s3 + $0x968] sm:$0xff] }
 0x31d   :  { %3761 = vmatpush.msrb.mxu0 %v5711_v18  ;;  %3781 = vmatpush.msrb.mxu1 %v5727_v30  ;;  %v12020_v30 = vld [vmem:[#allocation31_spill] sm:$0xff] }
 0x31e   :  { %3877 = vmatpush.msrb.mxu2 %v5743_v31  ;;  %3897 = vmatpush.msrb.mxu3 %v5759_v36  ;;  %v6186_v56 = vpop.eup %6185  ;;  %v2526_v18 = vpop.xlane.xlu1 %2525  ;;  %v12021_v36 = vld [vmem:[#allocation33_spill] sm:$0xff] }
 0x31f   :  { %3762 = vmatpush.msrb.mxu0 %v5710_v5  ;;  %3782 = vmatpush.msrb.mxu1 %v5726_v20  ;;  %v10086_v62 = vpop.eup %6187  ;;  %vm1096_vm11 = vweird.f32 %v6186_v56  ;;  %v5786_v5 = vld [vmem:[%s11453_s3 + $0x860] sm:$0xff] }
 0x320   :  { %3878 = vmatpush.msrb.mxu2 %v5742_v6  ;;  %3898 = vmatpush.msrb.mxu3 %v5758_v59  ;;  %v1453_v60 = vmul.f32 %v10086_v62, %v10054_v51  ;;  %vm1097_vm13 = vmor %vm1095_vm12, %vm1096_vm11  ;;  %v5802_v20 = vld [vmem:[%s11453_s3 + $0x8e0] sm:$0xff]  ;;  %vm1459_vm14 = vweird.f32 %v10086_v62 }
 0x321   :  { %3763 = vmatmul.f32.vlgmr.msrb.gmra.mxu0 %v9702_v8  ;;  %3783 = vmatmul.f32.vlgmr.msrb.gmra.mxu1 %v9715_v2  ;;  %v5804_v8 = vld [vmem:[%s11453_s3 + $0x8f0] sm:$0xff]  ;;  %v365_v2 = vmul.f32 %v6184_v21, %v364_v50  ;;  %v5818_v6 = vld [vmem:[%s11453_s3 + $0x960] sm:$0xff]  ;;  %vm1460_vm5 = vmor %vm1458_vm15, %vm1459_vm14 }
 0x322   :  { %3879 = vmatmul.f32.vlgmr.msrb.gmra.mxu2 %v9747_v40  ;;  %3899 = vmatmul.f32.vlgmr.msrb.gmra.mxu3 %v9768_v45  ;;  %v5836_v40 = vld [vmem:[%s11453_s3 + $0x9f0] sm:$0xff]  ;;  %v1090_v45 = vmul.f32 %v6186_v56, %v10025_v29  ;;  %v1454_v22 = vmul.f32 %v10086_v62, %v1453_v60  ;;  %v5835_v29 = vld [vmem:[%s11453_s3 + $0x9e8] sm:$0xff]  ;;  %v12025_v60 = vld [vmem:[#allocation37_spill] sm:$0xff] }
 0x323   :  { %3993 = vmatpush.msra.mxu0 %v5789_v28  ;;  %4013 = vmatpush.msra.mxu1 %v5805_v9  ;;  %v366_v48 = vmul.f32 0.5, %v365_v2 }
 0x324   :  { %4111 = vmatpush.msra.mxu2 %v5821_v24  ;;  %4131 = vmatpush.msra.mxu3 %v5837_v37  ;;  %v1091_v43 = vmul.f32 %v6186_v56, %v1090_v45  ;;  %v1455_v26 = vmul.f32 0.5, %v1454_v22  ;;  %v12022_v24 = vld [vmem:[#allocation53_spill] sm:$0xff] }
 0x325   :  { %3994 = vmatpush.msra.mxu0 %v5788_v57  ;;  %4014 = vmatpush.msra.mxu1 %v5804_v8  ;;  %v367_v25 = vsub.f32 1.5, %v366_v48  ;;  %v12023_v57 = vld [vmem:[#allocation5_spill] sm:$0xff] }
 0x326   :  { %4112 = vmatpush.msra.mxu2 %v5820_v39  ;;  %4132 = vmatpush.msra.mxu3 %v5836_v40  ;;  %v1092_v1 = vmul.f32 0.5, %v1091_v43  ;;  %v1456_v47 = vsub.f32 1.5, %v1455_v26  ;;  %v5785_v40 = vld [vmem:[%s11453_s3 + $0x858] sm:$0xff]  ;;  %v5784_v26 = vld [vmem:[%s11453_s3 + $0x850] sm:$0xff] }
 0x327   :  { %v368_v54 = vmul.f32 %v6184_v21, %v367_v25  ;;  %3995 = vmatpush.msra.mxu0 %v5787_v33  ;;  %4015 = vmatpush.msra.mxu1 %v5803_v10  ;;  %v5801_v45 = vld [vmem:[%s11453_s3 + $0x8d8] sm:$0xff]  ;;  %v12024_v25 = vld [vmem:[#allocation28_spill] sm:$0xff] }
 0x328   :  { %v1093_v63 = vsub.f32 1.5, %v1092_v1  ;;  %4113 = vmatpush.msra.mxu2 %v5819_v38  ;;  %4133 = vmatpush.msra.mxu3 %v5835_v29  ;;  %v5817_v48 = vld [vmem:[%s11453_s3 + $0x958] sm:$0xff] }
 0x329   :  { %v372_v35 = vsel %vm371_vm10, %v6184_v21, %v368_v54  ;;  %v2528_v21 = vmul.f32 %v2526_v18, %v7544_v34  ;;  %3996 = vmatpush.msra.mxu0 %v5786_v5  ;;  %4016 = vmatpush.msra.mxu1 %v5802_v20  ;;  %v5833_v22 = vld [vmem:[%s11453_s3 + $0x9d8] sm:$0xff]  ;;  %v5831_v18 = vld [vmem:[%s11453_s3 + $0x9c8] sm:$0xff]  ;;  %v5814_v5 = vld [vmem:[%s11453_s3 + $0x940] sm:$0xff] }
 0x32a   :  { %v1094_v27 = vmul.f32 %v6186_v56, %v1093_v63  ;;  %v10093_v0 = vmul.f32 %v372_v35, %v12014_v23  ;;  %v10096_v14 = vmul.f32 %v372_v35, %v12015_v16  ;;  %v10099_v19 = vmul.f32 %v372_v35, %v12016_v61  ;;  %4114 = vmatpush.msra.mxu2 %v5818_v6  ;;  %v5800_v23 = vld [vmem:[%s11453_s3 + $0x8d0] sm:$0xff] }
 0x32b   :  { %v10103_v44 = vmul.f32 %v372_v35, %v12017_v41  ;;  %v10112_v12 = vmul.f32 %v372_v35, %v12018_v46  ;;  %v10115_v7 = vmul.f32 %v372_v35, %v12019_v11  ;;  %v10126_v31 = vmul.f32 %v372_v35, %v12020_v30  ;;  %3997 = vmatpush.msra.mxu0 %v5785_v40  ;;  %v5799_v11 = vld [vmem:[%s11453_s3 + $0x8c8] sm:$0xff]  ;;  %v12029_v6 = vld [vmem:[#allocation12_spill] sm:$0xff]  ;;  %v5813_v40 = vld [vmem:[%s11453_s3 + $0x938] sm:$0xff] }
 0x32c   :  { %v10117_v4 = vsel %vm1097_vm13, %v6186_v56, %v1094_v27  ;;  %v10129_v53 = vmul.f32 %v372_v35, %v12021_v36  ;;  %v397_v59 = vmax.f32 %v10093_v0, 0.0  ;;  %v398_v50 = vmax.f32 %v10096_v14, 0.0  ;;  %v5834_v56 = vld [vmem:[%s11453_s3 + $0x9e0] sm:$0xff]  ;;  %4017 = vmatpush.msra.mxu1 %v5801_v45  ;;  %4115 = vmatpush.msra.mxu2 %v5817_v48  ;;  %v5816_v0 = vld [vmem:[%s11453_s3 + $0x950] sm:$0xff]  ;;  %v12028_v36 = vld [vmem:[#allocation11_spill] sm:$0xff] }
 0x32d   :  { %v399_v28 = vmax.f32 %v10099_v19, 0.0  ;;  %v10150_v37 = vmul.f32 %v10117_v4, %v12022_v24  ;;  %v10154_v8 = vmul.f32 %v10117_v4, %v12023_v57  ;;  %v10157_v39 = vadd.f32 1e-05, %v2528_v21  ;;  %4134 = vmatpush.msra.mxu3 %v5834_v56  ;;  %v12026_v14 = vld [vmem:[#allocation64_spill] sm:$0xff]  ;;  %v12027_v19 = vld [vmem:[#allocation9_spill] sm:$0xff]  ;;  %3998 = vmatpush.msra.mxu0 %v5784_v26  ;;  %v5798_v21 = vld [vmem:[%s11453_s3 + $0x8c0] sm:$0xff] }
 0x32e   :  { %v400_v43 = vmax.f32 %v10103_v44, 0.0  ;;  %v10171_v1 = vmul.f32 %v10117_v4, %v12024_v25  ;;  %v1110_v54 = vmul.f32 %v10117_v4, %v12025_v60  ;;  %v1457_v63 = vmul.f32 %v10086_v62, %v1456_v47  ;;  %4018 = vmatpush.msra.mxu1 %v5800_v23  ;;  %v5832_v44 = vld [vmem:[%s11453_s3 + $0x9d0] sm:$0xff]  ;;  %4116 = vmatpush.msra.mxu2 %v5816_v0  ;;  %v12030_v57 = vld [vmem:[#allocation75_spill] sm:$0xff]  ;;  %v12034_v23 = vld [vmem:[#allocation18_spill] sm:$0xff] }
 0x32f   :  { %v401_v35 = vmax.f32 %v10112_v12, 0.0  ;;  %6189 = vrsqrt.f32 %v10157_v39  ;;  %4135 = vmatpush.msra.mxu3 %v5833_v22  ;;  %v402_v51 = vmax.f32 %v10115_v7, 0.0  ;;  %v403_v16 = vmax.f32 %v10126_v31, 0.0  ;;  %v5783_v12 = vld [vmem:[%s11453_s3 + $0x848] sm:$0xff] }
 0x330   :  { %v1111_v61 = vmul.f32 %v10117_v4, %v12026_v14  ;;  %v1113_v41 = vmul.f32 %v10117_v4, %v12027_v19  ;;  %v404_v33 = vmax.f32 %v10129_v53, 0.0  ;;  %v1123_v10 = vmax.f32 %v10150_v37, 0.0  ;;  %v5815_v7 = vld [vmem:[%s11453_s3 + $0x948] sm:$0xff]  ;;  %3999 = vmatpush.msra.mxu0 %v5783_v12  ;;  %4019 = vmatpush.msra.mxu1 %v5799_v11  ;;  %v12036_v12 = vld [vmem:[#allocation4_spill] sm:$0xff] }
 0x331   :  { %v1125_v46 = vmax.f32 %v10154_v8, 0.0  ;;  %4136 = vmatpush.msra.mxu3 %v5832_v44  ;;  %v1124_v47 = vmax.f32 %v10171_v1, 0.0  ;;  %v1126_v38 = vmax.f32 %v1110_v54, 0.0  ;;  %v1461_v29 = vsel %vm1460_vm5, %v10086_v62, %v1457_v63  ;;  %4117 = vmatpush.msra.mxu2 %v5815_v7  ;;  %v5782_v62 = vld [vmem:[%s11453_s3 + $0x840] sm:$0xff]  ;;  %v12031_v48 = vld [vmem:[#allocation79_spill] sm:$0xff]  ;;  %v5829_v1 = vld [vmem:[%s11453_s3 + $0x9b8] sm:$0xff] }
 0x332   :  { %v10222_v30 = vmax.f32 %v397_v59, %v399_v28  ;;  %v10224_v31 = vmax.f32 %v398_v50, %v400_v43  ;;  %v10228_v53 = vmul.f32 %v10117_v4, %v12028_v36  ;;  %v10239_v20 = vmax.f32 %v401_v35, %v403_v16  ;;  %4000 = vmatpush.msra.mxu0 %v5782_v62  ;;  %v12032_v63 = vld [vmem:[#allocation82_spill] sm:$0xff]  ;;  %v12033_v35 = vld [vmem:[#allocation52_spill] sm:$0xff]  ;;  %v5779_v36 = vld [vmem:[%s11453_s3 + $0x828] sm:$0xff] }
 0x333   :  { %4137 = vmatpush.msra.mxu3 %v5831_v18  ;;  %v10243_v59 = vmul.f32 %v10117_v4, %v12029_v6  ;;  %v1127_v50 = vmax.f32 %v1111_v61, 0.0  ;;  %v1129_v28 = vmax.f32 %v1113_v41, 0.0  ;;  %4020 = vmatpush.msra.mxu1 %v5798_v21  ;;  %v10250_v24 = vmax.f32 %v402_v51, %v404_v33  ;;  %v5781_v4 = vld [vmem:[%s11453_s3 + $0x838] sm:$0xff]  ;;  %v5780_v51 = vld [vmem:[%s11453_s3 + $0x830] sm:$0xff]  ;;  %v12037_v7 = vld [vmem:[#allocation34_spill] sm:$0xff] }
 0x334   :  { %v10252_v37 = vmax.f32 %v1123_v10, %v1125_v46  ;;  %v10255_v8 = vmul.f32 %v1461_v29, %v12030_v57  ;;  %4118 = vmatpush.msra.mxu2 %v5814_v5  ;;  %v10266_v45 = vmax.f32 %v1124_v47, %v1126_v38  ;;  %v10269_v43 = vmul.f32 %v1461_v29, %v12031_v48  ;;  %v5796_v16 = vld [vmem:[%s11453_s3 + $0x8b0] sm:$0xff]  ;;  %v12035_v10 = vld [vmem:[#allocation10_spill] sm:$0xff]  ;;  %v5811_v6 = vld [vmem:[%s11453_s3 + $0x928] sm:$0xff] }
 0x335   :  { %v10248_v56 = vpop.eup %6189  ;;  %4001 = vmatpush.msra.mxu0 %v5781_v4  ;;  %v1128_v54 = vmax.f32 %v10228_v53, 0.0  ;;  %v10280_v22 = vmul.f32 %v1461_v29, %v12032_v63  ;;  %v10283_v26 = vmul.f32 %v1461_v29, %v12033_v35  ;;  %v10286_v0 = vmul.f32 %v1461_v29, %v12034_v23  ;;  %v5812_v44 = vld [vmem:[%s11453_s3 + $0x930] sm:$0xff]  ;;  %v5795_v53 = vld [vmem:[%s11453_s3 + $0x8a8] sm:$0xff]  ;;  %v5810_v4 = vld [vmem:[%s11453_s3 + $0x920] sm:$0xff] }
 0x336   :  { %v2542_v25 = vmul.f32 %v10248_v56, %v10157_v39  ;;  %4119 = vmatpush.msra.mxu2 %v5813_v40  ;;  %v1130_v14 = vmax.f32 %v10243_v59, 0.0  ;;  %v10295_v61 = vmax.f32 %v1127_v50, %v1129_v28  ;;  %v5828_v33 = vld [vmem:[%s11453_s3 + $0x9b0] sm:$0xff]  ;;  %v10307_v46 = vmul.f32 %v1461_v29, %v12035_v10  ;;  %v5827_v59 = vld [vmem:[%s11453_s3 + $0x9a8] sm:$0xff]  ;;  %v5778_v50 = vld [vmem:[%s11453_s3 + $0x820] sm:$0xff] }
 0x337   :  { %4002 = vmatpush.msra.mxu0 %v5780_v51  ;;  %v10310_v11 = vmul.f32 %v1461_v29, %v12036_v12  ;;  %v10313_v47 = vmul.f32 %v1461_v29, %v12037_v7  ;;  %v1486_v38 = vmax.f32 %v10255_v8, 0.0  ;;  %v1487_v62 = vmax.f32 %v10269_v43, 0.0  ;;  %v5794_v8 = vld [vmem:[%s11453_s3 + $0x8a0] sm:$0xff]  ;;  %v5793_v63 = vld [vmem:[%s11453_s3 + $0x898] sm:$0xff] }
 0x338   :  { %v1800_v9 = vpop.xlane.xlu2 %1799  ;;  %v2543_v41 = vmul.f32 %v10248_v56, %v2542_v25  ;;  %4120 = vmatpush.msra.mxu2 %v5812_v44  ;;  %v1488_v28 = vmax.f32 %v10280_v22, 0.0  ;;  %v1490_v57 = vmax.f32 %v10286_v0, 0.0  ;;  %vm2548_vm8 = vweird.f32 %v10248_v56  ;;  %v5825_v23 = vld [vmem:[%s11453_s3 + $0x998] sm:$0xff] }
 0x339   :  { %v1802_v2 = vmul.f32 %v1800_v9, %v7544_v34  ;;  %v5830_v9 = vld [vmem:[%s11453_s3 + $0x9c0] sm:$0xff]  ;;  %4003 = vmatpush.msra.mxu0 %v5779_v36  ;;  %v1138_v40 = vmax.f32 %v1128_v54, %v1130_v14  ;;  %v1491_v22 = vmax.f32 %v10307_v46, 0.0  ;;  %v1492_v35 = vmax.f32 %v10310_v11, 0.0  ;;  %v5776_v14 = vld [vmem:[%s11453_s3 + $0x810] sm:$0xff]  ;;  %v12038_v46 = vld [vmem:[#allocation73_spill] sm:$0xff] }
 0x33a   :  { %4138 = vmatpush.msra.mxu3 %v5830_v9  ;;  %v2544_v5 = vmul.f32 0.5, %v2543_v41  ;;  %v1489_v9 = vmax.f32 %v10283_v26, 0.0  ;;  %4121 = vmatpush.msra.mxu2 %v5811_v6  ;;  %v1493_v54 = vmax.f32 %v10313_v47, 0.0  ;;  %vm2547_vm9 = vweird.f32 %v10157_v39  ;;  %v5809_v26 = vld [vmem:[%s11453_s3 + $0x918] sm:$0xff]  ;;  %v5808_v41 = vld [vmem:[%s11453_s3 + $0x910] sm:$0xff]  ;;  %v12039_v11 = vld [vmem:[#allocation74_spill] sm:$0xff] }
 0x33b   :  { %v10181_v27 = vadd.f32 1e-05, %v1802_v2  ;;  %v5797_v2 = vld [vmem:[%s11453_s3 + $0x8b8] sm:$0xff]  ;;  %4004 = vmatpush.msra.mxu0 %v5778_v50  ;;  %vm2549_vm11 = vmor %vm2547_vm9, %vm2548_vm8  ;;  %v10372_v39 = vmax.f32 %v10222_v30, %v10239_v20  ;;  %v10389_v30 = vmax.f32 %v10252_v37, %v10295_v61  ;;  %v10400_v44 = vmax.f32 %v10266_v45, %v1138_v40  ;;  %v5807_v47 = vld [vmem:[%s11453_s3 + $0x908] sm:$0xff] }
 0x33c   :  { %4021 = vmatpush.msra.mxu1 %v5797_v2  ;;  %4139 = vmatpush.msra.mxu3 %v5829_v1  ;;  %v5826_v2 = vld [vmem:[%s11453_s3 + $0x9a0] sm:$0xff]  ;;  %v2545_v25 = vsub.f32 1.5, %v2544_v5  ;;  %v5777_v1 = vld [vmem:[%s11453_s3 + $0x818] sm:$0xff]  ;;  %v10404_v37 = vmax.f32 %v1487_v62, %v1489_v9  ;;  %v10406_v61 = vmax.f32 %v1490_v57, %v1492_v35  ;;  %v10416_v45 = vmax.f32 %v1491_v22, %v1493_v54  ;;  %v12045_v57 = vld [vmem:[#allocation19_spill] sm:$0xff] }
 0x33d   :  { %6191 = vrsqrt.f32 %v10181_v27  ;;  %4122 = vmatpush.msra.mxu2 %v5810_v4  ;;  %4005 = vmatpush.msra.mxu0 %v5777_v1  ;;  %vm1821_vm12 = vweird.f32 %v10181_v27  ;;  %v12042_v62 = vld [vmem:[#allocation29_spill] sm:$0xff]  ;;  %v5774_v6 = vld [vmem:[%s11453_s3 + $0x800] sm:$0xff]  ;;  %v12047_v40 = vld [vmem:[#allocation39_spill] sm:$0xff] }
 0x33e   :  { %4022 = vmatpush.msra.mxu1 %v5796_v16  ;;  %4140 = vmatpush.msra.mxu3 %v5828_v33  ;;  %v2546_v51 = vmul.f32 %v10248_v56, %v2545_v25  ;;  %v10376_v16 = vmax.f32 %v10224_v31, %v10250_v24  ;;  %v5824_v24 = vld [vmem:[%s11453_s3 + $0x990] sm:$0xff]  ;;  %v10402_v33 = vmax.f32 %v1486_v38, %v1488_v28  ;;  %v5823_v38 = vld [vmem:[%s11453_s3 + $0x988] sm:$0xff]  ;;  %v12044_v28 = vld [vmem:[#allocation6_spill] sm:$0xff] }
 0x33f   :  { %4123 = vmatpush.msra.mxu2 %v5809_v26  ;;  %4006 = vmatpush.msra.mxu0 %v5776_v14  ;;  %v12046_v4 = vld [vmem:[#allocation38_spill] sm:$0xff]  ;;  %v5853_v26 = vld [vmem:[%s11453_s3 + $0xa78] sm:$0xff] }
 0x340   :  { %4023 = vmatpush.msra.mxu1 %v5795_v53  ;;  %4141 = vmatpush.msra.mxu3 %v5827_v59  ;;  %v10394_v20 = vsel %vm2549_vm11, %v10248_v56, %v2546_v51  ;;  %v5791_v56 = vld [vmem:[%s11453_s3 + $0x888] sm:$0xff]  ;;  %v5790_v59 = vld [vmem:[%s11453_s3 + $0x880] sm:$0xff] }
 0x341   :  { %4124 = vmatpush.msra.mxu2 %v5808_v41  ;;  %v10421_v12 = vmul.f32 %v10394_v20, %v12038_v46  ;;  %v10425_v7 = vmul.f32 %v10394_v20, %v12039_v11  ;;  %v5806_v25 = vld [vmem:[%s11453_s3 + $0x900] sm:$0xff]  ;;  %v5885_v41 = vld [vmem:[%s11453_s3 + $0xb78] sm:$0xff]  ;;  %v5852_v11 = vld [vmem:[%s11453_s3 + $0xa70] sm:$0xff] }
 0x342   :  { %4024 = vmatpush.msra.mxu1 %v5794_v8  ;;  %4142 = vmatpush.msra.mxu3 %v5826_v2  ;;  %v5822_v1 = vld [vmem:[%s11453_s3 + $0x980] sm:$0xff] }
 0x343   :  { %v10276_v60 = vpop.eup %6191  ;;  %4125 = vmatpush.msra.mxu2 %v5807_v47  ;;  %v5868_v47 = vld [vmem:[%s11453_s3 + $0xaf0] sm:$0xff] }
 0x344   :  { %v1816_v19 = vmul.f32 %v10276_v60, %v10181_v27  ;;  %vm1822_vm10 = vweird.f32 %v10276_v60  ;;  %4025 = vmatpush.msra.mxu1 %v5793_v63  ;;  %4143 = vmatpush.msra.mxu3 %v5825_v23  ;;  %v5775_v27 = vld [vmem:[%s11453_s3 + $0x808] sm:$0xff]  ;;  %v5869_v23 = vld [vmem:[%s11453_s3 + $0xaf8] sm:$0xff] }
 0x345   :  { %vm1823_vm13 = vmor %vm1821_vm12, %vm1822_vm10  ;;  %4007 = vmatpush.msra.mxu0 %v5775_v27  ;;  %v12048_v27 = vld [vmem:[#allocation80_spill] sm:$0xff]  ;;  %4126 = vmatpush.msra.mxu2 %v5806_v25 }
 0x346   :  { %v711_v18 = vpop.xlane.xlu0 %710  ;;  %v1817_v21 = vmul.f32 %v10276_v60, %v1816_v19  ;;  %v5792_v19 = vld [vmem:[%s11453_s3 + $0x890] sm:$0xff]  ;;  %4144 = vmatpush.msra.mxu3 %v5824_v24 }
 0x347   :  { %v713_v29 = vmul.f32 %v711_v18, %v7544_v34  ;;  %4026 = vmatpush.msra.mxu1 %v5792_v19  ;;  %v12040_v18 = vld [vmem:[#allocation56_spill] sm:$0xff]  ;;  %4008 = vmatpush.msra.mxu0 %v5774_v6 }
 0x348   :  { %v1818_v48 = vmul.f32 0.5, %v1817_v21  ;;  %4145 = vmatpush.msra.mxu3 %v5823_v38  ;;  %v12050_v38 = vld [vmem:[#allocation35_spill] sm:$0xff]  ;;  %4343 = vmatpush.msrb.mxu2 %v5885_v41 }
 0x349   :  { %v10347_v43 = vadd.f32 1e-05, %v713_v29  ;;  %v12043_v29 = vld [vmem:[#allocation32_spill] sm:$0xff]  ;;  %4027 = vmatpush.msra.mxu1 %v5791_v56  ;;  %v10471_v56 = vmul.f32 %v10394_v20, %v12048_v27  ;;  %4227 = vmatpush.msrb.mxu0 %v5853_v26  ;;  %v2576_v26 = vmax.f32 %v10425_v7, 0.0 }
 0x34a   :  { %v1819_v0 = vsub.f32 1.5, %v1818_v48  ;;  %4146 = vmatpush.msra.mxu3 %v5822_v1  ;;  %v5899_v1 = vld [vmem:[%s11453_s3 + $0xbe8] sm:$0xff] }
 0x34b   :  { %6193 = vrsqrt.f32 %v10347_v43  ;;  %4028 = vmatpush.msra.mxu1 %v5790_v59  ;;  %v12053_v59 = vld [vmem:[#allocation36_spill] sm:$0xff]  ;;  %4228 = vmatpush.msrb.mxu0 %v5852_v11  ;;  %vm732_vm15 = vweird.f32 %v10347_v43 }
 0x34c   :  { %v1820_v31 = vmul.f32 %v10276_v60, %v1819_v0 }
 0x34d   :  { %4247 = vmatpush.msrb.mxu1 %v5869_v23  ;;  %v5866_v23 = vld [vmem:[%s11453_s3 + $0xae0] sm:$0xff] }
 0x34e   :  { %v1824_v10 = vsel %vm1823_vm13, %v10276_v60, %v1820_v31  ;;  %v12041_v60 = vld [vmem:[#allocation65_spill] sm:$0xff] }
 0x34f   :  { %v1833_v36 = vmul.f32 %v1824_v10, %v12040_v18  ;;  %v1834_v53 = vmul.f32 %v1824_v10, %v12041_v60  ;;  %v1835_v21 = vmul.f32 %v1824_v10, %v12042_v62  ;;  %v1836_v5 = vmul.f32 %v1824_v10, %v12043_v29  ;;  %v5901_v31 = vld [vmem:[%s11453_s3 + $0xbf8] sm:$0xff]  ;;  %v5900_v29 = vld [vmem:[%s11453_s3 + $0xbf0] sm:$0xff]  ;;  %4248 = vmatpush.msrb.mxu1 %v5868_v47 }
 0x350   :  { %v1837_v9 = vmul.f32 %v1824_v10, %v12044_v28  ;;  %v1838_v8 = vmul.f32 %v1824_v10, %v12045_v57  ;;  %v1839_v2 = vmul.f32 %v1824_v10, %v12046_v4  ;;  %v1840_v48 = vmul.f32 %v1824_v10, %v12047_v40  ;;  %v12049_v10 = vld [vmem:[#allocation81_spill] sm:$0xff]  ;;  %4363 = vmatpush.msrb.mxu3 %v5901_v31  ;;  %v5867_v4 = vld [vmem:[%s11453_s3 + $0xae8] sm:$0xff] }
 0x351   :  { %v10443_v50 = vpop.eup %6193  ;;  %v1849_v63 = vmax.f32 %v1833_v36, 0.0  ;;  %v1850_v22 = vmax.f32 %v1834_v53, 0.0  ;;  %v1851_v35 = vmax.f32 %v1835_v21, 0.0  ;;  %v1852_v54 = vmax.f32 %v1836_v5, 0.0  ;;  %v12051_v36 = vld [vmem:[#allocation30_spill] sm:$0xff]  ;;  %v12052_v53 = vld [vmem:[#allocation59_spill] sm:$0xff]  ;;  %4249 = vmatpush.msrb.mxu1 %v5867_v4 }
 0x352   :  { %v1853_v0 = vmax.f32 %v1837_v9, 0.0  ;;  %v1854_v51 = vmax.f32 %v1838_v8, 0.0  ;;  %v1855_v14 = vmax.f32 %v1839_v2, 0.0  ;;  %v1856_v19 = vmax.f32 %v1840_v48, 0.0  ;;  %v5884_v21 = vld [vmem:[%s11453_s3 + $0xb70] sm:$0xff]  ;;  %v2163_v9 = vpop.xlane.xlu0 %2162  ;;  %v5851_v8 = vld [vmem:[%s11453_s3 + $0xa68] sm:$0xff]  ;;  %4364 = vmatpush.msrb.mxu3 %v5900_v29 }
 0x353   :  { %v727_v24 = vmul.f32 %v10443_v50, %v10347_v43  ;;  %v10475_v46 = vmul.f32 %v10394_v20, %v12049_v10  ;;  %v10485_v18 = vmul.f32 %v10394_v20, %v12050_v38  ;;  %v10489_v60 = vmul.f32 %v10394_v20, %v12051_v36  ;;  %4344 = vmatpush.msrb.mxu2 %v5884_v21  ;;  %v5881_v38 = vld [vmem:[%s11453_s3 + $0xb58] sm:$0xff]  ;;  %v5864_v43 = vld [vmem:[%s11453_s3 + $0xad0] sm:$0xff] }
 0x354   :  { %v10493_v62 = vmul.f32 %v10394_v20, %v12052_v53  ;;  %v1859_v5 = vmax.f32 %v1849_v63, %v1851_v35  ;;  %v10504_v28 = vmul.f32 %v10394_v20, %v12053_v59  ;;  %v4036_v2 = vrot.slane %v10372_v39, 1  ;;  %v5883_v20 = vld [vmem:[%s11453_s3 + $0xb68] sm:$0xff]  ;;  %4229 = vmatpush.msrb.mxu0 %v5851_v8  ;;  %4365 = vmatpush.msrb.mxu3 %v5899_v1 }
 0x355   :  { %v728_v6 = vmul.f32 %v10443_v50, %v727_v24  ;;  %v1860_v40 = vmax.f32 %v1850_v22, %v1852_v54  ;;  %v1863_v48 = vmax.f32 %v1853_v0, %v1855_v14  ;;  %v1864_v25 = vmax.f32 %v1854_v51, %v1856_v19  ;;  %v5850_v54 = vld [vmem:[%s11453_s3 + $0xa60] sm:$0xff]  ;;  %4345 = vmatpush.msrb.mxu2 %v5883_v20  ;;  %v5863_v8 = vld [vmem:[%s11453_s3 + $0xac8] sm:$0xff] }
 0x356   :  { %v2889_v57 = vpop.xlane.xlu2 %2888  ;;  %vm733_vm14 = vweird.f32 %v10443_v50  ;;  %v2575_v35 = vmax.f32 %v10421_v12, 0.0  ;;  %v2577_v22 = vmax.f32 %v10471_v56, 0.0  ;;  %v2578_v0 = vmax.f32 %v10475_v46, 0.0  ;;  %v5882_v14 = vld [vmem:[%s11453_s3 + $0xb60] sm:$0xff]  ;;  %v5865_v56 = vld [vmem:[%s11453_s3 + $0xad8] sm:$0xff]  ;;  %4230 = vmatpush.msrb.mxu0 %v5850_v54  ;;  %4250 = vmatpush.msrb.mxu1 %v5866_v23 }
 0x357   :  { %v729_v63 = vmul.f32 0.5, %v728_v6  ;;  %v2579_v51 = vmax.f32 %v10485_v18, 0.0  ;;  %v2165_v12 = vmul.f32 %v2163_v9, %v7544_v34  ;;  %v2891_v7 = vmul.f32 %v2889_v57, %v7544_v34  ;;  %v5898_v19 = vld [vmem:[%s11453_s3 + $0xbe0] sm:$0xff]  ;;  %v5849_v34 = vld [vmem:[%s11453_s3 + $0xa58] sm:$0xff]  ;;  %4346 = vmatpush.msrb.mxu2 %v5882_v14  ;;  %vm734_vm5 = vmor %vm732_vm15, %vm733_vm14 }
 0x358   :  { %v2580_v31 = vmax.f32 %v10489_v60, 0.0  ;;  %v2581_v24 = vmax.f32 %v10493_v62, 0.0  ;;  %v2582_v27 = vmax.f32 %v10504_v28, 0.0  ;;  %v10550_v10 = vmax.f32 %v10402_v33, %v10406_v61  ;;  %v5897_v18 = vld [vmem:[%s11453_s3 + $0xbd8] sm:$0xff]  ;;  %4366 = vmatpush.msrb.mxu3 %v5898_v19  ;;  %4231 = vmatpush.msrb.mxu0 %v5849_v34  ;;  %v5896_v6 = vld [vmem:[%s11453_s3 + $0xbd0] sm:$0xff]  ;;  %v5847_v57 = vld [vmem:[%s11453_s3 + $0xa48] sm:$0xff] }
 0x359   :  { %v730_v41 = vsub.f32 1.5, %v729_v63  ;;  %v10554_v46 = vmax.f32 %v10404_v37, %v10416_v45  ;;  %v10556_v11 = vadd.f32 1e-05, %v2165_v12  ;;  %v10558_v47 = vadd.f32 1e-05, %v2891_v7  ;;  %v5848_v37 = vld [vmem:[%s11453_s3 + $0xa50] sm:$0xff]  ;;  %4251 = vmatpush.msrb.mxu1 %v5865_v56  ;;  %4347 = vmatpush.msrb.mxu2 %v5881_v38 }
 0x35a   :  { %v10566_v33 = vmax.f32 %v1859_v5, %v1863_v48  ;;  %v4037_v45 = vrot.slane %v10376_v16, 1  ;;  %v10574_v36 = vmax.f32 %v1860_v40, %v1864_v25  ;;  %v2585_v60 = vmax.f32 %v2575_v35, %v2577_v22  ;;  %4367 = vmatpush.msrb.mxu3 %v5897_v18  ;;  %v5880_v5 = vld [vmem:[%s11453_s3 + $0xb50] sm:$0xff]  ;;  %4232 = vmatpush.msrb.mxu0 %v5848_v37  ;;  %v5894_v22 = vld [vmem:[%s11453_s3 + $0xbc0] sm:$0xff]  ;;  %v5845_v12 = vld [vmem:[%s11453_s3 + $0xa38] sm:$0xff] }
 0x35b   :  { %v731_v61 = vmul.f32 %v10443_v50, %v730_v41  ;;  %v2586_v53 = vmax.f32 %v2576_v26, %v2578_v0  ;;  %6195 = vrsqrt.f32 %v10556_v11  ;;  %v2589_v21 = vmax.f32 %v2579_v51, %v2581_v24  ;;  %4252 = vmatpush.msrb.mxu1 %v5864_v43  ;;  %4348 = vmatpush.msrb.mxu2 %v5880_v5  ;;  %v5878_v26 = vld [vmem:[%s11453_s3 + $0xb40] sm:$0xff]  ;;  %v5861_v7 = vld [vmem:[%s11453_s3 + $0xab8] sm:$0xff]  ;;  %v5860_v37 = vld [vmem:[%s11453_s3 + $0xab0] sm:$0xff] }
 0x35c   :  { %v2590_v29 = vmax.f32 %v2580_v31, %v2582_v27  ;;  %6197 = vrsqrt.f32 %v10558_v47  ;;  %4368 = vmatpush.msrb.mxu3 %v5896_v6  ;;  %4233 = vmatpush.msrb.mxu0 %v5847_v57  ;;  %v4152_v14 = vrot.slane %v10372_v39, 2  ;;  %v5877_v27 = vld [vmem:[%s11453_s3 + $0xb38] sm:$0xff]  ;;  %v3912_v56 = vrot.slane %v10389_v30, 6  ;;  %v5892_v5 = vld [vmem:[%s11453_s3 + $0xbb0] sm:$0xff] }
 0x35d   :  { %v735_v62 = vsel %vm734_vm5, %v10443_v50, %v731_v61  ;;  %4253 = vmatpush.msrb.mxu1 %v5863_v8  ;;  %v10624_v51 = vmax.f32 %v2585_v60, %v2589_v21  ;;  %v5893_v34 = vld [vmem:[%s11453_s3 + $0xbb8] sm:$0xff]  ;;  %v5844_v61 = vld [vmem:[%s11453_s3 + $0xa30] sm:$0xff]  ;;  %v3918_v60 = vrot.slane %v10550_v10, 5  ;;  %v3924_v43 = vrot.slane %v10566_v33, 4 }
 0x35e   :  { %v744_v59 = vmul.f32 %v735_v62, %v9086_v13  ;;  %v745_v28 = vmul.f32 %v735_v62, %v9090_v49  ;;  %v746_v50 = vmul.f32 %v735_v62, %v9094_v42  ;;  %v747_v9 = vmul.f32 %v735_v62, %v9101_v32  ;;  %v5879_v42 = vld [vmem:[%s11453_s3 + $0xb48] sm:$0xff] }
 0x35f   :  { %v748_v4 = vmul.f32 %v735_v62, %v9129_v3  ;;  %v749_v40 = vmul.f32 %v735_v62, %v9138_v58  ;;  %v750_v13 = vmul.f32 %v735_v62, %v9142_v55  ;;  %v751_v49 = vmul.f32 %v735_v62, %v9228_v52  ;;  %v5895_v32 = vld [vmem:[%s11453_s3 + $0xbc8] sm:$0xff]  ;;  %v5846_v3 = vld [vmem:[%s11453_s3 + $0xa40] sm:$0xff]  ;;  %4349 = vmatpush.msrb.mxu2 %v5879_v42 }
 0x360   :  { %v760_v48 = vmax.f32 %v744_v59, 0.0  ;;  %v761_v25 = vmax.f32 %v745_v28, 0.0  ;;  %v762_v20 = vmax.f32 %v746_v50, 0.0  ;;  %v763_v1 = vmax.f32 %v747_v9, 0.0  ;;  %v5862_v58 = vld [vmem:[%s11453_s3 + $0xac0] sm:$0xff]  ;;  %4369 = vmatpush.msrb.mxu3 %v5895_v32  ;;  %4234 = vmatpush.msrb.mxu0 %v5846_v3  ;;  %v5843_v59 = vld [vmem:[%s11453_s3 + $0xa28] sm:$0xff] }
 0x361   :  { %v764_v55 = vmax.f32 %v748_v4, 0.0  ;;  %v765_v52 = vmax.f32 %v749_v40, 0.0  ;;  %v766_v63 = vmax.f32 %v750_v13, 0.0  ;;  %v767_v35 = vmax.f32 %v751_v49, 0.0  ;;  %v10622_v54 = vpop.eup %6195  ;;  %4254 = vmatpush.msrb.mxu1 %v5862_v58  ;;  %4350 = vmatpush.msrb.mxu2 %v5878_v26  ;;  %v5859_v28 = vld [vmem:[%s11453_s3 + $0xaa8] sm:$0xff]  ;;  %v5890_v3 = vld [vmem:[%s11453_s3 + $0xba0] sm:$0xff] }
 0x362   :  { %v770_v23 = vmax.f32 %v760_v48, %v762_v20  ;;  %v771_v0 = vmax.f32 %v761_v25, %v763_v1  ;;  %v10633_v19 = vpop.eup %6197  ;;  %v2179_v24 = vmul.f32 %v10622_v54, %v10556_v11  ;;  %v10644_v38 = vmax.f32 %v2586_v53, %v2590_v29  ;;  %4370 = vmatpush.msrb.mxu3 %v5894_v22  ;;  %v5876_v29 = vld [vmem:[%s11453_s3 + $0xb30] sm:$0xff]  ;;  %v5875_v4 = vld [vmem:[%s11453_s3 + $0xb28] sm:$0xff]  ;;  %v5842_v48 = vld [vmem:[%s11453_s3 + $0xa20] sm:$0xff] }
 0x363   :  { %v774_v41 = vmax.f32 %v764_v55, %v766_v63  ;;  %v775_v31 = vmax.f32 %v765_v52, %v767_v35  ;;  %v2905_v18 = vmul.f32 %v10633_v19, %v10558_v47  ;;  %vm2184_vm8 = vweird.f32 %v10556_v11  ;;  %4235 = vmatpush.msrb.mxu0 %v5845_v12  ;;  %4255 = vmatpush.msrb.mxu1 %v5861_v7  ;;  %v5891_v40 = vld [vmem:[%s11453_s3 + $0xba8] sm:$0xff]  ;;  %v5858_v25 = vld [vmem:[%s11453_s3 + $0xaa0] sm:$0xff]  ;;  %v5841_v35 = vld [vmem:[%s11453_s3 + $0xa18] sm:$0xff] }
 0x364   :  { %v2180_v21 = vmul.f32 %v10622_v54, %v2179_v24  ;;  %4351 = vmatpush.msrb.mxu2 %v5877_v27  ;;  %4371 = vmatpush.msrb.mxu3 %v5893_v34  ;;  %v3936_v50 = vrot.slane %v10624_v51, 2  ;;  %v3913_v9 = vrot.slane %v10400_v44, 6  ;;  %v3919_v57 = vrot.slane %v10554_v46, 5  ;;  %v5874_v1 = vld [vmem:[%s11453_s3 + $0xb20] sm:$0xff]  ;;  %v5857_v26 = vld [vmem:[%s11453_s3 + $0xa98] sm:$0xff] }
 0x365   :  { %v10656_v62 = vmax.f32 %v770_v23, %v774_v41  ;;  %v10658_v53 = vmax.f32 %v771_v0, %v775_v31  ;;  %v2906_v6 = vmul.f32 %v10633_v19, %v2905_v18  ;;  %4236 = vmatpush.msrb.mxu0 %v5844_v61  ;;  %4256 = vmatpush.msrb.mxu1 %v5860_v37  ;;  %vm2185_vm9 = vweird.f32 %v10622_v54  ;;  %v5873_v7 = vld [vmem:[%s11453_s3 + $0xb18] sm:$0xff]  ;;  %v5840_v37 = vld [vmem:[%s11453_s3 + $0xa10] sm:$0xff] }
 0x366   :  { %v2181_v8 = vmul.f32 0.5, %v2180_v21  ;;  %vm2910_vm10 = vweird.f32 %v10558_v47  ;;  %vm2911_vm11 = vweird.f32 %v10633_v19  ;;  %4352 = vmatpush.msrb.mxu2 %v5876_v29  ;;  %4372 = vmatpush.msrb.mxu3 %v5892_v5  ;;  %v4040_v20 = vrot.slane %v10389_v30, 7  ;;  %vm2186_vm12 = vmor %vm2184_vm8, %vm2185_vm9  ;;  %v5889_v34 = vld [vmem:[%s11453_s3 + $0xb98] sm:$0xff]  ;;  %v12054_v5 = vld [vmem:[#allocation40_spill] sm:$0xff] }
 0x367   :  { %v3906_v13 = vrot.slane %v10656_v62, 7  ;;  %v3907_v49 = vrot.slane %v10658_v53, 7  ;;  %v4064_v42 = vsel %vm3000_vm2, %v4036_v2, %v10656_v62  ;;  %v2907_v32 = vmul.f32 0.5, %v2906_v6  ;;  %4237 = vmatpush.msrb.mxu0 %v5843_v59  ;;  %4257 = vmatpush.msrb.mxu1 %v5859_v28  ;;  %v12055_v6 = vld [vmem:[#allocation83_spill] sm:$0xff]  ;;  %v12056_v28 = vld [vmem:[#allocation84_spill] sm:$0xff]  ;;  %vm2912_vm13 = vmor %vm2910_vm10, %vm2911_vm11 }
 0x368   :  { %v2182_v2 = vsub.f32 1.5, %v2181_v8  ;;  %v3925_v55 = vrot.slane %v10574_v36, 4  ;;  %4353 = vmatpush.msrb.mxu2 %v5875_v4  ;;  %4373 = vmatpush.msrb.mxu3 %v5891_v40  ;;  %v4066_v0 = vsel %vm3003_vm3, %v4064_v42, %v4040_v20  ;;  %v3937_v31 = vrot.slane %v10644_v38, 2  ;;  %v12057_v8 = vld [vmem:[#allocation85_spill] sm:$0xff]  ;;  %v5872_v40 = vld [vmem:[%s11453_s3 + $0xb10] sm:$0xff]  ;;  %v12059_v42 = vld [vmem:[#allocation87_spill] sm:$0xff] }
 0x369   :  { %v3946_v58 = vsel %vm3000_vm2, %v10372_v39, %v3906_v13  ;;  %v3947_v52 = vsel %vm3000_vm2, %v10376_v16, %v3907_v49  ;;  %v2908_v63 = vsub.f32 1.5, %v2907_v32  ;;  %4238 = vmatpush.msrb.mxu0 %v5842_v48  ;;  %4258 = vmatpush.msrb.mxu1 %v5858_v25  ;;  %v4044_v24 = vrot.slane %v10550_v10, 6  ;;  %v12058_v13 = vld [vmem:[#allocation86_spill] sm:$0xff]  ;;  %v12060_v48 = vld [vmem:[#allocation88_spill] sm:$0xff]  ;;  %v12061_v20 = vld [vmem:[#allocation91_spill] sm:$0xff] }
 0x36a   :  { %v3948_v22 = vsel %vm3003_vm3, %v3946_v58, %v3912_v56  ;;  %v3949_v23 = vsel %vm3003_vm3, %v3947_v52, %v3913_v9  ;;  %v2183_v12 = vmul.f32 %v10622_v54, %v2182_v2  ;;  %4354 = vmatpush.msrb.mxu2 %v5874_v1  ;;  %4374 = vmatpush.msrb.mxu3 %v5890_v3  ;;  %v4048_v18 = vrot.slane %v10566_v33, 5  ;;  %v5839_v1 = vld [vmem:[%s11453_s3 + $0xa08] sm:$0xff] }
 0x36b   :  { %v3950_v41 = vsel %vm3006_vm4, %v3948_v22, %v3918_v60  ;;  %v2909_v27 = vmul.f32 %v10633_v19, %v2908_v63  ;;  %v4056_v61 = vrot.slane %v10624_v51, 3  ;;  %4239 = vmatpush.msrb.mxu0 %v5841_v35  ;;  %4259 = vmatpush.msrb.mxu1 %v5857_v26  ;;  %v5856_v60 = vld [vmem:[%s11453_s3 + $0xa90] sm:$0xff]  ;;  %v10750_v21 = vsel %vm3006_vm4, %v3949_v23, %v3919_v57  ;;  %v5855_v3 = vld [vmem:[%s11453_s3 + $0xa88] sm:$0xff] }
 0x36c   :  { %v10738_v56 = vsel %vm3009_vm6, %v3950_v41, %v3924_v43  ;;  %v2187_v11 = vsel %vm2186_vm12, %v10622_v54, %v2183_v12  ;;  %v10753_v43 = vsel %vm3006_vm4, %v4066_v0, %v4044_v24  ;;  %v4041_v29 = vrot.slane %v10400_v44, 7  ;;  %4355 = vmatpush.msrb.mxu2 %v5873_v7  ;;  %v5888_v57 = vld [vmem:[%s11453_s3 + $0xb90] sm:$0xff]  ;;  %4375 = vmatpush.msrb.mxu3 %v5889_v34  ;;  %v5871_v26 = vld [vmem:[%s11453_s3 + $0xb08] sm:$0xff] }
 0x36d   :  { %v2196_v54 = vmul.f32 %v2187_v11, %v12054_v5  ;;  %v2197_v59 = vmul.f32 %v2187_v11, %v12055_v6  ;;  %v2198_v9 = vmul.f32 %v2187_v11, %v12056_v28  ;;  %v2199_v4 = vmul.f32 %v2187_v11, %v12057_v8  ;;  %4240 = vmatpush.msrb.mxu0 %v5840_v37  ;;  %v5887_v7 = vld [vmem:[%s11453_s3 + $0xb88] sm:$0xff]  ;;  %v12062_v5 = vld [vmem:[#allocation93_spill] sm:$0xff]  ;;  %v5854_v28 = vld [vmem:[%s11453_s3 + $0xa80] sm:$0xff] }
 0x36e   :  { %v2200_v49 = vmul.f32 %v2187_v11, %v12058_v13  ;;  %v2201_v32 = vmul.f32 %v2187_v11, %v12059_v42  ;;  %v2202_v25 = vmul.f32 %v2187_v11, %v12060_v48  ;;  %v2203_v2 = vmul.f32 %v2187_v11, %v12061_v20  ;;  %4260 = vmatpush.msrb.mxu1 %v5856_v60  ;;  %v5838_v11 = vld [vmem:[%s11453_s3 + $0xa00] sm:$0xff]  ;;  %v12063_v6 = vld [vmem:[#allocation7_spill] sm:$0xff]  ;;  %v12067_v13 = vld [vmem:[#allocation89_spill] sm:$0xff] }
 0x36f   :  { %v2212_v58 = vmax.f32 %v2196_v54, 0.0  ;;  %v2213_v52 = vmax.f32 %v2197_v59, 0.0  ;;  %v2214_v63 = vmax.f32 %v2198_v9, 0.0  ;;  %v2215_v35 = vmax.f32 %v2199_v4, 0.0  ;;  %4356 = vmatpush.msrb.mxu2 %v5872_v40  ;;  %4376 = vmatpush.msrb.mxu3 %v5888_v57  ;;  %v12065_v8 = vld [vmem:[#allocation54_spill] sm:$0xff]  ;;  %v12066_v40 = vld [vmem:[#allocation21_spill] sm:$0xff] }
 0x370   :  { %v2216_v22 = vmax.f32 %v2200_v49, 0.0  ;;  %v2217_v23 = vmax.f32 %v2201_v32, 0.0  ;;  %v2218_v0 = vmax.f32 %v2202_v25, 0.0  ;;  %v2219_v12 = vmax.f32 %v2203_v2, 0.0  ;;  %4241 = vmatpush.msrb.mxu0 %v5839_v1  ;;  %4261 = vmatpush.msrb.mxu1 %v5855_v3  ;;  %v5886_v42 = vld [vmem:[%s11453_s3 + $0xb80] sm:$0xff] }
 0x371   :  { %v2222_v41 = vmax.f32 %v2212_v58, %v2214_v63  ;;  %v2223_v24 = vmax.f32 %v2213_v52, %v2215_v35  ;;  %v2913_v34 = vsel %vm2912_vm13, %v10633_v19, %v2909_v27  ;;  %v4045_v37 = vrot.slane %v10554_v46, 6  ;;  %4357 = vmatpush.msrb.mxu2 %v5871_v26  ;;  %v5870_v19 = vld [vmem:[%s11453_s3 + $0xb00] sm:$0xff]  ;;  %v12064_v27 = vld [vmem:[#allocation8_spill] sm:$0xff]  ;;  %4377 = vmatpush.msrb.mxu3 %v5887_v7 }
 0x372   :  { %v2226_v47 = vmax.f32 %v2216_v22, %v2218_v0  ;;  %v2227_v60 = vmax.f32 %v2217_v23, %v2219_v12  ;;  %v2922_v54 = vmul.f32 %v2913_v34, %v12062_v5  ;;  %v2923_v59 = vmul.f32 %v2913_v34, %v12063_v6  ;;  %4242 = vmatpush.msrb.mxu0 %v5838_v11 }
 0x373   :  { %v2924_v9 = vmul.f32 %v2913_v34, %v12064_v27  ;;  %v2925_v4 = vmul.f32 %v2913_v34, %v12065_v8  ;;  %v2926_v57 = vmul.f32 %v2913_v34, %v12066_v40  ;;  %v2927_v49 = vmul.f32 %v2913_v34, %v12067_v13  ;;  %4262 = vmatpush.msrb.mxu1 %v5854_v28  ;;  %v5916_v13 = vld [vmem:[%s11453_s3 + $0xc70] sm:$0xff] }
 0x374   :  { %v10806_v32 = vmax.f32 %v2222_v41, %v2226_v47  ;;  %v10808_v48 = vmax.f32 %v2223_v24, %v2227_v60  ;;  %v2928_v25 = vmul.f32 %v2913_v34, %v9431_v17  ;;  %v2929_v20 = vmul.f32 %v2913_v34, %v9435_v15  ;;  %4358 = vmatpush.msrb.mxu2 %v5870_v19 }
 0x375   :  { %v2938_v2 = vmax.f32 %v2922_v54, 0.0  ;;  %v2939_v1 = vmax.f32 %v2923_v59, 0.0  ;;  %v2940_v3 = vmax.f32 %v2924_v9, 0.0  ;;  %v2941_v58 = vmax.f32 %v2925_v4, 0.0  ;;  %4378 = vmatpush.msrb.mxu3 %v5886_v42 }
 0x376   :  { %v2942_v52 = vmax.f32 %v2926_v57, 0.0  ;;  %v2943_v63 = vmax.f32 %v2927_v49, 0.0  ;;  %v2944_v35 = vmax.f32 %v2928_v25, 0.0  ;;  %v2945_v26 = vmax.f32 %v2929_v20, 0.0 }
 0x377   :  { %v2948_v22 = vmax.f32 %v2938_v2, %v2940_v3  ;;  %v2949_v23 = vmax.f32 %v2939_v1, %v2941_v58  ;;  %v3930_v0 = vrot.slane %v10806_v32, 3  ;;  %v3931_v17 = vrot.slane %v10808_v48, 3  ;;  %v5965_v2 = vld [vmem:[%s11453_s3 + $0xdf8] sm:$0xff]  ;;  %v5932_v1 = vld [vmem:[%s11453_s3 + $0xcf0] sm:$0xff] }
 0x378   :  { %v2952_v12 = vmax.f32 %v2942_v52, %v2944_v35  ;;  %v2953_v15 = vmax.f32 %v2943_v63, %v2945_v26  ;;  %v3953_v7 = vsel %vm3009_vm6, %v10750_v21, %v3925_v55  ;;  %v4052_v41 = vrot.slane %v10806_v32, 4  ;;  %v5948_v63 = vld [vmem:[%s11453_s3 + $0xd70] sm:$0xff]  ;;  %v5915_v35 = vld [vmem:[%s11453_s3 + $0xc68] sm:$0xff] }
 0x379   :  { %v3954_v24 = vsel %vm132_vm0, %v10738_v56, %v3930_v0  ;;  %v4049_v34 = vrot.slane %v10574_v36, 5  ;;  %v4057_v11 = vrot.slane %v10644_v38, 3  ;;  %v4065_v47 = vsel %vm3000_vm2, %v4037_v45, %v10658_v53  ;;  %v5931_v0 = vld [vmem:[%s11453_s3 + $0xce8] sm:$0xff] }
 0x37a   :  { %v10827_v60 = vmax.f32 %v2948_v22, %v2952_v12  ;;  %v10829_v5 = vmax.f32 %v2949_v23, %v2953_v15  ;;  %v3955_v55 = vsel %vm132_vm0, %v3953_v7, %v3931_v17  ;;  %v4070_v56 = vsel %vm3009_vm6, %v10753_v43, %v4048_v18  ;;  %v5964_v23 = vld [vmem:[%s11453_s3 + $0xdf0] sm:$0xff] }
 0x37b   :  { %v4072_v21 = vsel %vm132_vm0, %v4070_v56, %v4052_v41  ;;  %v4053_v54 = vrot.slane %v10808_v48, 4  ;;  %v4067_v6 = vsel %vm3003_vm3, %v4065_v47, %v4041_v29  ;;  %v4156_v45 = vrot.slane %v10656_v62, 1  ;;  %v5947_v41 = vld [vmem:[%s11453_s3 + $0xd68] sm:$0xff] }
 0x37c   :  { %v3942_v59 = vrot.slane %v10827_v60, 1  ;;  %v3956_v28 = vsel %vm133_vm1, %v3954_v24, %v3936_v50  ;;  %v3943_v19 = vrot.slane %v10829_v5, 1  ;;  %v4060_v18 = vrot.slane %v10827_v60, 2  ;;  %v5917_v50 = vld [vmem:[%s11453_s3 + $0xc78] sm:$0xff]  ;;  %v5914_v24 = vld [vmem:[%s11453_s3 + $0xc60] sm:$0xff]  ;;  %v5963_v56 = vld [vmem:[%s11453_s3 + $0xde8] sm:$0xff] }
 0x37d   :  { %v3957_v43 = vsel %vm133_vm1, %v3955_v55, %v3937_v31  ;;  %v4074_v29 = vsel %vm133_vm1, %v4072_v21, %v4056_v61  ;;  %v4061_v27 = vrot.slane %v10829_v5, 2  ;;  %v4069_v9 = vsel %vm3006_vm4, %v4067_v6, %v4045_v37  ;;  %v5933_v61 = vld [vmem:[%s11453_s3 + $0xcf8] sm:$0xff]  ;;  %v5930_v21 = vld [vmem:[%s11453_s3 + $0xce0] sm:$0xff] }
 0x37e   :  { %v3958_v8 = vsel %vm3016_vm7, %v3956_v28, %v3942_v59  ;;  %v3959_v4 = vsel %vm3016_vm7, %v3957_v43, %v3943_v19  ;;  %v4076_v40 = vsel %vm3016_vm7, %v4074_v29, %v4060_v18  ;;  %v4071_v31 = vsel %vm3009_vm6, %v4069_v9, %v4049_v34  ;;  %v5949_v37 = vld [vmem:[%s11453_s3 + $0xd78] sm:$0xff]  ;;  %v5946_v28 = vld [vmem:[%s11453_s3 + $0xd60] sm:$0xff] }
 0x37f   :  { %4009 = vmatmul.f32.vlgmr.msra.gmra.mxu0 %v3958_v8  ;;  %4029 = vmatmul.f32.vlgmr.msra.gmra.mxu1 %v3959_v4  ;;  %v4073_v57 = vsel %vm132_vm0, %v4071_v31, %v4053_v54  ;;  %v4160_v49 = vrot.slane %v10550_v10, 7  ;;  %v4168_v42 = vrot.slane %v10806_v32, 5  ;;  %v4180_v25 = vsel %vm3000_vm2, %v4152_v14, %v4156_v45 }
 0x380   :  { %4127 = vmatmul.f32.vlgmr.msra.gmra.mxu2 %v4076_v40  ;;  %v4075_v20 = vsel %vm133_vm1, %v4073_v57, %v4057_v11  ;;  %4459 = vmatpush.msra.mxu0 %v5917_v50  ;;  %v4164_v3 = vrot.slane %v10566_v33, 6  ;;  %v4182_v58 = vsel %vm3003_vm3, %v4180_v25, %v10389_v30  ;;  %v4157_v52 = vrot.slane %v10658_v53, 1  ;;  %v5913_v40 = vld [vmem:[%s11453_s3 + $0xc58] sm:$0xff] }
 0x381   :  { %v4077_v14 = vsel %vm3016_vm7, %v4075_v20, %v4061_v27  ;;  %4479 = vmatpush.msra.mxu1 %v5933_v61  ;;  %4575 = vmatpush.msra.mxu2 %v5949_v37  ;;  %v4184_v26 = vsel %vm3006_vm4, %v4182_v58, %v4160_v49  ;;  %v4153_v22 = vrot.slane %v10376_v16, 2  ;;  %v4172_v17 = vrot.slane %v10624_v51, 4  ;;  %v5962_v27 = vld [vmem:[%s11453_s3 + $0xde0] sm:$0xff] }
 0x382   :  { %4147 = vmatmul.f32.vlgmr.msra.gmra.mxu3 %v4077_v14  ;;  %4460 = vmatpush.msra.mxu0 %v5916_v13  ;;  %v4176_v12 = vrot.slane %v10827_v60, 3  ;;  %v4186_v15 = vsel %vm3009_vm6, %v4184_v26, %v4164_v3  ;;  %v4161_v7 = vrot.slane %v10554_v46, 7  ;;  %v4169_v11 = vrot.slane %v10808_v48, 5  ;;  %v5945_v13 = vld [vmem:[%s11453_s3 + $0xd58] sm:$0xff] }
 0x383   :  { %4595 = vmatpush.msra.mxu3 %v5965_v2  ;;  %4480 = vmatpush.msra.mxu1 %v5932_v1  ;;  %v4188_v34 = vsel %vm132_vm0, %v4186_v15, %v4168_v42  ;;  %v4181_v47 = vsel %vm3000_vm2, %v4153_v22, %v4157_v52  ;;  %v4272_v55 = vrot.slane %v10656_v62, 2  ;;  %v4165_v54 = vrot.slane %v10574_v36, 6  ;;  %v5929_v2 = vld [vmem:[%s11453_s3 + $0xcd8] sm:$0xff] }
 0x384   :  { %4576 = vmatpush.msra.mxu2 %v5948_v63  ;;  %4461 = vmatpush.msra.mxu0 %v5915_v35  ;;  %v4173_v6 = vrot.slane %v10644_v38, 4  ;;  %v4183_v45 = vsel %vm3003_vm3, %v4181_v47, %v10400_v44  ;;  %v4268_v59 = vrot.slane %v10372_v39, 3  ;;  %v4190_v19 = vsel %vm133_vm1, %v4188_v34, %v4172_v17  ;;  %v5961_v1 = vld [vmem:[%s11453_s3 + $0xdd8] sm:$0xff]  ;;  %v5912_v63 = vld [vmem:[%s11453_s3 + $0xc50] sm:$0xff] }
 0x385   :  { %4596 = vmatpush.msra.mxu3 %v5964_v23  ;;  %4481 = vmatpush.msra.mxu1 %v5931_v0  ;;  %v4177_v18 = vrot.slane %v10829_v5, 3  ;;  %v4185_v43 = vsel %vm3006_vm4, %v4183_v45, %v4161_v7  ;;  %v4276_v29 = vrot.slane %v10389_v30, 1  ;;  %v4280_v50 = vrot.slane %v10566_v33, 7  ;;  %v5944_v35 = vld [vmem:[%s11453_s3 + $0xd50] sm:$0xff]  ;;  %v5959_v45 = vld [vmem:[%s11453_s3 + $0xdc8] sm:$0xff] }
 0x386   :  { %4577 = vmatpush.msra.mxu2 %v5947_v41  ;;  %4462 = vmatpush.msra.mxu0 %v5914_v24  ;;  %v4187_v9 = vsel %vm3009_vm6, %v4185_v43, %v4165_v54  ;;  %v4284_v8 = vrot.slane %v10806_v32, 6  ;;  %v4296_v4 = vsel %vm3000_vm2, %v4268_v59, %v4272_v55  ;;  %v4192_v31 = vsel %vm3016_vm7, %v4190_v19, %v4176_v12  ;;  %v5928_v0 = vld [vmem:[%s11453_s3 + $0xcd0] sm:$0xff]  ;;  %v5911_v41 = vld [vmem:[%s11453_s3 + $0xc48] sm:$0xff]  ;;  %v5910_v59 = vld [vmem:[%s11453_s3 + $0xc40] sm:$0xff] }
 0x387   :  { %4597 = vmatpush.msra.mxu3 %v5963_v56  ;;  %4482 = vmatpush.msra.mxu1 %v5930_v21  ;;  %v4189_v61 = vsel %vm132_vm0, %v4187_v9, %v4169_v11  ;;  %v4298_v37 = vsel %vm3003_vm3, %v4296_v4, %v4276_v29  ;;  %v4273_v57 = vrot.slane %v10658_v53, 2  ;;  %v4292_v42 = vrot.slane %v10827_v60, 4  ;;  %v5960_v7 = vld [vmem:[%s11453_s3 + $0xdd0] sm:$0xff]  ;;  %v5927_v55 = vld [vmem:[%s11453_s3 + $0xcc8] sm:$0xff]  ;;  %v5942_v9 = vld [vmem:[%s11453_s3 + $0xd40] sm:$0xff] }
 0x388   :  { %4578 = vmatpush.msra.mxu2 %v5946_v28  ;;  %4243 = vmatmul.f32.vlgmr.msrb.gmra.mxu0 %v4192_v31  ;;  %v4191_v49 = vsel %vm133_vm1, %v4189_v61, %v4173_v6  ;;  %v4300_v25 = vsel %vm3006_vm4, %v4298_v37, %v10550_v10  ;;  %v4269_v20 = vrot.slane %v10376_v16, 3  ;;  %v4288_v58 = vrot.slane %v10624_v51, 5  ;;  %v5943_v56 = vld [vmem:[%s11453_s3 + $0xd48] sm:$0xff]  ;;  %v5909_v61 = vld [vmem:[%s11453_s3 + $0xc38] sm:$0xff] }
 0x389   :  { %4598 = vmatpush.msra.mxu3 %v5962_v27  ;;  %v4193_v3 = vsel %vm3016_vm7, %v4191_v49, %v4177_v18  ;;  %v4302_v52 = vsel %vm3009_vm6, %v4300_v25, %v4280_v50  ;;  %v4277_v14 = vrot.slane %v10400_v44, 1  ;;  %4463 = vmatpush.msra.mxu0 %v5913_v40  ;;  %v4285_v22 = vrot.slane %v10808_v48, 6  ;;  %v5926_v18 = vld [vmem:[%s11453_s3 + $0xcc0] sm:$0xff]  ;;  %v5925_v37 = vld [vmem:[%s11453_s3 + $0xcb8] sm:$0xff] }
 0x38a   :  { %4263 = vmatmul.f32.vlgmr.msrb.gmra.mxu1 %v4193_v3  ;;  %v4304_v26 = vsel %vm132_vm0, %v4302_v52, %v4284_v8  ;;  %v4297_v23 = vsel %vm3000_vm2, %v4269_v20, %v4273_v57  ;;  %4579 = vmatpush.msra.mxu2 %v5945_v13  ;;  %v4281_v12 = vrot.slane %v10574_v36, 7  ;;  %v4388_v24 = vrot.slane %v10656_v62, 3  ;;  %v5958_v50 = vld [vmem:[%s11453_s3 + $0xdc0] sm:$0xff]  ;;  %v5941_v49 = vld [vmem:[%s11453_s3 + $0xd38] sm:$0xff] }
 0x38b   :  { %v4306_v17 = vsel %vm133_vm1, %v4304_v26, %v4288_v58  ;;  %v4299_v15 = vsel %vm3003_vm3, %v4297_v23, %v4277_v14  ;;  %4483 = vmatpush.msra.mxu1 %v5929_v2  ;;  %4599 = vmatpush.msra.mxu3 %v5961_v1  ;;  %v4293_v11 = vrot.slane %v10829_v5, 4  ;;  %v4384_v21 = vrot.slane %v10372_v39, 4  ;;  %v5908_v2 = vld [vmem:[%s11453_s3 + $0xc30] sm:$0xff] }
 0x38c   :  { %v4308_v34 = vsel %vm3016_vm7, %v4306_v17, %v4292_v42  ;;  %v4301_v47 = vsel %vm3006_vm4, %v4299_v15, %v10554_v46  ;;  %4464 = vmatpush.msra.mxu0 %v5912_v63  ;;  %4580 = vmatpush.msra.mxu2 %v5944_v35  ;;  %v4289_v54 = vrot.slane %v10644_v38, 5  ;;  %v4392_v28 = vrot.slane %v10389_v30, 2  ;;  %v5957_v42 = vld [vmem:[%s11453_s3 + $0xdb8] sm:$0xff]  ;;  %v5924_v1 = vld [vmem:[%s11453_s3 + $0xcb0] sm:$0xff]  ;;  %v5907_v17 = vld [vmem:[%s11453_s3 + $0xc28] sm:$0xff] }
 0x38d   :  { %4359 = vmatmul.f32.vlgmr.msrb.gmra.mxu2 %v4308_v34  ;;  %v4303_v6 = vsel %vm3009_vm6, %v4301_v47, %v4281_v12  ;;  %4484 = vmatpush.msra.mxu1 %v5928_v0  ;;  %v4396_v43 = vrot.slane %v10550_v10, 1  ;;  %v4412_v29 = vsel %vm3000_vm2, %v4384_v21, %v4388_v24  ;;  %v4400_v8 = vrot.slane %v10806_v32, 7  ;;  %v5940_v63 = vld [vmem:[%s11453_s3 + $0xd30] sm:$0xff]  ;;  %v5923_v12 = vld [vmem:[%s11453_s3 + $0xca8] sm:$0xff] }
 0x38e   :  { %v4305_v19 = vsel %vm132_vm0, %v4303_v6, %v4285_v22  ;;  %4600 = vmatpush.msra.mxu3 %v5960_v7  ;;  %4465 = vmatpush.msra.mxu0 %v5911_v41  ;;  %v4414_v4 = vsel %vm3003_vm3, %v4412_v29, %v4392_v28  ;;  %v4389_v40 = vrot.slane %v10658_v53, 3  ;;  %v4385_v13 = vrot.slane %v10376_v16, 4  ;;  %v5956_v35 = vld [vmem:[%s11453_s3 + $0xdb0] sm:$0xff]  ;;  %v5939_v34 = vld [vmem:[%s11453_s3 + $0xd28] sm:$0xff]  ;;  %v5922_v6 = vld [vmem:[%s11453_s3 + $0xca0] sm:$0xff] }
 0x38f   :  { %v4307_v27 = vsel %vm133_vm1, %v4305_v19, %v4289_v54  ;;  %4485 = vmatpush.msra.mxu1 %v5927_v55  ;;  %4581 = vmatpush.msra.mxu2 %v5943_v56  ;;  %v4416_v57 = vsel %vm3006_vm4, %v4414_v4, %v4396_v43  ;;  %v4393_v25 = vrot.slane %v10400_v44, 2  ;;  %v4397_v20 = vrot.slane %v10554_v46, 1  ;;  %v5906_v54 = vld [vmem:[%s11453_s3 + $0xc20] sm:$0xff]  ;;  %v5921_v4 = vld [vmem:[%s11453_s3 + $0xc98] sm:$0xff] }
 0x390   :  { %v4309_v31 = vsel %vm3016_vm7, %v4307_v27, %v4293_v11  ;;  %4601 = vmatpush.msra.mxu3 %v5959_v45  ;;  %4466 = vmatpush.msra.mxu0 %v5910_v59  ;;  %v4418_v3 = vsel %vm3009_vm6, %v4416_v57, %v10566_v33  ;;  %v4401_v58 = vrot.slane %v10808_v48, 7  ;;  %v4413_v52 = vsel %vm3000_vm2, %v4385_v13, %v4389_v40  ;;  %v5955_v11 = vld [vmem:[%s11453_s3 + $0xda8] sm:$0xff]  ;;  %v5954_v43 = vld [vmem:[%s11453_s3 + $0xda0] sm:$0xff]  ;;  %v5937_v57 = vld [vmem:[%s11453_s3 + $0xd18] sm:$0xff] }
 0x391   :  { %4379 = vmatmul.f32.vlgmr.msrb.gmra.mxu3 %v4309_v31  ;;  %4486 = vmatpush.msra.mxu1 %v5926_v18  ;;  %v4504_v14 = vrot.slane %v10656_v62, 4  ;;  %v4408_v26 = vrot.slane %v10827_v60, 5  ;;  %v4420_v22 = vsel %vm132_vm0, %v4418_v3, %v4400_v8  ;;  %v4415_v23 = vsel %vm3003_vm3, %v4413_v52, %v4393_v25  ;;  %v5938_v18 = vld [vmem:[%s11453_s3 + $0xd20] sm:$0xff]  ;;  %v5905_v8 = vld [vmem:[%s11453_s3 + $0xc18] sm:$0xff] }
 0x392   :  { %4582 = vmatpush.msra.mxu2 %v5942_v9  ;;  %4602 = vmatpush.msra.mxu3 %v5958_v50  ;;  %v4500_v0 = vrot.slane %v10372_v39, 5  ;;  %v4404_v15 = vrot.slane %v10624_v51, 6  ;;  %v4405_v7 = vrot.slane %v10644_v38, 6  ;;  %v4417_v41 = vsel %vm3006_vm4, %v4415_v23, %v4397_v20  ;;  %v5953_v13 = vld [vmem:[%s11453_s3 + $0xd98] sm:$0xff] }
 0x393   :  { %4467 = vmatpush.msra.mxu0 %v5909_v61  ;;  %4487 = vmatpush.msra.mxu1 %v5925_v37  ;;  %v4508_v24 = vrot.slane %v10389_v30, 3  ;;  %v4409_v47 = vrot.slane %v10829_v5, 5  ;;  %v4419_v55 = vsel %vm3009_vm6, %v4417_v41, %v10574_v36  ;;  %v4512_v56 = vrot.slane %v10550_v10, 2 }
 0x394   :  { %4583 = vmatpush.msra.mxu2 %v5941_v49  ;;  %4603 = vmatpush.msra.mxu3 %v5957_v42  ;;  %v4528_v21 = vsel %vm3000_vm2, %v4500_v0, %v4504_v14  ;;  %v4422_v45 = vsel %vm133_vm1, %v4420_v22, %v4404_v15  ;;  %v4421_v59 = vsel %vm132_vm0, %v4419_v55, %v4401_v58  ;;  %v4505_v19 = vrot.slane %v10658_v53, 4 }
 0x395   :  { %4468 = vmatpush.msra.mxu0 %v5908_v2  ;;  %4488 = vmatpush.msra.mxu1 %v5924_v1  ;;  %v4530_v28 = vsel %vm3003_vm3, %v4528_v21, %v4508_v24  ;;  %v11102_v29 = vsel %vm3016_vm7, %v4422_v45, %v4408_v26  ;;  %v4516_v27 = vrot.slane %v10566_v33, 1  ;;  %v4501_v50 = vrot.slane %v10376_v16, 5  ;;  %v5904_v2 = vld [vmem:[%s11453_s3 + $0xc10] sm:$0xff]  ;;  %v5918_v45 = vld [vmem:[%s11453_s3 + $0xc80] sm:$0xff] }
 0x396   :  { %4584 = vmatpush.msra.mxu2 %v5940_v63  ;;  %4604 = vmatpush.msra.mxu3 %v5956_v35  ;;  %v4532_v9 = vsel %vm3006_vm4, %v4530_v28, %v4512_v56  ;;  %v4423_v40 = vsel %vm133_vm1, %v4421_v59, %v4405_v7  ;;  %v4520_v31 = vrot.slane %v10624_v51, 7  ;;  %v4524_v61 = vrot.slane %v10827_v60, 6  ;;  %v5920_v1 = vld [vmem:[%s11453_s3 + $0xc90] sm:$0xff] }
 0x397   :  { %4469 = vmatpush.msra.mxu0 %v5907_v17  ;;  %4489 = vmatpush.msra.mxu1 %v5923_v12  ;;  %v4509_v37 = vrot.slane %v10400_v44, 3  ;;  %v4513_v49 = vrot.slane %v10554_v46, 2  ;;  %v4529_v42 = vsel %vm3000_vm2, %v4501_v50, %v4505_v19  ;;  %v4616_v25 = vrot.slane %v10372_v39, 6  ;;  %v5936_v63 = vld [vmem:[%s11453_s3 + $0xd10] sm:$0xff]  ;;  %v5903_v17 = vld [vmem:[%s11453_s3 + $0xc08] sm:$0xff] }
 0x398   :  { %4585 = vmatpush.msra.mxu2 %v5939_v34  ;;  %4605 = vmatpush.msra.mxu3 %v5955_v11  ;;  %v4620_v20 = vrot.slane %v10656_v62, 5  ;;  %v4534_v3 = vsel %vm3009_vm6, %v4532_v9, %v4516_v27  ;;  %v4517_v58 = vrot.slane %v10574_v36, 1  ;;  %v4624_v14 = vrot.slane %v10389_v30, 4  ;;  %v5952_v35 = vld [vmem:[%s11453_s3 + $0xd90] sm:$0xff]  ;;  %v5919_v12 = vld [vmem:[%s11453_s3 + $0xc88] sm:$0xff]  ;;  %v5950_v27 = vld [vmem:[%s11453_s3 + $0xd80] sm:$0xff] }
 0x399   :  { %4470 = vmatpush.msra.mxu0 %v5906_v54  ;;  %4490 = vmatpush.msra.mxu1 %v5922_v6  ;;  %v4531_v52 = vsel %vm3003_vm3, %v4529_v42, %v4509_v37  ;;  %v4536_v26 = vsel %vm132_vm0, %v4534_v3, %v10806_v32  ;;  %v4628_v23 = vrot.slane %v10550_v10, 3  ;;  %v4521_v15 = vrot.slane %v10644_v38, 7  ;;  %v5935_v34 = vld [vmem:[%s11453_s3 + $0xd08] sm:$0xff]  ;;  %v5902_v6 = vld [vmem:[%s11453_s3 + $0xc00] sm:$0xff] }
 0x39a   :  { %4586 = vmatpush.msra.mxu2 %v5938_v18  ;;  %4606 = vmatpush.msra.mxu3 %v5954_v43  ;;  %v4533_v22 = vsel %vm3006_vm4, %v4531_v52, %v4513_v49  ;;  %v4644_v0 = vsel %vm3000_vm2, %v4616_v25, %v4620_v20  ;;  %v4632_v41 = vrot.slane %v10566_v33, 2  ;;  %v5951_v11 = vld [vmem:[%s11453_s3 + $0xd88] sm:$0xff]  ;;  %v4636_v56 = vrot.slane %v10806_v32, 1  ;;  %v5934_v43 = vld [vmem:[%s11453_s3 + $0xd00] sm:$0xff]  ;;  %v5981_v25 = vld [vmem:[%s11453_s3 + $0xe78] sm:$0xff] }
 0x39b   :  { %4471 = vmatpush.msra.mxu0 %v5905_v8  ;;  %4491 = vmatpush.msra.mxu1 %v5921_v4  ;;  %v4535_v7 = vsel %vm3009_vm6, %v4533_v22, %v4517_v58  ;;  %v4646_v24 = vsel %vm3003_vm3, %v4644_v0, %v4624_v14  ;;  %v4621_v54 = vrot.slane %v10658_v53, 5  ;;  %v4538_v59 = vsel %vm133_vm1, %v4536_v26, %v4520_v31  ;;  %v5997_v20 = vld [vmem:[%s11453_s3 + $0xef8] sm:$0xff]  ;;  %v6028_v0 = vld [vmem:[%s11453_s3 + $0xff0] sm:$0xff] }
 0x39c   :  { %4587 = vmatpush.msra.mxu2 %v5937_v57  ;;  %4607 = vmatpush.msra.mxu3 %v5953_v13  ;;  %v4537_v55 = vsel %vm132_vm0, %v4535_v7, %v10808_v48  ;;  %v4648_v21 = vsel %vm3006_vm4, %v4646_v24, %v4628_v23  ;;  %v4525_v28 = vrot.slane %v10829_v5, 6  ;;  %v4617_v18 = vrot.slane %v10376_v16, 6  ;;  %v6029_v58 = vld [vmem:[%s11453_s3 + $0xff8] sm:$0xff]  ;;  %v5979_v7 = vld [vmem:[%s11453_s3 + $0xe68] sm:$0xff] }
 0x39d   :  { %4472 = vmatpush.msra.mxu0 %v5904_v2  ;;  %4492 = vmatpush.msra.mxu1 %v5920_v1  ;;  %v4650_v19 = vsel %vm3009_vm6, %v4648_v21, %v4632_v41  ;;  %v4425_v9 = vsel %vm3016_vm7, %v4423_v40, %v4409_v47  ;;  %v4540_v50 = vsel %vm3016_vm7, %v4538_v59, %v4524_v61  ;;  %v4625_v4 = vrot.slane %v10400_v44, 4  ;;  %v5995_v41 = vld [vmem:[%s11453_s3 + $0xee8] sm:$0xff] }
 0x39e   :  { %4588 = vmatpush.msra.mxu2 %v5936_v63  ;;  %4608 = vmatpush.msra.mxu3 %v5952_v35  ;;  %v4652_v8 = vsel %vm132_vm0, %v4650_v19, %v4636_v56  ;;  %v4539_v31 = vsel %vm133_vm1, %v4537_v55, %v4521_v15  ;;  %v4629_v37 = vrot.slane %v10554_v46, 3  ;;  %v4637_v57 = vrot.slane %v10808_v48, 1  ;;  %v5996_v35 = vld [vmem:[%s11453_s3 + $0xef0] sm:$0xff] }
 0x39f   :  { %4473 = vmatpush.msra.mxu0 %v5903_v17  ;;  %4493 = vmatpush.msra.mxu1 %v5919_v12  ;;  %v4645_v13 = vsel %vm3000_vm2, %v4617_v18, %v4621_v54  ;;  %v4640_v47 = vrot.slane %v10827_v60, 7  ;;  %v4633_v40 = vrot.slane %v10574_v36, 2  ;;  %v4736_v49 = vrot.slane %v10656_v62, 6  ;;  %v6013_v62 = vld [vmem:[%s11453_s3 + $0xf78] sm:$0xff]  ;;  %v5994_v54 = vld [vmem:[%s11453_s3 + $0xee0] sm:$0xff] }
 0x3a0   :  { %4589 = vmatpush.msra.mxu2 %v5935_v34  ;;  %4609 = vmatpush.msra.mxu3 %v5951_v11  ;;  %v4647_v61 = vsel %vm3003_vm3, %v4645_v13, %v4625_v4  ;;  %v4541_v42 = vsel %vm3016_vm7, %v4539_v31, %v4525_v28  ;;  %v4654_v2 = vsel %vm133_vm1, %v4652_v8, %v10624_v51  ;;  %v4732_v3 = vrot.slane %v10372_v39, 7  ;;  %v6027_v11 = vld [vmem:[%s11453_s3 + $0xfe8] sm:$0xff]  ;;  %v6026_v28 = vld [vmem:[%s11453_s3 + $0xfe0] sm:$0xff]  ;;  %v5992_v31 = vld [vmem:[%s11453_s3 + $0xed0] sm:$0xff] }
 0x3a1   :  { %4474 = vmatpush.msra.mxu0 %v5902_v6  ;;  %4494 = vmatpush.msra.mxu1 %v5918_v45  ;;  %v4649_v1 = vsel %vm3006_vm4, %v4647_v61, %v4629_v37  ;;  %v11218_v52 = vsel %vm3016_vm7, %v4654_v2, %v4640_v47  ;;  %v4740_v63 = vrot.slane %v10389_v30, 5  ;;  %v4744_v39 = vrot.slane %v10550_v10, 4  ;;  %v6012_v10 = vld [vmem:[%s11453_s3 + $0xf70] sm:$0xff]  ;;  %v5975_v47 = vld [vmem:[%s11453_s3 + $0xe48] sm:$0xff]  ;;  %v6022_v2 = vld [vmem:[%s11453_s3 + $0xfc0] sm:$0xff] }
 0x3a2   :  { %4590 = vmatpush.msra.mxu2 %v5934_v43  ;;  %4610 = vmatpush.msra.mxu3 %v5950_v27  ;;  %v4651_v14 = vsel %vm3009_vm6, %v4649_v1, %v4633_v40  ;;  %v4641_v26 = vrot.slane %v10829_v5, 7  ;;  %v4752_v23 = vrot.slane %v10806_v32, 2  ;;  %v4760_v30 = vsel %vm3000_vm2, %v4732_v3, %v4736_v49  ;;  %v5993_v43 = vld [vmem:[%s11453_s3 + $0xed8] sm:$0xff]  ;;  %v5991_v40 = vld [vmem:[%s11453_s3 + $0xec8] sm:$0xff] }
 0x3a3   :  { %4475 = vmatmul.f32.vlgmr.msra.gmra.mxu0 %v11102_v29  ;;  %4495 = vmatmul.f32.vlgmr.msra.gmra.mxu1 %v4425_v9  ;;  %v5980_v29 = vld [vmem:[%s11453_s3 + $0xe70] sm:$0xff]  ;;  %v4653_v22 = vsel %vm132_vm0, %v4651_v14, %v4637_v57  ;;  %v4748_v12 = vrot.slane %v10566_v33, 3  ;;  %v4762_v15 = vsel %vm3003_vm3, %v4760_v30, %v4740_v63  ;;  %v4737_v32 = vrot.slane %v10658_v53, 6  ;;  %v6011_v53 = vld [vmem:[%s11453_s3 + $0xf68] sm:$0xff]  ;;  %v5973_v1 = vld [vmem:[%s11453_s3 + $0xe38] sm:$0xff] }
 0x3a4   :  { %4591 = vmatmul.f32.vlgmr.msra.gmra.mxu2 %v4540_v50  ;;  %4611 = vmatmul.f32.vlgmr.msra.gmra.mxu3 %v4541_v42  ;;  %v4655_v17 = vsel %vm133_vm1, %v4653_v22, %v10644_v38  ;;  %v4764_v34 = vsel %vm3006_vm4, %v4762_v15, %v4744_v39  ;;  %v4733_v33 = vrot.slane %v10376_v16, 7  ;;  %v4756_v55 = vrot.slane %v10624_v51, 1  ;;  %v5978_v16 = vld [vmem:[%s11453_s3 + $0xe60] sm:$0xff]  ;;  %v6025_v50 = vld [vmem:[%s11453_s3 + $0xfd8] sm:$0xff]  ;;  %v6024_v57 = vld [vmem:[%s11453_s3 + $0xfd0] sm:$0xff] }
 0x3a5   :  { %4691 = vmatpush.msrb.mxu0 %v5981_v25  ;;  %4711 = vmatpush.msrb.mxu1 %v5997_v20  ;;  %v11251_v24 = vsel %vm3016_vm7, %v4655_v17, %v4641_v26  ;;  %v4766_v56 = vsel %vm3009_vm6, %v4764_v34, %v4748_v12  ;;  %v4741_v21 = vrot.slane %v10400_v44, 5  ;;  %v4745_v45 = vrot.slane %v10554_v46, 4  ;;  %v6010_v44 = vld [vmem:[%s11453_s3 + $0xf60] sm:$0xff]  ;;  %v6007_v49 = vld [vmem:[%s11453_s3 + $0xf48] sm:$0xff]  ;;  %v5989_v3 = vld [vmem:[%s11453_s3 + $0xeb8] sm:$0xff] }
 0x3a6   :  { %4807 = vmatpush.msrb.mxu2 %v6013_v62  ;;  %4827 = vmatpush.msrb.mxu3 %v6029_v58  ;;  %v4768_v6 = vsel %vm132_vm0, %v4766_v56, %v4752_v23  ;;  %v4753_v51 = vrot.slane %v10808_v48, 2  ;;  %v4761_v59 = vsel %vm3000_vm2, %v4733_v33, %v4737_v32  ;;  %v4749_v18 = vrot.slane %v10574_v36, 3  ;;  %v5977_v48 = vld [vmem:[%s11453_s3 + $0xe58] sm:$0xff]  ;;  %v6023_v42 = vld [vmem:[%s11453_s3 + $0xfc8] sm:$0xff]  ;;  %v5974_v25 = vld [vmem:[%s11453_s3 + $0xe40] sm:$0xff] }
 0x3a7   :  { %4692 = vmatpush.msrb.mxu0 %v5980_v29  ;;  %4712 = vmatpush.msrb.mxu1 %v5996_v35  ;;  %v4770_v19 = vsel %vm133_vm1, %v4768_v6, %v4756_v55  ;;  %v4763_v46 = vsel %vm3003_vm3, %v4761_v59, %v4741_v21  ;;  %v6009_v36 = vld [vmem:[%s11453_s3 + $0xf58] sm:$0xff]  ;;  %v4757_v8 = vrot.slane %v10644_v38, 1  ;;  %v6008_v38 = vld [vmem:[%s11453_s3 + $0xf50] sm:$0xff]  ;;  %v6006_v20 = vld [vmem:[%s11453_s3 + $0xf40] sm:$0xff]  ;;  %v3165_v59 = vpop.f32.mrf.mxu1 }
 0x3a8   :  { %4808 = vmatpush.msrb.mxu2 %v6012_v10  ;;  %4828 = vmatpush.msrb.mxu3 %v6028_v0  ;;  %v11291_v27 = vsel %vm3016_vm7, %v4770_v19, %v10827_v60  ;;  %v4765_v9 = vsel %vm3006_vm4, %v4763_v46, %v4745_v45  ;;  %v5976_v60 = vld [vmem:[%s11453_s3 + $0xe50] sm:$0xff]  ;;  %v6005_v62 = vld [vmem:[%s11453_s3 + $0xf38] sm:$0xff]  ;;  %v5971_v35 = vld [vmem:[%s11453_s3 + $0xe28] sm:$0xff] }
 0x3a9   :  { %4693 = vmatpush.msrb.mxu0 %v5979_v7  ;;  %4713 = vmatpush.msrb.mxu1 %v5995_v41  ;;  %v4767_v4 = vsel %vm3009_vm6, %v4765_v9, %v4749_v18  ;;  %v6021_v58 = vld [vmem:[%s11453_s3 + $0xfb8] sm:$0xff]  ;;  %v5972_v14 = vld [vmem:[%s11453_s3 + $0xe30] sm:$0xff]  ;;  %v5987_v26 = vld [vmem:[%s11453_s3 + $0xea8] sm:$0xff] }
 0x3aa   :  { %4809 = vmatpush.msrb.mxu2 %v6011_v53  ;;  %4829 = vmatpush.msrb.mxu3 %v6027_v11  ;;  %v4769_v37 = vsel %vm132_vm0, %v4767_v4, %v4753_v51  ;;  %v5988_v63 = vld [vmem:[%s11453_s3 + $0xeb0] sm:$0xff]  ;;  %v6003_v22 = vld [vmem:[%s11453_s3 + $0xf28] sm:$0xff]  ;;  %v5970_v30 = vld [vmem:[%s11453_s3 + $0xe20] sm:$0xff]  ;;  %v3145_v51 = vpop.f32.mrf.mxu0 }
 0x3ab   :  { %4694 = vmatpush.msrb.mxu0 %v5978_v16  ;;  %4714 = vmatpush.msrb.mxu1 %v5994_v54  ;;  %v4771_v13 = vsel %vm133_vm1, %v4769_v37, %v4757_v8  ;;  %v6004_v39 = vld [vmem:[%s11453_s3 + $0xf30] sm:$0xff]  ;;  %v6019_v23 = vld [vmem:[%s11453_s3 + $0xfa8] sm:$0xff]  ;;  %v5986_v10 = vld [vmem:[%s11453_s3 + $0xea0] sm:$0xff]  ;;  %v3166_v4 = vadd.f32 %v3165_v59, %v3145_v51 }
 0x3ac   :  { %4810 = vmatpush.msrb.mxu2 %v6010_v44  ;;  %4830 = vmatpush.msrb.mxu3 %v6026_v28  ;;  %v11324_v61 = vsel %vm3016_vm7, %v4771_v13, %v10829_v5  ;;  %v5990_v5 = vld [vmem:[%s11453_s3 + $0xec0] sm:$0xff]  ;;  %v6020_v29 = vld [vmem:[%s11453_s3 + $0xfb0] sm:$0xff]  ;;  %v5969_v12 = vld [vmem:[%s11453_s3 + $0xe18] sm:$0xff]  ;;  %v3185_v44 = vpop.f32.mrf.mxu2  ;;  %v3205_v28 = vpop.f32.mrf.mxu3 }
 0x3ad   :  { %4695 = vmatpush.msrb.mxu0 %v5977_v48  ;;  %4715 = vmatpush.msrb.mxu1 %v5993_v43  ;;  %v6002_v0 = vld [vmem:[%s11453_s3 + $0xf20] sm:$0xff]  ;;  %v5985_v15 = vld [vmem:[%s11453_s3 + $0xe98] sm:$0xff]  ;;  %v5968_v41 = vld [vmem:[%s11453_s3 + $0xe10] sm:$0xff] }
 0x3ae   :  { %4811 = vmatpush.msrb.mxu2 %v6009_v36  ;;  %4831 = vmatpush.msrb.mxu3 %v6025_v50  ;;  %v6018_v17 = vld [vmem:[%s11453_s3 + $0xfa0] sm:$0xff]  ;;  %v6001_v32 = vld [vmem:[%s11453_s3 + $0xf18] sm:$0xff]  ;;  %v5984_v34 = vld [vmem:[%s11453_s3 + $0xe90] sm:$0xff] }
 0x3af   :  { %4696 = vmatpush.msrb.mxu0 %v5976_v60  ;;  %4716 = vmatpush.msrb.mxu1 %v5992_v31  ;;  %v6017_v7 = vld [vmem:[%s11453_s3 + $0xf98] sm:$0xff]  ;;  %v6000_v33 = vld [vmem:[%s11453_s3 + $0xf10] sm:$0xff]  ;;  %v5967_v11 = vld [vmem:[%s11453_s3 + $0xe08] sm:$0xff]  ;;  %v3320_v18 = vpop.f32.mrf.mxu1 }
 0x3b0   :  { %4812 = vmatpush.msrb.mxu2 %v6008_v38  ;;  %4832 = vmatpush.msrb.mxu3 %v6024_v57  ;;  %v6016_v53 = vld [vmem:[%s11453_s3 + $0xf90] sm:$0xff]  ;;  %v5983_v55 = vld [vmem:[%s11453_s3 + $0xe88] sm:$0xff]  ;;  %v5966_v16 = vld [vmem:[%s11453_s3 + $0xe00] sm:$0xff] }
 0x3b1   :  { %4697 = vmatpush.msrb.mxu0 %v5975_v47  ;;  %4717 = vmatpush.msrb.mxu1 %v5991_v40  ;;  %v5999_v56 = vld [vmem:[%s11453_s3 + $0xf08] sm:$0xff]  ;;  %v5982_v54 = vld [vmem:[%s11453_s3 + $0xe80] sm:$0xff] }
 0x3b2   :  { %4813 = vmatpush.msrb.mxu2 %v6007_v49  ;;  %4833 = vmatpush.msrb.mxu3 %v6023_v42  ;;  %v6015_v21 = vld [vmem:[%s11453_s3 + $0xf88] sm:$0xff]  ;;  %v5998_v6 = vld [vmem:[%s11453_s3 + $0xf00] sm:$0xff]  ;;  %v3300_v19 = vpop.f32.mrf.mxu0 }
 0x3b3   :  { %4698 = vmatpush.msrb.mxu0 %v5974_v25  ;;  %4718 = vmatpush.msrb.mxu1 %v5990_v5  ;;  %v6014_v45 = vld [vmem:[%s11453_s3 + $0xf80] sm:$0xff]  ;;  %v3321_v57 = vadd.f32 %v3320_v18, %v3300_v19 }
 0x3b4   :  { %4814 = vmatpush.msrb.mxu2 %v6006_v20  ;;  %4834 = vmatpush.msrb.mxu3 %v6022_v2  ;;  %v3416_v46 = vpop.f32.mrf.mxu2  ;;  %v3436_v48 = vpop.f32.mrf.mxu3 }
 0x3b5   :  { %4699 = vmatpush.msrb.mxu0 %v5973_v1  ;;  %4719 = vmatpush.msrb.mxu1 %v5989_v3  ;;  %v3437_v13 = vadd.f32 %v3436_v48, %v3416_v46 }
 0x3b6   :  { %4815 = vmatpush.msrb.mxu2 %v6005_v62  ;;  %4835 = vmatpush.msrb.mxu3 %v6021_v58 }
 0x3b7   :  { %4700 = vmatpush.msrb.mxu0 %v5972_v14  ;;  %4720 = vmatpush.msrb.mxu1 %v5988_v63  ;;  %v3552_v9 = vpop.f32.mrf.mxu1 }
 0x3b8   :  { %4816 = vmatpush.msrb.mxu2 %v6004_v39  ;;  %4836 = vmatpush.msrb.mxu3 %v6020_v29 }
 0x3b9   :  { %4701 = vmatpush.msrb.mxu0 %v5971_v35  ;;  %4721 = vmatpush.msrb.mxu1 %v5987_v26 }
 0x3ba   :  { %4817 = vmatpush.msrb.mxu2 %v6003_v22  ;;  %4837 = vmatpush.msrb.mxu3 %v6019_v23  ;;  %v3532_v43 = vpop.f32.mrf.mxu0 }
 0x3bb   :  { %4702 = vmatpush.msrb.mxu0 %v5970_v30  ;;  %4722 = vmatpush.msrb.mxu1 %v5986_v10  ;;  %v3553_v49 = vadd.f32 %v3552_v9, %v3532_v43 }
 0x3bc   :  { %4818 = vmatpush.msrb.mxu2 %v6002_v0  ;;  %4838 = vmatpush.msrb.mxu3 %v6018_v17  ;;  %v3648_v36 = vpop.f32.mrf.mxu2  ;;  %v3668_v50 = vpop.f32.mrf.mxu3 }
 0x3bd   :  { %4703 = vmatpush.msrb.mxu0 %v5969_v12  ;;  %4723 = vmatpush.msrb.mxu1 %v5985_v15  ;;  %v3669_v25 = vadd.f32 %v3668_v50, %v3648_v36 }
 0x3be   :  { %4819 = vmatpush.msrb.mxu2 %v6001_v32  ;;  %4839 = vmatpush.msrb.mxu3 %v6017_v7 }
 0x3bf   :  { %4704 = vmatpush.msrb.mxu0 %v5968_v41  ;;  %4724 = vmatpush.msrb.mxu1 %v5984_v34 }
 0x3c0   :  { %4820 = vmatpush.msrb.mxu2 %v6000_v33  ;;  %4840 = vmatpush.msrb.mxu3 %v6016_v53 }
 0x3c1   :  { %4705 = vmatpush.msrb.mxu0 %v5967_v11  ;;  %4725 = vmatpush.msrb.mxu1 %v5983_v55 }
 0x3c2   :  { %4821 = vmatpush.msrb.mxu2 %v5999_v56  ;;  %4841 = vmatpush.msrb.mxu3 %v6015_v21  ;;  %v3764_v8 = vpop.f32.mrf.mxu0 }
 0x3c3   :  { %4706 = vmatpush.msrb.mxu0 %v5966_v16  ;;  %4726 = vmatpush.msrb.mxu1 %v5982_v54 }
 0x3c4   :  { %4822 = vmatpush.msrb.mxu2 %v5998_v6  ;;  %4842 = vmatpush.msrb.mxu3 %v6014_v45  ;;  %v3900_v60 = vpop.f32.mrf.mxu3  ;;  %v6164_v6 = vld [vmem:[%s11454_s4] ss:$0 sm:$0xff] }
 0x3c5   :  { %4707 = vmatmul.f32.vlgmr.msrb.gmra.mxu0 %v11218_v52  ;;  %4727 = vmatmul.f32.vlgmr.msrb.gmra.mxu1 %v11251_v24  ;;  %v3784_v52 = vpop.f32.mrf.mxu1  ;;  %v3880_v24 = vpop.f32.mrf.mxu2 }
 0x3c6   :  { %4823 = vmatmul.f32.vlgmr.msrb.gmra.mxu2 %v11291_v27  ;;  %4843 = vmatmul.f32.vlgmr.msrb.gmra.mxu3 %v11324_v61  ;;  %v3186_v27 = vadd.f32 %v3185_v44, %v3166_v4  ;;  %v3785_v1 = vadd.f32 %v3784_v52, %v3764_v8  ;;  %v3901_v62 = vadd.f32 %v3900_v60, %v3880_v24 }
 0x3c8   :  { %v3206_v38 = vadd.f32 %v3205_v28, %v3186_v27 }
 0x3ca   :  { %v3323_v61 = vadd.f32 %v3321_v57, %v3206_v38 }
 0x3cc   :  { %v3439_v42 = vadd.f32 %v3437_v13, %v3323_v61 }
 0x3ce   :  { %v3555_v2 = vadd.f32 %v3553_v49, %v3439_v42 }
 0x3d0   :  { %v3671_v3 = vadd.f32 %v3669_v25, %v3555_v2 }
 0x3d2   :  { %v3787_v58 = vadd.f32 %v3785_v1, %v3671_v3 }
 0x3d4   :  { %v3903_v29 = vadd.f32 %v3901_v62, %v3787_v58 }
 0x3fc   :  { %v4010_v31 = vpop.f32.mrf.mxu0  ;;  %v4030_v37 = vpop.f32.mrf.mxu1 }
 0x3fd   :  { %v4031_v14 = vadd.f32 %v4030_v37, %v4010_v31 }
 0x3ff   :  { %v4033_v23 = vadd.f32 %v4031_v14, %v3903_v29 }
 0x403   :  { %v4128_v47 = vpop.f32.mrf.mxu2 }
 0x405   :  { %v4148_v40 = vpop.f32.mrf.mxu3  ;;  %v4244_v5 = vpop.f32.mrf.mxu0 }
 0x406   :  { %v4149_v35 = vadd.f32 %v4148_v40, %v4128_v47 }
 0x407   :  { %v4264_v20 = vpop.f32.mrf.mxu1 }
 0x408   :  { %v4151_v30 = vadd.f32 %v4149_v35, %v4033_v23  ;;  %v4265_v10 = vadd.f32 %v4264_v20, %v4244_v5 }
 0x40a   :  { %v4267_v15 = vadd.f32 %v4265_v10, %v4151_v30 }
 0x410   :  { %v4360_v63 = vpop.f32.mrf.mxu2 }
 0x414   :  { %v4380_v39 = vpop.f32.mrf.mxu3 }
 0x415   :  { %v4381_v0 = vadd.f32 %v4380_v39, %v4360_v63 }
 0x417   :  { %v4383_v34 = vadd.f32 %v4381_v0, %v4267_v15 }
 0x420   :  { %v4476_v26 = vpop.f32.mrf.mxu0  ;;  %v4496_v22 = vpop.f32.mrf.mxu1 }
 0x421   :  { %v4497_v32 = vadd.f32 %v4496_v22, %v4476_v26 }
 0x423   :  { %v4499_v53 = vadd.f32 %v4497_v32, %v4383_v34 }
 0x427   :  { %v4592_v17 = vpop.f32.mrf.mxu2  ;;  %v4612_v12 = vpop.f32.mrf.mxu3 }
 0x428   :  { %v4613_v33 = vadd.f32 %v4612_v12, %v4592_v17 }
 0x42a   :  { %v4615_v55 = vadd.f32 %v4613_v33, %v4499_v53 }
 0x442   :  { %v4708_v7 = vpop.f32.mrf.mxu0  ;;  %v4728_v41 = vpop.f32.mrf.mxu1 }
 0x443   :  { %v4729_v11 = vadd.f32 %v4728_v41, %v4708_v7 }
 0x445   :  { %v4731_v16 = vadd.f32 %v4729_v11, %v4615_v55 }
 0x449   :  { %v4824_v56 = vpop.f32.mrf.mxu2  ;;  %v4844_v21 = vpop.f32.mrf.mxu3 }
 0x44a   :  { %v4845_v54 = vadd.f32 %v4844_v21, %v4824_v56 }
 0x44c   :  { %v4847_v45 = vadd.f32 %v4845_v54, %v4731_v16 }
 0x44e   :  { %v4852_v51 = vadd.f32 %v6164_v6, %v4847_v45 }
 0x450   :  { %4853 = vst [vmem:[%s11455_s5] sm:$0xff] %v4852_v51 }

</bundles_post_ra>
